<compile_context>
chip_gen: v7x
topology: tpu7x:2x2x1
jax: 0.10.0
libtpu: 0.0.40
codegen_flags: <defaults>
</compile_context>

<pallas_src>
import functools

import numpy as np
import jax
import jax.numpy as jnp
from jax.experimental import pallas as pl
from jax.experimental.pallas import tpu as pltpu


# ---------------------------------------------------------------------------
# Kernel: all n_flows (coupling + Flip) steps in a single invocation.
# ---------------------------------------------------------------------------
def _flow_stack_kernel(x_ref, mask_ref, prew_ref, preb_ref,
                       wt_ref, bt_ref, ws_ref, bs_ref,
                       resw_ref, resb_ref, skipw_ref, skipb_ref,
                       postw_ref, postb_ref, o_ref, *, dilation_rate):
    N, C = o_ref.shape
    half = C // 2
    F, L = wt_ref.shape[0], wt_ref.shape[1]
    H = prew_ref.shape[2]
    K = wt_ref.shape[2] // H

    # Hoisted mask broadcasts (JAX does not CSE broadcast_in_dim).
    mask1 = mask_ref[...]                                   # (N, 1)
    mask_h = jnp.broadcast_to(mask1, (N, H))
    mask_c = jnp.broadcast_to(mask1, (N, half))

    x = x_ref[...]
    s0 = x[:, :half]
    s1 = x[:, half:]

    for f in range(F):                                      # F is small & static -> unrolled
        # --- pre 1x1 conv: contraction dim == half is tiny -> VPU FMAs instead of the MXU.
        pre_w = prew_ref[f]                                 # (half, H)
        if half <= 4:
            h = s0[:, 0:1] * pre_w[0:1, :]
            for c in range(1, half):
                h = h + s0[:, c:c + 1] * pre_w[c:c + 1, :]
        else:
            h = jnp.dot(s0, pre_w, preferred_element_type=jnp.float32)
        h = (h + preb_ref[f]) * mask_h

        # --- WaveNet-style stack.
        skip = None
        for i in range(L):
            d = dilation_rate ** i
            pad = (K * d - d) // 2
            if pad > 0:
                zpad = jnp.zeros((pad, H), h.dtype)
                h_pad = jnp.concatenate([zpad, h, zpad], axis=0)
            else:
                h_pad = h
            # Dilated conv: K statically-shifted copies concatenated on lanes, then one wide
            # (K*H) contraction per gate on the MXU (bf16 operands, f32 accumulation).
            taps = jnp.concatenate(
                [h_pad[k * d:k * d + N, :] for k in range(K)], axis=1
            ).astype(jnp.bfloat16)
            x_t = jnp.dot(taps, wt_ref[f, i],
                          preferred_element_type=jnp.float32) + bt_ref[f, i]
            x_s = jnp.dot(taps, ws_ref[f, i],
                          preferred_element_type=jnp.float32) + bs_ref[f, i]
            # fused_add_tanh_sigmoid_multiply with g == 0 (kept in f32 on the VPU/EUP).
            acts = (jnp.tanh(x_t) * jax.nn.sigmoid(x_s)).astype(jnp.bfloat16)
            if i < L - 1:
                res = jnp.dot(acts, resw_ref[f, i],
                              preferred_element_type=jnp.float32) + resb_ref[f, i]
                h = (h + res) * mask_h
            sk = jnp.dot(acts, skipw_ref[f, i],
                         preferred_element_type=jnp.float32) + skipb_ref[f, i]
            skip = sk if skip is None else skip + sk
        wn_out = skip * mask_h

        # --- post 1x1 conv (mean only => logs == 0) + coupling.
        m = (jnp.dot(wn_out, postw_ref[f],
                     preferred_element_type=jnp.float32) + postb_ref[f]) * mask_c
        s1_new = m + s1 * mask_c
        # Flip's channel reversal is folded into the (host-permuted) weights -> just swap halves.
        s0, s1 = s1_new, s0

    o_ref[...] = jnp.concatenate([s0, s1], axis=1).astype(o_ref.dtype)


# ---------------------------------------------------------------------------
# Wrapper
# ---------------------------------------------------------------------------
def residual_coupling_block(x, x_mask, params, *, dilation_rate, n_flows):
    """x: (B, C, T) (PyTorch NCL), x_mask: (B, 1, T). Returns (B, C, T)."""
    B, C, T = x.shape
    half = C // 2
    F = n_flows
    L, K, H = (params["in_w_t"].shape[1], params["in_w_t"].shape[2],
               params["in_w_t"].shape[3])

    # Per-example zero gaps of width >= max conv padding: once batch is folded into the row
    # (sublane) dim, the dilated conv's zero padding and batch isolation come for free from
    # static sublane shifts — no T x T shift matrices, no per-tap masks.
    d_max = dilation_rate ** (L - 1)
    pad_max = (K * d_max - d_max) // 2
    T_pad = ((T + 2 * pad_max + 7) // 8) * 8          # round up to a sublane multiple
    lead = pad_max
    N = B * T_pad

    x_btc = jnp.transpose(x, (0, 2, 1)).astype(jnp.float32)          # (B, T, C)
    m_bt1 = jnp.transpose(x_mask, (0, 2, 1)).astype(jnp.float32)     # (B, T, 1)
    x_flat = jnp.pad(x_btc, ((0, 0), (lead, T_pad - T - lead), (0, 0))).reshape(N, C)
    m_flat = jnp.pad(m_bt1, ((0, 0), (lead, T_pad - T - lead), (0, 0))).reshape(N, 1)

    # Fold the Flip (channel reversal) into the pre/post weights of odd flows so the kernel
    # only swaps halves.  (For odd n_flows the leftover half-reversal is undone below.)
    pre_w, post_w, post_b = [], [], []
    for f in range(F):
        if f % 2 == 1:
            pre_w.append(params["pre_w"][f, ::-1, :])
            post_w.append(params["post_w"][f, :, ::-1])
            post_b.append(params["post_b"][f, :, ::-1])
        else:
            pre_w.append(params["pre_w"][f])
            post_w.append(params["post_w"][f])
            post_b.append(params["post_b"][f])
    pre_w = jnp.stack(pre_w)
    post_w = jnp.stack(post_w)
    post_b = jnp.stack(post_b)

    # Fuse the K conv taps into one wide contraction; MXU operands go in as bf16.
    wt = params["in_w_t"].reshape(F, L, K * H, H).astype(jnp.bfloat16)
    ws = params["in_w_s"].reshape(F, L, K * H, H).astype(jnp.bfloat16)
    resw = params["res_w"].astype(jnp.bfloat16)
    resb = params["res_b"]
    if resw.shape[1] == 0:        # n_layers == 1: keep pallas inputs non-empty (never read)
        resw = jnp.zeros((F, 1, H, H), jnp.bfloat16)
        resb = jnp.zeros((F, 1, 1, H), jnp.float32)
    skipw = params["skip_w"].astype(jnp.bfloat16)

    kernel = functools.partial(_flow_stack_kernel, dilation_rate=dilation_rate)
    # Grid collapsed to a single invocation: all flow weights (~0.4 MB) + state fit easily in
    # VMEM on v5e/v6e/v7x, so there is no per-grid-step pipeline overhead or weight re-DMA.
    out_flat = pl.pallas_call(
        kernel,
        out_shape=jax.ShapeDtypeStruct((N, C), jnp.float32),
        compiler_params=pltpu.CompilerParams(vmem_limit_bytes=32 * 1024 * 1024),
    )(x_flat, m_flat,
      pre_w, params["pre_b"],
      wt, params["in_b_t"], ws, params["in_b_s"],
      resw, resb, skipw, params["skip_b"],
      post_w, post_b)

    out = out_flat.reshape(B, T_pad, C)[:, lead:lead + T, :]
    if F % 2 == 1:   # undo the residual per-half reversal when n_flows is odd
        out = jnp.concatenate([out[..., :half][..., ::-1],
                               out[..., half:][..., ::-1]], axis=-1)
    return jnp.transpose(out, (0, 2, 1))


# ---------------------------------------------------------------------------
# Parameters & pure-JAX reference
# ---------------------------------------------------------------------------
def init_params(key, *, channels, hidden_channels, kernel_size, n_layers, n_flows):
    half = channels // 2
    H, K, L, F = hidden_channels, kernel_size, n_layers, n_flows
    ks = jax.random.split(key, 12)
    s = 0.1
    rnd = lambda k, shape: s * jax.random.normal(k, shape, jnp.float32)
    return dict(
        pre_w=rnd(ks[0], (F, half, H)),
        pre_b=rnd(ks[1], (F, 1, H)),
        # WN in_layers (Conv1d H->2H, kernel K, dilation d) split into tanh / sigmoid halves.
        in_w_t=rnd(ks[2], (F, L, K, H, H)),
        in_b_t=rnd(ks[3], (F, L, 1, H)),
        in_w_s=rnd(ks[4], (F, L, K, H, H)),
        in_b_s=rnd(ks[5], (F, L, 1, H)),
        # res/skip 1x1 convs split: layers 0..L-2 have a residual half, last layer is skip-only.
        res_w=rnd(ks[6], (F, max(L - 1, 0), H, H)),
        res_b=rnd(ks[7], (F, max(L - 1, 0), 1, H)),
        skip_w=rnd(ks[8], (F, L, H, H)),
        skip_b=rnd(ks[9], (F, L, 1, H)),
        # NOTE: torch zero-inits the post conv (flows start as identity); small nonzero values
        # are used here so the whole compute path is actually exercised by the test.
        post_w=rnd(ks[10], (F, H, half)),
        post_b=rnd(ks[11], (F, 1, half)),
    )


def reference_forward(x_btc, mask_bt1, params, *, dilation_rate, n_flows):
    """Pure-JAX (f32) reference of the same math, with the explicit Flip."""
    pre_w, pre_b = params["pre_w"], params["pre_b"]
    in_w_t, in_b_t = params["in_w_t"], params["in_b_t"]
    in_w_s, in_b_s = params["in_w_s"], params["in_b_s"]
    res_w, res_b = params["res_w"], params["res_b"]
    skip_w, skip_b = params["skip_w"], params["skip_b"]
    post_w, post_b = params["post_w"], params["post_b"]
    half, H = pre_w.shape[1], pre_w.shape[2]
    L, K = in_w_t.shape[1], in_w_t.shape[2]
    B, T, C = x_btc.shape
    x = x_btc.astype(jnp.float32)
    mask = mask_bt1.astype(jnp.float32)
    for f in range(n_flows):
        x0, x1 = x[..., :half], x[..., half:]
        h = (jnp.einsum("btc,ch->bth", x0, pre_w[f]) + pre_b[f]) * mask
        skip = jnp.zeros((B, T, H), jnp.float32)
        for i in range(L):
            d = dilation_rate ** i
            pad = (K * d - d) // 2
            hp = jnp.pad(h, ((0, 0), (pad, pad), (0, 0)))
            xt = jnp.zeros((B, T, H), jnp.float32) + in_b_t[f, i]
            xs = jnp.zeros((B, T, H), jnp.float32) + in_b_s[f, i]
            for k in range(K):
                seg = hp[:, k * d:k * d + T, :]
                xt = xt + jnp.einsum("bth,hj->btj", seg, in_w_t[f, i, k])
                xs = xs + jnp.einsum("bth,hj->btj", seg, in_w_s[f, i, k])
            acts = jnp.tanh(xt) * jax.nn.sigmoid(xs)
            if i < L - 1:
                res = jnp.einsum("bth,hj->btj", acts, res_w[f, i]) + res_b[f, i]
                h = (h + res) * mask
            skip = skip + jnp.einsum("bth,hj->btj", acts, skip_w[f, i]) + skip_b[f, i]
        wn_out = skip * mask
        m = (jnp.einsum("bth,hc->btc", wn_out, post_w[f]) + post_b[f]) * mask
        x1n = m + x1 * mask
        x = jnp.concatenate([x0, x1n], axis=-1)[..., ::-1]   # coupling + Flip
    return x


if __name__ == "__main__":
    # channels=4, hidden_channels=32, kernel_size=3, dilation_rate=1, n_layers=4, n_flows=4
    B, C, T = 2, 4, 16
    HIDDEN, KSIZE, DIL, NLAYERS, NFLOWS = 32, 3, 1, 4, 4

    key = jax.random.PRNGKey(0)
    kx, kp = jax.random.split(key)
    x = jax.random.normal(kx, (B, C, T), jnp.float32)                    # PyTorch NCL layout
    lengths = jnp.array([T, T - 4])
    x_mask = (jnp.arange(T)[None, :] < lengths[:, None]).astype(jnp.float32)[:, None, :]

    params = init_params(kp, channels=C, hidden_channels=HIDDEN, kernel_size=KSIZE,
                         n_layers=NLAYERS, n_flows=NFLOWS)

    out = residual_coupling_block(x, x_mask, params, dilation_rate=DIL, n_flows=NFLOWS)
    out = jax.block_until_ready(out)
    assert out.shape == (B, C, T)

    ref = reference_forward(jnp.transpose(x, (0, 2, 1)), jnp.transpose(x_mask, (0, 2, 1)),
                            params, dilation_rate=DIL, n_flows=NFLOWS)
    ref = jnp.transpose(ref, (0, 2, 1))
    # Tolerance accounts for bf16 MXU operands in the kernel vs. the f32 reference.
    np.testing.assert_allclose(np.asarray(out), np.asarray(ref), rtol=2e-2, atol=2e-2)

    print("KERNEL_OK")
</pallas_src>

<mosaic_0001>
module attributes {stable_mosaic.version = 11 : i64} {
  func.func @_flow_stack_kernel(%arg0: memref<48x4xf32, #tpu.memory_space<vmem>>, %arg1: memref<48x1xf32, #tpu.memory_space<vmem>>, %arg2: memref<4x2x32xf32, #tpu.memory_space<vmem>>, %arg3: memref<4x1x32xf32, #tpu.memory_space<vmem>>, %arg4: memref<4x4x96x32xbf16, #tpu.memory_space<vmem>>, %arg5: memref<4x4x1x32xf32, #tpu.memory_space<vmem>>, %arg6: memref<4x4x96x32xbf16, #tpu.memory_space<vmem>>, %arg7: memref<4x4x1x32xf32, #tpu.memory_space<vmem>>, %arg8: memref<4x3x32x32xbf16, #tpu.memory_space<vmem>>, %arg9: memref<4x3x1x32xf32, #tpu.memory_space<vmem>>, %arg10: memref<4x4x32x32xbf16, #tpu.memory_space<vmem>>, %arg11: memref<4x4x1x32xf32, #tpu.memory_space<vmem>>, %arg12: memref<4x32x2xf32, #tpu.memory_space<vmem>>, %arg13: memref<4x1x2xf32, #tpu.memory_space<vmem>>, %arg14: memref<48x4xf32, #tpu.memory_space<vmem>>) attributes {dimension_semantics = [], scalar_prefetch = 0 : i64, scratch_operands = 0 : i64, tpu.core_type = #tpu.core_type<tc>} {
    %c0 = arith.constant 0 : index
    %c0_0 = arith.constant 0 : index
    %0 = vector.load %arg1[%c0, %c0_0] : memref<48x1xf32, #tpu.memory_space<vmem>>, vector<48x1xf32>
    %1 = vector.shape_cast %0 : vector<48x1xf32> to vector<48x1xf32>
    %2 = vector.broadcast %1 : vector<48x1xf32> to vector<48x32xf32>
    %3 = vector.shape_cast %0 : vector<48x1xf32> to vector<48x1xf32>
    %4 = vector.broadcast %3 : vector<48x1xf32> to vector<48x2xf32>
    %c0_1 = arith.constant 0 : index
    %c0_2 = arith.constant 0 : index
    %5 = vector.load %arg0[%c0_1, %c0_2] : memref<48x4xf32, #tpu.memory_space<vmem>>, vector<48x4xf32>
    %6 = vector.extract_strided_slice %5 {offsets = [0, 0], sizes = [48, 2], strides = [1, 1]} : vector<48x4xf32> to vector<48x2xf32>
    %7 = vector.extract_strided_slice %5 {offsets = [0, 2], sizes = [48, 2], strides = [1, 1]} : vector<48x4xf32> to vector<48x2xf32>
    %c0_3 = arith.constant 0 : index
    %c0_4 = arith.constant 0 : index
    %c0_5 = arith.constant 0 : index
    %8 = vector.load %arg2[%c0_3, %c0_4, %c0_5] : memref<4x2x32xf32, #tpu.memory_space<vmem>>, vector<1x2x32xf32>
    %9 = vector.shape_cast %8 : vector<1x2x32xf32> to vector<2x32xf32>
    %10 = vector.extract_strided_slice %6 {offsets = [0, 0], sizes = [48, 1], strides = [1, 1]} : vector<48x2xf32> to vector<48x1xf32>
    %11 = vector.extract_strided_slice %9 {offsets = [0, 0], sizes = [1, 32], strides = [1, 1]} : vector<2x32xf32> to vector<1x32xf32>
    %12 = vector.broadcast %10 : vector<48x1xf32> to vector<48x32xf32>
    %13 = vector.broadcast %11 : vector<1x32xf32> to vector<48x32xf32>
    %14 = arith.mulf %12, %13 : vector<48x32xf32>
    %15 = vector.extract_strided_slice %6 {offsets = [0, 1], sizes = [48, 1], strides = [1, 1]} : vector<48x2xf32> to vector<48x1xf32>
    %16 = vector.extract_strided_slice %9 {offsets = [1, 0], sizes = [1, 32], strides = [1, 1]} : vector<2x32xf32> to vector<1x32xf32>
    %17 = vector.broadcast %15 : vector<48x1xf32> to vector<48x32xf32>
    %18 = vector.broadcast %16 : vector<1x32xf32> to vector<48x32xf32>
    %19 = arith.mulf %17, %18 : vector<48x32xf32>
    %20 = arith.addf %14, %19 : vector<48x32xf32>
    %c0_6 = arith.constant 0 : index
    %c0_7 = arith.constant 0 : index
    %c0_8 = arith.constant 0 : index
    %21 = vector.load %arg3[%c0_6, %c0_7, %c0_8] : memref<4x1x32xf32, #tpu.memory_space<vmem>>, vector<1x1x32xf32>
    %22 = vector.shape_cast %21 : vector<1x1x32xf32> to vector<1x32xf32>
    %23 = vector.broadcast %22 : vector<1x32xf32> to vector<48x32xf32>
    %24 = arith.addf %20, %23 : vector<48x32xf32>
    %25 = arith.mulf %24, %2 : vector<48x32xf32>
    %cst = arith.constant 0.000000e+00 : f32
    %26 = vector.broadcast %cst : f32 to vector<1x32xf32>
    %27 = tpu.concatenate %26, %25, %26 in 0 : vector<1x32xf32>, vector<48x32xf32>, vector<1x32xf32> -> vector<50x32xf32>
    %28 = vector.extract_strided_slice %27 {offsets = [0, 0], sizes = [48, 32], strides = [1, 1]} : vector<50x32xf32> to vector<48x32xf32>
    %29 = vector.extract_strided_slice %27 {offsets = [1, 0], sizes = [48, 32], strides = [1, 1]} : vector<50x32xf32> to vector<48x32xf32>
    %30 = vector.extract_strided_slice %27 {offsets = [2, 0], sizes = [48, 32], strides = [1, 1]} : vector<50x32xf32> to vector<48x32xf32>
    %31 = tpu.concatenate %28, %29, %30 in 1 : vector<48x32xf32>, vector<48x32xf32>, vector<48x32xf32> -> vector<48x96xf32>
    %32 = arith.truncf %31 : vector<48x96xf32> to vector<48x96xbf16>
    %c0_9 = arith.constant 0 : index
    %c0_10 = arith.constant 0 : index
    %c0_11 = arith.constant 0 : index
    %c0_12 = arith.constant 0 : index
    %33 = vector.load %arg4[%c0_9, %c0_10, %c0_11, %c0_12] : memref<4x4x96x32xbf16, #tpu.memory_space<vmem>>, vector<1x1x96x32xbf16>
    %34 = vector.shape_cast %33 : vector<1x1x96x32xbf16> to vector<96x32xbf16>
    %cst_13 = arith.constant dense<0.000000e+00> : vector<48x32xf32>
    %35 = tpu.matmul %32, %34, %cst_13 {dimension_numbers = #tpu.dot_dimension_numbers<[1], [0], [0], [1], [0, 0, 1, 1], [], []>} : vector<48x96xbf16>, vector<96x32xbf16>, vector<48x32xf32> -> vector<48x32xf32>
    %c0_14 = arith.constant 0 : index
    %c0_15 = arith.constant 0 : index
    %c0_16 = arith.constant 0 : index
    %c0_17 = arith.constant 0 : index
    %36 = vector.load %arg5[%c0_14, %c0_15, %c0_16, %c0_17] : memref<4x4x1x32xf32, #tpu.memory_space<vmem>>, vector<1x1x1x32xf32>
    %37 = vector.shape_cast %36 : vector<1x1x1x32xf32> to vector<1x32xf32>
    %38 = vector.broadcast %37 : vector<1x32xf32> to vector<48x32xf32>
    %39 = arith.addf %35, %38 : vector<48x32xf32>
    %c0_18 = arith.constant 0 : index
    %c0_19 = arith.constant 0 : index
    %c0_20 = arith.constant 0 : index
    %c0_21 = arith.constant 0 : index
    %40 = vector.load %arg6[%c0_18, %c0_19, %c0_20, %c0_21] : memref<4x4x96x32xbf16, #tpu.memory_space<vmem>>, vector<1x1x96x32xbf16>
    %41 = vector.shape_cast %40 : vector<1x1x96x32xbf16> to vector<96x32xbf16>
    %cst_22 = arith.constant dense<0.000000e+00> : vector<48x32xf32>
    %42 = tpu.matmul %32, %41, %cst_22 {dimension_numbers = #tpu.dot_dimension_numbers<[1], [0], [0], [1], [0, 0, 1, 1], [], []>} : vector<48x96xbf16>, vector<96x32xbf16>, vector<48x32xf32> -> vector<48x32xf32>
    %c0_23 = arith.constant 0 : index
    %c0_24 = arith.constant 0 : index
    %c0_25 = arith.constant 0 : index
    %c0_26 = arith.constant 0 : index
    %43 = vector.load %arg7[%c0_23, %c0_24, %c0_25, %c0_26] : memref<4x4x1x32xf32, #tpu.memory_space<vmem>>, vector<1x1x1x32xf32>
    %44 = vector.shape_cast %43 : vector<1x1x1x32xf32> to vector<1x32xf32>
    %45 = vector.broadcast %44 : vector<1x32xf32> to vector<48x32xf32>
    %46 = arith.addf %42, %45 : vector<48x32xf32>
    %47 = math.tanh %39 : vector<48x32xf32>
    %48 = arith.negf %46 : vector<48x32xf32>
    %49 = math.exp %48 : vector<48x32xf32>
    %cst_27 = arith.constant 1.000000e+00 : f32
    %50 = vector.broadcast %cst_27 : f32 to vector<48x32xf32>
    %51 = arith.addf %50, %49 : vector<48x32xf32>
    %52 = arith.divf %50, %51 : vector<48x32xf32>
    %53 = arith.mulf %47, %52 : vector<48x32xf32>
    %54 = arith.truncf %53 : vector<48x32xf32> to vector<48x32xbf16>
    %c0_28 = arith.constant 0 : index
    %c0_29 = arith.constant 0 : index
    %c0_30 = arith.constant 0 : index
    %c0_31 = arith.constant 0 : index
    %55 = vector.load %arg8[%c0_28, %c0_29, %c0_30, %c0_31] : memref<4x3x32x32xbf16, #tpu.memory_space<vmem>>, vector<1x1x32x32xbf16>
    %56 = vector.shape_cast %55 : vector<1x1x32x32xbf16> to vector<32x32xbf16>
    %cst_32 = arith.constant dense<0.000000e+00> : vector<48x32xf32>
    %57 = tpu.matmul %54, %56, %cst_32 {dimension_numbers = #tpu.dot_dimension_numbers<[1], [0], [0], [1], [0, 0, 1, 1], [], []>} : vector<48x32xbf16>, vector<32x32xbf16>, vector<48x32xf32> -> vector<48x32xf32>
    %c0_33 = arith.constant 0 : index
    %c0_34 = arith.constant 0 : index
    %c0_35 = arith.constant 0 : index
    %c0_36 = arith.constant 0 : index
    %58 = vector.load %arg9[%c0_33, %c0_34, %c0_35, %c0_36] : memref<4x3x1x32xf32, #tpu.memory_space<vmem>>, vector<1x1x1x32xf32>
    %59 = vector.shape_cast %58 : vector<1x1x1x32xf32> to vector<1x32xf32>
    %60 = vector.broadcast %59 : vector<1x32xf32> to vector<48x32xf32>
    %61 = arith.addf %57, %60 : vector<48x32xf32>
    %62 = arith.addf %25, %61 : vector<48x32xf32>
    %63 = arith.mulf %62, %2 : vector<48x32xf32>
    %c0_37 = arith.constant 0 : index
    %c0_38 = arith.constant 0 : index
    %c0_39 = arith.constant 0 : index
    %c0_40 = arith.constant 0 : index
    %64 = vector.load %arg10[%c0_37, %c0_38, %c0_39, %c0_40] : memref<4x4x32x32xbf16, #tpu.memory_space<vmem>>, vector<1x1x32x32xbf16>
    %65 = vector.shape_cast %64 : vector<1x1x32x32xbf16> to vector<32x32xbf16>
    %cst_41 = arith.constant dense<0.000000e+00> : vector<48x32xf32>
    %66 = tpu.matmul %54, %65, %cst_41 {dimension_numbers = #tpu.dot_dimension_numbers<[1], [0], [0], [1], [0, 0, 1, 1], [], []>} : vector<48x32xbf16>, vector<32x32xbf16>, vector<48x32xf32> -> vector<48x32xf32>
    %c0_42 = arith.constant 0 : index
    %c0_43 = arith.constant 0 : index
    %c0_44 = arith.constant 0 : index
    %c0_45 = arith.constant 0 : index
    %67 = vector.load %arg11[%c0_42, %c0_43, %c0_44, %c0_45] : memref<4x4x1x32xf32, #tpu.memory_space<vmem>>, vector<1x1x1x32xf32>
    %68 = vector.shape_cast %67 : vector<1x1x1x32xf32> to vector<1x32xf32>
    %69 = vector.broadcast %68 : vector<1x32xf32> to vector<48x32xf32>
    %70 = arith.addf %66, %69 : vector<48x32xf32>
    %cst_46 = arith.constant 0.000000e+00 : f32
    %71 = vector.broadcast %cst_46 : f32 to vector<1x32xf32>
    %72 = tpu.concatenate %71, %63, %71 in 0 : vector<1x32xf32>, vector<48x32xf32>, vector<1x32xf32> -> vector<50x32xf32>
    %73 = vector.extract_strided_slice %72 {offsets = [0, 0], sizes = [48, 32], strides = [1, 1]} : vector<50x32xf32> to vector<48x32xf32>
    %74 = vector.extract_strided_slice %72 {offsets = [1, 0], sizes = [48, 32], strides = [1, 1]} : vector<50x32xf32> to vector<48x32xf32>
    %75 = vector.extract_strided_slice %72 {offsets = [2, 0], sizes = [48, 32], strides = [1, 1]} : vector<50x32xf32> to vector<48x32xf32>
    %76 = tpu.concatenate %73, %74, %75 in 1 : vector<48x32xf32>, vector<48x32xf32>, vector<48x32xf32> -> vector<48x96xf32>
    %77 = arith.truncf %76 : vector<48x96xf32> to vector<48x96xbf16>
    %c0_47 = arith.constant 0 : index
    %c1 = arith.constant 1 : index
    %c0_48 = arith.constant 0 : index
    %c0_49 = arith.constant 0 : index
    %78 = vector.load %arg4[%c0_47, %c1, %c0_48, %c0_49] : memref<4x4x96x32xbf16, #tpu.memory_space<vmem>>, vector<1x1x96x32xbf16>
    %79 = vector.shape_cast %78 : vector<1x1x96x32xbf16> to vector<96x32xbf16>
    %cst_50 = arith.constant dense<0.000000e+00> : vector<48x32xf32>
    %80 = tpu.matmul %77, %79, %cst_50 {dimension_numbers = #tpu.dot_dimension_numbers<[1], [0], [0], [1], [0, 0, 1, 1], [], []>} : vector<48x96xbf16>, vector<96x32xbf16>, vector<48x32xf32> -> vector<48x32xf32>
    %c0_51 = arith.constant 0 : index
    %c1_52 = arith.constant 1 : index
    %c0_53 = arith.constant 0 : index
    %c0_54 = arith.constant 0 : index
    %81 = vector.load %arg5[%c0_51, %c1_52, %c0_53, %c0_54] : memref<4x4x1x32xf32, #tpu.memory_space<vmem>>, vector<1x1x1x32xf32>
    %82 = vector.shape_cast %81 : vector<1x1x1x32xf32> to vector<1x32xf32>
    %83 = vector.broadcast %82 : vector<1x32xf32> to vector<48x32xf32>
    %84 = arith.addf %80, %83 : vector<48x32xf32>
    %c0_55 = arith.constant 0 : index
    %c1_56 = arith.constant 1 : index
    %c0_57 = arith.constant 0 : index
    %c0_58 = arith.constant 0 : index
    %85 = vector.load %arg6[%c0_55, %c1_56, %c0_57, %c0_58] : memref<4x4x96x32xbf16, #tpu.memory_space<vmem>>, vector<1x1x96x32xbf16>
    %86 = vector.shape_cast %85 : vector<1x1x96x32xbf16> to vector<96x32xbf16>
    %cst_59 = arith.constant dense<0.000000e+00> : vector<48x32xf32>
    %87 = tpu.matmul %77, %86, %cst_59 {dimension_numbers = #tpu.dot_dimension_numbers<[1], [0], [0], [1], [0, 0, 1, 1], [], []>} : vector<48x96xbf16>, vector<96x32xbf16>, vector<48x32xf32> -> vector<48x32xf32>
    %c0_60 = arith.constant 0 : index
    %c1_61 = arith.constant 1 : index
    %c0_62 = arith.constant 0 : index
    %c0_63 = arith.constant 0 : index
    %88 = vector.load %arg7[%c0_60, %c1_61, %c0_62, %c0_63] : memref<4x4x1x32xf32, #tpu.memory_space<vmem>>, vector<1x1x1x32xf32>
    %89 = vector.shape_cast %88 : vector<1x1x1x32xf32> to vector<1x32xf32>
    %90 = vector.broadcast %89 : vector<1x32xf32> to vector<48x32xf32>
    %91 = arith.addf %87, %90 : vector<48x32xf32>
    %92 = math.tanh %84 : vector<48x32xf32>
    %93 = arith.negf %91 : vector<48x32xf32>
    %94 = math.exp %93 : vector<48x32xf32>
    %cst_64 = arith.constant 1.000000e+00 : f32
    %95 = vector.broadcast %cst_64 : f32 to vector<48x32xf32>
    %96 = arith.addf %95, %94 : vector<48x32xf32>
    %97 = arith.divf %95, %96 : vector<48x32xf32>
    %98 = arith.mulf %92, %97 : vector<48x32xf32>
    %99 = arith.truncf %98 : vector<48x32xf32> to vector<48x32xbf16>
    %c0_65 = arith.constant 0 : index
    %c1_66 = arith.constant 1 : index
    %c0_67 = arith.constant 0 : index
    %c0_68 = arith.constant 0 : index
    %100 = vector.load %arg8[%c0_65, %c1_66, %c0_67, %c0_68] : memref<4x3x32x32xbf16, #tpu.memory_space<vmem>>, vector<1x1x32x32xbf16>
    %101 = vector.shape_cast %100 : vector<1x1x32x32xbf16> to vector<32x32xbf16>
    %cst_69 = arith.constant dense<0.000000e+00> : vector<48x32xf32>
    %102 = tpu.matmul %99, %101, %cst_69 {dimension_numbers = #tpu.dot_dimension_numbers<[1], [0], [0], [1], [0, 0, 1, 1], [], []>} : vector<48x32xbf16>, vector<32x32xbf16>, vector<48x32xf32> -> vector<48x32xf32>
    %c0_70 = arith.constant 0 : index
    %c1_71 = arith.constant 1 : index
    %c0_72 = arith.constant 0 : index
    %c0_73 = arith.constant 0 : index
    %103 = vector.load %arg9[%c0_70, %c1_71, %c0_72, %c0_73] : memref<4x3x1x32xf32, #tpu.memory_space<vmem>>, vector<1x1x1x32xf32>
    %104 = vector.shape_cast %103 : vector<1x1x1x32xf32> to vector<1x32xf32>
    %105 = vector.broadcast %104 : vector<1x32xf32> to vector<48x32xf32>
    %106 = arith.addf %102, %105 : vector<48x32xf32>
    %107 = arith.addf %63, %106 : vector<48x32xf32>
    %108 = arith.mulf %107, %2 : vector<48x32xf32>
    %c0_74 = arith.constant 0 : index
    %c1_75 = arith.constant 1 : index
    %c0_76 = arith.constant 0 : index
    %c0_77 = arith.constant 0 : index
    %109 = vector.load %arg10[%c0_74, %c1_75, %c0_76, %c0_77] : memref<4x4x32x32xbf16, #tpu.memory_space<vmem>>, vector<1x1x32x32xbf16>
    %110 = vector.shape_cast %109 : vector<1x1x32x32xbf16> to vector<32x32xbf16>
    %cst_78 = arith.constant dense<0.000000e+00> : vector<48x32xf32>
    %111 = tpu.matmul %99, %110, %cst_78 {dimension_numbers = #tpu.dot_dimension_numbers<[1], [0], [0], [1], [0, 0, 1, 1], [], []>} : vector<48x32xbf16>, vector<32x32xbf16>, vector<48x32xf32> -> vector<48x32xf32>
    %c0_79 = arith.constant 0 : index
    %c1_80 = arith.constant 1 : index
    %c0_81 = arith.constant 0 : index
    %c0_82 = arith.constant 0 : index
    %112 = vector.load %arg11[%c0_79, %c1_80, %c0_81, %c0_82] : memref<4x4x1x32xf32, #tpu.memory_space<vmem>>, vector<1x1x1x32xf32>
    %113 = vector.shape_cast %112 : vector<1x1x1x32xf32> to vector<1x32xf32>
    %114 = vector.broadcast %113 : vector<1x32xf32> to vector<48x32xf32>
    %115 = arith.addf %111, %114 : vector<48x32xf32>
    %116 = arith.addf %70, %115 : vector<48x32xf32>
    %cst_83 = arith.constant 0.000000e+00 : f32
    %117 = vector.broadcast %cst_83 : f32 to vector<1x32xf32>
    %118 = tpu.concatenate %117, %108, %117 in 0 : vector<1x32xf32>, vector<48x32xf32>, vector<1x32xf32> -> vector<50x32xf32>
    %119 = vector.extract_strided_slice %118 {offsets = [0, 0], sizes = [48, 32], strides = [1, 1]} : vector<50x32xf32> to vector<48x32xf32>
    %120 = vector.extract_strided_slice %118 {offsets = [1, 0], sizes = [48, 32], strides = [1, 1]} : vector<50x32xf32> to vector<48x32xf32>
    %121 = vector.extract_strided_slice %118 {offsets = [2, 0], sizes = [48, 32], strides = [1, 1]} : vector<50x32xf32> to vector<48x32xf32>
    %122 = tpu.concatenate %119, %120, %121 in 1 : vector<48x32xf32>, vector<48x32xf32>, vector<48x32xf32> -> vector<48x96xf32>
    %123 = arith.truncf %122 : vector<48x96xf32> to vector<48x96xbf16>
    %c0_84 = arith.constant 0 : index
    %c2 = arith.constant 2 : index
    %c0_85 = arith.constant 0 : index
    %c0_86 = arith.constant 0 : index
    %124 = vector.load %arg4[%c0_84, %c2, %c0_85, %c0_86] : memref<4x4x96x32xbf16, #tpu.memory_space<vmem>>, vector<1x1x96x32xbf16>
    %125 = vector.shape_cast %124 : vector<1x1x96x32xbf16> to vector<96x32xbf16>
    %cst_87 = arith.constant dense<0.000000e+00> : vector<48x32xf32>
    %126 = tpu.matmul %123, %125, %cst_87 {dimension_numbers = #tpu.dot_dimension_numbers<[1], [0], [0], [1], [0, 0, 1, 1], [], []>} : vector<48x96xbf16>, vector<96x32xbf16>, vector<48x32xf32> -> vector<48x32xf32>
    %c0_88 = arith.constant 0 : index
    %c2_89 = arith.constant 2 : index
    %c0_90 = arith.constant 0 : index
    %c0_91 = arith.constant 0 : index
    %127 = vector.load %arg5[%c0_88, %c2_89, %c0_90, %c0_91] : memref<4x4x1x32xf32, #tpu.memory_space<vmem>>, vector<1x1x1x32xf32>
    %128 = vector.shape_cast %127 : vector<1x1x1x32xf32> to vector<1x32xf32>
    %129 = vector.broadcast %128 : vector<1x32xf32> to vector<48x32xf32>
    %130 = arith.addf %126, %129 : vector<48x32xf32>
    %c0_92 = arith.constant 0 : index
    %c2_93 = arith.constant 2 : index
    %c0_94 = arith.constant 0 : index
    %c0_95 = arith.constant 0 : index
    %131 = vector.load %arg6[%c0_92, %c2_93, %c0_94, %c0_95] : memref<4x4x96x32xbf16, #tpu.memory_space<vmem>>, vector<1x1x96x32xbf16>
    %132 = vector.shape_cast %131 : vector<1x1x96x32xbf16> to vector<96x32xbf16>
    %cst_96 = arith.constant dense<0.000000e+00> : vector<48x32xf32>
    %133 = tpu.matmul %123, %132, %cst_96 {dimension_numbers = #tpu.dot_dimension_numbers<[1], [0], [0], [1], [0, 0, 1, 1], [], []>} : vector<48x96xbf16>, vector<96x32xbf16>, vector<48x32xf32> -> vector<48x32xf32>
    %c0_97 = arith.constant 0 : index
    %c2_98 = arith.constant 2 : index
    %c0_99 = arith.constant 0 : index
    %c0_100 = arith.constant 0 : index
    %134 = vector.load %arg7[%c0_97, %c2_98, %c0_99, %c0_100] : memref<4x4x1x32xf32, #tpu.memory_space<vmem>>, vector<1x1x1x32xf32>
    %135 = vector.shape_cast %134 : vector<1x1x1x32xf32> to vector<1x32xf32>
    %136 = vector.broadcast %135 : vector<1x32xf32> to vector<48x32xf32>
    %137 = arith.addf %133, %136 : vector<48x32xf32>
    %138 = math.tanh %130 : vector<48x32xf32>
    %139 = arith.negf %137 : vector<48x32xf32>
    %140 = math.exp %139 : vector<48x32xf32>
    %cst_101 = arith.constant 1.000000e+00 : f32
    %141 = vector.broadcast %cst_101 : f32 to vector<48x32xf32>
    %142 = arith.addf %141, %140 : vector<48x32xf32>
    %143 = arith.divf %141, %142 : vector<48x32xf32>
    %144 = arith.mulf %138, %143 : vector<48x32xf32>
    %145 = arith.truncf %144 : vector<48x32xf32> to vector<48x32xbf16>
    %c0_102 = arith.constant 0 : index
    %c2_103 = arith.constant 2 : index
    %c0_104 = arith.constant 0 : index
    %c0_105 = arith.constant 0 : index
    %146 = vector.load %arg8[%c0_102, %c2_103, %c0_104, %c0_105] : memref<4x3x32x32xbf16, #tpu.memory_space<vmem>>, vector<1x1x32x32xbf16>
    %147 = vector.shape_cast %146 : vector<1x1x32x32xbf16> to vector<32x32xbf16>
    %cst_106 = arith.constant dense<0.000000e+00> : vector<48x32xf32>
    %148 = tpu.matmul %145, %147, %cst_106 {dimension_numbers = #tpu.dot_dimension_numbers<[1], [0], [0], [1], [0, 0, 1, 1], [], []>} : vector<48x32xbf16>, vector<32x32xbf16>, vector<48x32xf32> -> vector<48x32xf32>
    %c0_107 = arith.constant 0 : index
    %c2_108 = arith.constant 2 : index
    %c0_109 = arith.constant 0 : index
    %c0_110 = arith.constant 0 : index
    %149 = vector.load %arg9[%c0_107, %c2_108, %c0_109, %c0_110] : memref<4x3x1x32xf32, #tpu.memory_space<vmem>>, vector<1x1x1x32xf32>
    %150 = vector.shape_cast %149 : vector<1x1x1x32xf32> to vector<1x32xf32>
    %151 = vector.broadcast %150 : vector<1x32xf32> to vector<48x32xf32>
    %152 = arith.addf %148, %151 : vector<48x32xf32>
    %153 = arith.addf %108, %152 : vector<48x32xf32>
    %154 = arith.mulf %153, %2 : vector<48x32xf32>
    %c0_111 = arith.constant 0 : index
    %c2_112 = arith.constant 2 : index
    %c0_113 = arith.constant 0 : index
    %c0_114 = arith.constant 0 : index
    %155 = vector.load %arg10[%c0_111, %c2_112, %c0_113, %c0_114] : memref<4x4x32x32xbf16, #tpu.memory_space<vmem>>, vector<1x1x32x32xbf16>
    %156 = vector.shape_cast %155 : vector<1x1x32x32xbf16> to vector<32x32xbf16>
    %cst_115 = arith.constant dense<0.000000e+00> : vector<48x32xf32>
    %157 = tpu.matmul %145, %156, %cst_115 {dimension_numbers = #tpu.dot_dimension_numbers<[1], [0], [0], [1], [0, 0, 1, 1], [], []>} : vector<48x32xbf16>, vector<32x32xbf16>, vector<48x32xf32> -> vector<48x32xf32>
    %c0_116 = arith.constant 0 : index
    %c2_117 = arith.constant 2 : index
    %c0_118 = arith.constant 0 : index
    %c0_119 = arith.constant 0 : index
    %158 = vector.load %arg11[%c0_116, %c2_117, %c0_118, %c0_119] : memref<4x4x1x32xf32, #tpu.memory_space<vmem>>, vector<1x1x1x32xf32>
    %159 = vector.shape_cast %158 : vector<1x1x1x32xf32> to vector<1x32xf32>
    %160 = vector.broadcast %159 : vector<1x32xf32> to vector<48x32xf32>
    %161 = arith.addf %157, %160 : vector<48x32xf32>
    %162 = arith.addf %116, %161 : vector<48x32xf32>
    %cst_120 = arith.constant 0.000000e+00 : f32
    %163 = vector.broadcast %cst_120 : f32 to vector<1x32xf32>
    %164 = tpu.concatenate %163, %154, %163 in 0 : vector<1x32xf32>, vector<48x32xf32>, vector<1x32xf32> -> vector<50x32xf32>
    %165 = vector.extract_strided_slice %164 {offsets = [0, 0], sizes = [48, 32], strides = [1, 1]} : vector<50x32xf32> to vector<48x32xf32>
    %166 = vector.extract_strided_slice %164 {offsets = [1, 0], sizes = [48, 32], strides = [1, 1]} : vector<50x32xf32> to vector<48x32xf32>
    %167 = vector.extract_strided_slice %164 {offsets = [2, 0], sizes = [48, 32], strides = [1, 1]} : vector<50x32xf32> to vector<48x32xf32>
    %168 = tpu.concatenate %165, %166, %167 in 1 : vector<48x32xf32>, vector<48x32xf32>, vector<48x32xf32> -> vector<48x96xf32>
    %169 = arith.truncf %168 : vector<48x96xf32> to vector<48x96xbf16>
    %c0_121 = arith.constant 0 : index
    %c3 = arith.constant 3 : index
    %c0_122 = arith.constant 0 : index
    %c0_123 = arith.constant 0 : index
    %170 = vector.load %arg4[%c0_121, %c3, %c0_122, %c0_123] : memref<4x4x96x32xbf16, #tpu.memory_space<vmem>>, vector<1x1x96x32xbf16>
    %171 = vector.shape_cast %170 : vector<1x1x96x32xbf16> to vector<96x32xbf16>
    %cst_124 = arith.constant dense<0.000000e+00> : vector<48x32xf32>
    %172 = tpu.matmul %169, %171, %cst_124 {dimension_numbers = #tpu.dot_dimension_numbers<[1], [0], [0], [1], [0, 0, 1, 1], [], []>} : vector<48x96xbf16>, vector<96x32xbf16>, vector<48x32xf32> -> vector<48x32xf32>
    %c0_125 = arith.constant 0 : index
    %c3_126 = arith.constant 3 : index
    %c0_127 = arith.constant 0 : index
    %c0_128 = arith.constant 0 : index
    %173 = vector.load %arg5[%c0_125, %c3_126, %c0_127, %c0_128] : memref<4x4x1x32xf32, #tpu.memory_space<vmem>>, vector<1x1x1x32xf32>
    %174 = vector.shape_cast %173 : vector<1x1x1x32xf32> to vector<1x32xf32>
    %175 = vector.broadcast %174 : vector<1x32xf32> to vector<48x32xf32>
    %176 = arith.addf %172, %175 : vector<48x32xf32>
    %c0_129 = arith.constant 0 : index
    %c3_130 = arith.constant 3 : index
    %c0_131 = arith.constant 0 : index
    %c0_132 = arith.constant 0 : index
    %177 = vector.load %arg6[%c0_129, %c3_130, %c0_131, %c0_132] : memref<4x4x96x32xbf16, #tpu.memory_space<vmem>>, vector<1x1x96x32xbf16>
    %178 = vector.shape_cast %177 : vector<1x1x96x32xbf16> to vector<96x32xbf16>
    %cst_133 = arith.constant dense<0.000000e+00> : vector<48x32xf32>
    %179 = tpu.matmul %169, %178, %cst_133 {dimension_numbers = #tpu.dot_dimension_numbers<[1], [0], [0], [1], [0, 0, 1, 1], [], []>} : vector<48x96xbf16>, vector<96x32xbf16>, vector<48x32xf32> -> vector<48x32xf32>
    %c0_134 = arith.constant 0 : index
    %c3_135 = arith.constant 3 : index
    %c0_136 = arith.constant 0 : index
    %c0_137 = arith.constant 0 : index
    %180 = vector.load %arg7[%c0_134, %c3_135, %c0_136, %c0_137] : memref<4x4x1x32xf32, #tpu.memory_space<vmem>>, vector<1x1x1x32xf32>
    %181 = vector.shape_cast %180 : vector<1x1x1x32xf32> to vector<1x32xf32>
    %182 = vector.broadcast %181 : vector<1x32xf32> to vector<48x32xf32>
    %183 = arith.addf %179, %182 : vector<48x32xf32>
    %184 = math.tanh %176 : vector<48x32xf32>
    %185 = arith.negf %183 : vector<48x32xf32>
    %186 = math.exp %185 : vector<48x32xf32>
    %cst_138 = arith.constant 1.000000e+00 : f32
    %187 = vector.broadcast %cst_138 : f32 to vector<48x32xf32>
    %188 = arith.addf %187, %186 : vector<48x32xf32>
    %189 = arith.divf %187, %188 : vector<48x32xf32>
    %190 = arith.mulf %184, %189 : vector<48x32xf32>
    %191 = arith.truncf %190 : vector<48x32xf32> to vector<48x32xbf16>
    %c0_139 = arith.constant 0 : index
    %c3_140 = arith.constant 3 : index
    %c0_141 = arith.constant 0 : index
    %c0_142 = arith.constant 0 : index
    %192 = vector.load %arg10[%c0_139, %c3_140, %c0_141, %c0_142] : memref<4x4x32x32xbf16, #tpu.memory_space<vmem>>, vector<1x1x32x32xbf16>
    %193 = vector.shape_cast %192 : vector<1x1x32x32xbf16> to vector<32x32xbf16>
    %cst_143 = arith.constant dense<0.000000e+00> : vector<48x32xf32>
    %194 = tpu.matmul %191, %193, %cst_143 {dimension_numbers = #tpu.dot_dimension_numbers<[1], [0], [0], [1], [0, 0, 1, 1], [], []>} : vector<48x32xbf16>, vector<32x32xbf16>, vector<48x32xf32> -> vector<48x32xf32>
    %c0_144 = arith.constant 0 : index
    %c3_145 = arith.constant 3 : index
    %c0_146 = arith.constant 0 : index
    %c0_147 = arith.constant 0 : index
    %195 = vector.load %arg11[%c0_144, %c3_145, %c0_146, %c0_147] : memref<4x4x1x32xf32, #tpu.memory_space<vmem>>, vector<1x1x1x32xf32>
    %196 = vector.shape_cast %195 : vector<1x1x1x32xf32> to vector<1x32xf32>
    %197 = vector.broadcast %196 : vector<1x32xf32> to vector<48x32xf32>
    %198 = arith.addf %194, %197 : vector<48x32xf32>
    %199 = arith.addf %162, %198 : vector<48x32xf32>
    %200 = arith.mulf %199, %2 : vector<48x32xf32>
    %c0_148 = arith.constant 0 : index
    %c0_149 = arith.constant 0 : index
    %c0_150 = arith.constant 0 : index
    %201 = vector.load %arg12[%c0_148, %c0_149, %c0_150] : memref<4x32x2xf32, #tpu.memory_space<vmem>>, vector<1x32x2xf32>
    %202 = vector.shape_cast %201 : vector<1x32x2xf32> to vector<32x2xf32>
    %cst_151 = arith.constant dense<0.000000e+00> : vector<48x2xf32>
    %203 = tpu.matmul %200, %202, %cst_151 {dimension_numbers = #tpu.dot_dimension_numbers<[1], [0], [0], [1], [0, 0, 1, 1], [], []>} : vector<48x32xf32>, vector<32x2xf32>, vector<48x2xf32> -> vector<48x2xf32>
    %c0_152 = arith.constant 0 : index
    %c0_153 = arith.constant 0 : index
    %c0_154 = arith.constant 0 : index
    %204 = vector.load %arg13[%c0_152, %c0_153, %c0_154] : memref<4x1x2xf32, #tpu.memory_space<vmem>>, vector<1x1x2xf32>
    %205 = vector.shape_cast %204 : vector<1x1x2xf32> to vector<1x2xf32>
    %206 = vector.broadcast %205 : vector<1x2xf32> to vector<48x2xf32>
    %207 = arith.addf %203, %206 : vector<48x2xf32>
    %208 = arith.mulf %207, %4 : vector<48x2xf32>
    %209 = arith.mulf %7, %4 : vector<48x2xf32>
    %210 = arith.addf %208, %209 : vector<48x2xf32>
    %c1_155 = arith.constant 1 : index
    %c0_156 = arith.constant 0 : index
    %c0_157 = arith.constant 0 : index
    %211 = vector.load %arg2[%c1_155, %c0_156, %c0_157] : memref<4x2x32xf32, #tpu.memory_space<vmem>>, vector<1x2x32xf32>
    %212 = vector.shape_cast %211 : vector<1x2x32xf32> to vector<2x32xf32>
    %213 = vector.extract_strided_slice %210 {offsets = [0, 0], sizes = [48, 1], strides = [1, 1]} : vector<48x2xf32> to vector<48x1xf32>
    %214 = vector.extract_strided_slice %212 {offsets = [0, 0], sizes = [1, 32], strides = [1, 1]} : vector<2x32xf32> to vector<1x32xf32>
    %215 = vector.broadcast %213 : vector<48x1xf32> to vector<48x32xf32>
    %216 = vector.broadcast %214 : vector<1x32xf32> to vector<48x32xf32>
    %217 = arith.mulf %215, %216 : vector<48x32xf32>
    %218 = vector.extract_strided_slice %210 {offsets = [0, 1], sizes = [48, 1], strides = [1, 1]} : vector<48x2xf32> to vector<48x1xf32>
    %219 = vector.extract_strided_slice %212 {offsets = [1, 0], sizes = [1, 32], strides = [1, 1]} : vector<2x32xf32> to vector<1x32xf32>
    %220 = vector.broadcast %218 : vector<48x1xf32> to vector<48x32xf32>
    %221 = vector.broadcast %219 : vector<1x32xf32> to vector<48x32xf32>
    %222 = arith.mulf %220, %221 : vector<48x32xf32>
    %223 = arith.addf %217, %222 : vector<48x32xf32>
    %c1_158 = arith.constant 1 : index
    %c0_159 = arith.constant 0 : index
    %c0_160 = arith.constant 0 : index
    %224 = vector.load %arg3[%c1_158, %c0_159, %c0_160] : memref<4x1x32xf32, #tpu.memory_space<vmem>>, vector<1x1x32xf32>
    %225 = vector.shape_cast %224 : vector<1x1x32xf32> to vector<1x32xf32>
    %226 = vector.broadcast %225 : vector<1x32xf32> to vector<48x32xf32>
    %227 = arith.addf %223, %226 : vector<48x32xf32>
    %228 = arith.mulf %227, %2 : vector<48x32xf32>
    %cst_161 = arith.constant 0.000000e+00 : f32
    %229 = vector.broadcast %cst_161 : f32 to vector<1x32xf32>
    %230 = tpu.concatenate %229, %228, %229 in 0 : vector<1x32xf32>, vector<48x32xf32>, vector<1x32xf32> -> vector<50x32xf32>
    %231 = vector.extract_strided_slice %230 {offsets = [0, 0], sizes = [48, 32], strides = [1, 1]} : vector<50x32xf32> to vector<48x32xf32>
    %232 = vector.extract_strided_slice %230 {offsets = [1, 0], sizes = [48, 32], strides = [1, 1]} : vector<50x32xf32> to vector<48x32xf32>
    %233 = vector.extract_strided_slice %230 {offsets = [2, 0], sizes = [48, 32], strides = [1, 1]} : vector<50x32xf32> to vector<48x32xf32>
    %234 = tpu.concatenate %231, %232, %233 in 1 : vector<48x32xf32>, vector<48x32xf32>, vector<48x32xf32> -> vector<48x96xf32>
    %235 = arith.truncf %234 : vector<48x96xf32> to vector<48x96xbf16>
    %c1_162 = arith.constant 1 : index
    %c0_163 = arith.constant 0 : index
    %c0_164 = arith.constant 0 : index
    %c0_165 = arith.constant 0 : index
    %236 = vector.load %arg4[%c1_162, %c0_163, %c0_164, %c0_165] : memref<4x4x96x32xbf16, #tpu.memory_space<vmem>>, vector<1x1x96x32xbf16>
    %237 = vector.shape_cast %236 : vector<1x1x96x32xbf16> to vector<96x32xbf16>
    %cst_166 = arith.constant dense<0.000000e+00> : vector<48x32xf32>
    %238 = tpu.matmul %235, %237, %cst_166 {dimension_numbers = #tpu.dot_dimension_numbers<[1], [0], [0], [1], [0, 0, 1, 1], [], []>} : vector<48x96xbf16>, vector<96x32xbf16>, vector<48x32xf32> -> vector<48x32xf32>
    %c1_167 = arith.constant 1 : index
    %c0_168 = arith.constant 0 : index
    %c0_169 = arith.constant 0 : index
    %c0_170 = arith.constant 0 : index
    %239 = vector.load %arg5[%c1_167, %c0_168, %c0_169, %c0_170] : memref<4x4x1x32xf32, #tpu.memory_space<vmem>>, vector<1x1x1x32xf32>
    %240 = vector.shape_cast %239 : vector<1x1x1x32xf32> to vector<1x32xf32>
    %241 = vector.broadcast %240 : vector<1x32xf32> to vector<48x32xf32>
    %242 = arith.addf %238, %241 : vector<48x32xf32>
    %c1_171 = arith.constant 1 : index
    %c0_172 = arith.constant 0 : index
    %c0_173 = arith.constant 0 : index
    %c0_174 = arith.constant 0 : index
    %243 = vector.load %arg6[%c1_171, %c0_172, %c0_173, %c0_174] : memref<4x4x96x32xbf16, #tpu.memory_space<vmem>>, vector<1x1x96x32xbf16>
    %244 = vector.shape_cast %243 : vector<1x1x96x32xbf16> to vector<96x32xbf16>
    %cst_175 = arith.constant dense<0.000000e+00> : vector<48x32xf32>
    %245 = tpu.matmul %235, %244, %cst_175 {dimension_numbers = #tpu.dot_dimension_numbers<[1], [0], [0], [1], [0, 0, 1, 1], [], []>} : vector<48x96xbf16>, vector<96x32xbf16>, vector<48x32xf32> -> vector<48x32xf32>
    %c1_176 = arith.constant 1 : index
    %c0_177 = arith.constant 0 : index
    %c0_178 = arith.constant 0 : index
    %c0_179 = arith.constant 0 : index
    %246 = vector.load %arg7[%c1_176, %c0_177, %c0_178, %c0_179] : memref<4x4x1x32xf32, #tpu.memory_space<vmem>>, vector<1x1x1x32xf32>
    %247 = vector.shape_cast %246 : vector<1x1x1x32xf32> to vector<1x32xf32>
    %248 = vector.broadcast %247 : vector<1x32xf32> to vector<48x32xf32>
    %249 = arith.addf %245, %248 : vector<48x32xf32>
    %250 = math.tanh %242 : vector<48x32xf32>
    %251 = arith.negf %249 : vector<48x32xf32>
    %252 = math.exp %251 : vector<48x32xf32>
    %cst_180 = arith.constant 1.000000e+00 : f32
    %253 = vector.broadcast %cst_180 : f32 to vector<48x32xf32>
    %254 = arith.addf %253, %252 : vector<48x32xf32>
    %255 = arith.divf %253, %254 : vector<48x32xf32>
    %256 = arith.mulf %250, %255 : vector<48x32xf32>
    %257 = arith.truncf %256 : vector<48x32xf32> to vector<48x32xbf16>
    %c1_181 = arith.constant 1 : index
    %c0_182 = arith.constant 0 : index
    %c0_183 = arith.constant 0 : index
    %c0_184 = arith.constant 0 : index
    %258 = vector.load %arg8[%c1_181, %c0_182, %c0_183, %c0_184] : memref<4x3x32x32xbf16, #tpu.memory_space<vmem>>, vector<1x1x32x32xbf16>
    %259 = vector.shape_cast %258 : vector<1x1x32x32xbf16> to vector<32x32xbf16>
    %cst_185 = arith.constant dense<0.000000e+00> : vector<48x32xf32>
    %260 = tpu.matmul %257, %259, %cst_185 {dimension_numbers = #tpu.dot_dimension_numbers<[1], [0], [0], [1], [0, 0, 1, 1], [], []>} : vector<48x32xbf16>, vector<32x32xbf16>, vector<48x32xf32> -> vector<48x32xf32>
    %c1_186 = arith.constant 1 : index
    %c0_187 = arith.constant 0 : index
    %c0_188 = arith.constant 0 : index
    %c0_189 = arith.constant 0 : index
    %261 = vector.load %arg9[%c1_186, %c0_187, %c0_188, %c0_189] : memref<4x3x1x32xf32, #tpu.memory_space<vmem>>, vector<1x1x1x32xf32>
    %262 = vector.shape_cast %261 : vector<1x1x1x32xf32> to vector<1x32xf32>
    %263 = vector.broadcast %262 : vector<1x32xf32> to vector<48x32xf32>
    %264 = arith.addf %260, %263 : vector<48x32xf32>
    %265 = arith.addf %228, %264 : vector<48x32xf32>
    %266 = arith.mulf %265, %2 : vector<48x32xf32>
    %c1_190 = arith.constant 1 : index
    %c0_191 = arith.constant 0 : index
    %c0_192 = arith.constant 0 : index
    %c0_193 = arith.constant 0 : index
    %267 = vector.load %arg10[%c1_190, %c0_191, %c0_192, %c0_193] : memref<4x4x32x32xbf16, #tpu.memory_space<vmem>>, vector<1x1x32x32xbf16>
    %268 = vector.shape_cast %267 : vector<1x1x32x32xbf16> to vector<32x32xbf16>
    %cst_194 = arith.constant dense<0.000000e+00> : vector<48x32xf32>
    %269 = tpu.matmul %257, %268, %cst_194 {dimension_numbers = #tpu.dot_dimension_numbers<[1], [0], [0], [1], [0, 0, 1, 1], [], []>} : vector<48x32xbf16>, vector<32x32xbf16>, vector<48x32xf32> -> vector<48x32xf32>
    %c1_195 = arith.constant 1 : index
    %c0_196 = arith.constant 0 : index
    %c0_197 = arith.constant 0 : index
    %c0_198 = arith.constant 0 : index
    %270 = vector.load %arg11[%c1_195, %c0_196, %c0_197, %c0_198] : memref<4x4x1x32xf32, #tpu.memory_space<vmem>>, vector<1x1x1x32xf32>
    %271 = vector.shape_cast %270 : vector<1x1x1x32xf32> to vector<1x32xf32>
    %272 = vector.broadcast %271 : vector<1x32xf32> to vector<48x32xf32>
    %273 = arith.addf %269, %272 : vector<48x32xf32>
    %cst_199 = arith.constant 0.000000e+00 : f32
    %274 = vector.broadcast %cst_199 : f32 to vector<1x32xf32>
    %275 = tpu.concatenate %274, %266, %274 in 0 : vector<1x32xf32>, vector<48x32xf32>, vector<1x32xf32> -> vector<50x32xf32>
    %276 = vector.extract_strided_slice %275 {offsets = [0, 0], sizes = [48, 32], strides = [1, 1]} : vector<50x32xf32> to vector<48x32xf32>
    %277 = vector.extract_strided_slice %275 {offsets = [1, 0], sizes = [48, 32], strides = [1, 1]} : vector<50x32xf32> to vector<48x32xf32>
    %278 = vector.extract_strided_slice %275 {offsets = [2, 0], sizes = [48, 32], strides = [1, 1]} : vector<50x32xf32> to vector<48x32xf32>
    %279 = tpu.concatenate %276, %277, %278 in 1 : vector<48x32xf32>, vector<48x32xf32>, vector<48x32xf32> -> vector<48x96xf32>
    %280 = arith.truncf %279 : vector<48x96xf32> to vector<48x96xbf16>
    %c1_200 = arith.constant 1 : index
    %c1_201 = arith.constant 1 : index
    %c0_202 = arith.constant 0 : index
    %c0_203 = arith.constant 0 : index
    %281 = vector.load %arg4[%c1_200, %c1_201, %c0_202, %c0_203] : memref<4x4x96x32xbf16, #tpu.memory_space<vmem>>, vector<1x1x96x32xbf16>
    %282 = vector.shape_cast %281 : vector<1x1x96x32xbf16> to vector<96x32xbf16>
    %cst_204 = arith.constant dense<0.000000e+00> : vector<48x32xf32>
    %283 = tpu.matmul %280, %282, %cst_204 {dimension_numbers = #tpu.dot_dimension_numbers<[1], [0], [0], [1], [0, 0, 1, 1], [], []>} : vector<48x96xbf16>, vector<96x32xbf16>, vector<48x32xf32> -> vector<48x32xf32>
    %c1_205 = arith.constant 1 : index
    %c1_206 = arith.constant 1 : index
    %c0_207 = arith.constant 0 : index
    %c0_208 = arith.constant 0 : index
    %284 = vector.load %arg5[%c1_205, %c1_206, %c0_207, %c0_208] : memref<4x4x1x32xf32, #tpu.memory_space<vmem>>, vector<1x1x1x32xf32>
    %285 = vector.shape_cast %284 : vector<1x1x1x32xf32> to vector<1x32xf32>
    %286 = vector.broadcast %285 : vector<1x32xf32> to vector<48x32xf32>
    %287 = arith.addf %283, %286 : vector<48x32xf32>
    %c1_209 = arith.constant 1 : index
    %c1_210 = arith.constant 1 : index
    %c0_211 = arith.constant 0 : index
    %c0_212 = arith.constant 0 : index
    %288 = vector.load %arg6[%c1_209, %c1_210, %c0_211, %c0_212] : memref<4x4x96x32xbf16, #tpu.memory_space<vmem>>, vector<1x1x96x32xbf16>
    %289 = vector.shape_cast %288 : vector<1x1x96x32xbf16> to vector<96x32xbf16>
    %cst_213 = arith.constant dense<0.000000e+00> : vector<48x32xf32>
    %290 = tpu.matmul %280, %289, %cst_213 {dimension_numbers = #tpu.dot_dimension_numbers<[1], [0], [0], [1], [0, 0, 1, 1], [], []>} : vector<48x96xbf16>, vector<96x32xbf16>, vector<48x32xf32> -> vector<48x32xf32>
    %c1_214 = arith.constant 1 : index
    %c1_215 = arith.constant 1 : index
    %c0_216 = arith.constant 0 : index
    %c0_217 = arith.constant 0 : index
    %291 = vector.load %arg7[%c1_214, %c1_215, %c0_216, %c0_217] : memref<4x4x1x32xf32, #tpu.memory_space<vmem>>, vector<1x1x1x32xf32>
    %292 = vector.shape_cast %291 : vector<1x1x1x32xf32> to vector<1x32xf32>
    %293 = vector.broadcast %292 : vector<1x32xf32> to vector<48x32xf32>
    %294 = arith.addf %290, %293 : vector<48x32xf32>
    %295 = math.tanh %287 : vector<48x32xf32>
    %296 = arith.negf %294 : vector<48x32xf32>
    %297 = math.exp %296 : vector<48x32xf32>
    %cst_218 = arith.constant 1.000000e+00 : f32
    %298 = vector.broadcast %cst_218 : f32 to vector<48x32xf32>
    %299 = arith.addf %298, %297 : vector<48x32xf32>
    %300 = arith.divf %298, %299 : vector<48x32xf32>
    %301 = arith.mulf %295, %300 : vector<48x32xf32>
    %302 = arith.truncf %301 : vector<48x32xf32> to vector<48x32xbf16>
    %c1_219 = arith.constant 1 : index
    %c1_220 = arith.constant 1 : index
    %c0_221 = arith.constant 0 : index
    %c0_222 = arith.constant 0 : index
    %303 = vector.load %arg8[%c1_219, %c1_220, %c0_221, %c0_222] : memref<4x3x32x32xbf16, #tpu.memory_space<vmem>>, vector<1x1x32x32xbf16>
    %304 = vector.shape_cast %303 : vector<1x1x32x32xbf16> to vector<32x32xbf16>
    %cst_223 = arith.constant dense<0.000000e+00> : vector<48x32xf32>
    %305 = tpu.matmul %302, %304, %cst_223 {dimension_numbers = #tpu.dot_dimension_numbers<[1], [0], [0], [1], [0, 0, 1, 1], [], []>} : vector<48x32xbf16>, vector<32x32xbf16>, vector<48x32xf32> -> vector<48x32xf32>
    %c1_224 = arith.constant 1 : index
    %c1_225 = arith.constant 1 : index
    %c0_226 = arith.constant 0 : index
    %c0_227 = arith.constant 0 : index
    %306 = vector.load %arg9[%c1_224, %c1_225, %c0_226, %c0_227] : memref<4x3x1x32xf32, #tpu.memory_space<vmem>>, vector<1x1x1x32xf32>
    %307 = vector.shape_cast %306 : vector<1x1x1x32xf32> to vector<1x32xf32>
    %308 = vector.broadcast %307 : vector<1x32xf32> to vector<48x32xf32>
    %309 = arith.addf %305, %308 : vector<48x32xf32>
    %310 = arith.addf %266, %309 : vector<48x32xf32>
    %311 = arith.mulf %310, %2 : vector<48x32xf32>
    %c1_228 = arith.constant 1 : index
    %c1_229 = arith.constant 1 : index
    %c0_230 = arith.constant 0 : index
    %c0_231 = arith.constant 0 : index
    %312 = vector.load %arg10[%c1_228, %c1_229, %c0_230, %c0_231] : memref<4x4x32x32xbf16, #tpu.memory_space<vmem>>, vector<1x1x32x32xbf16>
    %313 = vector.shape_cast %312 : vector<1x1x32x32xbf16> to vector<32x32xbf16>
    %cst_232 = arith.constant dense<0.000000e+00> : vector<48x32xf32>
    %314 = tpu.matmul %302, %313, %cst_232 {dimension_numbers = #tpu.dot_dimension_numbers<[1], [0], [0], [1], [0, 0, 1, 1], [], []>} : vector<48x32xbf16>, vector<32x32xbf16>, vector<48x32xf32> -> vector<48x32xf32>
    %c1_233 = arith.constant 1 : index
    %c1_234 = arith.constant 1 : index
    %c0_235 = arith.constant 0 : index
    %c0_236 = arith.constant 0 : index
    %315 = vector.load %arg11[%c1_233, %c1_234, %c0_235, %c0_236] : memref<4x4x1x32xf32, #tpu.memory_space<vmem>>, vector<1x1x1x32xf32>
    %316 = vector.shape_cast %315 : vector<1x1x1x32xf32> to vector<1x32xf32>
    %317 = vector.broadcast %316 : vector<1x32xf32> to vector<48x32xf32>
    %318 = arith.addf %314, %317 : vector<48x32xf32>
    %319 = arith.addf %273, %318 : vector<48x32xf32>
    %cst_237 = arith.constant 0.000000e+00 : f32
    %320 = vector.broadcast %cst_237 : f32 to vector<1x32xf32>
    %321 = tpu.concatenate %320, %311, %320 in 0 : vector<1x32xf32>, vector<48x32xf32>, vector<1x32xf32> -> vector<50x32xf32>
    %322 = vector.extract_strided_slice %321 {offsets = [0, 0], sizes = [48, 32], strides = [1, 1]} : vector<50x32xf32> to vector<48x32xf32>
    %323 = vector.extract_strided_slice %321 {offsets = [1, 0], sizes = [48, 32], strides = [1, 1]} : vector<50x32xf32> to vector<48x32xf32>
    %324 = vector.extract_strided_slice %321 {offsets = [2, 0], sizes = [48, 32], strides = [1, 1]} : vector<50x32xf32> to vector<48x32xf32>
    %325 = tpu.concatenate %322, %323, %324 in 1 : vector<48x32xf32>, vector<48x32xf32>, vector<48x32xf32> -> vector<48x96xf32>
    %326 = arith.truncf %325 : vector<48x96xf32> to vector<48x96xbf16>
    %c1_238 = arith.constant 1 : index
    %c2_239 = arith.constant 2 : index
    %c0_240 = arith.constant 0 : index
    %c0_241 = arith.constant 0 : index
    %327 = vector.load %arg4[%c1_238, %c2_239, %c0_240, %c0_241] : memref<4x4x96x32xbf16, #tpu.memory_space<vmem>>, vector<1x1x96x32xbf16>
    %328 = vector.shape_cast %327 : vector<1x1x96x32xbf16> to vector<96x32xbf16>
    %cst_242 = arith.constant dense<0.000000e+00> : vector<48x32xf32>
    %329 = tpu.matmul %326, %328, %cst_242 {dimension_numbers = #tpu.dot_dimension_numbers<[1], [0], [0], [1], [0, 0, 1, 1], [], []>} : vector<48x96xbf16>, vector<96x32xbf16>, vector<48x32xf32> -> vector<48x32xf32>
    %c1_243 = arith.constant 1 : index
    %c2_244 = arith.constant 2 : index
    %c0_245 = arith.constant 0 : index
    %c0_246 = arith.constant 0 : index
    %330 = vector.load %arg5[%c1_243, %c2_244, %c0_245, %c0_246] : memref<4x4x1x32xf32, #tpu.memory_space<vmem>>, vector<1x1x1x32xf32>
    %331 = vector.shape_cast %330 : vector<1x1x1x32xf32> to vector<1x32xf32>
    %332 = vector.broadcast %331 : vector<1x32xf32> to vector<48x32xf32>
    %333 = arith.addf %329, %332 : vector<48x32xf32>
    %c1_247 = arith.constant 1 : index
    %c2_248 = arith.constant 2 : index
    %c0_249 = arith.constant 0 : index
    %c0_250 = arith.constant 0 : index
    %334 = vector.load %arg6[%c1_247, %c2_248, %c0_249, %c0_250] : memref<4x4x96x32xbf16, #tpu.memory_space<vmem>>, vector<1x1x96x32xbf16>
    %335 = vector.shape_cast %334 : vector<1x1x96x32xbf16> to vector<96x32xbf16>
    %cst_251 = arith.constant dense<0.000000e+00> : vector<48x32xf32>
    %336 = tpu.matmul %326, %335, %cst_251 {dimension_numbers = #tpu.dot_dimension_numbers<[1], [0], [0], [1], [0, 0, 1, 1], [], []>} : vector<48x96xbf16>, vector<96x32xbf16>, vector<48x32xf32> -> vector<48x32xf32>
    %c1_252 = arith.constant 1 : index
    %c2_253 = arith.constant 2 : index
    %c0_254 = arith.constant 0 : index
    %c0_255 = arith.constant 0 : index
    %337 = vector.load %arg7[%c1_252, %c2_253, %c0_254, %c0_255] : memref<4x4x1x32xf32, #tpu.memory_space<vmem>>, vector<1x1x1x32xf32>
    %338 = vector.shape_cast %337 : vector<1x1x1x32xf32> to vector<1x32xf32>
    %339 = vector.broadcast %338 : vector<1x32xf32> to vector<48x32xf32>
    %340 = arith.addf %336, %339 : vector<48x32xf32>
    %341 = math.tanh %333 : vector<48x32xf32>
    %342 = arith.negf %340 : vector<48x32xf32>
    %343 = math.exp %342 : vector<48x32xf32>
    %cst_256 = arith.constant 1.000000e+00 : f32
    %344 = vector.broadcast %cst_256 : f32 to vector<48x32xf32>
    %345 = arith.addf %344, %343 : vector<48x32xf32>
    %346 = arith.divf %344, %345 : vector<48x32xf32>
    %347 = arith.mulf %341, %346 : vector<48x32xf32>
    %348 = arith.truncf %347 : vector<48x32xf32> to vector<48x32xbf16>
    %c1_257 = arith.constant 1 : index
    %c2_258 = arith.constant 2 : index
    %c0_259 = arith.constant 0 : index
    %c0_260 = arith.constant 0 : index
    %349 = vector.load %arg8[%c1_257, %c2_258, %c0_259, %c0_260] : memref<4x3x32x32xbf16, #tpu.memory_space<vmem>>, vector<1x1x32x32xbf16>
    %350 = vector.shape_cast %349 : vector<1x1x32x32xbf16> to vector<32x32xbf16>
    %cst_261 = arith.constant dense<0.000000e+00> : vector<48x32xf32>
    %351 = tpu.matmul %348, %350, %cst_261 {dimension_numbers = #tpu.dot_dimension_numbers<[1], [0], [0], [1], [0, 0, 1, 1], [], []>} : vector<48x32xbf16>, vector<32x32xbf16>, vector<48x32xf32> -> vector<48x32xf32>
    %c1_262 = arith.constant 1 : index
    %c2_263 = arith.constant 2 : index
    %c0_264 = arith.constant 0 : index
    %c0_265 = arith.constant 0 : index
    %352 = vector.load %arg9[%c1_262, %c2_263, %c0_264, %c0_265] : memref<4x3x1x32xf32, #tpu.memory_space<vmem>>, vector<1x1x1x32xf32>
    %353 = vector.shape_cast %352 : vector<1x1x1x32xf32> to vector<1x32xf32>
    %354 = vector.broadcast %353 : vector<1x32xf32> to vector<48x32xf32>
    %355 = arith.addf %351, %354 : vector<48x32xf32>
    %356 = arith.addf %311, %355 : vector<48x32xf32>
    %357 = arith.mulf %356, %2 : vector<48x32xf32>
    %c1_266 = arith.constant 1 : index
    %c2_267 = arith.constant 2 : index
    %c0_268 = arith.constant 0 : index
    %c0_269 = arith.constant 0 : index
    %358 = vector.load %arg10[%c1_266, %c2_267, %c0_268, %c0_269] : memref<4x4x32x32xbf16, #tpu.memory_space<vmem>>, vector<1x1x32x32xbf16>
    %359 = vector.shape_cast %358 : vector<1x1x32x32xbf16> to vector<32x32xbf16>
    %cst_270 = arith.constant dense<0.000000e+00> : vector<48x32xf32>
    %360 = tpu.matmul %348, %359, %cst_270 {dimension_numbers = #tpu.dot_dimension_numbers<[1], [0], [0], [1], [0, 0, 1, 1], [], []>} : vector<48x32xbf16>, vector<32x32xbf16>, vector<48x32xf32> -> vector<48x32xf32>
    %c1_271 = arith.constant 1 : index
    %c2_272 = arith.constant 2 : index
    %c0_273 = arith.constant 0 : index
    %c0_274 = arith.constant 0 : index
    %361 = vector.load %arg11[%c1_271, %c2_272, %c0_273, %c0_274] : memref<4x4x1x32xf32, #tpu.memory_space<vmem>>, vector<1x1x1x32xf32>
    %362 = vector.shape_cast %361 : vector<1x1x1x32xf32> to vector<1x32xf32>
    %363 = vector.broadcast %362 : vector<1x32xf32> to vector<48x32xf32>
    %364 = arith.addf %360, %363 : vector<48x32xf32>
    %365 = arith.addf %319, %364 : vector<48x32xf32>
    %cst_275 = arith.constant 0.000000e+00 : f32
    %366 = vector.broadcast %cst_275 : f32 to vector<1x32xf32>
    %367 = tpu.concatenate %366, %357, %366 in 0 : vector<1x32xf32>, vector<48x32xf32>, vector<1x32xf32> -> vector<50x32xf32>
    %368 = vector.extract_strided_slice %367 {offsets = [0, 0], sizes = [48, 32], strides = [1, 1]} : vector<50x32xf32> to vector<48x32xf32>
    %369 = vector.extract_strided_slice %367 {offsets = [1, 0], sizes = [48, 32], strides = [1, 1]} : vector<50x32xf32> to vector<48x32xf32>
    %370 = vector.extract_strided_slice %367 {offsets = [2, 0], sizes = [48, 32], strides = [1, 1]} : vector<50x32xf32> to vector<48x32xf32>
    %371 = tpu.concatenate %368, %369, %370 in 1 : vector<48x32xf32>, vector<48x32xf32>, vector<48x32xf32> -> vector<48x96xf32>
    %372 = arith.truncf %371 : vector<48x96xf32> to vector<48x96xbf16>
    %c1_276 = arith.constant 1 : index
    %c3_277 = arith.constant 3 : index
    %c0_278 = arith.constant 0 : index
    %c0_279 = arith.constant 0 : index
    %373 = vector.load %arg4[%c1_276, %c3_277, %c0_278, %c0_279] : memref<4x4x96x32xbf16, #tpu.memory_space<vmem>>, vector<1x1x96x32xbf16>
    %374 = vector.shape_cast %373 : vector<1x1x96x32xbf16> to vector<96x32xbf16>
    %cst_280 = arith.constant dense<0.000000e+00> : vector<48x32xf32>
    %375 = tpu.matmul %372, %374, %cst_280 {dimension_numbers = #tpu.dot_dimension_numbers<[1], [0], [0], [1], [0, 0, 1, 1], [], []>} : vector<48x96xbf16>, vector<96x32xbf16>, vector<48x32xf32> -> vector<48x32xf32>
    %c1_281 = arith.constant 1 : index
    %c3_282 = arith.constant 3 : index
    %c0_283 = arith.constant 0 : index
    %c0_284 = arith.constant 0 : index
    %376 = vector.load %arg5[%c1_281, %c3_282, %c0_283, %c0_284] : memref<4x4x1x32xf32, #tpu.memory_space<vmem>>, vector<1x1x1x32xf32>
    %377 = vector.shape_cast %376 : vector<1x1x1x32xf32> to vector<1x32xf32>
    %378 = vector.broadcast %377 : vector<1x32xf32> to vector<48x32xf32>
    %379 = arith.addf %375, %378 : vector<48x32xf32>
    %c1_285 = arith.constant 1 : index
    %c3_286 = arith.constant 3 : index
    %c0_287 = arith.constant 0 : index
    %c0_288 = arith.constant 0 : index
    %380 = vector.load %arg6[%c1_285, %c3_286, %c0_287, %c0_288] : memref<4x4x96x32xbf16, #tpu.memory_space<vmem>>, vector<1x1x96x32xbf16>
    %381 = vector.shape_cast %380 : vector<1x1x96x32xbf16> to vector<96x32xbf16>
    %cst_289 = arith.constant dense<0.000000e+00> : vector<48x32xf32>
    %382 = tpu.matmul %372, %381, %cst_289 {dimension_numbers = #tpu.dot_dimension_numbers<[1], [0], [0], [1], [0, 0, 1, 1], [], []>} : vector<48x96xbf16>, vector<96x32xbf16>, vector<48x32xf32> -> vector<48x32xf32>
    %c1_290 = arith.constant 1 : index
    %c3_291 = arith.constant 3 : index
    %c0_292 = arith.constant 0 : index
    %c0_293 = arith.constant 0 : index
    %383 = vector.load %arg7[%c1_290, %c3_291, %c0_292, %c0_293] : memref<4x4x1x32xf32, #tpu.memory_space<vmem>>, vector<1x1x1x32xf32>
    %384 = vector.shape_cast %383 : vector<1x1x1x32xf32> to vector<1x32xf32>
    %385 = vector.broadcast %384 : vector<1x32xf32> to vector<48x32xf32>
    %386 = arith.addf %382, %385 : vector<48x32xf32>
    %387 = math.tanh %379 : vector<48x32xf32>
    %388 = arith.negf %386 : vector<48x32xf32>
    %389 = math.exp %388 : vector<48x32xf32>
    %cst_294 = arith.constant 1.000000e+00 : f32
    %390 = vector.broadcast %cst_294 : f32 to vector<48x32xf32>
    %391 = arith.addf %390, %389 : vector<48x32xf32>
    %392 = arith.divf %390, %391 : vector<48x32xf32>
    %393 = arith.mulf %387, %392 : vector<48x32xf32>
    %394 = arith.truncf %393 : vector<48x32xf32> to vector<48x32xbf16>
    %c1_295 = arith.constant 1 : index
    %c3_296 = arith.constant 3 : index
    %c0_297 = arith.constant 0 : index
    %c0_298 = arith.constant 0 : index
    %395 = vector.load %arg10[%c1_295, %c3_296, %c0_297, %c0_298] : memref<4x4x32x32xbf16, #tpu.memory_space<vmem>>, vector<1x1x32x32xbf16>
    %396 = vector.shape_cast %395 : vector<1x1x32x32xbf16> to vector<32x32xbf16>
    %cst_299 = arith.constant dense<0.000000e+00> : vector<48x32xf32>
    %397 = tpu.matmul %394, %396, %cst_299 {dimension_numbers = #tpu.dot_dimension_numbers<[1], [0], [0], [1], [0, 0, 1, 1], [], []>} : vector<48x32xbf16>, vector<32x32xbf16>, vector<48x32xf32> -> vector<48x32xf32>
    %c1_300 = arith.constant 1 : index
    %c3_301 = arith.constant 3 : index
    %c0_302 = arith.constant 0 : index
    %c0_303 = arith.constant 0 : index
    %398 = vector.load %arg11[%c1_300, %c3_301, %c0_302, %c0_303] : memref<4x4x1x32xf32, #tpu.memory_space<vmem>>, vector<1x1x1x32xf32>
    %399 = vector.shape_cast %398 : vector<1x1x1x32xf32> to vector<1x32xf32>
    %400 = vector.broadcast %399 : vector<1x32xf32> to vector<48x32xf32>
    %401 = arith.addf %397, %400 : vector<48x32xf32>
    %402 = arith.addf %365, %401 : vector<48x32xf32>
    %403 = arith.mulf %402, %2 : vector<48x32xf32>
    %c1_304 = arith.constant 1 : index
    %c0_305 = arith.constant 0 : index
    %c0_306 = arith.constant 0 : index
    %404 = vector.load %arg12[%c1_304, %c0_305, %c0_306] : memref<4x32x2xf32, #tpu.memory_space<vmem>>, vector<1x32x2xf32>
    %405 = vector.shape_cast %404 : vector<1x32x2xf32> to vector<32x2xf32>
    %cst_307 = arith.constant dense<0.000000e+00> : vector<48x2xf32>
    %406 = tpu.matmul %403, %405, %cst_307 {dimension_numbers = #tpu.dot_dimension_numbers<[1], [0], [0], [1], [0, 0, 1, 1], [], []>} : vector<48x32xf32>, vector<32x2xf32>, vector<48x2xf32> -> vector<48x2xf32>
    %c1_308 = arith.constant 1 : index
    %c0_309 = arith.constant 0 : index
    %c0_310 = arith.constant 0 : index
    %407 = vector.load %arg13[%c1_308, %c0_309, %c0_310] : memref<4x1x2xf32, #tpu.memory_space<vmem>>, vector<1x1x2xf32>
    %408 = vector.shape_cast %407 : vector<1x1x2xf32> to vector<1x2xf32>
    %409 = vector.broadcast %408 : vector<1x2xf32> to vector<48x2xf32>
    %410 = arith.addf %406, %409 : vector<48x2xf32>
    %411 = arith.mulf %410, %4 : vector<48x2xf32>
    %412 = arith.mulf %6, %4 : vector<48x2xf32>
    %413 = arith.addf %411, %412 : vector<48x2xf32>
    %c2_311 = arith.constant 2 : index
    %c0_312 = arith.constant 0 : index
    %c0_313 = arith.constant 0 : index
    %414 = vector.load %arg2[%c2_311, %c0_312, %c0_313] : memref<4x2x32xf32, #tpu.memory_space<vmem>>, vector<1x2x32xf32>
    %415 = vector.shape_cast %414 : vector<1x2x32xf32> to vector<2x32xf32>
    %416 = vector.extract_strided_slice %413 {offsets = [0, 0], sizes = [48, 1], strides = [1, 1]} : vector<48x2xf32> to vector<48x1xf32>
    %417 = vector.extract_strided_slice %415 {offsets = [0, 0], sizes = [1, 32], strides = [1, 1]} : vector<2x32xf32> to vector<1x32xf32>
    %418 = vector.broadcast %416 : vector<48x1xf32> to vector<48x32xf32>
    %419 = vector.broadcast %417 : vector<1x32xf32> to vector<48x32xf32>
    %420 = arith.mulf %418, %419 : vector<48x32xf32>
    %421 = vector.extract_strided_slice %413 {offsets = [0, 1], sizes = [48, 1], strides = [1, 1]} : vector<48x2xf32> to vector<48x1xf32>
    %422 = vector.extract_strided_slice %415 {offsets = [1, 0], sizes = [1, 32], strides = [1, 1]} : vector<2x32xf32> to vector<1x32xf32>
    %423 = vector.broadcast %421 : vector<48x1xf32> to vector<48x32xf32>
    %424 = vector.broadcast %422 : vector<1x32xf32> to vector<48x32xf32>
    %425 = arith.mulf %423, %424 : vector<48x32xf32>
    %426 = arith.addf %420, %425 : vector<48x32xf32>
    %c2_314 = arith.constant 2 : index
    %c0_315 = arith.constant 0 : index
    %c0_316 = arith.constant 0 : index
    %427 = vector.load %arg3[%c2_314, %c0_315, %c0_316] : memref<4x1x32xf32, #tpu.memory_space<vmem>>, vector<1x1x32xf32>
    %428 = vector.shape_cast %427 : vector<1x1x32xf32> to vector<1x32xf32>
    %429 = vector.broadcast %428 : vector<1x32xf32> to vector<48x32xf32>
    %430 = arith.addf %426, %429 : vector<48x32xf32>
    %431 = arith.mulf %430, %2 : vector<48x32xf32>
    %cst_317 = arith.constant 0.000000e+00 : f32
    %432 = vector.broadcast %cst_317 : f32 to vector<1x32xf32>
    %433 = tpu.concatenate %432, %431, %432 in 0 : vector<1x32xf32>, vector<48x32xf32>, vector<1x32xf32> -> vector<50x32xf32>
    %434 = vector.extract_strided_slice %433 {offsets = [0, 0], sizes = [48, 32], strides = [1, 1]} : vector<50x32xf32> to vector<48x32xf32>
    %435 = vector.extract_strided_slice %433 {offsets = [1, 0], sizes = [48, 32], strides = [1, 1]} : vector<50x32xf32> to vector<48x32xf32>
    %436 = vector.extract_strided_slice %433 {offsets = [2, 0], sizes = [48, 32], strides = [1, 1]} : vector<50x32xf32> to vector<48x32xf32>
    %437 = tpu.concatenate %434, %435, %436 in 1 : vector<48x32xf32>, vector<48x32xf32>, vector<48x32xf32> -> vector<48x96xf32>
    %438 = arith.truncf %437 : vector<48x96xf32> to vector<48x96xbf16>
    %c2_318 = arith.constant 2 : index
    %c0_319 = arith.constant 0 : index
    %c0_320 = arith.constant 0 : index
    %c0_321 = arith.constant 0 : index
    %439 = vector.load %arg4[%c2_318, %c0_319, %c0_320, %c0_321] : memref<4x4x96x32xbf16, #tpu.memory_space<vmem>>, vector<1x1x96x32xbf16>
    %440 = vector.shape_cast %439 : vector<1x1x96x32xbf16> to vector<96x32xbf16>
    %cst_322 = arith.constant dense<0.000000e+00> : vector<48x32xf32>
    %441 = tpu.matmul %438, %440, %cst_322 {dimension_numbers = #tpu.dot_dimension_numbers<[1], [0], [0], [1], [0, 0, 1, 1], [], []>} : vector<48x96xbf16>, vector<96x32xbf16>, vector<48x32xf32> -> vector<48x32xf32>
    %c2_323 = arith.constant 2 : index
    %c0_324 = arith.constant 0 : index
    %c0_325 = arith.constant 0 : index
    %c0_326 = arith.constant 0 : index
    %442 = vector.load %arg5[%c2_323, %c0_324, %c0_325, %c0_326] : memref<4x4x1x32xf32, #tpu.memory_space<vmem>>, vector<1x1x1x32xf32>
    %443 = vector.shape_cast %442 : vector<1x1x1x32xf32> to vector<1x32xf32>
    %444 = vector.broadcast %443 : vector<1x32xf32> to vector<48x32xf32>
    %445 = arith.addf %441, %444 : vector<48x32xf32>
    %c2_327 = arith.constant 2 : index
    %c0_328 = arith.constant 0 : index
    %c0_329 = arith.constant 0 : index
    %c0_330 = arith.constant 0 : index
    %446 = vector.load %arg6[%c2_327, %c0_328, %c0_329, %c0_330] : memref<4x4x96x32xbf16, #tpu.memory_space<vmem>>, vector<1x1x96x32xbf16>
    %447 = vector.shape_cast %446 : vector<1x1x96x32xbf16> to vector<96x32xbf16>
    %cst_331 = arith.constant dense<0.000000e+00> : vector<48x32xf32>
    %448 = tpu.matmul %438, %447, %cst_331 {dimension_numbers = #tpu.dot_dimension_numbers<[1], [0], [0], [1], [0, 0, 1, 1], [], []>} : vector<48x96xbf16>, vector<96x32xbf16>, vector<48x32xf32> -> vector<48x32xf32>
    %c2_332 = arith.constant 2 : index
    %c0_333 = arith.constant 0 : index
    %c0_334 = arith.constant 0 : index
    %c0_335 = arith.constant 0 : index
    %449 = vector.load %arg7[%c2_332, %c0_333, %c0_334, %c0_335] : memref<4x4x1x32xf32, #tpu.memory_space<vmem>>, vector<1x1x1x32xf32>
    %450 = vector.shape_cast %449 : vector<1x1x1x32xf32> to vector<1x32xf32>
    %451 = vector.broadcast %450 : vector<1x32xf32> to vector<48x32xf32>
    %452 = arith.addf %448, %451 : vector<48x32xf32>
    %453 = math.tanh %445 : vector<48x32xf32>
    %454 = arith.negf %452 : vector<48x32xf32>
    %455 = math.exp %454 : vector<48x32xf32>
    %cst_336 = arith.constant 1.000000e+00 : f32
    %456 = vector.broadcast %cst_336 : f32 to vector<48x32xf32>
    %457 = arith.addf %456, %455 : vector<48x32xf32>
    %458 = arith.divf %456, %457 : vector<48x32xf32>
    %459 = arith.mulf %453, %458 : vector<48x32xf32>
    %460 = arith.truncf %459 : vector<48x32xf32> to vector<48x32xbf16>
    %c2_337 = arith.constant 2 : index
    %c0_338 = arith.constant 0 : index
    %c0_339 = arith.constant 0 : index
    %c0_340 = arith.constant 0 : index
    %461 = vector.load %arg8[%c2_337, %c0_338, %c0_339, %c0_340] : memref<4x3x32x32xbf16, #tpu.memory_space<vmem>>, vector<1x1x32x32xbf16>
    %462 = vector.shape_cast %461 : vector<1x1x32x32xbf16> to vector<32x32xbf16>
    %cst_341 = arith.constant dense<0.000000e+00> : vector<48x32xf32>
    %463 = tpu.matmul %460, %462, %cst_341 {dimension_numbers = #tpu.dot_dimension_numbers<[1], [0], [0], [1], [0, 0, 1, 1], [], []>} : vector<48x32xbf16>, vector<32x32xbf16>, vector<48x32xf32> -> vector<48x32xf32>
    %c2_342 = arith.constant 2 : index
    %c0_343 = arith.constant 0 : index
    %c0_344 = arith.constant 0 : index
    %c0_345 = arith.constant 0 : index
    %464 = vector.load %arg9[%c2_342, %c0_343, %c0_344, %c0_345] : memref<4x3x1x32xf32, #tpu.memory_space<vmem>>, vector<1x1x1x32xf32>
    %465 = vector.shape_cast %464 : vector<1x1x1x32xf32> to vector<1x32xf32>
    %466 = vector.broadcast %465 : vector<1x32xf32> to vector<48x32xf32>
    %467 = arith.addf %463, %466 : vector<48x32xf32>
    %468 = arith.addf %431, %467 : vector<48x32xf32>
    %469 = arith.mulf %468, %2 : vector<48x32xf32>
    %c2_346 = arith.constant 2 : index
    %c0_347 = arith.constant 0 : index
    %c0_348 = arith.constant 0 : index
    %c0_349 = arith.constant 0 : index
    %470 = vector.load %arg10[%c2_346, %c0_347, %c0_348, %c0_349] : memref<4x4x32x32xbf16, #tpu.memory_space<vmem>>, vector<1x1x32x32xbf16>
    %471 = vector.shape_cast %470 : vector<1x1x32x32xbf16> to vector<32x32xbf16>
    %cst_350 = arith.constant dense<0.000000e+00> : vector<48x32xf32>
    %472 = tpu.matmul %460, %471, %cst_350 {dimension_numbers = #tpu.dot_dimension_numbers<[1], [0], [0], [1], [0, 0, 1, 1], [], []>} : vector<48x32xbf16>, vector<32x32xbf16>, vector<48x32xf32> -> vector<48x32xf32>
    %c2_351 = arith.constant 2 : index
    %c0_352 = arith.constant 0 : index
    %c0_353 = arith.constant 0 : index
    %c0_354 = arith.constant 0 : index
    %473 = vector.load %arg11[%c2_351, %c0_352, %c0_353, %c0_354] : memref<4x4x1x32xf32, #tpu.memory_space<vmem>>, vector<1x1x1x32xf32>
    %474 = vector.shape_cast %473 : vector<1x1x1x32xf32> to vector<1x32xf32>
    %475 = vector.broadcast %474 : vector<1x32xf32> to vector<48x32xf32>
    %476 = arith.addf %472, %475 : vector<48x32xf32>
    %cst_355 = arith.constant 0.000000e+00 : f32
    %477 = vector.broadcast %cst_355 : f32 to vector<1x32xf32>
    %478 = tpu.concatenate %477, %469, %477 in 0 : vector<1x32xf32>, vector<48x32xf32>, vector<1x32xf32> -> vector<50x32xf32>
    %479 = vector.extract_strided_slice %478 {offsets = [0, 0], sizes = [48, 32], strides = [1, 1]} : vector<50x32xf32> to vector<48x32xf32>
    %480 = vector.extract_strided_slice %478 {offsets = [1, 0], sizes = [48, 32], strides = [1, 1]} : vector<50x32xf32> to vector<48x32xf32>
    %481 = vector.extract_strided_slice %478 {offsets = [2, 0], sizes = [48, 32], strides = [1, 1]} : vector<50x32xf32> to vector<48x32xf32>
    %482 = tpu.concatenate %479, %480, %481 in 1 : vector<48x32xf32>, vector<48x32xf32>, vector<48x32xf32> -> vector<48x96xf32>
    %483 = arith.truncf %482 : vector<48x96xf32> to vector<48x96xbf16>
    %c2_356 = arith.constant 2 : index
    %c1_357 = arith.constant 1 : index
    %c0_358 = arith.constant 0 : index
    %c0_359 = arith.constant 0 : index
    %484 = vector.load %arg4[%c2_356, %c1_357, %c0_358, %c0_359] : memref<4x4x96x32xbf16, #tpu.memory_space<vmem>>, vector<1x1x96x32xbf16>
    %485 = vector.shape_cast %484 : vector<1x1x96x32xbf16> to vector<96x32xbf16>
    %cst_360 = arith.constant dense<0.000000e+00> : vector<48x32xf32>
    %486 = tpu.matmul %483, %485, %cst_360 {dimension_numbers = #tpu.dot_dimension_numbers<[1], [0], [0], [1], [0, 0, 1, 1], [], []>} : vector<48x96xbf16>, vector<96x32xbf16>, vector<48x32xf32> -> vector<48x32xf32>
    %c2_361 = arith.constant 2 : index
    %c1_362 = arith.constant 1 : index
    %c0_363 = arith.constant 0 : index
    %c0_364 = arith.constant 0 : index
    %487 = vector.load %arg5[%c2_361, %c1_362, %c0_363, %c0_364] : memref<4x4x1x32xf32, #tpu.memory_space<vmem>>, vector<1x1x1x32xf32>
    %488 = vector.shape_cast %487 : vector<1x1x1x32xf32> to vector<1x32xf32>
    %489 = vector.broadcast %488 : vector<1x32xf32> to vector<48x32xf32>
    %490 = arith.addf %486, %489 : vector<48x32xf32>
    %c2_365 = arith.constant 2 : index
    %c1_366 = arith.constant 1 : index
    %c0_367 = arith.constant 0 : index
    %c0_368 = arith.constant 0 : index
    %491 = vector.load %arg6[%c2_365, %c1_366, %c0_367, %c0_368] : memref<4x4x96x32xbf16, #tpu.memory_space<vmem>>, vector<1x1x96x32xbf16>
    %492 = vector.shape_cast %491 : vector<1x1x96x32xbf16> to vector<96x32xbf16>
    %cst_369 = arith.constant dense<0.000000e+00> : vector<48x32xf32>
    %493 = tpu.matmul %483, %492, %cst_369 {dimension_numbers = #tpu.dot_dimension_numbers<[1], [0], [0], [1], [0, 0, 1, 1], [], []>} : vector<48x96xbf16>, vector<96x32xbf16>, vector<48x32xf32> -> vector<48x32xf32>
    %c2_370 = arith.constant 2 : index
    %c1_371 = arith.constant 1 : index
    %c0_372 = arith.constant 0 : index
    %c0_373 = arith.constant 0 : index
    %494 = vector.load %arg7[%c2_370, %c1_371, %c0_372, %c0_373] : memref<4x4x1x32xf32, #tpu.memory_space<vmem>>, vector<1x1x1x32xf32>
    %495 = vector.shape_cast %494 : vector<1x1x1x32xf32> to vector<1x32xf32>
    %496 = vector.broadcast %495 : vector<1x32xf32> to vector<48x32xf32>
    %497 = arith.addf %493, %496 : vector<48x32xf32>
    %498 = math.tanh %490 : vector<48x32xf32>
    %499 = arith.negf %497 : vector<48x32xf32>
    %500 = math.exp %499 : vector<48x32xf32>
    %cst_374 = arith.constant 1.000000e+00 : f32
    %501 = vector.broadcast %cst_374 : f32 to vector<48x32xf32>
    %502 = arith.addf %501, %500 : vector<48x32xf32>
    %503 = arith.divf %501, %502 : vector<48x32xf32>
    %504 = arith.mulf %498, %503 : vector<48x32xf32>
    %505 = arith.truncf %504 : vector<48x32xf32> to vector<48x32xbf16>
    %c2_375 = arith.constant 2 : index
    %c1_376 = arith.constant 1 : index
    %c0_377 = arith.constant 0 : index
    %c0_378 = arith.constant 0 : index
    %506 = vector.load %arg8[%c2_375, %c1_376, %c0_377, %c0_378] : memref<4x3x32x32xbf16, #tpu.memory_space<vmem>>, vector<1x1x32x32xbf16>
    %507 = vector.shape_cast %506 : vector<1x1x32x32xbf16> to vector<32x32xbf16>
    %cst_379 = arith.constant dense<0.000000e+00> : vector<48x32xf32>
    %508 = tpu.matmul %505, %507, %cst_379 {dimension_numbers = #tpu.dot_dimension_numbers<[1], [0], [0], [1], [0, 0, 1, 1], [], []>} : vector<48x32xbf16>, vector<32x32xbf16>, vector<48x32xf32> -> vector<48x32xf32>
    %c2_380 = arith.constant 2 : index
    %c1_381 = arith.constant 1 : index
    %c0_382 = arith.constant 0 : index
    %c0_383 = arith.constant 0 : index
    %509 = vector.load %arg9[%c2_380, %c1_381, %c0_382, %c0_383] : memref<4x3x1x32xf32, #tpu.memory_space<vmem>>, vector<1x1x1x32xf32>
    %510 = vector.shape_cast %509 : vector<1x1x1x32xf32> to vector<1x32xf32>
    %511 = vector.broadcast %510 : vector<1x32xf32> to vector<48x32xf32>
    %512 = arith.addf %508, %511 : vector<48x32xf32>
    %513 = arith.addf %469, %512 : vector<48x32xf32>
    %514 = arith.mulf %513, %2 : vector<48x32xf32>
    %c2_384 = arith.constant 2 : index
    %c1_385 = arith.constant 1 : index
    %c0_386 = arith.constant 0 : index
    %c0_387 = arith.constant 0 : index
    %515 = vector.load %arg10[%c2_384, %c1_385, %c0_386, %c0_387] : memref<4x4x32x32xbf16, #tpu.memory_space<vmem>>, vector<1x1x32x32xbf16>
    %516 = vector.shape_cast %515 : vector<1x1x32x32xbf16> to vector<32x32xbf16>
    %cst_388 = arith.constant dense<0.000000e+00> : vector<48x32xf32>
    %517 = tpu.matmul %505, %516, %cst_388 {dimension_numbers = #tpu.dot_dimension_numbers<[1], [0], [0], [1], [0, 0, 1, 1], [], []>} : vector<48x32xbf16>, vector<32x32xbf16>, vector<48x32xf32> -> vector<48x32xf32>
    %c2_389 = arith.constant 2 : index
    %c1_390 = arith.constant 1 : index
    %c0_391 = arith.constant 0 : index
    %c0_392 = arith.constant 0 : index
    %518 = vector.load %arg11[%c2_389, %c1_390, %c0_391, %c0_392] : memref<4x4x1x32xf32, #tpu.memory_space<vmem>>, vector<1x1x1x32xf32>
    %519 = vector.shape_cast %518 : vector<1x1x1x32xf32> to vector<1x32xf32>
    %520 = vector.broadcast %519 : vector<1x32xf32> to vector<48x32xf32>
    %521 = arith.addf %517, %520 : vector<48x32xf32>
    %522 = arith.addf %476, %521 : vector<48x32xf32>
    %cst_393 = arith.constant 0.000000e+00 : f32
    %523 = vector.broadcast %cst_393 : f32 to vector<1x32xf32>
    %524 = tpu.concatenate %523, %514, %523 in 0 : vector<1x32xf32>, vector<48x32xf32>, vector<1x32xf32> -> vector<50x32xf32>
    %525 = vector.extract_strided_slice %524 {offsets = [0, 0], sizes = [48, 32], strides = [1, 1]} : vector<50x32xf32> to vector<48x32xf32>
    %526 = vector.extract_strided_slice %524 {offsets = [1, 0], sizes = [48, 32], strides = [1, 1]} : vector<50x32xf32> to vector<48x32xf32>
    %527 = vector.extract_strided_slice %524 {offsets = [2, 0], sizes = [48, 32], strides = [1, 1]} : vector<50x32xf32> to vector<48x32xf32>
    %528 = tpu.concatenate %525, %526, %527 in 1 : vector<48x32xf32>, vector<48x32xf32>, vector<48x32xf32> -> vector<48x96xf32>
    %529 = arith.truncf %528 : vector<48x96xf32> to vector<48x96xbf16>
    %c2_394 = arith.constant 2 : index
    %c2_395 = arith.constant 2 : index
    %c0_396 = arith.constant 0 : index
    %c0_397 = arith.constant 0 : index
    %530 = vector.load %arg4[%c2_394, %c2_395, %c0_396, %c0_397] : memref<4x4x96x32xbf16, #tpu.memory_space<vmem>>, vector<1x1x96x32xbf16>
    %531 = vector.shape_cast %530 : vector<1x1x96x32xbf16> to vector<96x32xbf16>
    %cst_398 = arith.constant dense<0.000000e+00> : vector<48x32xf32>
    %532 = tpu.matmul %529, %531, %cst_398 {dimension_numbers = #tpu.dot_dimension_numbers<[1], [0], [0], [1], [0, 0, 1, 1], [], []>} : vector<48x96xbf16>, vector<96x32xbf16>, vector<48x32xf32> -> vector<48x32xf32>
    %c2_399 = arith.constant 2 : index
    %c2_400 = arith.constant 2 : index
    %c0_401 = arith.constant 0 : index
    %c0_402 = arith.constant 0 : index
    %533 = vector.load %arg5[%c2_399, %c2_400, %c0_401, %c0_402] : memref<4x4x1x32xf32, #tpu.memory_space<vmem>>, vector<1x1x1x32xf32>
    %534 = vector.shape_cast %533 : vector<1x1x1x32xf32> to vector<1x32xf32>
    %535 = vector.broadcast %534 : vector<1x32xf32> to vector<48x32xf32>
    %536 = arith.addf %532, %535 : vector<48x32xf32>
    %c2_403 = arith.constant 2 : index
    %c2_404 = arith.constant 2 : index
    %c0_405 = arith.constant 0 : index
    %c0_406 = arith.constant 0 : index
    %537 = vector.load %arg6[%c2_403, %c2_404, %c0_405, %c0_406] : memref<4x4x96x32xbf16, #tpu.memory_space<vmem>>, vector<1x1x96x32xbf16>
    %538 = vector.shape_cast %537 : vector<1x1x96x32xbf16> to vector<96x32xbf16>
    %cst_407 = arith.constant dense<0.000000e+00> : vector<48x32xf32>
    %539 = tpu.matmul %529, %538, %cst_407 {dimension_numbers = #tpu.dot_dimension_numbers<[1], [0], [0], [1], [0, 0, 1, 1], [], []>} : vector<48x96xbf16>, vector<96x32xbf16>, vector<48x32xf32> -> vector<48x32xf32>
    %c2_408 = arith.constant 2 : index
    %c2_409 = arith.constant 2 : index
    %c0_410 = arith.constant 0 : index
    %c0_411 = arith.constant 0 : index
    %540 = vector.load %arg7[%c2_408, %c2_409, %c0_410, %c0_411] : memref<4x4x1x32xf32, #tpu.memory_space<vmem>>, vector<1x1x1x32xf32>
    %541 = vector.shape_cast %540 : vector<1x1x1x32xf32> to vector<1x32xf32>
    %542 = vector.broadcast %541 : vector<1x32xf32> to vector<48x32xf32>
    %543 = arith.addf %539, %542 : vector<48x32xf32>
    %544 = math.tanh %536 : vector<48x32xf32>
    %545 = arith.negf %543 : vector<48x32xf32>
    %546 = math.exp %545 : vector<48x32xf32>
    %cst_412 = arith.constant 1.000000e+00 : f32
    %547 = vector.broadcast %cst_412 : f32 to vector<48x32xf32>
    %548 = arith.addf %547, %546 : vector<48x32xf32>
    %549 = arith.divf %547, %548 : vector<48x32xf32>
    %550 = arith.mulf %544, %549 : vector<48x32xf32>
    %551 = arith.truncf %550 : vector<48x32xf32> to vector<48x32xbf16>
    %c2_413 = arith.constant 2 : index
    %c2_414 = arith.constant 2 : index
    %c0_415 = arith.constant 0 : index
    %c0_416 = arith.constant 0 : index
    %552 = vector.load %arg8[%c2_413, %c2_414, %c0_415, %c0_416] : memref<4x3x32x32xbf16, #tpu.memory_space<vmem>>, vector<1x1x32x32xbf16>
    %553 = vector.shape_cast %552 : vector<1x1x32x32xbf16> to vector<32x32xbf16>
    %cst_417 = arith.constant dense<0.000000e+00> : vector<48x32xf32>
    %554 = tpu.matmul %551, %553, %cst_417 {dimension_numbers = #tpu.dot_dimension_numbers<[1], [0], [0], [1], [0, 0, 1, 1], [], []>} : vector<48x32xbf16>, vector<32x32xbf16>, vector<48x32xf32> -> vector<48x32xf32>
    %c2_418 = arith.constant 2 : index
    %c2_419 = arith.constant 2 : index
    %c0_420 = arith.constant 0 : index
    %c0_421 = arith.constant 0 : index
    %555 = vector.load %arg9[%c2_418, %c2_419, %c0_420, %c0_421] : memref<4x3x1x32xf32, #tpu.memory_space<vmem>>, vector<1x1x1x32xf32>
    %556 = vector.shape_cast %555 : vector<1x1x1x32xf32> to vector<1x32xf32>
    %557 = vector.broadcast %556 : vector<1x32xf32> to vector<48x32xf32>
    %558 = arith.addf %554, %557 : vector<48x32xf32>
    %559 = arith.addf %514, %558 : vector<48x32xf32>
    %560 = arith.mulf %559, %2 : vector<48x32xf32>
    %c2_422 = arith.constant 2 : index
    %c2_423 = arith.constant 2 : index
    %c0_424 = arith.constant 0 : index
    %c0_425 = arith.constant 0 : index
    %561 = vector.load %arg10[%c2_422, %c2_423, %c0_424, %c0_425] : memref<4x4x32x32xbf16, #tpu.memory_space<vmem>>, vector<1x1x32x32xbf16>
    %562 = vector.shape_cast %561 : vector<1x1x32x32xbf16> to vector<32x32xbf16>
    %cst_426 = arith.constant dense<0.000000e+00> : vector<48x32xf32>
    %563 = tpu.matmul %551, %562, %cst_426 {dimension_numbers = #tpu.dot_dimension_numbers<[1], [0], [0], [1], [0, 0, 1, 1], [], []>} : vector<48x32xbf16>, vector<32x32xbf16>, vector<48x32xf32> -> vector<48x32xf32>
    %c2_427 = arith.constant 2 : index
    %c2_428 = arith.constant 2 : index
    %c0_429 = arith.constant 0 : index
    %c0_430 = arith.constant 0 : index
    %564 = vector.load %arg11[%c2_427, %c2_428, %c0_429, %c0_430] : memref<4x4x1x32xf32, #tpu.memory_space<vmem>>, vector<1x1x1x32xf32>
    %565 = vector.shape_cast %564 : vector<1x1x1x32xf32> to vector<1x32xf32>
    %566 = vector.broadcast %565 : vector<1x32xf32> to vector<48x32xf32>
    %567 = arith.addf %563, %566 : vector<48x32xf32>
    %568 = arith.addf %522, %567 : vector<48x32xf32>
    %cst_431 = arith.constant 0.000000e+00 : f32
    %569 = vector.broadcast %cst_431 : f32 to vector<1x32xf32>
    %570 = tpu.concatenate %569, %560, %569 in 0 : vector<1x32xf32>, vector<48x32xf32>, vector<1x32xf32> -> vector<50x32xf32>
    %571 = vector.extract_strided_slice %570 {offsets = [0, 0], sizes = [48, 32], strides = [1, 1]} : vector<50x32xf32> to vector<48x32xf32>
    %572 = vector.extract_strided_slice %570 {offsets = [1, 0], sizes = [48, 32], strides = [1, 1]} : vector<50x32xf32> to vector<48x32xf32>
    %573 = vector.extract_strided_slice %570 {offsets = [2, 0], sizes = [48, 32], strides = [1, 1]} : vector<50x32xf32> to vector<48x32xf32>
    %574 = tpu.concatenate %571, %572, %573 in 1 : vector<48x32xf32>, vector<48x32xf32>, vector<48x32xf32> -> vector<48x96xf32>
    %575 = arith.truncf %574 : vector<48x96xf32> to vector<48x96xbf16>
    %c2_432 = arith.constant 2 : index
    %c3_433 = arith.constant 3 : index
    %c0_434 = arith.constant 0 : index
    %c0_435 = arith.constant 0 : index
    %576 = vector.load %arg4[%c2_432, %c3_433, %c0_434, %c0_435] : memref<4x4x96x32xbf16, #tpu.memory_space<vmem>>, vector<1x1x96x32xbf16>
    %577 = vector.shape_cast %576 : vector<1x1x96x32xbf16> to vector<96x32xbf16>
    %cst_436 = arith.constant dense<0.000000e+00> : vector<48x32xf32>
    %578 = tpu.matmul %575, %577, %cst_436 {dimension_numbers = #tpu.dot_dimension_numbers<[1], [0], [0], [1], [0, 0, 1, 1], [], []>} : vector<48x96xbf16>, vector<96x32xbf16>, vector<48x32xf32> -> vector<48x32xf32>
    %c2_437 = arith.constant 2 : index
    %c3_438 = arith.constant 3 : index
    %c0_439 = arith.constant 0 : index
    %c0_440 = arith.constant 0 : index
    %579 = vector.load %arg5[%c2_437, %c3_438, %c0_439, %c0_440] : memref<4x4x1x32xf32, #tpu.memory_space<vmem>>, vector<1x1x1x32xf32>
    %580 = vector.shape_cast %579 : vector<1x1x1x32xf32> to vector<1x32xf32>
    %581 = vector.broadcast %580 : vector<1x32xf32> to vector<48x32xf32>
    %582 = arith.addf %578, %581 : vector<48x32xf32>
    %c2_441 = arith.constant 2 : index
    %c3_442 = arith.constant 3 : index
    %c0_443 = arith.constant 0 : index
    %c0_444 = arith.constant 0 : index
    %583 = vector.load %arg6[%c2_441, %c3_442, %c0_443, %c0_444] : memref<4x4x96x32xbf16, #tpu.memory_space<vmem>>, vector<1x1x96x32xbf16>
    %584 = vector.shape_cast %583 : vector<1x1x96x32xbf16> to vector<96x32xbf16>
    %cst_445 = arith.constant dense<0.000000e+00> : vector<48x32xf32>
    %585 = tpu.matmul %575, %584, %cst_445 {dimension_numbers = #tpu.dot_dimension_numbers<[1], [0], [0], [1], [0, 0, 1, 1], [], []>} : vector<48x96xbf16>, vector<96x32xbf16>, vector<48x32xf32> -> vector<48x32xf32>
    %c2_446 = arith.constant 2 : index
    %c3_447 = arith.constant 3 : index
    %c0_448 = arith.constant 0 : index
    %c0_449 = arith.constant 0 : index
    %586 = vector.load %arg7[%c2_446, %c3_447, %c0_448, %c0_449] : memref<4x4x1x32xf32, #tpu.memory_space<vmem>>, vector<1x1x1x32xf32>
    %587 = vector.shape_cast %586 : vector<1x1x1x32xf32> to vector<1x32xf32>
    %588 = vector.broadcast %587 : vector<1x32xf32> to vector<48x32xf32>
    %589 = arith.addf %585, %588 : vector<48x32xf32>
    %590 = math.tanh %582 : vector<48x32xf32>
    %591 = arith.negf %589 : vector<48x32xf32>
    %592 = math.exp %591 : vector<48x32xf32>
    %cst_450 = arith.constant 1.000000e+00 : f32
    %593 = vector.broadcast %cst_450 : f32 to vector<48x32xf32>
    %594 = arith.addf %593, %592 : vector<48x32xf32>
    %595 = arith.divf %593, %594 : vector<48x32xf32>
    %596 = arith.mulf %590, %595 : vector<48x32xf32>
    %597 = arith.truncf %596 : vector<48x32xf32> to vector<48x32xbf16>
    %c2_451 = arith.constant 2 : index
    %c3_452 = arith.constant 3 : index
    %c0_453 = arith.constant 0 : index
    %c0_454 = arith.constant 0 : index
    %598 = vector.load %arg10[%c2_451, %c3_452, %c0_453, %c0_454] : memref<4x4x32x32xbf16, #tpu.memory_space<vmem>>, vector<1x1x32x32xbf16>
    %599 = vector.shape_cast %598 : vector<1x1x32x32xbf16> to vector<32x32xbf16>
    %cst_455 = arith.constant dense<0.000000e+00> : vector<48x32xf32>
    %600 = tpu.matmul %597, %599, %cst_455 {dimension_numbers = #tpu.dot_dimension_numbers<[1], [0], [0], [1], [0, 0, 1, 1], [], []>} : vector<48x32xbf16>, vector<32x32xbf16>, vector<48x32xf32> -> vector<48x32xf32>
    %c2_456 = arith.constant 2 : index
    %c3_457 = arith.constant 3 : index
    %c0_458 = arith.constant 0 : index
    %c0_459 = arith.constant 0 : index
    %601 = vector.load %arg11[%c2_456, %c3_457, %c0_458, %c0_459] : memref<4x4x1x32xf32, #tpu.memory_space<vmem>>, vector<1x1x1x32xf32>
    %602 = vector.shape_cast %601 : vector<1x1x1x32xf32> to vector<1x32xf32>
    %603 = vector.broadcast %602 : vector<1x32xf32> to vector<48x32xf32>
    %604 = arith.addf %600, %603 : vector<48x32xf32>
    %605 = arith.addf %568, %604 : vector<48x32xf32>
    %606 = arith.mulf %605, %2 : vector<48x32xf32>
    %c2_460 = arith.constant 2 : index
    %c0_461 = arith.constant 0 : index
    %c0_462 = arith.constant 0 : index
    %607 = vector.load %arg12[%c2_460, %c0_461, %c0_462] : memref<4x32x2xf32, #tpu.memory_space<vmem>>, vector<1x32x2xf32>
    %608 = vector.shape_cast %607 : vector<1x32x2xf32> to vector<32x2xf32>
    %cst_463 = arith.constant dense<0.000000e+00> : vector<48x2xf32>
    %609 = tpu.matmul %606, %608, %cst_463 {dimension_numbers = #tpu.dot_dimension_numbers<[1], [0], [0], [1], [0, 0, 1, 1], [], []>} : vector<48x32xf32>, vector<32x2xf32>, vector<48x2xf32> -> vector<48x2xf32>
    %c2_464 = arith.constant 2 : index
    %c0_465 = arith.constant 0 : index
    %c0_466 = arith.constant 0 : index
    %610 = vector.load %arg13[%c2_464, %c0_465, %c0_466] : memref<4x1x2xf32, #tpu.memory_space<vmem>>, vector<1x1x2xf32>
    %611 = vector.shape_cast %610 : vector<1x1x2xf32> to vector<1x2xf32>
    %612 = vector.broadcast %611 : vector<1x2xf32> to vector<48x2xf32>
    %613 = arith.addf %609, %612 : vector<48x2xf32>
    %614 = arith.mulf %613, %4 : vector<48x2xf32>
    %615 = arith.mulf %210, %4 : vector<48x2xf32>
    %616 = arith.addf %614, %615 : vector<48x2xf32>
    %c3_467 = arith.constant 3 : index
    %c0_468 = arith.constant 0 : index
    %c0_469 = arith.constant 0 : index
    %617 = vector.load %arg2[%c3_467, %c0_468, %c0_469] : memref<4x2x32xf32, #tpu.memory_space<vmem>>, vector<1x2x32xf32>
    %618 = vector.shape_cast %617 : vector<1x2x32xf32> to vector<2x32xf32>
    %619 = vector.extract_strided_slice %616 {offsets = [0, 0], sizes = [48, 1], strides = [1, 1]} : vector<48x2xf32> to vector<48x1xf32>
    %620 = vector.extract_strided_slice %618 {offsets = [0, 0], sizes = [1, 32], strides = [1, 1]} : vector<2x32xf32> to vector<1x32xf32>
    %621 = vector.broadcast %619 : vector<48x1xf32> to vector<48x32xf32>
    %622 = vector.broadcast %620 : vector<1x32xf32> to vector<48x32xf32>
    %623 = arith.mulf %621, %622 : vector<48x32xf32>
    %624 = vector.extract_strided_slice %616 {offsets = [0, 1], sizes = [48, 1], strides = [1, 1]} : vector<48x2xf32> to vector<48x1xf32>
    %625 = vector.extract_strided_slice %618 {offsets = [1, 0], sizes = [1, 32], strides = [1, 1]} : vector<2x32xf32> to vector<1x32xf32>
    %626 = vector.broadcast %624 : vector<48x1xf32> to vector<48x32xf32>
    %627 = vector.broadcast %625 : vector<1x32xf32> to vector<48x32xf32>
    %628 = arith.mulf %626, %627 : vector<48x32xf32>
    %629 = arith.addf %623, %628 : vector<48x32xf32>
    %c3_470 = arith.constant 3 : index
    %c0_471 = arith.constant 0 : index
    %c0_472 = arith.constant 0 : index
    %630 = vector.load %arg3[%c3_470, %c0_471, %c0_472] : memref<4x1x32xf32, #tpu.memory_space<vmem>>, vector<1x1x32xf32>
    %631 = vector.shape_cast %630 : vector<1x1x32xf32> to vector<1x32xf32>
    %632 = vector.broadcast %631 : vector<1x32xf32> to vector<48x32xf32>
    %633 = arith.addf %629, %632 : vector<48x32xf32>
    %634 = arith.mulf %633, %2 : vector<48x32xf32>
    %cst_473 = arith.constant 0.000000e+00 : f32
    %635 = vector.broadcast %cst_473 : f32 to vector<1x32xf32>
    %636 = tpu.concatenate %635, %634, %635 in 0 : vector<1x32xf32>, vector<48x32xf32>, vector<1x32xf32> -> vector<50x32xf32>
    %637 = vector.extract_strided_slice %636 {offsets = [0, 0], sizes = [48, 32], strides = [1, 1]} : vector<50x32xf32> to vector<48x32xf32>
    %638 = vector.extract_strided_slice %636 {offsets = [1, 0], sizes = [48, 32], strides = [1, 1]} : vector<50x32xf32> to vector<48x32xf32>
    %639 = vector.extract_strided_slice %636 {offsets = [2, 0], sizes = [48, 32], strides = [1, 1]} : vector<50x32xf32> to vector<48x32xf32>
    %640 = tpu.concatenate %637, %638, %639 in 1 : vector<48x32xf32>, vector<48x32xf32>, vector<48x32xf32> -> vector<48x96xf32>
    %641 = arith.truncf %640 : vector<48x96xf32> to vector<48x96xbf16>
    %c3_474 = arith.constant 3 : index
    %c0_475 = arith.constant 0 : index
    %c0_476 = arith.constant 0 : index
    %c0_477 = arith.constant 0 : index
    %642 = vector.load %arg4[%c3_474, %c0_475, %c0_476, %c0_477] : memref<4x4x96x32xbf16, #tpu.memory_space<vmem>>, vector<1x1x96x32xbf16>
    %643 = vector.shape_cast %642 : vector<1x1x96x32xbf16> to vector<96x32xbf16>
    %cst_478 = arith.constant dense<0.000000e+00> : vector<48x32xf32>
    %644 = tpu.matmul %641, %643, %cst_478 {dimension_numbers = #tpu.dot_dimension_numbers<[1], [0], [0], [1], [0, 0, 1, 1], [], []>} : vector<48x96xbf16>, vector<96x32xbf16>, vector<48x32xf32> -> vector<48x32xf32>
    %c3_479 = arith.constant 3 : index
    %c0_480 = arith.constant 0 : index
    %c0_481 = arith.constant 0 : index
    %c0_482 = arith.constant 0 : index
    %645 = vector.load %arg5[%c3_479, %c0_480, %c0_481, %c0_482] : memref<4x4x1x32xf32, #tpu.memory_space<vmem>>, vector<1x1x1x32xf32>
    %646 = vector.shape_cast %645 : vector<1x1x1x32xf32> to vector<1x32xf32>
    %647 = vector.broadcast %646 : vector<1x32xf32> to vector<48x32xf32>
    %648 = arith.addf %644, %647 : vector<48x32xf32>
    %c3_483 = arith.constant 3 : index
    %c0_484 = arith.constant 0 : index
    %c0_485 = arith.constant 0 : index
    %c0_486 = arith.constant 0 : index
    %649 = vector.load %arg6[%c3_483, %c0_484, %c0_485, %c0_486] : memref<4x4x96x32xbf16, #tpu.memory_space<vmem>>, vector<1x1x96x32xbf16>
    %650 = vector.shape_cast %649 : vector<1x1x96x32xbf16> to vector<96x32xbf16>
    %cst_487 = arith.constant dense<0.000000e+00> : vector<48x32xf32>
    %651 = tpu.matmul %641, %650, %cst_487 {dimension_numbers = #tpu.dot_dimension_numbers<[1], [0], [0], [1], [0, 0, 1, 1], [], []>} : vector<48x96xbf16>, vector<96x32xbf16>, vector<48x32xf32> -> vector<48x32xf32>
    %c3_488 = arith.constant 3 : index
    %c0_489 = arith.constant 0 : index
    %c0_490 = arith.constant 0 : index
    %c0_491 = arith.constant 0 : index
    %652 = vector.load %arg7[%c3_488, %c0_489, %c0_490, %c0_491] : memref<4x4x1x32xf32, #tpu.memory_space<vmem>>, vector<1x1x1x32xf32>
    %653 = vector.shape_cast %652 : vector<1x1x1x32xf32> to vector<1x32xf32>
    %654 = vector.broadcast %653 : vector<1x32xf32> to vector<48x32xf32>
    %655 = arith.addf %651, %654 : vector<48x32xf32>
    %656 = math.tanh %648 : vector<48x32xf32>
    %657 = arith.negf %655 : vector<48x32xf32>
    %658 = math.exp %657 : vector<48x32xf32>
    %cst_492 = arith.constant 1.000000e+00 : f32
    %659 = vector.broadcast %cst_492 : f32 to vector<48x32xf32>
    %660 = arith.addf %659, %658 : vector<48x32xf32>
    %661 = arith.divf %659, %660 : vector<48x32xf32>
    %662 = arith.mulf %656, %661 : vector<48x32xf32>
    %663 = arith.truncf %662 : vector<48x32xf32> to vector<48x32xbf16>
    %c3_493 = arith.constant 3 : index
    %c0_494 = arith.constant 0 : index
    %c0_495 = arith.constant 0 : index
    %c0_496 = arith.constant 0 : index
    %664 = vector.load %arg8[%c3_493, %c0_494, %c0_495, %c0_496] : memref<4x3x32x32xbf16, #tpu.memory_space<vmem>>, vector<1x1x32x32xbf16>
    %665 = vector.shape_cast %664 : vector<1x1x32x32xbf16> to vector<32x32xbf16>
    %cst_497 = arith.constant dense<0.000000e+00> : vector<48x32xf32>
    %666 = tpu.matmul %663, %665, %cst_497 {dimension_numbers = #tpu.dot_dimension_numbers<[1], [0], [0], [1], [0, 0, 1, 1], [], []>} : vector<48x32xbf16>, vector<32x32xbf16>, vector<48x32xf32> -> vector<48x32xf32>
    %c3_498 = arith.constant 3 : index
    %c0_499 = arith.constant 0 : index
    %c0_500 = arith.constant 0 : index
    %c0_501 = arith.constant 0 : index
    %667 = vector.load %arg9[%c3_498, %c0_499, %c0_500, %c0_501] : memref<4x3x1x32xf32, #tpu.memory_space<vmem>>, vector<1x1x1x32xf32>
    %668 = vector.shape_cast %667 : vector<1x1x1x32xf32> to vector<1x32xf32>
    %669 = vector.broadcast %668 : vector<1x32xf32> to vector<48x32xf32>
    %670 = arith.addf %666, %669 : vector<48x32xf32>
    %671 = arith.addf %634, %670 : vector<48x32xf32>
    %672 = arith.mulf %671, %2 : vector<48x32xf32>
    %c3_502 = arith.constant 3 : index
    %c0_503 = arith.constant 0 : index
    %c0_504 = arith.constant 0 : index
    %c0_505 = arith.constant 0 : index
    %673 = vector.load %arg10[%c3_502, %c0_503, %c0_504, %c0_505] : memref<4x4x32x32xbf16, #tpu.memory_space<vmem>>, vector<1x1x32x32xbf16>
    %674 = vector.shape_cast %673 : vector<1x1x32x32xbf16> to vector<32x32xbf16>
    %cst_506 = arith.constant dense<0.000000e+00> : vector<48x32xf32>
    %675 = tpu.matmul %663, %674, %cst_506 {dimension_numbers = #tpu.dot_dimension_numbers<[1], [0], [0], [1], [0, 0, 1, 1], [], []>} : vector<48x32xbf16>, vector<32x32xbf16>, vector<48x32xf32> -> vector<48x32xf32>
    %c3_507 = arith.constant 3 : index
    %c0_508 = arith.constant 0 : index
    %c0_509 = arith.constant 0 : index
    %c0_510 = arith.constant 0 : index
    %676 = vector.load %arg11[%c3_507, %c0_508, %c0_509, %c0_510] : memref<4x4x1x32xf32, #tpu.memory_space<vmem>>, vector<1x1x1x32xf32>
    %677 = vector.shape_cast %676 : vector<1x1x1x32xf32> to vector<1x32xf32>
    %678 = vector.broadcast %677 : vector<1x32xf32> to vector<48x32xf32>
    %679 = arith.addf %675, %678 : vector<48x32xf32>
    %cst_511 = arith.constant 0.000000e+00 : f32
    %680 = vector.broadcast %cst_511 : f32 to vector<1x32xf32>
    %681 = tpu.concatenate %680, %672, %680 in 0 : vector<1x32xf32>, vector<48x32xf32>, vector<1x32xf32> -> vector<50x32xf32>
    %682 = vector.extract_strided_slice %681 {offsets = [0, 0], sizes = [48, 32], strides = [1, 1]} : vector<50x32xf32> to vector<48x32xf32>
    %683 = vector.extract_strided_slice %681 {offsets = [1, 0], sizes = [48, 32], strides = [1, 1]} : vector<50x32xf32> to vector<48x32xf32>
    %684 = vector.extract_strided_slice %681 {offsets = [2, 0], sizes = [48, 32], strides = [1, 1]} : vector<50x32xf32> to vector<48x32xf32>
    %685 = tpu.concatenate %682, %683, %684 in 1 : vector<48x32xf32>, vector<48x32xf32>, vector<48x32xf32> -> vector<48x96xf32>
    %686 = arith.truncf %685 : vector<48x96xf32> to vector<48x96xbf16>
    %c3_512 = arith.constant 3 : index
    %c1_513 = arith.constant 1 : index
    %c0_514 = arith.constant 0 : index
    %c0_515 = arith.constant 0 : index
    %687 = vector.load %arg4[%c3_512, %c1_513, %c0_514, %c0_515] : memref<4x4x96x32xbf16, #tpu.memory_space<vmem>>, vector<1x1x96x32xbf16>
    %688 = vector.shape_cast %687 : vector<1x1x96x32xbf16> to vector<96x32xbf16>
    %cst_516 = arith.constant dense<0.000000e+00> : vector<48x32xf32>
    %689 = tpu.matmul %686, %688, %cst_516 {dimension_numbers = #tpu.dot_dimension_numbers<[1], [0], [0], [1], [0, 0, 1, 1], [], []>} : vector<48x96xbf16>, vector<96x32xbf16>, vector<48x32xf32> -> vector<48x32xf32>
    %c3_517 = arith.constant 3 : index
    %c1_518 = arith.constant 1 : index
    %c0_519 = arith.constant 0 : index
    %c0_520 = arith.constant 0 : index
    %690 = vector.load %arg5[%c3_517, %c1_518, %c0_519, %c0_520] : memref<4x4x1x32xf32, #tpu.memory_space<vmem>>, vector<1x1x1x32xf32>
    %691 = vector.shape_cast %690 : vector<1x1x1x32xf32> to vector<1x32xf32>
    %692 = vector.broadcast %691 : vector<1x32xf32> to vector<48x32xf32>
    %693 = arith.addf %689, %692 : vector<48x32xf32>
    %c3_521 = arith.constant 3 : index
    %c1_522 = arith.constant 1 : index
    %c0_523 = arith.constant 0 : index
    %c0_524 = arith.constant 0 : index
    %694 = vector.load %arg6[%c3_521, %c1_522, %c0_523, %c0_524] : memref<4x4x96x32xbf16, #tpu.memory_space<vmem>>, vector<1x1x96x32xbf16>
    %695 = vector.shape_cast %694 : vector<1x1x96x32xbf16> to vector<96x32xbf16>
    %cst_525 = arith.constant dense<0.000000e+00> : vector<48x32xf32>
    %696 = tpu.matmul %686, %695, %cst_525 {dimension_numbers = #tpu.dot_dimension_numbers<[1], [0], [0], [1], [0, 0, 1, 1], [], []>} : vector<48x96xbf16>, vector<96x32xbf16>, vector<48x32xf32> -> vector<48x32xf32>
    %c3_526 = arith.constant 3 : index
    %c1_527 = arith.constant 1 : index
    %c0_528 = arith.constant 0 : index
    %c0_529 = arith.constant 0 : index
    %697 = vector.load %arg7[%c3_526, %c1_527, %c0_528, %c0_529] : memref<4x4x1x32xf32, #tpu.memory_space<vmem>>, vector<1x1x1x32xf32>
    %698 = vector.shape_cast %697 : vector<1x1x1x32xf32> to vector<1x32xf32>
    %699 = vector.broadcast %698 : vector<1x32xf32> to vector<48x32xf32>
    %700 = arith.addf %696, %699 : vector<48x32xf32>
    %701 = math.tanh %693 : vector<48x32xf32>
    %702 = arith.negf %700 : vector<48x32xf32>
    %703 = math.exp %702 : vector<48x32xf32>
    %cst_530 = arith.constant 1.000000e+00 : f32
    %704 = vector.broadcast %cst_530 : f32 to vector<48x32xf32>
    %705 = arith.addf %704, %703 : vector<48x32xf32>
    %706 = arith.divf %704, %705 : vector<48x32xf32>
    %707 = arith.mulf %701, %706 : vector<48x32xf32>
    %708 = arith.truncf %707 : vector<48x32xf32> to vector<48x32xbf16>
    %c3_531 = arith.constant 3 : index
    %c1_532 = arith.constant 1 : index
    %c0_533 = arith.constant 0 : index
    %c0_534 = arith.constant 0 : index
    %709 = vector.load %arg8[%c3_531, %c1_532, %c0_533, %c0_534] : memref<4x3x32x32xbf16, #tpu.memory_space<vmem>>, vector<1x1x32x32xbf16>
    %710 = vector.shape_cast %709 : vector<1x1x32x32xbf16> to vector<32x32xbf16>
    %cst_535 = arith.constant dense<0.000000e+00> : vector<48x32xf32>
    %711 = tpu.matmul %708, %710, %cst_535 {dimension_numbers = #tpu.dot_dimension_numbers<[1], [0], [0], [1], [0, 0, 1, 1], [], []>} : vector<48x32xbf16>, vector<32x32xbf16>, vector<48x32xf32> -> vector<48x32xf32>
    %c3_536 = arith.constant 3 : index
    %c1_537 = arith.constant 1 : index
    %c0_538 = arith.constant 0 : index
    %c0_539 = arith.constant 0 : index
    %712 = vector.load %arg9[%c3_536, %c1_537, %c0_538, %c0_539] : memref<4x3x1x32xf32, #tpu.memory_space<vmem>>, vector<1x1x1x32xf32>
    %713 = vector.shape_cast %712 : vector<1x1x1x32xf32> to vector<1x32xf32>
    %714 = vector.broadcast %713 : vector<1x32xf32> to vector<48x32xf32>
    %715 = arith.addf %711, %714 : vector<48x32xf32>
    %716 = arith.addf %672, %715 : vector<48x32xf32>
    %717 = arith.mulf %716, %2 : vector<48x32xf32>
    %c3_540 = arith.constant 3 : index
    %c1_541 = arith.constant 1 : index
    %c0_542 = arith.constant 0 : index
    %c0_543 = arith.constant 0 : index
    %718 = vector.load %arg10[%c3_540, %c1_541, %c0_542, %c0_543] : memref<4x4x32x32xbf16, #tpu.memory_space<vmem>>, vector<1x1x32x32xbf16>
    %719 = vector.shape_cast %718 : vector<1x1x32x32xbf16> to vector<32x32xbf16>
    %cst_544 = arith.constant dense<0.000000e+00> : vector<48x32xf32>
    %720 = tpu.matmul %708, %719, %cst_544 {dimension_numbers = #tpu.dot_dimension_numbers<[1], [0], [0], [1], [0, 0, 1, 1], [], []>} : vector<48x32xbf16>, vector<32x32xbf16>, vector<48x32xf32> -> vector<48x32xf32>
    %c3_545 = arith.constant 3 : index
    %c1_546 = arith.constant 1 : index
    %c0_547 = arith.constant 0 : index
    %c0_548 = arith.constant 0 : index
    %721 = vector.load %arg11[%c3_545, %c1_546, %c0_547, %c0_548] : memref<4x4x1x32xf32, #tpu.memory_space<vmem>>, vector<1x1x1x32xf32>
    %722 = vector.shape_cast %721 : vector<1x1x1x32xf32> to vector<1x32xf32>
    %723 = vector.broadcast %722 : vector<1x32xf32> to vector<48x32xf32>
    %724 = arith.addf %720, %723 : vector<48x32xf32>
    %725 = arith.addf %679, %724 : vector<48x32xf32>
    %cst_549 = arith.constant 0.000000e+00 : f32
    %726 = vector.broadcast %cst_549 : f32 to vector<1x32xf32>
    %727 = tpu.concatenate %726, %717, %726 in 0 : vector<1x32xf32>, vector<48x32xf32>, vector<1x32xf32> -> vector<50x32xf32>
    %728 = vector.extract_strided_slice %727 {offsets = [0, 0], sizes = [48, 32], strides = [1, 1]} : vector<50x32xf32> to vector<48x32xf32>
    %729 = vector.extract_strided_slice %727 {offsets = [1, 0], sizes = [48, 32], strides = [1, 1]} : vector<50x32xf32> to vector<48x32xf32>
    %730 = vector.extract_strided_slice %727 {offsets = [2, 0], sizes = [48, 32], strides = [1, 1]} : vector<50x32xf32> to vector<48x32xf32>
    %731 = tpu.concatenate %728, %729, %730 in 1 : vector<48x32xf32>, vector<48x32xf32>, vector<48x32xf32> -> vector<48x96xf32>
    %732 = arith.truncf %731 : vector<48x96xf32> to vector<48x96xbf16>
    %c3_550 = arith.constant 3 : index
    %c2_551 = arith.constant 2 : index
    %c0_552 = arith.constant 0 : index
    %c0_553 = arith.constant 0 : index
    %733 = vector.load %arg4[%c3_550, %c2_551, %c0_552, %c0_553] : memref<4x4x96x32xbf16, #tpu.memory_space<vmem>>, vector<1x1x96x32xbf16>
    %734 = vector.shape_cast %733 : vector<1x1x96x32xbf16> to vector<96x32xbf16>
    %cst_554 = arith.constant dense<0.000000e+00> : vector<48x32xf32>
    %735 = tpu.matmul %732, %734, %cst_554 {dimension_numbers = #tpu.dot_dimension_numbers<[1], [0], [0], [1], [0, 0, 1, 1], [], []>} : vector<48x96xbf16>, vector<96x32xbf16>, vector<48x32xf32> -> vector<48x32xf32>
    %c3_555 = arith.constant 3 : index
    %c2_556 = arith.constant 2 : index
    %c0_557 = arith.constant 0 : index
    %c0_558 = arith.constant 0 : index
    %736 = vector.load %arg5[%c3_555, %c2_556, %c0_557, %c0_558] : memref<4x4x1x32xf32, #tpu.memory_space<vmem>>, vector<1x1x1x32xf32>
    %737 = vector.shape_cast %736 : vector<1x1x1x32xf32> to vector<1x32xf32>
    %738 = vector.broadcast %737 : vector<1x32xf32> to vector<48x32xf32>
    %739 = arith.addf %735, %738 : vector<48x32xf32>
    %c3_559 = arith.constant 3 : index
    %c2_560 = arith.constant 2 : index
    %c0_561 = arith.constant 0 : index
    %c0_562 = arith.constant 0 : index
    %740 = vector.load %arg6[%c3_559, %c2_560, %c0_561, %c0_562] : memref<4x4x96x32xbf16, #tpu.memory_space<vmem>>, vector<1x1x96x32xbf16>
    %741 = vector.shape_cast %740 : vector<1x1x96x32xbf16> to vector<96x32xbf16>
    %cst_563 = arith.constant dense<0.000000e+00> : vector<48x32xf32>
    %742 = tpu.matmul %732, %741, %cst_563 {dimension_numbers = #tpu.dot_dimension_numbers<[1], [0], [0], [1], [0, 0, 1, 1], [], []>} : vector<48x96xbf16>, vector<96x32xbf16>, vector<48x32xf32> -> vector<48x32xf32>
    %c3_564 = arith.constant 3 : index
    %c2_565 = arith.constant 2 : index
    %c0_566 = arith.constant 0 : index
    %c0_567 = arith.constant 0 : index
    %743 = vector.load %arg7[%c3_564, %c2_565, %c0_566, %c0_567] : memref<4x4x1x32xf32, #tpu.memory_space<vmem>>, vector<1x1x1x32xf32>
    %744 = vector.shape_cast %743 : vector<1x1x1x32xf32> to vector<1x32xf32>
    %745 = vector.broadcast %744 : vector<1x32xf32> to vector<48x32xf32>
    %746 = arith.addf %742, %745 : vector<48x32xf32>
    %747 = math.tanh %739 : vector<48x32xf32>
    %748 = arith.negf %746 : vector<48x32xf32>
    %749 = math.exp %748 : vector<48x32xf32>
    %cst_568 = arith.constant 1.000000e+00 : f32
    %750 = vector.broadcast %cst_568 : f32 to vector<48x32xf32>
    %751 = arith.addf %750, %749 : vector<48x32xf32>
    %752 = arith.divf %750, %751 : vector<48x32xf32>
    %753 = arith.mulf %747, %752 : vector<48x32xf32>
    %754 = arith.truncf %753 : vector<48x32xf32> to vector<48x32xbf16>
    %c3_569 = arith.constant 3 : index
    %c2_570 = arith.constant 2 : index
    %c0_571 = arith.constant 0 : index
    %c0_572 = arith.constant 0 : index
    %755 = vector.load %arg8[%c3_569, %c2_570, %c0_571, %c0_572] : memref<4x3x32x32xbf16, #tpu.memory_space<vmem>>, vector<1x1x32x32xbf16>
    %756 = vector.shape_cast %755 : vector<1x1x32x32xbf16> to vector<32x32xbf16>
    %cst_573 = arith.constant dense<0.000000e+00> : vector<48x32xf32>
    %757 = tpu.matmul %754, %756, %cst_573 {dimension_numbers = #tpu.dot_dimension_numbers<[1], [0], [0], [1], [0, 0, 1, 1], [], []>} : vector<48x32xbf16>, vector<32x32xbf16>, vector<48x32xf32> -> vector<48x32xf32>
    %c3_574 = arith.constant 3 : index
    %c2_575 = arith.constant 2 : index
    %c0_576 = arith.constant 0 : index
    %c0_577 = arith.constant 0 : index
    %758 = vector.load %arg9[%c3_574, %c2_575, %c0_576, %c0_577] : memref<4x3x1x32xf32, #tpu.memory_space<vmem>>, vector<1x1x1x32xf32>
    %759 = vector.shape_cast %758 : vector<1x1x1x32xf32> to vector<1x32xf32>
    %760 = vector.broadcast %759 : vector<1x32xf32> to vector<48x32xf32>
    %761 = arith.addf %757, %760 : vector<48x32xf32>
    %762 = arith.addf %717, %761 : vector<48x32xf32>
    %763 = arith.mulf %762, %2 : vector<48x32xf32>
    %c3_578 = arith.constant 3 : index
    %c2_579 = arith.constant 2 : index
    %c0_580 = arith.constant 0 : index
    %c0_581 = arith.constant 0 : index
    %764 = vector.load %arg10[%c3_578, %c2_579, %c0_580, %c0_581] : memref<4x4x32x32xbf16, #tpu.memory_space<vmem>>, vector<1x1x32x32xbf16>
    %765 = vector.shape_cast %764 : vector<1x1x32x32xbf16> to vector<32x32xbf16>
    %cst_582 = arith.constant dense<0.000000e+00> : vector<48x32xf32>
    %766 = tpu.matmul %754, %765, %cst_582 {dimension_numbers = #tpu.dot_dimension_numbers<[1], [0], [0], [1], [0, 0, 1, 1], [], []>} : vector<48x32xbf16>, vector<32x32xbf16>, vector<48x32xf32> -> vector<48x32xf32>
    %c3_583 = arith.constant 3 : index
    %c2_584 = arith.constant 2 : index
    %c0_585 = arith.constant 0 : index
    %c0_586 = arith.constant 0 : index
    %767 = vector.load %arg11[%c3_583, %c2_584, %c0_585, %c0_586] : memref<4x4x1x32xf32, #tpu.memory_space<vmem>>, vector<1x1x1x32xf32>
    %768 = vector.shape_cast %767 : vector<1x1x1x32xf32> to vector<1x32xf32>
    %769 = vector.broadcast %768 : vector<1x32xf32> to vector<48x32xf32>
    %770 = arith.addf %766, %769 : vector<48x32xf32>
    %771 = arith.addf %725, %770 : vector<48x32xf32>
    %cst_587 = arith.constant 0.000000e+00 : f32
    %772 = vector.broadcast %cst_587 : f32 to vector<1x32xf32>
    %773 = tpu.concatenate %772, %763, %772 in 0 : vector<1x32xf32>, vector<48x32xf32>, vector<1x32xf32> -> vector<50x32xf32>
    %774 = vector.extract_strided_slice %773 {offsets = [0, 0], sizes = [48, 32], strides = [1, 1]} : vector<50x32xf32> to vector<48x32xf32>
    %775 = vector.extract_strided_slice %773 {offsets = [1, 0], sizes = [48, 32], strides = [1, 1]} : vector<50x32xf32> to vector<48x32xf32>
    %776 = vector.extract_strided_slice %773 {offsets = [2, 0], sizes = [48, 32], strides = [1, 1]} : vector<50x32xf32> to vector<48x32xf32>
    %777 = tpu.concatenate %774, %775, %776 in 1 : vector<48x32xf32>, vector<48x32xf32>, vector<48x32xf32> -> vector<48x96xf32>
    %778 = arith.truncf %777 : vector<48x96xf32> to vector<48x96xbf16>
    %c3_588 = arith.constant 3 : index
    %c3_589 = arith.constant 3 : index
    %c0_590 = arith.constant 0 : index
    %c0_591 = arith.constant 0 : index
    %779 = vector.load %arg4[%c3_588, %c3_589, %c0_590, %c0_591] : memref<4x4x96x32xbf16, #tpu.memory_space<vmem>>, vector<1x1x96x32xbf16>
    %780 = vector.shape_cast %779 : vector<1x1x96x32xbf16> to vector<96x32xbf16>
    %cst_592 = arith.constant dense<0.000000e+00> : vector<48x32xf32>
    %781 = tpu.matmul %778, %780, %cst_592 {dimension_numbers = #tpu.dot_dimension_numbers<[1], [0], [0], [1], [0, 0, 1, 1], [], []>} : vector<48x96xbf16>, vector<96x32xbf16>, vector<48x32xf32> -> vector<48x32xf32>
    %c3_593 = arith.constant 3 : index
    %c3_594 = arith.constant 3 : index
    %c0_595 = arith.constant 0 : index
    %c0_596 = arith.constant 0 : index
    %782 = vector.load %arg5[%c3_593, %c3_594, %c0_595, %c0_596] : memref<4x4x1x32xf32, #tpu.memory_space<vmem>>, vector<1x1x1x32xf32>
    %783 = vector.shape_cast %782 : vector<1x1x1x32xf32> to vector<1x32xf32>
    %784 = vector.broadcast %783 : vector<1x32xf32> to vector<48x32xf32>
    %785 = arith.addf %781, %784 : vector<48x32xf32>
    %c3_597 = arith.constant 3 : index
    %c3_598 = arith.constant 3 : index
    %c0_599 = arith.constant 0 : index
    %c0_600 = arith.constant 0 : index
    %786 = vector.load %arg6[%c3_597, %c3_598, %c0_599, %c0_600] : memref<4x4x96x32xbf16, #tpu.memory_space<vmem>>, vector<1x1x96x32xbf16>
    %787 = vector.shape_cast %786 : vector<1x1x96x32xbf16> to vector<96x32xbf16>
    %cst_601 = arith.constant dense<0.000000e+00> : vector<48x32xf32>
    %788 = tpu.matmul %778, %787, %cst_601 {dimension_numbers = #tpu.dot_dimension_numbers<[1], [0], [0], [1], [0, 0, 1, 1], [], []>} : vector<48x96xbf16>, vector<96x32xbf16>, vector<48x32xf32> -> vector<48x32xf32>
    %c3_602 = arith.constant 3 : index
    %c3_603 = arith.constant 3 : index
    %c0_604 = arith.constant 0 : index
    %c0_605 = arith.constant 0 : index
    %789 = vector.load %arg7[%c3_602, %c3_603, %c0_604, %c0_605] : memref<4x4x1x32xf32, #tpu.memory_space<vmem>>, vector<1x1x1x32xf32>
    %790 = vector.shape_cast %789 : vector<1x1x1x32xf32> to vector<1x32xf32>
    %791 = vector.broadcast %790 : vector<1x32xf32> to vector<48x32xf32>
    %792 = arith.addf %788, %791 : vector<48x32xf32>
    %793 = math.tanh %785 : vector<48x32xf32>
    %794 = arith.negf %792 : vector<48x32xf32>
    %795 = math.exp %794 : vector<48x32xf32>
    %cst_606 = arith.constant 1.000000e+00 : f32
    %796 = vector.broadcast %cst_606 : f32 to vector<48x32xf32>
    %797 = arith.addf %796, %795 : vector<48x32xf32>
    %798 = arith.divf %796, %797 : vector<48x32xf32>
    %799 = arith.mulf %793, %798 : vector<48x32xf32>
    %800 = arith.truncf %799 : vector<48x32xf32> to vector<48x32xbf16>
    %c3_607 = arith.constant 3 : index
    %c3_608 = arith.constant 3 : index
    %c0_609 = arith.constant 0 : index
    %c0_610 = arith.constant 0 : index
    %801 = vector.load %arg10[%c3_607, %c3_608, %c0_609, %c0_610] : memref<4x4x32x32xbf16, #tpu.memory_space<vmem>>, vector<1x1x32x32xbf16>
    %802 = vector.shape_cast %801 : vector<1x1x32x32xbf16> to vector<32x32xbf16>
    %cst_611 = arith.constant dense<0.000000e+00> : vector<48x32xf32>
    %803 = tpu.matmul %800, %802, %cst_611 {dimension_numbers = #tpu.dot_dimension_numbers<[1], [0], [0], [1], [0, 0, 1, 1], [], []>} : vector<48x32xbf16>, vector<32x32xbf16>, vector<48x32xf32> -> vector<48x32xf32>
    %c3_612 = arith.constant 3 : index
    %c3_613 = arith.constant 3 : index
    %c0_614 = arith.constant 0 : index
    %c0_615 = arith.constant 0 : index
    %804 = vector.load %arg11[%c3_612, %c3_613, %c0_614, %c0_615] : memref<4x4x1x32xf32, #tpu.memory_space<vmem>>, vector<1x1x1x32xf32>
    %805 = vector.shape_cast %804 : vector<1x1x1x32xf32> to vector<1x32xf32>
    %806 = vector.broadcast %805 : vector<1x32xf32> to vector<48x32xf32>
    %807 = arith.addf %803, %806 : vector<48x32xf32>
    %808 = arith.addf %771, %807 : vector<48x32xf32>
    %809 = arith.mulf %808, %2 : vector<48x32xf32>
    %c3_616 = arith.constant 3 : index
    %c0_617 = arith.constant 0 : index
    %c0_618 = arith.constant 0 : index
    %810 = vector.load %arg12[%c3_616, %c0_617, %c0_618] : memref<4x32x2xf32, #tpu.memory_space<vmem>>, vector<1x32x2xf32>
    %811 = vector.shape_cast %810 : vector<1x32x2xf32> to vector<32x2xf32>
    %cst_619 = arith.constant dense<0.000000e+00> : vector<48x2xf32>
    %812 = tpu.matmul %809, %811, %cst_619 {dimension_numbers = #tpu.dot_dimension_numbers<[1], [0], [0], [1], [0, 0, 1, 1], [], []>} : vector<48x32xf32>, vector<32x2xf32>, vector<48x2xf32> -> vector<48x2xf32>
    %c3_620 = arith.constant 3 : index
    %c0_621 = arith.constant 0 : index
    %c0_622 = arith.constant 0 : index
    %813 = vector.load %arg13[%c3_620, %c0_621, %c0_622] : memref<4x1x2xf32, #tpu.memory_space<vmem>>, vector<1x1x2xf32>
    %814 = vector.shape_cast %813 : vector<1x1x2xf32> to vector<1x2xf32>
    %815 = vector.broadcast %814 : vector<1x2xf32> to vector<48x2xf32>
    %816 = arith.addf %812, %815 : vector<48x2xf32>
    %817 = arith.mulf %816, %4 : vector<48x2xf32>
    %818 = arith.mulf %413, %4 : vector<48x2xf32>
    %819 = arith.addf %817, %818 : vector<48x2xf32>
    %820 = tpu.concatenate %819, %616 in 1 : vector<48x2xf32>, vector<48x2xf32> -> vector<48x4xf32>
    %c0_623 = arith.constant 0 : index
    %c0_624 = arith.constant 0 : index
    %821 = vector.load %arg14[%c0_623, %c0_624] : memref<48x4xf32, #tpu.memory_space<vmem>>, vector<48x4xf32>
    tpu.vector_store %arg14[%c0_623, %c0_624], %820 {strides = array<i32>} : memref<48x4xf32, #tpu.memory_space<vmem>>, vector<48x4xf32>,
    return
  }
}

</mosaic_0001>

<bundles_post_ra>
// kernel: tpu_custom_call.1
= control target key start
LH: loop header
LB: loop body
LE: loop exit
PB: predicated region body
PF: predicated region fallthrough
CT: control target
= control target key end

     0   :  { %v14618_v0 = vmov 1   ;;  %v14619_v1 = vmov 0   ;;  %v121_v14 = vlaneseq  ;;  %v14620_v15 = vmov 0.0   ;;  %s14622_s15 = smov 64   ;;  %s14623_s16 = smov 32   ;;  %s18135_s0 = inlined_call_operand.vmem [shape: f32[48,4], index: 0, kind: input, shape index: {}]   ;;  %s18136_s1 = inlined_call_operand.vmem [shape: f32[48,1], index: 1, kind: input, shape index: {}]   ;;  %s18137_s4 = inlined_call_operand.vmem [shape: bf16[4,4,96,32], index: 4, kind: input, shape index: {}]   ;;  %s18138_s6 = inlined_call_operand.vmem [shape: bf16[4,4,96,32], index: 6, kind: input, shape index: {}]   ;;  %s18139_s2 = inlined_call_operand.vmem [shape: f32[4,2,32], index: 2, kind: input, shape index: {}]   ;;  %s18140_s3 = inlined_call_operand.vmem [shape: f32[4,1,32], index: 3, kind: input, shape index: {}]   ;;  %s18141_s8 = inlined_call_operand.vmem [shape: bf16[4,3,32,32], index: 8, kind: input, shape index: {}]   ;;  %s18142_s10 = inlined_call_operand.vmem [shape: bf16[4,4,32,32], index: 10, kind: input, shape index: {}]   ;;  %s18143_s7 = inlined_call_operand.vmem [shape: f32[4,4,1,32], index: 7, kind: input, shape index: {}]   ;;  %s18144_s5 = inlined_call_operand.vmem [shape: f32[4,4,1,32], index: 5, kind: input, shape index: {}]   ;;  %s18145_s9 = inlined_call_operand.vmem [shape: f32[4,3,1,32], index: 9, kind: input, shape index: {}]   ;;  %s18146_s12 = inlined_call_operand.vmem [shape: f32[4,32,2], index: 12, kind: input, shape index: {}]   ;;  %s18147_s11 = inlined_call_operand.vmem [shape: f32[4,4,1,32], index: 11, kind: input, shape index: {}]   ;;  %s18148_s13 = inlined_call_operand.vmem [shape: f32[4,1,2], index: 13, kind: input, shape index: {}]   ;;  %s18149_s14 = inlined_call_operand.vmem [shape: f32[48,4], index: 14, kind: output, shape index: {}]  }
   0x1   :  { %13281 = vset.pattern.permute.xlu0 %v14618_v0  ;;  %13279 = vset.pattern.permute.xlu1 %v14619_v1  ;;  %v86_v2 = vld [vmem:[%s18135_s0 + $0x10] sm:$0xff]  ;;  %v85_v3 = vld [vmem:[%s18135_s0 + $0x8] sm:$0xff]  ;;  %v84_v4 = vld [vmem:[%s18135_s0] sm:$0xff]  ;;  %vm196_vm0 = vcmask 1040384   ;;  %vm251_vm1 = vcmask 1045504   ;;  %vm219_vm2 = vcmask 1046528  }
   0x2   :  { %103 = vperm.xlu1 %13279, %v86_v2   ;;  %136 = vperm.xlu0 %13281, %v85_v3   ;;  %v49_v5 = vld [vmem:[%s18136_s1 + $0x8] sm:$0xff]  ;;  %v48_v6 = vld [vmem:[%s18136_s1] sm:$0xff]  ;;  %v50_v8 = vld [vmem:[%s18136_s1 + $0x10] sm:$0xff]  ;;  %v122_v20 = vshrl.u32 %v121_v14, 7  ;;  %vm14621_vm3 = vmmov 0   ;;  %vm283_vm4 = vcmask 261120  }
   0x3   :  { %v88_v7 = vld [vmem:[%s18135_s0 + $0x20] sm:$0xff]  ;;  %v87_v9 = vld [vmem:[%s18135_s0 + $0x18] sm:$0xff]  ;;  %v89_v10 = vld [vmem:[%s18135_s0 + $0x28] sm:$0xff]  ;;  %11715 = vmatprep.subr.bf16.mxu0 %v14620_v15  ;;  %11739 = vmatprep.subr.bf16.mxu1 %v14620_v15  ;;  %vm290_vm5 = vcmask 523264   ;;  %vm355_vm6 = vcmask 785408   ;;  %s14624_s29 = smov 126  }
   0x4   :  { %v51_v11 = vld [vmem:[%s18136_s1 + $0x18] sm:$0xff]  ;;  %v52_v12 = vld [vmem:[%s18136_s1 + $0x20] sm:$0xff]  ;;  %v53_v13 = vld [vmem:[%s18136_s1 + $0x28] sm:$0xff]  ;;  %v14771_v23 = vsub.s32 0, %v122_v20  ;;  %v14777_v25 = vsub.s32 1, %v122_v20  ;;  %11727 = vmatprep.mubr.msk.bf16.mxu0 %vm14621_vm3, %v14620_v15  ;;  %11751 = vmatprep.mubr.msk.bf16.mxu1 %vm14621_vm3, %v14620_v15  ;;  %vm10072_vm7 = vcmask 15360  }
   0x5   :  { %v13788_v16 = vld [vmem:[%s18137_s4] sm:$0xff]   ;;  %v13790_v18 = vld [vmem:[%s18137_s4 + $0x8] sm:$0xff]   ;;  %v13792_v21 = vld [vmem:[%s18137_s4 + $0x10] sm:$0xff]   ;;  %vm10079_vm8 = vcmask 31744  }
   0x6   :  { %13280 = vset.pattern.permute.xlu1 %v14618_v0  ;;  %13282 = vset.pattern.permute.xlu0 %v14619_v1  ;;  %v13789_v17 = vld [vmem:[%s18138_s6] sm:$0xff]   ;;  %v13791_v19 = vld [vmem:[%s18138_s6 + $0x8] sm:$0xff]   ;;  %v13793_v22 = vld [vmem:[%s18138_s6 + $0x10] sm:$0xff]  }
   0x7   :  { %93 = vperm.xlu0 %13282, %v84_v4   ;;  %132 = vperm.xlu1 %13280, %v84_v4   ;;  %v13794_v24 = vld [vmem:[%s18137_s4 + $0x18] sm:$0xff]   ;;  %v13796_v27 = vld [vmem:[%s18137_s4 + $0x20] sm:$0xff]   ;;  %v13798_v59 = vld [vmem:[%s18137_s4 + $0x28] sm:$0xff]  }
   0x8   :  { %11716 = vmatpush3.bf16.msra.mxu0 %v13788_v16  ;;  %11740 = vmatpush3.bf16.msra.mxu1 %v13789_v17  ;;  %v13795_v26 = vld [vmem:[%s18138_s6 + $0x18] sm:$0xff]   ;;  %v13797_v28 = vld [vmem:[%s18138_s6 + $0x20] sm:$0xff]   ;;  %v13799_v60 = vld [vmem:[%s18138_s6 + $0x28] sm:$0xff]  }
   0x9   :  { %11717 = vmatprep.subr.bf16.mxu0 %v14620_v15  ;;  %11741 = vmatprep.subr.bf16.mxu1 %v14620_v15  ;;  %v90_v29 = vld [vmem:[%s18139_s2] sm:$0x3] }
   0xa   :  { %v14798_v32 = vrot.slane %v90_v29, %v14777_v25  ;;  %v14801_v33 = vrot.slane %v90_v29, %v14771_v23  ;;  %v14809_v39 = vld [vmem:[%s18140_s3] ss:$0 sm:$0xff] }
   0xb   :  { %98 = vperm.xlu0 %13282, %v85_v3   ;;  %140 = vperm.xlu1 %13280, %v86_v2  }
   0xc   :  { %11718 = vmatpush3.bf16.msra.mxu0 %v13790_v18  ;;  %11742 = vmatpush3.bf16.msra.mxu1 %v13791_v19 }
   0xd   :  { %11719 = vmatprep.subr.bf16.mxu0 %v14620_v15  ;;  %11743 = vmatprep.subr.bf16.mxu1 %v14620_v15 }
   0xf   :  { %61 = vperm.xlu0 %13282, %v49_v5   ;;  %13283 = vset.pattern.permute.xlu1 %v14619_v1 }
  0x10   :  { %56 = vperm.xlu1 %13283, %v48_v6   ;;  %11720 = vmatpush3.bf16.msra.mxu0 %v13792_v21 }
  0x11   :  { %11744 = vmatpush3.bf16.msra.mxu1 %v13793_v22  ;;  %11721 = vmatprep.subr.bf16.mxu0 %v14620_v15 }
  0x12   :  { %11745 = vmatprep.subr.bf16.mxu1 %v14620_v15 }
  0x13   :  { %113 = vperm.xlu0 %13282, %v88_v7  }
  0x14   :  { %66 = vperm.xlu1 %13283, %v50_v8   ;;  %11722 = vmatpush3.bf16.msra.mxu0 %v13794_v24 }
  0x15   :  { %11746 = vmatpush3.bf16.msra.mxu1 %v13795_v26  ;;  %11723 = vmatprep.subr.bf16.mxu0 %v14620_v15 }
  0x16   :  { %11747 = vmatprep.subr.bf16.mxu1 %v14620_v15 }
  0x17   :  { %13285 = vset.pattern.permute.xlu0 %v14618_v0 }
  0x18   :  { %148 = vperm.xlu0 %13285, %v88_v7   ;;  %108 = vperm.xlu1 %13283, %v87_v9  }
  0x19   :  { %11724 = vmatpush3.bf16.msra.mxu0 %v13796_v27  ;;  %11748 = vmatpush3.bf16.msra.mxu1 %v13797_v28 }
  0x1a   :  { %11725 = vmatprep.subr.bf16.mxu0 %v14620_v15  ;;  %11749 = vmatprep.subr.bf16.mxu1 %v14620_v15 }
  0x1c   :  { %13284 = vset.pattern.permute.xlu1 %v14618_v0  ;;  %13287 = vset.pattern.permute.xlu0 %v14619_v1 }
  0x1d   :  { %144 = vperm.xlu1 %13284, %v87_v9   ;;  %118 = vperm.xlu0 %13287, %v89_v10  }
  0x1e   :  { %11726 = vmatpush3.bf16.msra.mxu0 %v13798_v59  ;;  %11750 = vmatpush3.bf16.msra.mxu1 %v13799_v60 }
  0x1f   :  { %11763 = vmatprep.subr.bf16.mxu0 %v14620_v15  ;;  %11779 = vmatprep.subr.bf16.mxu1 %v14620_v15 }
  0x21   :  { %13286 = vset.pattern.permute.xlu1 %v14619_v1 }
  0x22   :  { %71 = vperm.xlu1 %13286, %v51_v11  }
  0x26   :  { %76 = vperm.xlu1 %13286, %v52_v12  }
  0x2a   :  { %13288 = vset.pattern.permute.xlu1 %v14618_v0 }
  0x2b   :  { %152 = vperm.xlu1 %13288, %v89_v10  }
  0x2f   :  { %13289 = vset.pattern.permute.xlu1 %v14619_v1 }
  0x30   :  { %81 = vperm.xlu1 %13289, %v53_v13  }
  0x81   :  { %v104_v30 = vpop.permute.xlu1 %103  ;;  %v137_v31 = vpop.permute.xlu0 %136 }
  0x82   :  { %v160_v38 = vmul.f32 %v14798_v32, %v137_v31  ;;  %v127_v45 = vmul.f32 %v14801_v33, %v104_v30 }
  0x86   :  { %v94_v34 = vpop.permute.xlu0 %93  ;;  %v133_v35 = vpop.permute.xlu1 %132 }
  0x87   :  { %v125_v36 = vmul.f32 %v14801_v33, %v94_v34  ;;  %v159_v37 = vmul.f32 %v14798_v32, %v133_v35 }
  0x89   :  { %v165_v40 = vadd.f32 %v159_v37, %v125_v36 }
  0x8a   :  { %v99_v41 = vpop.permute.xlu0 %98  ;;  %v141_v42 = vpop.permute.xlu1 %140 }
  0x8b   :  { %v126_v43 = vmul.f32 %v14801_v33, %v99_v41  ;;  %v161_v44 = vmul.f32 %v14798_v32, %v141_v42  ;;  %v178_v47 = vadd.f32 %v14809_v39, %v165_v40 }
  0x8d   :  { %v166_v46 = vadd.f32 %v160_v38, %v126_v43  ;;  %v167_v48 = vadd.f32 %v161_v44, %v127_v45 }
  0x8e   :  { %v14815_v49 = vpop.permute.xlu0 %61 }
  0x8f   :  { %v179_v50 = vadd.f32 %v14809_v39, %v166_v46  ;;  %v14818_v51 = vpop.permute.xlu1 %56  ;;  %v180_v54 = vadd.f32 %v14809_v39, %v167_v48 }
  0x90   :  { %v14821_v52 = vmul.f32 %v178_v47, %v14818_v51 }
  0x91   :  { %v14824_v53 = vmul.f32 %v179_v50, %v14815_v49 }
  0x92   :  { %v197_v55 = vrot.slane %v14821_v52, 7  ;;  %v114_v56 = vpop.permute.xlu0 %113 }
  0x93   :  { %v14828_v57 = vpop.permute.xlu1 %66  ;;  %v198_v58 = vrot.slane %v14824_v53, 7  ;;  %v129_v24 = vmul.f32 %v14801_v33, %v114_v56 }
  0x94   :  { %v14838_v61 = vmul.f32 %v180_v54, %v14828_v57  ;;  %v14841_v62 = vsel %vm196_vm0, 0.0, %v197_v55 }
  0x95   :  { %v14844_v63 = vsel %vm196_vm0, %v197_v55, %v198_v58  ;;  %v252_v2 = vrot.slane %v14841_v62, 2  ;;  %v220_v5 = vrot.slane %v14841_v62, 1 }
  0x96   :  { %v200_v3 = vrot.slane %v14838_v61, 7  ;;  %v253_v4 = vrot.slane %v14844_v63, 2  ;;  %v221_v6 = vrot.slane %v14844_v63, 1 }
  0x97   :  { %v109_v7 = vpop.permute.xlu1 %108  ;;  %v149_v9 = vpop.permute.xlu0 %148 }
  0x98   :  { %v14858_v8 = vsel %vm196_vm0, %v198_v58, %v200_v3  ;;  %v254_v12 = vsel %vm251_vm1, %v252_v2, %v253_v4  ;;  %v222_v14 = vsel %vm219_vm2, %v220_v5, %v221_v6  ;;  %v163_v17 = vmul.f32 %v14798_v32, %v149_v9 }
  0x99   :  { %v255_v10 = vrot.slane %v14858_v8, 2  ;;  %v223_v11 = vrot.slane %v14858_v8, 1  ;;  %v128_v21 = vmul.f32 %v14801_v33, %v109_v7 }
  0x9a   :  { %v169_v27 = vadd.f32 %v163_v17, %v129_v24 }
  0x9b   :  { %v256_v13 = vsel %vm251_vm1, %v253_v4, %v255_v10  ;;  %v224_v16 = vsel %vm219_vm2, %v221_v6, %v223_v11 }
  0x9c   :  { %v145_v18 = vpop.permute.xlu1 %144  ;;  %v13295_v19 = vpack.i.bf16 %v256_v13, %v254_v12  ;;  %v13290_v20 = vpack.i.bf16 %v224_v16, %v222_v14  ;;  %v182_v31 = vadd.f32 %v14809_v39, %v169_v27  ;;  %v119_v36 = vpop.permute.xlu0 %118 }
  0x9d   :  { %v162_v22 = vmul.f32 %v14798_v32, %v145_v18  ;;  %v130_v43 = vmul.f32 %v14801_v33, %v119_v36 }
  0x9e   :  { %13296 = vrot.lane.b32.xlu1 %v13295_v19, %s14622_s15  ;;  %13291 = vrot.lane.b32.xlu0 %v13290_v20, %s14623_s16 }
  0x9f   :  { %v168_v26 = vadd.f32 %v162_v22, %v128_v21 }
  0xa1   :  { %v181_v28 = vadd.f32 %v14809_v39, %v168_v26  ;;  %v14873_v29 = vpop.permute.xlu1 %71 }
  0xa3   :  { %v14876_v30 = vmul.f32 %v181_v28, %v14873_v29 }
  0xa5   :  { %v14879_v34 = vpop.permute.xlu1 %76  ;;  %v202_v35 = vrot.slane %v14876_v30, 7 }
  0xa6   :  { %v14883_v37 = vmul.f32 %v182_v31, %v14879_v34 }
  0xa7   :  { %v203_v38 = vsel %vm196_vm0, %v200_v3, %v202_v35 }
  0xa8   :  { %v204_v40 = vrot.slane %v14883_v37, 7  ;;  %v257_v41 = vrot.slane %v203_v38, 2  ;;  %v225_v42 = vrot.slane %v203_v38, 1 }
  0xaa   :  { %v153_v44 = vpop.permute.xlu1 %152  ;;  %v14889_v45 = vsel %vm196_vm0, %v202_v35, %v204_v40  ;;  %v258_v50 = vsel %vm251_vm1, %v255_v10, %v257_v41  ;;  %v226_v56 = vsel %vm219_vm2, %v223_v11, %v225_v42 }
  0xab   :  { %v164_v46 = vmul.f32 %v14798_v32, %v153_v44  ;;  %v259_v47 = vrot.slane %v14889_v45, 2  ;;  %v227_v48 = vrot.slane %v14889_v45, 1 }
  0xad   :  { %v170_v54 = vadd.f32 %v164_v46, %v130_v43  ;;  %v260_v55 = vsel %vm251_vm1, %v257_v41, %v259_v47  ;;  %v228_v58 = vsel %vm219_vm2, %v225_v42, %v227_v48 }
  0xae   :  { %v13305_v33 = vpack.i.bf16 %v260_v55, %v258_v50  ;;  %v13300_v59 = vpack.i.bf16 %v228_v58, %v226_v56 }
  0xaf   :  { %v183_v60 = vadd.f32 %v14809_v39, %v170_v54  ;;  %v14899_v2 = vpop.permute.xlu1 %81 }
  0xb0   :  { %13306 = vrot.lane.b32.xlu1 %v13305_v33, %s14622_s15  ;;  %13301 = vrot.lane.b32.xlu0 %v13300_v59, %s14623_s16 }
  0xb1   :  { %v14904_v32 = vmul.f32 %v183_v60, %v14899_v2 }
  0xb3   :  { %v206_v3 = vrot.slane %v14904_v32, 7 }
  0xb5   :  { %v207_v4 = vsel %vm196_vm0, %v204_v40, %v206_v3  ;;  %v216_v5 = vsel %vm196_vm0, %v206_v3, 0.0  ;;  %v13800_v3 = vld [vmem:[%s18141_s8] sm:$0xff]  }
  0xb6   :  { %v261_v6 = vrot.slane %v207_v4, 2  ;;  %v263_v7 = vrot.slane %v216_v5, 2  ;;  %v229_v9 = vrot.slane %v207_v4, 1  ;;  %v231_v10 = vrot.slane %v216_v5, 1  ;;  %v13803_v5 = vld [vmem:[%s18142_s10 + $0x8] sm:$0xff]  }
  0xb8   :  { %v262_v39 = vsel %vm251_vm1, %v259_v47, %v261_v6  ;;  %v264_v11 = vsel %vm251_vm1, %v261_v6, %v263_v7  ;;  %v230_v12 = vsel %vm219_vm2, %v227_v48, %v229_v9  ;;  %v232_v13 = vsel %vm219_vm2, %v229_v9, %v231_v10  ;;  %v10101_v6 = vld [vmem:[%s18143_s7] ss:$0 sm:$0xff] }
  0xb9   :  { %v13315_v14 = vpack.i.bf16 %v264_v11, %v262_v39  ;;  %v13310_v16 = vpack.i.bf16 %v232_v13, %v230_v12 }
  0xbb   :  { %13316 = vrot.lane.b32.xlu1 %v13315_v14, %s14622_s15  ;;  %13311 = vrot.lane.b32.xlu0 %v13310_v16, %s14623_s16 }
 0x110   :  { %v13292_v17 = vpop.permute.xlu0 %13291  ;;  %v13297_v18 = vpop.permute.xlu1 %13296 }
 0x111   :  { %v13294_v19 = vunpack.i.h.bf16 %v13292_v17  ;;  %v13293_v20 = vunpack.i.l.bf16 %v13292_v17  ;;  %v13299_v21 = vunpack.i.h.bf16 %v13297_v18  ;;  %v13298_v22 = vunpack.i.l.bf16 %v13297_v18 }
 0x113   :  { %v285_v24 = vsel %vm283_vm4, %v14844_v63, %v13294_v19  ;;  %v284_v26 = vsel %vm283_vm4, %v14841_v62, %v13293_v20  ;;  %v14971_v20 = vld [vmem:[%s18144_s5] ss:$0 sm:$0xff] }
 0x114   :  { %v292_v27 = vsel %vm290_vm5, %v285_v24, %v13299_v21  ;;  %v291_v28 = vsel %vm290_vm5, %v284_v26, %v13298_v22 }
 0x115   :  { %v297_v31 = vpack.c.bf16 %v292_v27, %v291_v28 }
 0x117   :  { %11728 = vmatmul.mubr.msk.bf16.vlgmr.msra.gmra.mrb[0].mxu0 %vm355_vm6, %v297_v31  ;;  %11752 = vmatmul.mubr.msk.bf16.vlgmr.msra.gmra.mrb[0].mxu1 %vm355_vm6, %v297_v31 }
 0x118   :  { %11731 = vmatprep.mubr.msk.bf16.mxu0 %vm14621_vm3, %v14620_v15  ;;  %11755 = vmatprep.mubr.msk.bf16.mxu1 %vm14621_vm3, %v14620_v15 }
 0x119   :  { %11764 = vmatpush3.bf16.msra.mxu0 %v13800_v3 }
 0x11a   :  { %11765 = vmatprep.subr.bf16.mxu0 %v14620_v15 }
 0x122   :  { %v13302_v63 = vpop.permute.xlu0 %13301  ;;  %v13307_v35 = vpop.permute.xlu1 %13306 }
 0x123   :  { %v13304_v36 = vunpack.i.h.bf16 %v13302_v63  ;;  %v13303_v62 = vunpack.i.l.bf16 %v13302_v63  ;;  %v13309_v40 = vunpack.i.h.bf16 %v13307_v35  ;;  %v13308_v41 = vunpack.i.l.bf16 %v13307_v35 }
 0x125   :  { %v287_v42 = vsel %vm283_vm4, %v203_v38, %v13304_v36  ;;  %v286_v43 = vsel %vm283_vm4, %v14858_v8, %v13303_v62 }
 0x126   :  { %v294_v44 = vsel %vm290_vm5, %v287_v42, %v13309_v40  ;;  %v293_v46 = vsel %vm290_vm5, %v286_v43, %v13308_v41 }
 0x127   :  { %v298_v47 = vpack.c.bf16 %v294_v44, %v293_v46 }
 0x129   :  { %11732 = vmatmul.mubr.msk.bf16.gmra.mrb[4].mxu0 %vm355_vm6, %v298_v47  ;;  %11756 = vmatmul.mubr.msk.bf16.gmra.mrb[4].mxu1 %vm355_vm6, %v298_v47 }
 0x12a   :  { %11735 = vmatprep.mubr.msk.bf16.mxu0 %vm14621_vm3, %v14620_v15  ;;  %11759 = vmatprep.mubr.msk.bf16.mxu1 %vm14621_vm3, %v14620_v15 }
 0x12d   :  { %v13312_v48 = vpop.permute.xlu0 %13311  ;;  %v13317_v38 = vpop.permute.xlu1 %13316 }
 0x12e   :  { %v13314_v50 = vunpack.i.h.bf16 %v13312_v48  ;;  %v13313_v54 = vunpack.i.l.bf16 %v13312_v48  ;;  %v13319_v8 = vunpack.i.h.bf16 %v13317_v38  ;;  %v13318_v55 = vunpack.i.l.bf16 %v13317_v38 }
 0x130   :  { %v289_v56 = vsel %vm283_vm4, %v207_v4, %v13314_v50  ;;  %v288_v58 = vsel %vm283_vm4, %v14889_v45, %v13313_v54  ;;  %v13801_v45 = vld [vmem:[%s18142_s10] sm:$0xff]   ;;  %v13802_v4 = vld [vmem:[%s18141_s8 + $0x8] sm:$0xff]  }
 0x131   :  { %v296_v33 = vsel %vm290_vm5, %v289_v56, %v13319_v8  ;;  %v295_v59 = vsel %vm290_vm5, %v288_v58, %v13318_v55  ;;  %11780 = vmatpush3.bf16.msra.mxu1 %v13801_v45  ;;  %11766 = vmatpush3.bf16.msra.mxu0 %v13802_v4 }
 0x132   :  { %v299_v60 = vpack.c.bf16 %v296_v33, %v295_v59  ;;  %11781 = vmatprep.subr.bf16.mxu1 %v14620_v15  ;;  %11795 = vmatprep.subr.bf16.mxu0 %v14620_v15 }
 0x134   :  { %11736 = vmatmul.mubr.msk.bf16.gmra.mrb[8].mxu0 %vm355_vm6, %v299_v60  ;;  %11760 = vmatmul.mubr.msk.bf16.gmra.mrb[8].mxu1 %vm355_vm6, %v299_v60 }
 0x135   :  { %11767 = vmatprep.mubr.msk.bf16.mxu0 %vm14621_vm3, %v14620_v15  ;;  %11783 = vmatprep.mubr.msk.bf16.mxu1 %vm14621_vm3, %v14620_v15 }
 0x136   :  { %11782 = vmatpush3.bf16.msra.mxu1 %v13803_v5 }
 0x137   :  { %11819 = vmatprep.subr.bf16.mxu1 %v14620_v15 }
 0x1ea   :  { %v399_v7 = vpop.f32.mrb[0].mxu0  ;;  %v511_v9 = vpop.f32.mrb[0].mxu1 }
 0x1eb   :  { %v512_v10 = vadd.f32 %v10101_v6, %v511_v9  ;;  %v11729_v39 = vpop.f32.mrb[1].mxu0  ;;  %v11753_v11 = vpop.f32.mrb[1].mxu1  ;;  %v400_v21 = vadd.f32 %v14971_v20, %v399_v7 }
 0x1ec   :  { %v402_v12 = vpop.f32.mrb[2].mxu0  ;;  %v514_v13 = vpop.f32.mrb[2].mxu1 }
 0x1ed   :  { %v10111_v14 = vmul.f32 -1.442695, %v512_v10  ;;  %v515_v16 = vadd.f32 %v10101_v6, %v514_v13  ;;  %v11730_v17 = vpop.f32.mrb[3].mxu0  ;;  %v11754_v18 = vpop.f32.mrb[3].mxu1  ;;  %v403_v24 = vadd.f32 %v14971_v20, %v402_v12 }
 0x1ef   :  { %14036 = vpow2.f32 %v10111_v14  ;;  %v10112_v19 = vmul.f32 -1.442695, %v515_v16 }
 0x1f1   :  { %14038 = vpow2.f32 %v10112_v19 }
 0x1f2   :  { %14040 = vtanh.f32 %v400_v21 }
 0x1f9   :  { %v14037_v22 = vpop.eup %14036 }
 0x1fa   :  { %v558_v26 = vadd.f32 1.0, %v14037_v22 }
 0x1fb   :  { %v14039_v27 = vpop.eup %14038 }
 0x1fc   :  { %14042 = vrcp.f32 %v558_v26  ;;  %v559_v28 = vadd.f32 1.0, %v14039_v27  ;;  %v407_v31 = vpop.f32.mrb[4].mxu0  ;;  %v519_v63 = vpop.f32.mrb[4].mxu1 }
 0x1fd   :  { %14044 = vtanh.f32 %v403_v24  ;;  %v520_v35 = vadd.f32 %v10101_v6, %v519_v63  ;;  %v11733_v36 = vpop.f32.mrb[5].mxu0  ;;  %v11757_v62 = vpop.f32.mrb[5].mxu1  ;;  %v408_v8 = vadd.f32 %v14971_v20, %v407_v31 }
 0x1fe   :  { %14046 = vrcp.f32 %v559_v28  ;;  %v410_v40 = vpop.f32.mrb[6].mxu0  ;;  %v522_v41 = vpop.f32.mrb[6].mxu1 }
 0x1ff   :  { %v10113_v42 = vmul.f32 -1.442695, %v520_v35  ;;  %v523_v43 = vadd.f32 %v10101_v6, %v522_v41  ;;  %v11734_v44 = vpop.f32.mrb[7].mxu0  ;;  %v11758_v46 = vpop.f32.mrb[7].mxu1  ;;  %v411_v45 = vadd.f32 %v14971_v20, %v410_v40 }
 0x200   :  { %v14041_v48 = vpop.eup %14040  ;;  %v13804_v46 = vld [vmem:[%s18137_s4 + $0x30] sm:$0xff]  }
 0x201   :  { %14048 = vpow2.f32 %v10113_v42  ;;  %v10114_v47 = vmul.f32 -1.442695, %v523_v43 }
 0x203   :  { %14050 = vpow2.f32 %v10114_v47  ;;  %v13805_v47 = vld [vmem:[%s18138_s6 + $0x30] sm:$0xff]  }
 0x204   :  { %14052 = vtanh.f32 %v408_v8  ;;  %v13810_v8 = vld [vmem:[%s18137_s4 + $0x48] sm:$0xff]  }
 0x206   :  { %v14043_v38 = vpop.eup %14042 }
 0x207   :  { %v14045_v50 = vpop.eup %14044  ;;  %v576_v54 = vmul.f32 %v14043_v38, %v14041_v48  ;;  %v415_v55 = vpop.f32.mrb[8].mxu0  ;;  %v13806_v48 = vld [vmem:[%s18137_s4 + $0x38] sm:$0xff]  }
 0x208   :  { %v527_v56 = vpop.f32.mrb[8].mxu1  ;;  %v14047_v58 = vpop.eup %14046  ;;  %v13807_v38 = vld [vmem:[%s18138_s6 + $0x38] sm:$0xff]  }
 0x209   :  { %v528_v33 = vadd.f32 %v10101_v6, %v527_v56  ;;  %v11737_v59 = vpop.f32.mrb[9].mxu0  ;;  %v11761_v60 = vpop.f32.mrb[9].mxu1  ;;  %v577_v3 = vmul.f32 %v14047_v58, %v14045_v50  ;;  %v13808_v50 = vld [vmem:[%s18137_s4 + $0x40] sm:$0xff]   ;;  %v13812_v56 = vld [vmem:[%s18137_s4 + $0x50] sm:$0xff]  }
 0x20a   :  { %v418_v4 = vpop.f32.mrb[10].mxu0  ;;  %v530_v5 = vpop.f32.mrb[10].mxu1  ;;  %v13813_v58 = vld [vmem:[%s18138_s6 + $0x50] sm:$0xff]  }
 0x20b   :  { %v10115_v7 = vmul.f32 -1.442695, %v528_v33  ;;  %v531_v9 = vadd.f32 %v10101_v6, %v530_v5  ;;  %v11738_v10 = vpop.f32.mrb[11].mxu0  ;;  %v11762_v39 = vpop.f32.mrb[11].mxu1  ;;  %v582_v12 = vpack.c.bf16 %v577_v3, %v576_v54  ;;  %v416_v6 = vadd.f32 %v14971_v20, %v415_v55  ;;  %v13809_v54 = vld [vmem:[%s18138_s6 + $0x40] sm:$0xff]   ;;  %v13811_v55 = vld [vmem:[%s18138_s6 + $0x48] sm:$0xff]  }
 0x20c   :  { %v14049_v11 = vpop.eup %14048  ;;  %v419_v24 = vadd.f32 %v14971_v20, %v418_v4 }
 0x20d   :  { %v560_v13 = vadd.f32 1.0, %v14049_v11  ;;  %14054 = vpow2.f32 %v10115_v7  ;;  %v10116_v14 = vmul.f32 -1.442695, %v531_v9  ;;  %v14051_v16 = vpop.eup %14050  ;;  %11768 = vmatmul.mubr.msk.bf16.vlgmr.msra.gmra.mrb[12].mxu0 %vm283_vm4, %v582_v12  ;;  %11784 = vmatmul.mubr.msk.bf16.vlgmr.msra.gmra.mrb[12].mxu1 %vm283_vm4, %v582_v12 }
 0x20e   :  { %14056 = vtanh.f32 %v411_v45  ;;  %v561_v17 = vadd.f32 1.0, %v14051_v16  ;;  %11771 = vmatprep.mubr.msk.bf16.mxu0 %vm14621_vm3, %v14620_v15  ;;  %11787 = vmatprep.mubr.msk.bf16.mxu1 %vm14621_vm3, %v14620_v15  ;;  %v14053_v18 = vpop.eup %14052  ;;  %v10117_v45 = vld [vmem:[%s18145_s9] ss:$0 sm:$0xff] }
 0x20f   :  { %14058 = vrcp.f32 %v560_v13  ;;  %11796 = vmatpush3.bf16.msra.mxu0 %v13804_v46  ;;  %11820 = vmatpush3.bf16.msra.mxu1 %v13805_v47 }
 0x210   :  { %14060 = vpow2.f32 %v10116_v14  ;;  %11797 = vmatprep.subr.bf16.mxu0 %v14620_v15  ;;  %11821 = vmatprep.subr.bf16.mxu1 %v14620_v15 }
 0x211   :  { %14062 = vrcp.f32 %v561_v17 }
 0x212   :  { %14064 = vtanh.f32 %v416_v6 }
 0x213   :  { %11798 = vmatpush3.bf16.msra.mxu0 %v13806_v48  ;;  %11822 = vmatpush3.bf16.msra.mxu1 %v13807_v38 }
 0x214   :  { %11799 = vmatprep.subr.bf16.mxu0 %v14620_v15  ;;  %11823 = vmatprep.subr.bf16.mxu1 %v14620_v15 }
 0x217   :  { %v14055_v19 = vpop.eup %14054  ;;  %11800 = vmatpush3.bf16.msra.mxu0 %v13808_v50  ;;  %11824 = vmatpush3.bf16.msra.mxu1 %v13809_v54 }
 0x218   :  { %v14057_v21 = vpop.eup %14056  ;;  %v562_v22 = vadd.f32 1.0, %v14055_v19  ;;  %11801 = vmatprep.subr.bf16.mxu0 %v14620_v15  ;;  %11825 = vmatprep.subr.bf16.mxu1 %v14620_v15 }
 0x219   :  { %v14059_v26 = vpop.eup %14058 }
 0x21a   :  { %v14061_v27 = vpop.eup %14060  ;;  %14066 = vrcp.f32 %v562_v22  ;;  %v578_v28 = vmul.f32 %v14059_v26, %v14053_v18  ;;  %v13814_v22 = vld [vmem:[%s18137_s4 + $0x58] sm:$0xff]  }
 0x21b   :  { %v14063_v31 = vpop.eup %14062  ;;  %v563_v63 = vadd.f32 1.0, %v14061_v27  ;;  %14068 = vtanh.f32 %v419_v24  ;;  %11802 = vmatpush3.bf16.msra.mxu0 %v13810_v8  ;;  %11826 = vmatpush3.bf16.msra.mxu1 %v13811_v55  ;;  %v13815_v24 = vld [vmem:[%s18138_s6 + $0x58] sm:$0xff]  }
 0x21c   :  { %v579_v35 = vmul.f32 %v14063_v31, %v14057_v21  ;;  %v14065_v20 = vpop.eup %14064  ;;  %11803 = vmatprep.subr.bf16.mxu0 %v14620_v15  ;;  %11827 = vmatprep.subr.bf16.mxu1 %v14620_v15 }
 0x21d   :  { %14070 = vrcp.f32 %v563_v63 }
 0x21e   :  { %v583_v36 = vpack.c.bf16 %v579_v35, %v578_v28 }
 0x21f   :  { %11804 = vmatpush3.bf16.msra.mxu0 %v13812_v56  ;;  %11828 = vmatpush3.bf16.msra.mxu1 %v13813_v58 }
 0x220   :  { %11772 = vmatmul.mubr.msk.bf16.gmra.mrb[16].mxu0 %vm283_vm4, %v583_v36  ;;  %11788 = vmatmul.mubr.msk.bf16.gmra.mrb[16].mxu1 %vm283_vm4, %v583_v36 }
 0x221   :  { %11775 = vmatprep.mubr.msk.bf16.mxu0 %vm14621_vm3, %v14620_v15  ;;  %11791 = vmatprep.mubr.msk.bf16.mxu1 %vm14621_vm3, %v14620_v15 }
 0x222   :  { %11805 = vmatprep.subr.bf16.mxu0 %v14620_v15  ;;  %11829 = vmatprep.subr.bf16.mxu1 %v14620_v15 }
 0x223   :  { %11806 = vmatpush3.bf16.msra.mxu0 %v13814_v22  ;;  %11830 = vmatpush3.bf16.msra.mxu1 %v13815_v24 }
 0x224   :  { %v14067_v62 = vpop.eup %14066  ;;  %11843 = vmatprep.subr.bf16.mxu0 %v14620_v15  ;;  %11859 = vmatprep.subr.bf16.mxu1 %v14620_v15 }
 0x225   :  { %v580_v40 = vmul.f32 %v14067_v62, %v14065_v20  ;;  %v14069_v41 = vpop.eup %14068 }
 0x227   :  { %v14071_v42 = vpop.eup %14070 }
 0x228   :  { %v581_v43 = vmul.f32 %v14071_v42, %v14069_v41 }
 0x22a   :  { %v584_v44 = vpack.c.bf16 %v581_v43, %v580_v40 }
 0x22c   :  { %11776 = vmatmul.mubr.msk.bf16.gmra.mrb[20].mxu0 %vm283_vm4, %v584_v44  ;;  %11792 = vmatmul.mubr.msk.bf16.gmra.mrb[20].mxu1 %vm283_vm4, %v584_v44 }
 0x22d   :  { %11807 = vmatprep.mubr.msk.bf16.mxu0 %vm14621_vm3, %v14620_v15  ;;  %11831 = vmatprep.mubr.msk.bf16.mxu1 %vm14621_vm3, %v14620_v15 }
 0x2e0   :  { %v651_v33 = vpop.f32.mrb[12].mxu0 }
 0x2e1   :  { %v11769_v59 = vpop.f32.mrb[13].mxu0  ;;  %v652_v5 = vadd.f32 %v10117_v45, %v651_v33 }
 0x2e2   :  { %v654_v60 = vpop.f32.mrb[14].mxu0 }
 0x2e3   :  { %v11770_v3 = vpop.f32.mrb[15].mxu0  ;;  %v655_v4 = vadd.f32 %v10117_v45, %v654_v60  ;;  %v674_v9 = vadd.f32 %v652_v5, %v14821_v52 }
 0x2e5   :  { %v675_v7 = vadd.f32 %v655_v4, %v14824_v53  ;;  %v15046_v39 = vmul.f32 %v674_v9, %v14818_v51 }
 0x2e7   :  { %v15043_v10 = vmul.f32 %v675_v7, %v14815_v49  ;;  %v772_v16 = vrot.slane %v15046_v39, 7 }
 0x2e9   :  { %v773_v11 = vrot.slane %v15043_v10, 7 }
 0x2eb   :  { %v15052_v52 = vsel %vm196_vm0, %v772_v16, %v773_v11 }
 0x2ec   :  { %v826_v27 = vrot.slane %v15052_v52, 2 }
 0x2f3   :  { %v659_v12 = vpop.f32.mrb[16].mxu0 }
 0x2f4   :  { %v660_v13 = vadd.f32 %v10117_v45, %v659_v12  ;;  %v11773_v14 = vpop.f32.mrb[17].mxu0 }
 0x2f5   :  { %v662_v17 = vpop.f32.mrb[18].mxu0 }
 0x2f6   :  { %v676_v6 = vadd.f32 %v660_v13, %v14838_v61  ;;  %v663_v18 = vadd.f32 %v10117_v45, %v662_v17  ;;  %v11774_v53 = vpop.f32.mrb[19].mxu0  ;;  %v15065_v61 = vsel %vm196_vm0, 0.0, %v772_v16 }
 0x2f7   :  { %v825_v63 = vrot.slane %v15065_v61, 2  ;;  %v794_v36 = vrot.slane %v15065_v61, 1 }
 0x2f8   :  { %v15055_v19 = vmul.f32 %v676_v6, %v14828_v57  ;;  %v677_v21 = vadd.f32 %v663_v18, %v14876_v30  ;;  %v795_v30 = vrot.slane %v15052_v52, 1 }
 0x2f9   :  { %v827_v62 = vsel %vm251_vm1, %v825_v63, %v826_v27 }
 0x2fa   :  { %v775_v26 = vrot.slane %v15055_v19, 7  ;;  %v15070_v28 = vmul.f32 %v677_v21, %v14873_v29  ;;  %v796_v43 = vsel %vm219_vm2, %v794_v36, %v795_v30 }
 0x2fc   :  { %v15076_v31 = vsel %vm196_vm0, %v773_v11, %v775_v26  ;;  %v777_v40 = vrot.slane %v15070_v28, 7 }
 0x2fd   :  { %v828_v35 = vrot.slane %v15076_v31, 2  ;;  %v797_v20 = vrot.slane %v15076_v31, 1 }
 0x2fe   :  { %v778_v56 = vsel %vm196_vm0, %v775_v26, %v777_v40 }
 0x2ff   :  { %v667_v41 = vpop.f32.mrb[20].mxu0  ;;  %v829_v42 = vsel %vm251_vm1, %v826_v27, %v828_v35  ;;  %v798_v44 = vsel %vm219_vm2, %v795_v30, %v797_v20  ;;  %v830_v3 = vrot.slane %v778_v56, 2 }
 0x300   :  { %v668_v46 = vadd.f32 %v10117_v45, %v667_v41  ;;  %v11777_v47 = vpop.f32.mrb[21].mxu0  ;;  %v13325_v48 = vpack.i.bf16 %v829_v42, %v827_v62  ;;  %v13320_v38 = vpack.i.bf16 %v798_v44, %v796_v43 }
 0x301   :  { %v670_v50 = vpop.f32.mrb[22].mxu0  ;;  %v831_v9 = vsel %vm251_vm1, %v828_v35, %v830_v3 }
 0x302   :  { %v678_v54 = vadd.f32 %v668_v46, %v14883_v37  ;;  %v671_v8 = vadd.f32 %v10117_v45, %v670_v50  ;;  %v11778_v55 = vpop.f32.mrb[23].mxu0  ;;  %13326 = vrot.lane.b32.xlu1 %v13325_v48, %s14622_s15  ;;  %13321 = vrot.lane.b32.xlu0 %v13320_v38, %s14623_s16  ;;  %v799_v37 = vrot.slane %v778_v56, 1 }
 0x304   :  { %v15092_v58 = vmul.f32 %v678_v54, %v14879_v34  ;;  %v679_v33 = vadd.f32 %v671_v8, %v14904_v32  ;;  %v800_v11 = vsel %vm219_vm2, %v797_v20, %v799_v37 }
 0x306   :  { %v779_v59 = vrot.slane %v15092_v58, 7  ;;  %v15097_v60 = vmul.f32 %v679_v33, %v14899_v2 }
 0x308   :  { %v781_v45 = vrot.slane %v15097_v60, 7  ;;  %v780_v4 = vsel %vm196_vm0, %v777_v40, %v779_v59 }
 0x309   :  { %v832_v5 = vrot.slane %v780_v4, 2  ;;  %v801_v7 = vrot.slane %v780_v4, 1 }
 0x30a   :  { %v782_v12 = vsel %vm196_vm0, %v779_v59, %v781_v45  ;;  %v791_v32 = vsel %vm196_vm0, %v781_v45, 0.0 }
 0x30b   :  { %v833_v13 = vsel %vm251_vm1, %v830_v3, %v832_v5  ;;  %v802_v14 = vsel %vm219_vm2, %v799_v37, %v801_v7  ;;  %v834_v16 = vrot.slane %v782_v12, 2  ;;  %v836_v17 = vrot.slane %v791_v32, 2 }
 0x30c   :  { %v13335_v6 = vpack.i.bf16 %v833_v13, %v831_v9  ;;  %v13330_v18 = vpack.i.bf16 %v802_v14, %v800_v11  ;;  %v803_v53 = vrot.slane %v782_v12, 1  ;;  %v805_v21 = vrot.slane %v791_v32, 1 }
 0x30d   :  { %v835_v22 = vsel %vm251_vm1, %v832_v5, %v834_v16  ;;  %v837_v24 = vsel %vm251_vm1, %v834_v16, %v836_v17  ;;  %v13817_v16 = vld [vmem:[%s18141_s8 + $0x18] sm:$0xff]  }
 0x30e   :  { %13336 = vrot.lane.b32.xlu1 %v13335_v6, %s14622_s15  ;;  %13331 = vrot.lane.b32.xlu0 %v13330_v18, %s14623_s16  ;;  %v804_v26 = vsel %vm219_vm2, %v801_v7, %v803_v53  ;;  %v806_v27 = vsel %vm219_vm2, %v803_v53, %v805_v21  ;;  %v13345_v30 = vpack.i.bf16 %v837_v24, %v835_v22  ;;  %v13819_v17 = vld [vmem:[%s18142_s10 + $0x18] sm:$0xff]   ;;  %v10165_v6 = vld [vmem:[%s18143_s7 + $0x1] ss:$0 sm:$0xff] }
 0x30f   :  { %v13340_v63 = vpack.i.bf16 %v806_v27, %v804_v26 }
 0x312   :  { %13346 = vrot.lane.b32.xlu1 %v13345_v30, %s14622_s15  ;;  %13341 = vrot.lane.b32.xlu0 %v13340_v63, %s14623_s16 }
 0x374   :  { %v13327_v35 = vpop.permute.xlu1 %13326  ;;  %v13322_v36 = vpop.permute.xlu0 %13321 }
 0x375   :  { %v13329_v20 = vunpack.i.h.bf16 %v13327_v35  ;;  %v13328_v62 = vunpack.i.l.bf16 %v13327_v35  ;;  %v13324_v40 = vunpack.i.h.bf16 %v13322_v36  ;;  %v13323_v41 = vunpack.i.l.bf16 %v13322_v36 }
 0x377   :  { %v857_v42 = vsel %vm283_vm4, %v15052_v52, %v13324_v40  ;;  %v856_v43 = vsel %vm283_vm4, %v15065_v61, %v13323_v41 }
 0x378   :  { %v863_v44 = vsel %vm290_vm5, %v857_v42, %v13329_v20  ;;  %v862_v46 = vsel %vm290_vm5, %v856_v43, %v13328_v62  ;;  %v10142_v62 = vld [vmem:[%s18144_s5 + $0x1] ss:$0 sm:$0xff] }
 0x379   :  { %v868_v47 = vpack.c.bf16 %v863_v44, %v862_v46 }
 0x37b   :  { %11808 = vmatmul.mubr.msk.bf16.vlgmr.msra.gmra.mrb[24].mxu0 %vm355_vm6, %v868_v47  ;;  %11832 = vmatmul.mubr.msk.bf16.vlgmr.msra.gmra.mrb[24].mxu1 %vm355_vm6, %v868_v47 }
 0x37c   :  { %11811 = vmatprep.mubr.msk.bf16.mxu0 %vm14621_vm3, %v14620_v15  ;;  %11835 = vmatprep.mubr.msk.bf16.mxu1 %vm14621_vm3, %v14620_v15 }
 0x380   :  { %v13337_v48 = vpop.permute.xlu1 %13336  ;;  %v13332_v52 = vpop.permute.xlu0 %13331 }
 0x381   :  { %v13339_v38 = vunpack.i.h.bf16 %v13337_v48  ;;  %v13338_v50 = vunpack.i.l.bf16 %v13337_v48  ;;  %v13334_v61 = vunpack.i.h.bf16 %v13332_v52  ;;  %v13333_v54 = vunpack.i.l.bf16 %v13332_v52 }
 0x383   :  { %v859_v8 = vsel %vm283_vm4, %v778_v56, %v13334_v61  ;;  %v858_v55 = vsel %vm283_vm4, %v15076_v31, %v13333_v54 }
 0x384   :  { %v13347_v33 = vpop.permute.xlu1 %13346  ;;  %v13342_v59 = vpop.permute.xlu0 %13341  ;;  %v864_v3 = vsel %vm290_vm5, %v858_v55, %v13338_v50  ;;  %v865_v37 = vsel %vm290_vm5, %v859_v8, %v13339_v38 }
 0x385   :  { %v13344_v45 = vunpack.i.h.bf16 %v13342_v59  ;;  %v13343_v5 = vunpack.i.l.bf16 %v13342_v59  ;;  %v869_v7 = vpack.c.bf16 %v865_v37, %v864_v3  ;;  %v13349_v9 = vunpack.i.h.bf16 %v13347_v33 }
 0x386   :  { %v13348_v11 = vunpack.i.l.bf16 %v13347_v33 }
 0x387   :  { %v861_v32 = vsel %vm283_vm4, %v782_v12, %v13344_v45  ;;  %v860_v13 = vsel %vm283_vm4, %v780_v4, %v13343_v5  ;;  %11812 = vmatmul.mubr.msk.bf16.gmra.mrb[28].mxu0 %vm355_vm6, %v869_v7  ;;  %11836 = vmatmul.mubr.msk.bf16.gmra.mrb[28].mxu1 %vm355_vm6, %v869_v7  ;;  %v13816_v4 = vld [vmem:[%s18141_s8 + $0x10] sm:$0xff]  }
 0x388   :  { %11815 = vmatprep.mubr.msk.bf16.mxu0 %vm14621_vm3, %v14620_v15  ;;  %11839 = vmatprep.mubr.msk.bf16.mxu1 %vm14621_vm3, %v14620_v15  ;;  %v866_v31 = vsel %vm290_vm5, %v860_v13, %v13348_v11  ;;  %v867_v56 = vsel %vm290_vm5, %v861_v32, %v13349_v9  ;;  %v13818_v12 = vld [vmem:[%s18142_s10 + $0x10] sm:$0xff]  }
 0x389   :  { %v870_v14 = vpack.c.bf16 %v867_v56, %v866_v31  ;;  %11844 = vmatpush3.bf16.msra.mxu0 %v13816_v4  ;;  %11860 = vmatpush3.bf16.msra.mxu1 %v13818_v12 }
 0x38a   :  { %11845 = vmatprep.subr.bf16.mxu0 %v14620_v15  ;;  %11861 = vmatprep.subr.bf16.mxu1 %v14620_v15 }
 0x38d   :  { %11846 = vmatpush3.bf16.msra.mxu0 %v13817_v16  ;;  %11862 = vmatpush3.bf16.msra.mxu1 %v13819_v17 }
 0x38e   :  { %11899 = vmatprep.subr.bf16.mxu1 %v14620_v15  ;;  %11875 = vmatprep.subr.bf16.mxu0 %v14620_v15 }
 0x38f   :  { %11816 = vmatmul.mubr.msk.bf16.gmra.mrb[32].mxu0 %vm355_vm6, %v870_v14  ;;  %11840 = vmatmul.mubr.msk.bf16.gmra.mrb[32].mxu1 %vm355_vm6, %v870_v14 }
 0x390   :  { %11847 = vmatprep.mubr.msk.bf16.mxu0 %vm14621_vm3, %v14620_v15  ;;  %11863 = vmatprep.mubr.msk.bf16.mxu1 %vm14621_vm3, %v14620_v15 }
 0x44e   :  { %v971_v18 = vpop.f32.mrb[24].mxu0  ;;  %v1085_v53 = vpop.f32.mrb[24].mxu1 }
 0x44f   :  { %v1086_v21 = vadd.f32 %v10165_v6, %v1085_v53  ;;  %v11809_v22 = vpop.f32.mrb[25].mxu0  ;;  %v11833_v24 = vpop.f32.mrb[25].mxu1  ;;  %v972_v40 = vadd.f32 %v10142_v62, %v971_v18 }
 0x450   :  { %v974_v26 = vpop.f32.mrb[26].mxu0  ;;  %v1088_v27 = vpop.f32.mrb[26].mxu1 }
 0x451   :  { %v10175_v30 = vmul.f32 -1.442695, %v1086_v21  ;;  %v1089_v63 = vadd.f32 %v10165_v6, %v1088_v27  ;;  %v11810_v35 = vpop.f32.mrb[27].mxu0  ;;  %v11834_v36 = vpop.f32.mrb[27].mxu1  ;;  %v975_v41 = vadd.f32 %v10142_v62, %v974_v26 }
 0x453   :  { %14072 = vpow2.f32 %v10175_v30  ;;  %v10176_v20 = vmul.f32 -1.442695, %v1089_v63 }
 0x455   :  { %14074 = vpow2.f32 %v10176_v20 }
 0x456   :  { %14076 = vtanh.f32 %v972_v40 }
 0x457   :  { %14078 = vtanh.f32 %v975_v41 }
 0x45a   :  { %v979_v42 = vpop.f32.mrb[28].mxu0  ;;  %v1093_v43 = vpop.f32.mrb[28].mxu1 }
 0x45b   :  { %v1094_v44 = vadd.f32 %v10165_v6, %v1093_v43  ;;  %v11813_v46 = vpop.f32.mrb[29].mxu0  ;;  %v11837_v47 = vpop.f32.mrb[29].mxu1  ;;  %v980_v17 = vadd.f32 %v10142_v62, %v979_v42 }
 0x45c   :  { %v982_v52 = vpop.f32.mrb[30].mxu0  ;;  %v1096_v38 = vpop.f32.mrb[30].mxu1 }
 0x45d   :  { %v14073_v48 = vpop.eup %14072  ;;  %v10177_v61 = vmul.f32 -1.442695, %v1094_v44  ;;  %v11814_v54 = vpop.f32.mrb[31].mxu0  ;;  %v1097_v33 = vadd.f32 %v10165_v6, %v1096_v38  ;;  %v983_v26 = vadd.f32 %v10142_v62, %v982_v52 }
 0x45e   :  { %v1132_v50 = vadd.f32 1.0, %v14073_v48  ;;  %v11838_v8 = vpop.f32.mrb[31].mxu1 }
 0x45f   :  { %v14075_v55 = vpop.eup %14074  ;;  %v10178_v3 = vmul.f32 -1.442695, %v1097_v33 }
 0x460   :  { %14080 = vrcp.f32 %v1132_v50  ;;  %v1133_v59 = vadd.f32 1.0, %v14075_v55  ;;  %v14077_v4 = vpop.eup %14076 }
 0x461   :  { %14082 = vpow2.f32 %v10177_v61  ;;  %v14079_v16 = vpop.eup %14078 }
 0x462   :  { %14084 = vrcp.f32 %v1133_v59  ;;  %v987_v37 = vpop.f32.mrb[32].mxu0  ;;  %v1101_v45 = vpop.f32.mrb[32].mxu1  ;;  %v13820_v59 = vld [vmem:[%s18138_s6 + $0x60] sm:$0xff]  }
 0x463   :  { %14086 = vpow2.f32 %v10178_v3  ;;  %v1102_v5 = vadd.f32 %v10165_v6, %v1101_v45  ;;  %v11817_v7 = vpop.f32.mrb[33].mxu0  ;;  %v11841_v9 = vpop.f32.mrb[33].mxu1  ;;  %v988_v35 = vadd.f32 %v10142_v62, %v987_v37  ;;  %v13821_v3 = vld [vmem:[%s18137_s4 + $0x60] sm:$0xff]   ;;  %v13822_v37 = vld [vmem:[%s18138_s6 + $0x68] sm:$0xff]  }
 0x464   :  { %v990_v11 = vpop.f32.mrb[34].mxu0  ;;  %v1104_v32 = vpop.f32.mrb[34].mxu1  ;;  %v13823_v45 = vld [vmem:[%s18137_s4 + $0x68] sm:$0xff]   ;;  %v13825_v7 = vld [vmem:[%s18137_s4 + $0x70] sm:$0xff]   ;;  %v13826_v9 = vld [vmem:[%s18138_s6 + $0x78] sm:$0xff]  }
 0x465   :  { %v10179_v13 = vmul.f32 -1.442695, %v1102_v5  ;;  %v1105_v31 = vadd.f32 %v10165_v6, %v1104_v32  ;;  %v11818_v56 = vpop.f32.mrb[35].mxu0  ;;  %v11842_v14 = vpop.f32.mrb[35].mxu1  ;;  %v991_v20 = vadd.f32 %v10142_v62, %v990_v11  ;;  %v13824_v5 = vld [vmem:[%s18138_s6 + $0x70] sm:$0xff]   ;;  %v13827_v11 = vld [vmem:[%s18137_s4 + $0x78] sm:$0xff]  }
 0x466   :  { %v13828_v32 = vld [vmem:[%s18138_s6 + $0x80] sm:$0xff]  }
 0x467   :  { %14088 = vpow2.f32 %v10179_v13  ;;  %v10180_v12 = vmul.f32 -1.442695, %v1105_v31  ;;  %v13829_v13 = vld [vmem:[%s18137_s4 + $0x80] sm:$0xff]  }
 0x468   :  { %v10186_v14 = vld [vmem:[%s18145_s9 + $0x1] ss:$0 sm:$0xff] }
 0x469   :  { %14090 = vpow2.f32 %v10180_v12 }
 0x46a   :  { %v14081_v18 = vpop.eup %14080  ;;  %14092 = vtanh.f32 %v980_v17 }
 0x46b   :  { %v14083_v53 = vpop.eup %14082  ;;  %v1150_v21 = vmul.f32 %v14081_v18, %v14077_v4 }
 0x46c   :  { %v14085_v22 = vpop.eup %14084  ;;  %v1134_v24 = vadd.f32 1.0, %v14083_v53 }
 0x46d   :  { %v1151_v27 = vmul.f32 %v14085_v22, %v14079_v16  ;;  %v14087_v30 = vpop.eup %14086 }
 0x46e   :  { %14094 = vrcp.f32 %v1134_v24  ;;  %v1135_v63 = vadd.f32 1.0, %v14087_v30 }
 0x46f   :  { %v1156_v6 = vpack.c.bf16 %v1151_v27, %v1150_v21  ;;  %14096 = vtanh.f32 %v983_v26 }
 0x470   :  { %14098 = vrcp.f32 %v1135_v63 }
 0x471   :  { %11848 = vmatmul.mubr.msk.bf16.vlgmr.msra.gmra.mrb[36].mxu0 %vm283_vm4, %v1156_v6  ;;  %11864 = vmatmul.mubr.msk.bf16.vlgmr.msra.gmra.mrb[12].mxu1 %vm283_vm4, %v1156_v6  ;;  %v14089_v36 = vpop.eup %14088  ;;  %14100 = vtanh.f32 %v988_v35 }
 0x472   :  { %11851 = vmatprep.mubr.msk.bf16.mxu0 %vm14621_vm3, %v14620_v15  ;;  %11867 = vmatprep.mubr.msk.bf16.mxu1 %vm14621_vm3, %v14620_v15  ;;  %v1136_v40 = vadd.f32 1.0, %v14089_v36 }
 0x473   :  { %v14091_v41 = vpop.eup %14090  ;;  %11900 = vmatpush3.bf16.msra.mxu1 %v13820_v59  ;;  %11876 = vmatpush3.bf16.msra.mxu0 %v13821_v3 }
 0x474   :  { %14102 = vrcp.f32 %v1136_v40  ;;  %v1137_v42 = vadd.f32 1.0, %v14091_v41  ;;  %v14093_v43 = vpop.eup %14092  ;;  %11901 = vmatprep.subr.bf16.mxu1 %v14620_v15  ;;  %11877 = vmatprep.subr.bf16.mxu0 %v14620_v15  ;;  %v13831_v40 = vld [vmem:[%s18137_s4 + $0x88] sm:$0xff]  }
 0x475   :  { %14104 = vtanh.f32 %v991_v20  ;;  %v13830_v20 = vld [vmem:[%s18138_s6 + $0x88] sm:$0xff]  }
 0x476   :  { %14106 = vrcp.f32 %v1137_v42 }
 0x477   :  { %11902 = vmatpush3.bf16.msra.mxu1 %v13822_v37  ;;  %11878 = vmatpush3.bf16.msra.mxu0 %v13823_v45 }
 0x478   :  { %v14095_v44 = vpop.eup %14094  ;;  %11903 = vmatprep.subr.bf16.mxu1 %v14620_v15  ;;  %11879 = vmatprep.subr.bf16.mxu0 %v14620_v15 }
 0x479   :  { %v1152_v46 = vmul.f32 %v14095_v44, %v14093_v43  ;;  %v14097_v47 = vpop.eup %14096 }
 0x47a   :  { %v14099_v48 = vpop.eup %14098 }
 0x47b   :  { %v1153_v52 = vmul.f32 %v14099_v48, %v14097_v47  ;;  %v14101_v62 = vpop.eup %14100  ;;  %11904 = vmatpush3.bf16.msra.mxu1 %v13824_v5  ;;  %11880 = vmatpush3.bf16.msra.mxu0 %v13825_v7 }
 0x47c   :  { %11905 = vmatprep.subr.bf16.mxu1 %v14620_v15  ;;  %11881 = vmatprep.subr.bf16.mxu0 %v14620_v15 }
 0x47d   :  { %v1157_v38 = vpack.c.bf16 %v1153_v52, %v1152_v46 }
 0x47e   :  { %v14103_v50 = vpop.eup %14102 }
 0x47f   :  { %v14105_v61 = vpop.eup %14104  ;;  %11852 = vmatmul.mubr.msk.bf16.gmra.mrb[40].mxu0 %vm283_vm4, %v1157_v38  ;;  %11868 = vmatmul.mubr.msk.bf16.gmra.mrb[16].mxu1 %vm283_vm4, %v1157_v38  ;;  %v1154_v54 = vmul.f32 %v14103_v50, %v14101_v62 }
 0x480   :  { %v14107_v8 = vpop.eup %14106  ;;  %11855 = vmatprep.mubr.msk.bf16.mxu0 %vm14621_vm3, %v14620_v15  ;;  %11871 = vmatprep.mubr.msk.bf16.mxu1 %vm14621_vm3, %v14620_v15 }
 0x481   :  { %v1155_v55 = vmul.f32 %v14107_v8, %v14105_v61  ;;  %11906 = vmatpush3.bf16.msra.mxu1 %v13826_v9  ;;  %11882 = vmatpush3.bf16.msra.mxu0 %v13827_v11 }
 0x482   :  { %11907 = vmatprep.subr.bf16.mxu1 %v14620_v15  ;;  %11883 = vmatprep.subr.bf16.mxu0 %v14620_v15 }
 0x483   :  { %v1158_v33 = vpack.c.bf16 %v1155_v55, %v1154_v54 }
 0x485   :  { %11908 = vmatpush3.bf16.msra.mxu1 %v13828_v32  ;;  %11884 = vmatpush3.bf16.msra.mxu0 %v13829_v13 }
 0x486   :  { %11909 = vmatprep.subr.bf16.mxu1 %v14620_v15  ;;  %11885 = vmatprep.subr.bf16.mxu0 %v14620_v15 }
 0x487   :  { %11856 = vmatmul.mubr.msk.bf16.gmra.mrb[44].mxu0 %vm283_vm4, %v1158_v33  ;;  %11872 = vmatmul.mubr.msk.bf16.gmra.mrb[20].mxu1 %vm283_vm4, %v1158_v33 }
 0x488   :  { %11887 = vmatprep.mubr.msk.bf16.mxu0 %vm14621_vm3, %v14620_v15  ;;  %11911 = vmatprep.mubr.msk.bf16.mxu1 %vm14621_vm3, %v14620_v15 }
 0x489   :  { %11910 = vmatpush3.bf16.msra.mxu1 %v13830_v20  ;;  %11886 = vmatpush3.bf16.msra.mxu0 %v13831_v40 }
 0x48a   :  { %11923 = vmatprep.subr.bf16.mxu0 %v14620_v15  ;;  %11939 = vmatprep.subr.bf16.mxu1 %v14620_v15 }
 0x544   :  { %v1227_v31 = vpop.f32.mrb[36].mxu0 }
 0x545   :  { %v11849_v56 = vpop.f32.mrb[37].mxu0  ;;  %v1228_v17 = vadd.f32 %v10186_v14, %v1227_v31 }
 0x546   :  { %v1230_v4 = vpop.f32.mrb[38].mxu0 }
 0x547   :  { %v1231_v12 = vadd.f32 %v10186_v14, %v1230_v4  ;;  %v11850_v16 = vpop.f32.mrb[39].mxu0  ;;  %v1250_v53 = vadd.f32 %v1228_v17, %v15046_v39 }
 0x549   :  { %v1251_v18 = vadd.f32 %v1231_v12, %v15043_v10  ;;  %v15237_v22 = vmul.f32 %v1250_v53, %v14818_v51 }
 0x54b   :  { %v15234_v21 = vmul.f32 %v1251_v18, %v14815_v49  ;;  %v1356_v63 = vrot.slane %v15237_v22, 7 }
 0x54d   :  { %v1357_v24 = vrot.slane %v15234_v21, 7 }
 0x54f   :  { %v15243_v39 = vsel %vm196_vm0, %v1356_v63, %v1357_v24 }
 0x550   :  { %v1410_v46 = vrot.slane %v15243_v39, 2  ;;  %v1379_v48 = vrot.slane %v15243_v39, 1 }
 0x552   :  { %v1235_v26 = vpop.f32.mrb[40].mxu0 }
 0x553   :  { %v1236_v27 = vadd.f32 %v10186_v14, %v1235_v26  ;;  %v11853_v30 = vpop.f32.mrb[41].mxu0 }
 0x554   :  { %v1238_v6 = vpop.f32.mrb[42].mxu0 }
 0x555   :  { %v1252_v35 = vadd.f32 %v1236_v27, %v15055_v19  ;;  %v1239_v36 = vadd.f32 %v10186_v14, %v1238_v6  ;;  %v11854_v10 = vpop.f32.mrb[43].mxu0  ;;  %v15256_v19 = vsel %vm196_vm0, 0.0, %v1356_v63 }
 0x556   :  { %v1409_v50 = vrot.slane %v15256_v19, 2  ;;  %v1378_v8 = vrot.slane %v15256_v19, 1 }
 0x557   :  { %v15252_v41 = vmul.f32 %v1252_v35, %v14828_v57  ;;  %v1253_v42 = vadd.f32 %v1239_v36, %v15070_v28 }
 0x558   :  { %v1411_v37 = vsel %vm251_vm1, %v1409_v50, %v1410_v46  ;;  %v1380_v5 = vsel %vm219_vm2, %v1378_v8, %v1379_v48 }
 0x559   :  { %v1359_v43 = vrot.slane %v15252_v41, 7  ;;  %v15260_v44 = vmul.f32 %v1253_v42, %v14873_v29 }
 0x55a   :  { %v1243_v47 = vpop.f32.mrb[44].mxu0 }
 0x55b   :  { %v1361_v28 = vrot.slane %v15260_v44, 7  ;;  %v1244_v52 = vadd.f32 %v10186_v14, %v1243_v47  ;;  %v11857_v62 = vpop.f32.mrb[45].mxu0  ;;  %v15268_v38 = vsel %vm196_vm0, %v1357_v24, %v1359_v43 }
 0x55c   :  { %v1246_v61 = vpop.f32.mrb[46].mxu0  ;;  %v1412_v54 = vrot.slane %v15268_v38, 2  ;;  %v1381_v55 = vrot.slane %v15268_v38, 1 }
 0x55d   :  { %v1254_v33 = vadd.f32 %v1244_v52, %v15092_v58  ;;  %v1247_v59 = vadd.f32 %v10186_v14, %v1246_v61  ;;  %v11858_v3 = vpop.f32.mrb[47].mxu0  ;;  %v1362_v9 = vsel %vm196_vm0, %v1359_v43, %v1361_v28 }
 0x55e   :  { %v1413_v45 = vsel %vm251_vm1, %v1410_v46, %v1412_v54  ;;  %v1382_v7 = vsel %vm219_vm2, %v1379_v48, %v1381_v55  ;;  %v1414_v14 = vrot.slane %v1362_v9, 2  ;;  %v1383_v4 = vrot.slane %v1362_v9, 1 }
 0x55f   :  { %v15281_v11 = vmul.f32 %v1254_v33, %v14879_v34  ;;  %v1255_v32 = vadd.f32 %v1247_v59, %v15097_v60  ;;  %v13355_v13 = vpack.i.bf16 %v1413_v45, %v1411_v37  ;;  %v13350_v31 = vpack.i.bf16 %v1382_v7, %v1380_v5 }
 0x560   :  { %v1415_v60 = vsel %vm251_vm1, %v1412_v54, %v1414_v14  ;;  %v1384_v53 = vsel %vm219_vm2, %v1381_v55, %v1383_v4 }
 0x561   :  { %v1363_v58 = vrot.slane %v15281_v11, 7  ;;  %v15286_v56 = vmul.f32 %v1255_v32, %v14899_v2  ;;  %13356 = vrot.lane.b32.xlu1 %v13355_v13, %s14622_s15  ;;  %13351 = vrot.lane.b32.xlu0 %v13350_v31, %s14623_s16 }
 0x563   :  { %v1365_v12 = vrot.slane %v15286_v56, 7  ;;  %v1364_v16 = vsel %vm196_vm0, %v1361_v28, %v1363_v58 }
 0x564   :  { %v1416_v17 = vrot.slane %v1364_v16, 2  ;;  %v1385_v18 = vrot.slane %v1364_v16, 1 }
 0x565   :  { %v1366_v24 = vsel %vm196_vm0, %v1363_v58, %v1365_v12  ;;  %v1375_v26 = vsel %vm196_vm0, %v1365_v12, 0.0 }
 0x566   :  { %v1417_v27 = vsel %vm251_vm1, %v1414_v14, %v1416_v17  ;;  %v1386_v30 = vsel %vm219_vm2, %v1383_v4, %v1385_v18  ;;  %v1418_v63 = vrot.slane %v1366_v24, 2  ;;  %v1420_v6 = vrot.slane %v1375_v26, 2 }
 0x567   :  { %v13365_v35 = vpack.i.bf16 %v1417_v27, %v1415_v60  ;;  %v13360_v36 = vpack.i.bf16 %v1386_v30, %v1384_v53  ;;  %v1387_v10 = vrot.slane %v1366_v24, 1  ;;  %v1389_v20 = vrot.slane %v1375_v26, 1 }
 0x568   :  { %v1419_v40 = vsel %vm251_vm1, %v1416_v17, %v1418_v63  ;;  %v1421_v42 = vsel %vm251_vm1, %v1418_v63, %v1420_v6  ;;  %v13833_v63 = vld [vmem:[%s18141_s8 + $0x28] sm:$0xff]  }
 0x569   :  { %13366 = vrot.lane.b32.xlu1 %v13365_v35, %s14622_s15  ;;  %13361 = vrot.lane.b32.xlu0 %v13360_v36, %s14623_s16  ;;  %v1388_v43 = vsel %vm219_vm2, %v1385_v18, %v1387_v10  ;;  %v1390_v46 = vsel %vm219_vm2, %v1387_v10, %v1389_v20  ;;  %v13375_v47 = vpack.i.bf16 %v1421_v42, %v1419_v40  ;;  %v13835_v6 = vld [vmem:[%s18142_s10 + $0x28] sm:$0xff]   ;;  %v10239_v35 = vld [vmem:[%s18143_s7 + $0x2] ss:$0 sm:$0xff] }
 0x56a   :  { %v13370_v48 = vpack.i.bf16 %v1390_v46, %v1388_v43 }
 0x56d   :  { %13376 = vrot.lane.b32.xlu1 %v13375_v47, %s14622_s15  ;;  %13371 = vrot.lane.b32.xlu0 %v13370_v48, %s14623_s16 }
 0x5d3   :  { %v13357_v28 = vpop.permute.xlu1 %13356  ;;  %v13352_v52 = vpop.permute.xlu0 %13351 }
 0x5d4   :  { %v13359_v62 = vunpack.i.h.bf16 %v13357_v28  ;;  %v13358_v50 = vunpack.i.l.bf16 %v13357_v28  ;;  %v13354_v61 = vunpack.i.h.bf16 %v13352_v52  ;;  %v13353_v54 = vunpack.i.l.bf16 %v13352_v52 }
 0x5d6   :  { %v1441_v8 = vsel %vm283_vm4, %v15243_v39, %v13354_v61  ;;  %v1440_v55 = vsel %vm283_vm4, %v15256_v19, %v13353_v54  ;;  %v10216_v54 = vld [vmem:[%s18144_s5 + $0x2] ss:$0 sm:$0xff] }
 0x5d7   :  { %v1447_v33 = vsel %vm290_vm5, %v1441_v8, %v13359_v62  ;;  %v1446_v59 = vsel %vm290_vm5, %v1440_v55, %v13358_v50 }
 0x5d8   :  { %v1452_v3 = vpack.c.bf16 %v1447_v33, %v1446_v59 }
 0x5da   :  { %11888 = vmatmul.mubr.msk.bf16.vlgmr.msra.gmra.mrb[48].mxu0 %vm355_vm6, %v1452_v3  ;;  %11912 = vmatmul.mubr.msk.bf16.vlgmr.msra.gmra.mrb[36].mxu1 %vm355_vm6, %v1452_v3 }
 0x5db   :  { %v13367_v37 = vpop.permute.xlu1 %13366  ;;  %v13362_v45 = vpop.permute.xlu0 %13361  ;;  %11891 = vmatprep.mubr.msk.bf16.mxu0 %vm14621_vm3, %v14620_v15  ;;  %11915 = vmatprep.mubr.msk.bf16.mxu1 %vm14621_vm3, %v14620_v15 }
 0x5dc   :  { %v13369_v39 = vunpack.i.h.bf16 %v13367_v37  ;;  %v13368_v5 = vunpack.i.l.bf16 %v13367_v37  ;;  %v13364_v19 = vunpack.i.h.bf16 %v13362_v45  ;;  %v13363_v7 = vunpack.i.l.bf16 %v13362_v45 }
 0x5de   :  { %v1443_v32 = vsel %vm283_vm4, %v1362_v9, %v13364_v19  ;;  %v1442_v13 = vsel %vm283_vm4, %v15268_v38, %v13363_v7 }
 0x5df   :  { %v13377_v31 = vpop.permute.xlu1 %13376  ;;  %v13372_v58 = vpop.permute.xlu0 %13371  ;;  %v1448_v14 = vsel %vm290_vm5, %v1442_v13, %v13368_v5  ;;  %v1449_v4 = vsel %vm290_vm5, %v1443_v32, %v13369_v39 }
 0x5e0   :  { %v13374_v12 = vunpack.i.h.bf16 %v13372_v58  ;;  %v13373_v17 = vunpack.i.l.bf16 %v13372_v58  ;;  %v1453_v18 = vpack.c.bf16 %v1449_v4, %v1448_v14  ;;  %v13379_v60 = vunpack.i.h.bf16 %v13377_v31 }
 0x5e1   :  { %v13378_v53 = vunpack.i.l.bf16 %v13377_v31 }
 0x5e2   :  { %v1445_v26 = vsel %vm283_vm4, %v1366_v24, %v13374_v12  ;;  %v1444_v27 = vsel %vm283_vm4, %v1364_v16, %v13373_v17  ;;  %11892 = vmatmul.mubr.msk.bf16.gmra.mrb[52].mxu0 %vm355_vm6, %v1453_v18  ;;  %11916 = vmatmul.mubr.msk.bf16.gmra.mrb[40].mxu1 %vm355_vm6, %v1453_v18  ;;  %v13832_v16 = vld [vmem:[%s18141_s8 + $0x20] sm:$0xff]  }
 0x5e3   :  { %11895 = vmatprep.mubr.msk.bf16.mxu0 %vm14621_vm3, %v14620_v15  ;;  %11919 = vmatprep.mubr.msk.bf16.mxu1 %vm14621_vm3, %v14620_v15  ;;  %v1450_v38 = vsel %vm290_vm5, %v1444_v27, %v13378_v53  ;;  %v1451_v9 = vsel %vm290_vm5, %v1445_v26, %v13379_v60  ;;  %v13834_v24 = vld [vmem:[%s18142_s10 + $0x20] sm:$0xff]  }
 0x5e4   :  { %v1454_v30 = vpack.c.bf16 %v1451_v9, %v1450_v38  ;;  %11924 = vmatpush3.bf16.msra.mxu0 %v13832_v16  ;;  %11940 = vmatpush3.bf16.msra.mxu1 %v13834_v24 }
 0x5e5   :  { %11925 = vmatprep.subr.bf16.mxu0 %v14620_v15  ;;  %11941 = vmatprep.subr.bf16.mxu1 %v14620_v15 }
 0x5e8   :  { %11926 = vmatpush3.bf16.msra.mxu0 %v13833_v63  ;;  %11942 = vmatpush3.bf16.msra.mxu1 %v13835_v6 }
 0x5e9   :  { %11979 = vmatprep.subr.bf16.mxu1 %v14620_v15  ;;  %11955 = vmatprep.subr.bf16.mxu0 %v14620_v15 }
 0x5ea   :  { %11896 = vmatmul.mubr.msk.bf16.gmra.mrb[56].mxu0 %vm355_vm6, %v1454_v30  ;;  %11920 = vmatmul.mubr.msk.bf16.gmra.mrb[44].mxu1 %vm355_vm6, %v1454_v30 }
 0x5eb   :  { %11927 = vmatprep.mubr.msk.bf16.mxu0 %vm14621_vm3, %v14620_v15  ;;  %11943 = vmatprep.mubr.msk.bf16.mxu1 %vm14621_vm3, %v14620_v15 }
 0x6ad   :  { %v1555_v36 = vpop.f32.mrb[48].mxu0  ;;  %v1669_v10 = vpop.f32.mrb[36].mxu1 }
 0x6ae   :  { %v1670_v20 = vadd.f32 %v10239_v35, %v1669_v10  ;;  %v11889_v40 = vpop.f32.mrb[49].mxu0  ;;  %v11913_v42 = vpop.f32.mrb[37].mxu1  ;;  %v1556_v19 = vadd.f32 %v10216_v54, %v1555_v36 }
 0x6af   :  { %v1558_v43 = vpop.f32.mrb[50].mxu0  ;;  %v1672_v46 = vpop.f32.mrb[38].mxu1 }
 0x6b0   :  { %v10249_v47 = vmul.f32 -1.442695, %v1670_v20  ;;  %v1673_v48 = vadd.f32 %v10239_v35, %v1672_v46  ;;  %v11890_v28 = vpop.f32.mrb[51].mxu0  ;;  %v11914_v52 = vpop.f32.mrb[39].mxu1  ;;  %v1559_v13 = vadd.f32 %v10216_v54, %v1558_v43 }
 0x6b2   :  { %14108 = vpow2.f32 %v10249_v47  ;;  %v10250_v62 = vmul.f32 -1.442695, %v1673_v48 }
 0x6b4   :  { %14110 = vpow2.f32 %v10250_v62 }
 0x6b5   :  { %v1563_v50 = vpop.f32.mrb[52].mxu0  ;;  %v1677_v61 = vpop.f32.mrb[40].mxu1 }
 0x6b6   :  { %v1678_v8 = vadd.f32 %v10239_v35, %v1677_v61  ;;  %v11893_v55 = vpop.f32.mrb[53].mxu0  ;;  %v11917_v33 = vpop.f32.mrb[41].mxu1  ;;  %v1564_v16 = vadd.f32 %v10216_v54, %v1563_v50 }
 0x6b7   :  { %v1566_v59 = vpop.f32.mrb[54].mxu0  ;;  %v1680_v3 = vpop.f32.mrb[42].mxu1 }
 0x6b8   :  { %v10251_v37 = vmul.f32 -1.442695, %v1678_v8  ;;  %v1681_v45 = vadd.f32 %v10239_v35, %v1680_v3  ;;  %v11894_v39 = vpop.f32.mrb[55].mxu0  ;;  %v11918_v5 = vpop.f32.mrb[43].mxu1  ;;  %v1567_v6 = vadd.f32 %v10216_v54, %v1566_v59 }
 0x6ba   :  { %14112 = vpow2.f32 %v10251_v37  ;;  %v10252_v7 = vmul.f32 -1.442695, %v1681_v45 }
 0x6bc   :  { %v14109_v32 = vpop.eup %14108  ;;  %14114 = vpow2.f32 %v10252_v7 }
 0x6bd   :  { %v1716_v31 = vadd.f32 1.0, %v14109_v32  ;;  %14116 = vtanh.f32 %v1556_v19  ;;  %v1571_v14 = vpop.f32.mrb[56].mxu0  ;;  %v1685_v4 = vpop.f32.mrb[44].mxu1 }
 0x6be   :  { %v14111_v58 = vpop.eup %14110  ;;  %v1686_v17 = vadd.f32 %v10239_v35, %v1685_v4  ;;  %v11897_v18 = vpop.f32.mrb[57].mxu0  ;;  %v1572_v47 = vadd.f32 %v10216_v54, %v1571_v14  ;;  %v13837_v14 = vld [vmem:[%s18137_s4 + $0x90] sm:$0xff]   ;;  %v13838_v4 = vld [vmem:[%s18138_s6 + $0x98] sm:$0xff]  }
 0x6bf   :  { %14118 = vrcp.f32 %v1716_v31  ;;  %v1717_v12 = vadd.f32 1.0, %v14111_v58  ;;  %v11921_v60 = vpop.f32.mrb[45].mxu1  ;;  %v1574_v53 = vpop.f32.mrb[58].mxu0  ;;  %v13836_v58 = vld [vmem:[%s18138_s6 + $0x90] sm:$0xff]   ;;  %v13841_v18 = vld [vmem:[%s18137_s4 + $0xa0] sm:$0xff]  }
 0x6c0   :  { %14120 = vtanh.f32 %v1559_v13  ;;  %v1688_v26 = vpop.f32.mrb[46].mxu1  ;;  %v10253_v27 = vmul.f32 -1.442695, %v1686_v17  ;;  %v11898_v9 = vpop.f32.mrb[59].mxu0  ;;  %v1575_v52 = vadd.f32 %v10216_v54, %v1574_v53  ;;  %v13840_v17 = vld [vmem:[%s18138_s6 + $0xa0] sm:$0xff]   ;;  %v13842_v60 = vld [vmem:[%s18138_s6 + $0xa8] sm:$0xff]  }
 0x6c1   :  { %14122 = vrcp.f32 %v1717_v12  ;;  %v1689_v38 = vadd.f32 %v10239_v35, %v1688_v26  ;;  %v11922_v30 = vpop.f32.mrb[47].mxu1  ;;  %v13839_v12 = vld [vmem:[%s18137_s4 + $0x98] sm:$0xff]   ;;  %v13843_v53 = vld [vmem:[%s18137_s4 + $0xa8] sm:$0xff]   ;;  %v13844_v26 = vld [vmem:[%s18138_s6 + $0xb0] sm:$0xff]  }
 0x6c2   :  { %14124 = vpow2.f32 %v10253_v27  ;;  %v13845_v27 = vld [vmem:[%s18137_s4 + $0xb0] sm:$0xff]  }
 0x6c3   :  { %v10254_v24 = vmul.f32 -1.442695, %v1689_v38  ;;  %v10260_v38 = vld [vmem:[%s18145_s9 + $0x2] ss:$0 sm:$0xff] }
 0x6c4   :  { %v14113_v63 = vpop.eup %14112 }
 0x6c5   :  { %14126 = vpow2.f32 %v10254_v24  ;;  %v1718_v36 = vadd.f32 1.0, %v14113_v63 }
 0x6c6   :  { %v14115_v10 = vpop.eup %14114  ;;  %14128 = vtanh.f32 %v1564_v16 }
 0x6c7   :  { %v14117_v20 = vpop.eup %14116  ;;  %14130 = vrcp.f32 %v1718_v36  ;;  %v1719_v40 = vadd.f32 1.0, %v14115_v10 }
 0x6c8   :  { %14132 = vtanh.f32 %v1567_v6 }
 0x6c9   :  { %v14119_v42 = vpop.eup %14118  ;;  %14134 = vrcp.f32 %v1719_v40 }
 0x6ca   :  { %v14121_v43 = vpop.eup %14120  ;;  %v1734_v46 = vmul.f32 %v14119_v42, %v14117_v20  ;;  %14136 = vtanh.f32 %v1572_v47 }
 0x6cb   :  { %v14123_v35 = vpop.eup %14122 }
 0x6cc   :  { %v1735_v48 = vmul.f32 %v14123_v35, %v14121_v43  ;;  %v14125_v28 = vpop.eup %14124 }
 0x6cd   :  { %v1720_v62 = vadd.f32 1.0, %v14125_v28 }
 0x6ce   :  { %v1740_v50 = vpack.c.bf16 %v1735_v48, %v1734_v46 }
 0x6cf   :  { %v14127_v61 = vpop.eup %14126  ;;  %14138 = vrcp.f32 %v1720_v62 }
 0x6d0   :  { %v1721_v8 = vadd.f32 1.0, %v14127_v61  ;;  %11928 = vmatmul.mubr.msk.bf16.vlgmr.msra.gmra.mrb[60].mxu0 %vm283_vm4, %v1740_v50  ;;  %11944 = vmatmul.mubr.msk.bf16.vlgmr.msra.gmra.mrb[12].mxu1 %vm283_vm4, %v1740_v50  ;;  %v14129_v55 = vpop.eup %14128  ;;  %14140 = vtanh.f32 %v1575_v52  ;;  %v13846_v50 = vld [vmem:[%s18138_s6 + $0xb8] sm:$0xff]  }
 0x6d1   :  { %11931 = vmatprep.mubr.msk.bf16.mxu0 %vm14621_vm3, %v14620_v15  ;;  %11947 = vmatprep.mubr.msk.bf16.mxu1 %vm14621_vm3, %v14620_v15  ;;  %v14131_v33 = vpop.eup %14130 }
 0x6d2   :  { %14142 = vrcp.f32 %v1721_v8  ;;  %v14133_v54 = vpop.eup %14132  ;;  %v1736_v59 = vmul.f32 %v14131_v33, %v14129_v55  ;;  %11980 = vmatpush3.bf16.msra.mxu1 %v13836_v58  ;;  %11956 = vmatpush3.bf16.msra.mxu0 %v13837_v14 }
 0x6d3   :  { %v14135_v3 = vpop.eup %14134  ;;  %11981 = vmatprep.subr.bf16.mxu1 %v14620_v15  ;;  %11957 = vmatprep.subr.bf16.mxu0 %v14620_v15 }
 0x6d4   :  { %v1737_v37 = vmul.f32 %v14135_v3, %v14133_v54  ;;  %v14137_v39 = vpop.eup %14136 }
 0x6d6   :  { %v1741_v45 = vpack.c.bf16 %v1737_v37, %v1736_v59  ;;  %11982 = vmatpush3.bf16.msra.mxu1 %v13838_v4  ;;  %11958 = vmatpush3.bf16.msra.mxu0 %v13839_v12 }
 0x6d7   :  { %11983 = vmatprep.subr.bf16.mxu1 %v14620_v15  ;;  %11959 = vmatprep.subr.bf16.mxu0 %v14620_v15 }
 0x6d8   :  { %11932 = vmatmul.mubr.msk.bf16.gmra.mrb[64].mxu0 %vm283_vm4, %v1741_v45  ;;  %11948 = vmatmul.mubr.msk.bf16.gmra.mrb[16].mxu1 %vm283_vm4, %v1741_v45 }
 0x6d9   :  { %v14139_v5 = vpop.eup %14138  ;;  %11935 = vmatprep.mubr.msk.bf16.mxu0 %vm14621_vm3, %v14620_v15  ;;  %11951 = vmatprep.mubr.msk.bf16.mxu1 %vm14621_vm3, %v14620_v15 }
 0x6da   :  { %v14141_v19 = vpop.eup %14140  ;;  %v1738_v7 = vmul.f32 %v14139_v5, %v14137_v39  ;;  %11984 = vmatpush3.bf16.msra.mxu1 %v13840_v17  ;;  %11960 = vmatpush3.bf16.msra.mxu0 %v13841_v18 }
 0x6db   :  { %11985 = vmatprep.subr.bf16.mxu1 %v14620_v15  ;;  %11961 = vmatprep.subr.bf16.mxu0 %v14620_v15 }
 0x6dc   :  { %v14143_v32 = vpop.eup %14142 }
 0x6dd   :  { %v1739_v13 = vmul.f32 %v14143_v32, %v14141_v19 }
 0x6de   :  { %11986 = vmatpush3.bf16.msra.mxu1 %v13842_v60  ;;  %11962 = vmatpush3.bf16.msra.mxu0 %v13843_v53 }
 0x6df   :  { %v1742_v31 = vpack.c.bf16 %v1739_v13, %v1738_v7  ;;  %11987 = vmatprep.subr.bf16.mxu1 %v14620_v15  ;;  %11963 = vmatprep.subr.bf16.mxu0 %v14620_v15 }
 0x6e1   :  { %11936 = vmatmul.mubr.msk.bf16.gmra.mrb[68].mxu0 %vm283_vm4, %v1742_v31  ;;  %11952 = vmatmul.mubr.msk.bf16.gmra.mrb[20].mxu1 %vm283_vm4, %v1742_v31 }
 0x6e2   :  { %11967 = vmatprep.mubr.msk.bf16.mxu0 %vm14621_vm3, %v14620_v15  ;;  %11991 = vmatprep.mubr.msk.bf16.mxu1 %vm14621_vm3, %v14620_v15 }
 0x6e3   :  { %11988 = vmatpush3.bf16.msra.mxu1 %v13844_v26  ;;  %11964 = vmatpush3.bf16.msra.mxu0 %v13845_v27 }
 0x6e4   :  { %11989 = vmatprep.subr.bf16.mxu1 %v14620_v15  ;;  %11965 = vmatprep.subr.bf16.mxu0 %v14620_v15 }
 0x6e7   :  { %11990 = vmatpush3.bf16.msra.mxu1 %v13846_v50 }
 0x6e8   :  { %12003 = vmatprep.subr.bf16.mxu1 %v14620_v15 }
 0x7a3   :  { %v1811_v9 = vpop.f32.mrb[60].mxu0 }
 0x7a4   :  { %v1812_v30 = vadd.f32 %v10260_v38, %v1811_v9  ;;  %v11929_v16 = vpop.f32.mrb[61].mxu0 }
 0x7a5   :  { %v1814_v24 = vpop.f32.mrb[62].mxu0 }
 0x7a6   :  { %v1834_v63 = vadd.f32 %v1812_v30, %v15237_v22  ;;  %v1815_v6 = vadd.f32 %v10260_v38, %v1814_v24  ;;  %v11930_v36 = vpop.f32.mrb[63].mxu0 }
 0x7a8   :  { %v1840_v10 = vmul.f32 %v1834_v63, %v14818_v51  ;;  %v1835_v20 = vadd.f32 %v1815_v6, %v15234_v21  ;;  %v13847_v21 = vld [vmem:[%s18137_s4 + $0xb8] sm:$0xff]  }
 0x7a9   :  { %11966 = vmatpush3.bf16.msra.mxu0 %v13847_v21 }
 0x7aa   :  { %v1841_v40 = vmul.f32 %v1835_v20, %v14815_v49  ;;  %v1940_v42 = vrot.slane %v1840_v10, 7 }
 0x7ab   :  { %v1819_v46 = vpop.f32.mrb[64].mxu0 }
 0x7ac   :  { %v1941_v43 = vrot.slane %v1841_v40, 7  ;;  %v1820_v35 = vadd.f32 %v10260_v38, %v1819_v46  ;;  %v11933_v47 = vpop.f32.mrb[65].mxu0  ;;  %v15439_v55 = vsel %vm196_vm0, 0.0, %v1940_v42 }
 0x7ad   :  { %v1822_v48 = vpop.f32.mrb[66].mxu0  ;;  %v1993_v19 = vrot.slane %v15439_v55, 2  ;;  %v1962_v32 = vrot.slane %v15439_v55, 1 }
 0x7ae   :  { %v15427_v28 = vsel %vm196_vm0, %v1940_v42, %v1941_v43  ;;  %v1836_v52 = vadd.f32 %v1820_v35, %v15252_v41  ;;  %v1823_v22 = vadd.f32 %v10260_v38, %v1822_v48  ;;  %v11934_v62 = vpop.f32.mrb[67].mxu0 }
 0x7af   :  { %v1994_v59 = vrot.slane %v15427_v28, 2  ;;  %v1963_v3 = vrot.slane %v15427_v28, 1 }
 0x7b0   :  { %v1842_v61 = vmul.f32 %v1836_v52, %v14828_v57  ;;  %v1837_v8 = vadd.f32 %v1823_v22, %v15260_v44 }
 0x7b1   :  { %v1995_v12 = vsel %vm251_vm1, %v1993_v19, %v1994_v59  ;;  %v1964_v18 = vsel %vm219_vm2, %v1962_v32, %v1963_v3  ;;  %v14616_v19 = vld [vmem:[%s18135_s0 + $0x28] sm:$0xff]  ;;  %v14617_v32 = vld [vmem:[%s18135_s0 + $0x20] sm:$0xff] }
 0x7b2   :  { %v1943_v41 = vrot.slane %v1842_v61, 7  ;;  %v1843_v33 = vmul.f32 %v1837_v8, %v14873_v29 }
 0x7b4   :  { %v1827_v54 = vpop.f32.mrb[68].mxu0  ;;  %v1945_v37 = vrot.slane %v1843_v33, 7  ;;  %v15446_v44 = vsel %vm196_vm0, %v1941_v43, %v1943_v41  ;;  %v14612_v33 = vld [vmem:[%s18135_s0 + $0x8] sm:$0xff] }
 0x7b5   :  { %v1828_v45 = vadd.f32 %v10260_v38, %v1827_v54  ;;  %v11937_v39 = vpop.f32.mrb[69].mxu0  ;;  %v1996_v7 = vrot.slane %v15446_v44, 2  ;;  %v1965_v13 = vrot.slane %v15446_v44, 1  ;;  %v15494_v54 = vmul.f32 %v14612_v33, %v14815_v49  ;;  %v10313_v33 = vld [vmem:[%s18143_s7 + $0x3] ss:$0 sm:$0xff] }
 0x7b6   :  { %v1830_v5 = vpop.f32.mrb[70].mxu0  ;;  %v15454_v4 = vsel %vm196_vm0, %v1943_v41, %v1945_v37  ;;  %v14615_v39 = vld [vmem:[%s18135_s0 + $0x10] sm:$0xff] }
 0x7b7   :  { %v1838_v31 = vadd.f32 %v1828_v45, %v15281_v11  ;;  %v1831_v58 = vadd.f32 %v10260_v38, %v1830_v5  ;;  %v11938_v14 = vpop.f32.mrb[71].mxu0  ;;  %v1997_v17 = vsel %vm251_vm1, %v1994_v59, %v1996_v7  ;;  %v1966_v60 = vsel %vm219_vm2, %v1963_v3, %v1965_v13  ;;  %v14613_v59 = vld [vmem:[%s18135_s0] sm:$0xff] }
 0x7b8   :  { %v13385_v27 = vpack.i.bf16 %v1997_v17, %v1995_v12  ;;  %v13380_v9 = vpack.i.bf16 %v1966_v60, %v1964_v18  ;;  %v1998_v30 = vrot.slane %v15454_v4, 2  ;;  %v1967_v16 = vrot.slane %v15454_v4, 1 }
 0x7b9   :  { %v1844_v53 = vmul.f32 %v1838_v31, %v14879_v34  ;;  %v1839_v26 = vadd.f32 %v1831_v58, %v15286_v56  ;;  %v15500_v3 = vmul.f32 %v14613_v59, %v14818_v51  ;;  %v15514_v5 = vmul.f32 %v14615_v39, %v14828_v57 }
 0x7ba   :  { %13386 = vrot.lane.b32.xlu1 %v13385_v27, %s14622_s15  ;;  %13381 = vrot.lane.b32.xlu0 %v13380_v9, %s14623_s16  ;;  %v1999_v10 = vsel %vm251_vm1, %v1996_v7, %v1998_v30  ;;  %v1968_v20 = vsel %vm219_vm2, %v1965_v13, %v1967_v16  ;;  %v15522_v7 = vmul.f32 %v14616_v19, %v14899_v2 }
 0x7bb   :  { %v1947_v11 = vrot.slane %v1844_v53, 7  ;;  %v1845_v38 = vmul.f32 %v1839_v26, %v14899_v2  ;;  %v15528_v13 = vmul.f32 %v14617_v32, %v14879_v34 }
 0x7bd   :  { %v1949_v24 = vrot.slane %v1845_v38, 7  ;;  %v15468_v63 = vsel %vm196_vm0, %v1945_v37, %v1947_v11  ;;  %v14614_v37 = vld [vmem:[%s18135_s0 + $0x18] sm:$0xff] }
 0x7be   :  { %v2000_v6 = vrot.slane %v15468_v63, 2  ;;  %v1969_v56 = vrot.slane %v15468_v63, 1  ;;  %v15508_v45 = vmul.f32 %v14614_v37, %v14873_v29 }
 0x7bf   :  { %v1959_v36 = vsel %vm196_vm0, %v1949_v24, 0.0  ;;  %v15476_v40 = vsel %vm196_vm0, %v1947_v11, %v1949_v24 }
 0x7c0   :  { %v2001_v42 = vsel %vm251_vm1, %v1998_v30, %v2000_v6  ;;  %v1970_v43 = vsel %vm219_vm2, %v1967_v16, %v1969_v56  ;;  %v2002_v46 = vrot.slane %v15476_v40, 2  ;;  %v2004_v35 = vrot.slane %v1959_v36, 2 }
 0x7c1   :  { %v13395_v47 = vpack.i.bf16 %v2001_v42, %v1999_v10  ;;  %v13390_v48 = vpack.i.bf16 %v1970_v43, %v1968_v20  ;;  %v1971_v52 = vrot.slane %v15476_v40, 1  ;;  %v1973_v22 = vrot.slane %v1959_v36, 1 }
 0x7c2   :  { %v2003_v62 = vsel %vm251_vm1, %v2000_v6, %v2002_v46  ;;  %v2005_v50 = vsel %vm251_vm1, %v2002_v46, %v2004_v35 }
 0x7c3   :  { %13396 = vrot.lane.b32.xlu1 %v13395_v47, %s14622_s15  ;;  %13391 = vrot.lane.b32.xlu0 %v13390_v48, %s14623_s16  ;;  %v1972_v21 = vsel %vm219_vm2, %v1969_v56, %v1971_v52  ;;  %v1974_v61 = vsel %vm219_vm2, %v1971_v52, %v1973_v22  ;;  %v13405_v8 = vpack.i.bf16 %v2005_v50, %v2003_v62  ;;  %v2430_v62 = vld [vmem:[%s18146_s12] sm:$0xff]  ;;  %v2431_v50 = vld [vmem:[%s18146_s12 + $0x8] sm:$0xff] }
 0x7c4   :  { %v13400_v41 = vpack.i.bf16 %v1974_v61, %v1972_v21  ;;  %v2432_v21 = vld [vmem:[%s18146_s12 + $0x10] sm:$0xff]  ;;  %v12999_v61 = vpack.c.bf16 %v2431_v50, %v2430_v62 }
 0x7c6   :  { %13000 = vmatprep.subr.bf16.mxu0 %v12999_v61 }
 0x7c7   :  { %13406 = vrot.lane.b32.xlu1 %v13405_v8, %s14622_s15  ;;  %13401 = vrot.lane.b32.xlu0 %v13400_v41, %s14623_s16  ;;  %v2433_v8 = vld [vmem:[%s18146_s12 + $0x18] sm:$0xff] }
 0x7c8   :  { %v13003_v41 = vpack.c.bf16 %v2433_v8, %v2432_v21 }
 0x7cb   :  { %2574 = vrot.lane.b32.xlu1 %v15494_v54, %s14624_s29  ;;  %2572 = vrot.lane.b32.xlu0 %v15500_v3, %s14624_s29 }
 0x7cf   :  { %2578 = vrot.lane.b32.xlu1 %v15508_v45, %s14624_s29  ;;  %2576 = vrot.lane.b32.xlu0 %v15514_v5, %s14624_s29 }
 0x7d3   :  { %2582 = vrot.lane.b32.xlu1 %v15522_v7, %s14624_s29  ;;  %2580 = vrot.lane.b32.xlu0 %v15528_v13, %s14624_s29 }
 0x82c   :  { %v13387_v31 = vpop.permute.xlu1 %13386  ;;  %v13382_v58 = vpop.permute.xlu0 %13381 }
 0x82d   :  { %v13389_v14 = vunpack.i.h.bf16 %v13387_v31  ;;  %v13388_v12 = vunpack.i.l.bf16 %v13387_v31  ;;  %v13384_v17 = vunpack.i.h.bf16 %v13382_v58  ;;  %v13383_v18 = vunpack.i.l.bf16 %v13382_v58 }
 0x82f   :  { %v2025_v60 = vsel %vm283_vm4, %v15427_v28, %v13384_v17  ;;  %v2024_v53 = vsel %vm283_vm4, %v15439_v55, %v13383_v18 }
 0x830   :  { %v2031_v26 = vsel %vm290_vm5, %v2025_v60, %v13389_v14  ;;  %v2030_v27 = vsel %vm290_vm5, %v2024_v53, %v13388_v12 }
 0x831   :  { %v2036_v9 = vpack.c.bf16 %v2031_v26, %v2030_v27  ;;  %v10290_v27 = vld [vmem:[%s18144_s5 + $0x3] ss:$0 sm:$0xff] }
 0x833   :  { %11968 = vmatmul.mubr.msk.bf16.vlgmr.msra.gmra.mrb[72].mxu0 %vm355_vm6, %v2036_v9  ;;  %11992 = vmatmul.mubr.msk.bf16.vlgmr.msra.gmra.mrb[48].mxu1 %vm355_vm6, %v2036_v9 }
 0x834   :  { %11971 = vmatprep.mubr.msk.bf16.mxu0 %vm14621_vm3, %v14620_v15  ;;  %11995 = vmatprep.mubr.msk.bf16.mxu1 %vm14621_vm3, %v14620_v15 }
 0x835   :  { %v13397_v11 = vpop.permute.xlu1 %13396  ;;  %v13392_v38 = vpop.permute.xlu0 %13391  ;;  %13002 = vmatpush3.bf16.msra.mxu0 %v12999_v61 }
 0x836   :  { %v13399_v28 = vunpack.i.h.bf16 %v13397_v11  ;;  %v13398_v30 = vunpack.i.l.bf16 %v13397_v11  ;;  %v13394_v55 = vunpack.i.h.bf16 %v13392_v38  ;;  %v13393_v16 = vunpack.i.l.bf16 %v13392_v38  ;;  %13004 = vmatprep.subr.bf16.mxu0 %v13003_v41 }
 0x838   :  { %v2027_v24 = vsel %vm283_vm4, %v15454_v4, %v13394_v55  ;;  %v2026_v6 = vsel %vm283_vm4, %v15446_v44, %v13393_v16 }
 0x839   :  { %v13407_v56 = vpop.permute.xlu1 %13406  ;;  %v13402_v36 = vpop.permute.xlu0 %13401  ;;  %v2032_v10 = vsel %vm290_vm5, %v2026_v6, %v13398_v30  ;;  %v2033_v20 = vsel %vm290_vm5, %v2027_v24, %v13399_v28  ;;  %13006 = vmatpush3.bf16.msra.mxu0 %v13003_v41 }
 0x83a   :  { %v13404_v42 = vunpack.i.h.bf16 %v13402_v36  ;;  %v13403_v43 = vunpack.i.l.bf16 %v13402_v36  ;;  %v2037_v46 = vpack.c.bf16 %v2033_v20, %v2032_v10  ;;  %v13409_v35 = vunpack.i.h.bf16 %v13407_v56  ;;  %12036 = vmatprep.subr.bf16.mxu0 %v14620_v15 }
 0x83b   :  { %v13408_v47 = vunpack.i.l.bf16 %v13407_v56 }
 0x83c   :  { %v2029_v48 = vsel %vm283_vm4, %v15476_v40, %v13404_v42  ;;  %v2028_v4 = vsel %vm283_vm4, %v15468_v63, %v13403_v43  ;;  %11972 = vmatmul.mubr.msk.bf16.gmra.mrb[76].mxu0 %vm355_vm6, %v2037_v46  ;;  %11996 = vmatmul.mubr.msk.bf16.gmra.mrb[52].mxu1 %vm355_vm6, %v2037_v46  ;;  %v13848_v63 = vld [vmem:[%s18142_s10 + $0x30] sm:$0xff]   ;;  %v13849_v40 = vld [vmem:[%s18142_s10 + $0x38] sm:$0xff]  }
 0x83d   :  { %11975 = vmatprep.mubr.msk.bf16.mxu0 %vm14621_vm3, %v14620_v15  ;;  %11999 = vmatprep.mubr.msk.bf16.mxu1 %vm14621_vm3, %v14620_v15  ;;  %v2034_v44 = vsel %vm290_vm5, %v2028_v4, %v13408_v47  ;;  %v2035_v52 = vsel %vm290_vm5, %v2029_v48, %v13409_v35 }
 0x83e   :  { %v2038_v22 = vpack.c.bf16 %v2035_v52, %v2034_v44  ;;  %12004 = vmatpush3.bf16.msra.mxu1 %v13848_v63 }
 0x83f   :  { %12005 = vmatprep.subr.bf16.mxu1 %v14620_v15 }
 0x842   :  { %12006 = vmatpush3.bf16.msra.mxu1 %v13849_v40 }
 0x843   :  { %12060 = vmatprep.subr.bf16.mxu1 %v14620_v15 }
 0x844   :  { %11976 = vmatmul.mubr.msk.bf16.gmra.mrb[80].mxu0 %vm355_vm6, %v2038_v22  ;;  %12000 = vmatmul.mubr.msk.bf16.gmra.mrb[56].mxu1 %vm355_vm6, %v2038_v22 }
 0x845   :  { %12007 = vmatprep.mubr.msk.bf16.mxu1 %vm14621_vm3, %v14620_v15 }
 0x906   :  { %v2139_v59 = vpop.f32.mrb[72].mxu0  ;;  %v2253_v37 = vpop.f32.mrb[48].mxu1 }
 0x907   :  { %v2254_v39 = vadd.f32 %v10313_v33, %v2253_v37  ;;  %v11969_v19 = vpop.f32.mrb[73].mxu0  ;;  %v11993_v32 = vpop.f32.mrb[49].mxu1  ;;  %v2140_v56 = vadd.f32 %v10290_v27, %v2139_v59 }
 0x908   :  { %v2142_v31 = vpop.f32.mrb[74].mxu0  ;;  %v2256_v58 = vpop.f32.mrb[50].mxu1 }
 0x909   :  { %v10323_v14 = vmul.f32 -1.442695, %v2254_v39  ;;  %v2257_v12 = vadd.f32 %v10313_v33, %v2256_v58  ;;  %v11970_v17 = vpop.f32.mrb[75].mxu0  ;;  %v11994_v18 = vpop.f32.mrb[51].mxu1  ;;  %v2143_v20 = vadd.f32 %v10290_v27, %v2142_v31 }
 0x90b   :  { %14144 = vpow2.f32 %v10323_v14  ;;  %v10324_v60 = vmul.f32 -1.442695, %v2257_v12 }
 0x90d   :  { %14146 = vpow2.f32 %v10324_v60 }
 0x90f   :  { %v2147_v53 = vpop.f32.mrb[76].mxu0  ;;  %v2261_v26 = vpop.f32.mrb[52].mxu1 }
 0x910   :  { %v2262_v9 = vadd.f32 %v10313_v33, %v2261_v26  ;;  %v11973_v11 = vpop.f32.mrb[77].mxu0  ;;  %v11997_v38 = vpop.f32.mrb[53].mxu1  ;;  %v2148_v21 = vadd.f32 %v10290_v27, %v2147_v53 }
 0x911   :  { %v2150_v28 = vpop.f32.mrb[78].mxu0  ;;  %v2264_v30 = vpop.f32.mrb[54].mxu1 }
 0x912   :  { %v10325_v55 = vmul.f32 -1.442695, %v2262_v9  ;;  %v2265_v16 = vadd.f32 %v10313_v33, %v2264_v30  ;;  %v11974_v24 = vpop.f32.mrb[79].mxu0  ;;  %v11998_v6 = vpop.f32.mrb[55].mxu1  ;;  %v2151_v41 = vadd.f32 %v10290_v27, %v2150_v28 }
 0x914   :  { %14148 = vpow2.f32 %v10325_v55  ;;  %v10326_v36 = vmul.f32 -1.442695, %v2265_v16 }
 0x915   :  { %v14145_v10 = vpop.eup %14144 }
 0x916   :  { %v2300_v42 = vadd.f32 1.0, %v14145_v10  ;;  %14150 = vpow2.f32 %v10326_v36 }
 0x917   :  { %v14147_v43 = vpop.eup %14146  ;;  %14152 = vtanh.f32 %v2140_v56  ;;  %v2155_v46 = vpop.f32.mrb[80].mxu0 }
 0x918   :  { %v2269_v35 = vpop.f32.mrb[56].mxu1  ;;  %14154 = vrcp.f32 %v2300_v42  ;;  %v2301_v47 = vadd.f32 1.0, %v14147_v43  ;;  %v11977_v4 = vpop.f32.mrb[81].mxu0  ;;  %v2156_v14 = vadd.f32 %v10290_v27, %v2155_v46  ;;  %v10123_v43 = vld [vmem:[%s18147_s11] ss:$0 sm:$0xff] }
 0x919   :  { %v2270_v48 = vadd.f32 %v10313_v33, %v2269_v35  ;;  %v12001_v44 = vpop.f32.mrb[57].mxu1  ;;  %14156 = vtanh.f32 %v2143_v20  ;;  %v2158_v52 = vpop.f32.mrb[82].mxu0  ;;  %v10197_v46 = vld [vmem:[%s18147_s11 + $0x1] ss:$0 sm:$0xff]  ;;  %v10334_v4 = vld [vmem:[%s18147_s11 + $0x3] ss:$0 sm:$0xff] }
 0x91a   :  { %v2272_v22 = vpop.f32.mrb[58].mxu1  ;;  %14158 = vrcp.f32 %v2301_v47  ;;  %v11978_v62 = vpop.f32.mrb[83].mxu0  ;;  %v2159_v18 = vadd.f32 %v10290_v27, %v2158_v52  ;;  %v13031_v35 = vadd.f32 %v10197_v46, %v10123_v43  ;;  %v10271_v47 = vld [vmem:[%s18147_s11 + $0x2] ss:$0 sm:$0xff] }
 0x91b   :  { %v10327_v63 = vmul.f32 -1.442695, %v2270_v48  ;;  %v2273_v40 = vadd.f32 %v10313_v33, %v2272_v22  ;;  %v12002_v50 = vpop.f32.mrb[59].mxu1 }
 0x91c   :  { %v13032_v48 = vadd.f32 %v13031_v35, %v10271_v47 }
 0x91d   :  { %14160 = vpow2.f32 %v10327_v63  ;;  %v10328_v61 = vmul.f32 -1.442695, %v2273_v40 }
 0x91e   :  { %v14149_v8 = vpop.eup %14148  ;;  %v13033_v44 = vadd.f32 %v13032_v48, %v10334_v4 }
 0x91f   :  { %14162 = vpow2.f32 %v10328_v61  ;;  %v2302_v59 = vadd.f32 1.0, %v14149_v8 }
 0x920   :  { %v14151_v37 = vpop.eup %14150  ;;  %14164 = vtanh.f32 %v2148_v21 }
 0x921   :  { %v14153_v39 = vpop.eup %14152  ;;  %14166 = vrcp.f32 %v2302_v59  ;;  %v2303_v19 = vadd.f32 1.0, %v14151_v37 }
 0x922   :  { %v14155_v32 = vpop.eup %14154  ;;  %14168 = vtanh.f32 %v2151_v41 }
 0x923   :  { %v14157_v31 = vpop.eup %14156  ;;  %v2318_v58 = vmul.f32 %v14155_v32, %v14153_v39  ;;  %14170 = vrcp.f32 %v2303_v19 }
 0x924   :  { %v14159_v33 = vpop.eup %14158  ;;  %14172 = vtanh.f32 %v2156_v14 }
 0x925   :  { %v2319_v12 = vmul.f32 %v14159_v33, %v14157_v31 }
 0x927   :  { %v14161_v17 = vpop.eup %14160  ;;  %v2324_v53 = vpack.c.bf16 %v2319_v12, %v2318_v58 }
 0x928   :  { %v2304_v60 = vadd.f32 1.0, %v14161_v17 }
 0x929   :  { %v14163_v26 = vpop.eup %14162  ;;  %12008 = vmatmul.mubr.msk.bf16.vlgmr.msra.gmra.mrb[12].mxu1 %vm283_vm4, %v2324_v53 }
 0x92a   :  { %14174 = vrcp.f32 %v2304_v60  ;;  %v2305_v9 = vadd.f32 1.0, %v14163_v26  ;;  %v14165_v11 = vpop.eup %14164  ;;  %12011 = vmatprep.mubr.msk.bf16.mxu1 %vm14621_vm3, %v14620_v15  ;;  %v10340_v26 = vld [vmem:[%s18148_s13] ss:$0 sm:$0xff] }
 0x92b   :  { %14176 = vtanh.f32 %v2159_v18  ;;  %v14167_v38 = vpop.eup %14166 }
 0x92c   :  { %14178 = vrcp.f32 %v2305_v9  ;;  %v14169_v28 = vpop.eup %14168  ;;  %v2320_v30 = vmul.f32 %v14167_v38, %v14165_v11 }
 0x92d   :  { %v14171_v55 = vpop.eup %14170 }
 0x92e   :  { %v2321_v16 = vmul.f32 %v14171_v55, %v14169_v28  ;;  %v14173_v24 = vpop.eup %14172  ;;  %v2575_v55 = vpop.permute.xlu1 %2574 }
 0x930   :  { %v2325_v27 = vpack.c.bf16 %v2321_v16, %v2320_v30 }
 0x932   :  { %12012 = vmatmul.mubr.msk.bf16.gmra.mrb[16].mxu1 %vm283_vm4, %v2325_v27  ;;  %v2573_v27 = vpop.permute.xlu0 %2572  ;;  %v2579_v46 = vpop.permute.xlu1 %2578 }
 0x933   :  { %12015 = vmatprep.mubr.msk.bf16.mxu1 %vm14621_vm3, %v14620_v15 }
 0x934   :  { %v14175_v6 = vpop.eup %14174 }
 0x935   :  { %v14177_v56 = vpop.eup %14176  ;;  %v2322_v36 = vmul.f32 %v14175_v6, %v14173_v24 }
 0x936   :  { %v14179_v10 = vpop.eup %14178  ;;  %v2577_v35 = vpop.permute.xlu0 %2576 }
 0x937   :  { %v2323_v20 = vmul.f32 %v14179_v10, %v14177_v56 }
 0x939   :  { %v2326_v42 = vpack.c.bf16 %v2323_v20, %v2322_v36 }
 0x93b   :  { %12016 = vmatmul.mubr.msk.bf16.gmra.mrb[20].mxu1 %vm283_vm4, %v2326_v42 }
 0x93c   :  { %12072 = vmatprep.mubr.msk.bf16.mxu1 %vm14621_vm3, %v14620_v15 }
 0x9fc   :  { %v2395_v52 = vpop.f32.mrb[12].mxu1 }
 0x9fd   :  { %v13034_v22 = vadd.f32 %v13033_v44, %v2395_v52  ;;  %v12009_v63 = vpop.f32.mrb[13].mxu1 }
 0x9fe   :  { %v2398_v40 = vpop.f32.mrb[14].mxu1 }
 0x9ff   :  { %v2424_v62 = vmul.f32 %v13034_v22, %v14818_v51  ;;  %v13038_v50 = vadd.f32 %v13033_v44, %v2398_v40  ;;  %v12010_v21 = vpop.f32.mrb[15].mxu1  ;;  %v2581_v40 = vpop.permute.xlu0 %2580 }
 0xa00   :  { %v2583_v21 = vpop.permute.xlu1 %2582 }
 0xa01   :  { %v2425_v61 = vmul.f32 %v13038_v50, %v14815_v49  ;;  %12027 = vmatprep.mubr.msk.f32.mxu0 %vm283_vm4, %v2424_v62 }
 0xa03   :  { %12028 = vmatmul.mubr.msk.f32.vlgmr.msra.gmra.mrb[84].mxu0 %vm283_vm4, %v2425_v61 }
 0xa05   :  { %v2403_v8 = vpop.f32.mrb[16].mxu1 }
 0xa06   :  { %v13042_v41 = vadd.f32 %v13033_v44, %v2403_v8  ;;  %v12013_v59 = vpop.f32.mrb[17].mxu1  ;;  %v13850_v8 = vld [vmem:[%s18138_s6 + $0xc0] sm:$0xff]  }
 0xa07   :  { %v2406_v37 = vpop.f32.mrb[18].mxu1  ;;  %12061 = vmatpush3.bf16.msra.mxu1 %v13850_v8  ;;  %v13852_v59 = vld [vmem:[%s18138_s6 + $0xc8] sm:$0xff]  }
 0xa08   :  { %v2426_v39 = vmul.f32 %v13042_v41, %v14828_v57  ;;  %v13046_v19 = vadd.f32 %v13033_v44, %v2406_v37  ;;  %v12014_v32 = vpop.f32.mrb[19].mxu1  ;;  %v13851_v41 = vld [vmem:[%s18137_s4 + $0xc0] sm:$0xff]   ;;  %v13853_v37 = vld [vmem:[%s18137_s4 + $0xc8] sm:$0xff]   ;;  %12062 = vmatprep.subr.bf16.mxu1 %v14620_v15 }
 0xa09   :  { %12037 = vmatpush3.bf16.msra.mxu0 %v13851_v41  ;;  %v13856_v32 = vld [vmem:[%s18138_s6 + $0xd8] sm:$0xff]  }
 0xa0a   :  { %v2427_v31 = vmul.f32 %v13046_v19, %v14873_v29  ;;  %12030 = vmatprep.mubr.msk.f32.mxu0 %vm283_vm4, %v2426_v39  ;;  %12038 = vmatprep.subr.bf16.mxu0 %v14620_v15  ;;  %v13854_v39 = vld [vmem:[%s18138_s6 + $0xd0] sm:$0xff]  }
 0xa0b   :  { %12063 = vmatpush3.bf16.msra.mxu1 %v13852_v59  ;;  %v13855_v19 = vld [vmem:[%s18137_s4 + $0xd0] sm:$0xff]   ;;  %v13860_v59 = vld [vmem:[%s18138_s6 + $0xe8] sm:$0xff]  }
 0xa0c   :  { %12031 = vmatmul.mubr.msk.f32.gmra.mrb[86].mxu0 %vm283_vm4, %v2427_v31  ;;  %12064 = vmatprep.subr.bf16.mxu1 %v14620_v15  ;;  %v13857_v31 = vld [vmem:[%s18137_s4 + $0xd8] sm:$0xff]  }
 0xa0d   :  { %12039 = vmatpush3.bf16.msra.mxu0 %v13853_v37  ;;  %v13861_v37 = vld [vmem:[%s18137_s4 + $0xe8] sm:$0xff]  }
 0xa0e   :  { %v2411_v58 = vpop.f32.mrb[20].mxu1  ;;  %12040 = vmatprep.subr.bf16.mxu0 %v14620_v15 }
 0xa0f   :  { %v13050_v33 = vadd.f32 %v13033_v44, %v2411_v58  ;;  %v12017_v14 = vpop.f32.mrb[21].mxu1  ;;  %12065 = vmatpush3.bf16.msra.mxu1 %v13854_v39  ;;  %v13858_v58 = vld [vmem:[%s18138_s6 + $0xe0] sm:$0xff]  }
 0xa10   :  { %v2414_v12 = vpop.f32.mrb[22].mxu1  ;;  %12066 = vmatprep.subr.bf16.mxu1 %v14620_v15  ;;  %v10347_v14 = vld [vmem:[%s18139_s2 + $0x2] sm:$0x3] }
 0xa11   :  { %v2428_v17 = vmul.f32 %v13050_v33, %v14879_v34  ;;  %v13054_v18 = vadd.f32 %v13033_v44, %v2414_v12  ;;  %v12018_v60 = vpop.f32.mrb[23].mxu1  ;;  %12041 = vmatpush3.bf16.msra.mxu0 %v13855_v19  ;;  %v13859_v33 = vld [vmem:[%s18137_s4 + $0xe0] sm:$0xff]  }
 0xa12   :  { %12042 = vmatprep.subr.bf16.mxu0 %v14620_v15 }
 0xa13   :  { %v2429_v53 = vmul.f32 %v13054_v18, %v14899_v2  ;;  %12033 = vmatprep.mubr.msk.f32.mxu0 %vm283_vm4, %v2428_v17  ;;  %12067 = vmatpush3.bf16.msra.mxu1 %v13856_v32  ;;  %v2631_v17 = vrot.slane %v10347_v14, %v14771_v23  ;;  %v2665_v18 = vrot.slane %v10347_v14, %v14777_v25 }
 0xa14   :  { %12068 = vmatprep.subr.bf16.mxu1 %v14620_v15 }
 0xa15   :  { %12034 = vmatmul.mubr.msk.f32.gmra.mrb[88].mxu0 %vm283_vm4, %v2429_v53 }
 0xa16   :  { %12048 = vmatprep.mubr.msk.bf16.mxu0 %vm14621_vm3, %v14620_v15  ;;  %12043 = vmatpush3.bf16.msra.mxu0 %v13857_v31 }
 0xa17   :  { %12044 = vmatprep.subr.bf16.mxu0 %v14620_v15  ;;  %12069 = vmatpush3.bf16.msra.mxu1 %v13858_v58 }
 0xa18   :  { %12070 = vmatprep.subr.bf16.mxu1 %v14620_v15 }
 0xa1a   :  { %12045 = vmatpush3.bf16.msra.mxu0 %v13859_v33 }
 0xa1b   :  { %12046 = vmatprep.subr.bf16.mxu0 %v14620_v15  ;;  %12071 = vmatpush3.bf16.msra.mxu1 %v13860_v59 }
 0xa1c   :  { %12100 = vmatprep.subr.bf16.mxu1 %v14620_v15 }
 0xa1e   :  { %12047 = vmatpush3.bf16.msra.mxu0 %v13861_v37 }
 0xa1f   :  { %12084 = vmatprep.subr.bf16.mxu0 %v14620_v15 }
 0xad6   :  { %v12029_v9 = vpop.f32.mrb[84].mxu0 }
 0xad7   :  { %v2531_v11 = vadd.f32 %v12029_v9, %v10340_v26  ;;  %v2525_v38 = vpop.f32.mrb[85].mxu0 }
 0xad8   :  { %v2526_v28 = vadd.f32 %v10340_v26, %v2525_v38 }
 0xad9   :  { %v2555_v30 = vmul.f32 %v2531_v11, %v14815_v49  ;;  %v15715_v11 = vld [vmem:[%s18140_s3 + $0x1] ss:$0 sm:$0xff] }
 0xada   :  { %v2554_v16 = vmul.f32 %v2526_v28, %v14818_v51 }
 0xadb   :  { %v15633_v24 = vadd.f32 %v2575_v55, %v2555_v30 }
 0xadc   :  { %v15635_v6 = vadd.f32 %v2573_v27, %v2554_v16 }
 0xadd   :  { %2605 = vperm.xlu1 %13289, %v15633_v24  }
 0xade   :  { %2600 = vperm.xlu0 %13287, %v15635_v6  }
 0xadf   :  { %v12032_v56 = vpop.f32.mrb[86].mxu0 }
 0xae0   :  { %v2541_v36 = vadd.f32 %v12032_v56, %v10340_v26  ;;  %v2535_v10 = vpop.f32.mrb[87].mxu0 }
 0xae1   :  { %v2536_v20 = vadd.f32 %v10340_v26, %v2535_v10  ;;  %13410 = vset.pattern.permute.xlu1 %v14618_v0 }
 0xae2   :  { %v2557_v42 = vmul.f32 %v2541_v36, %v14873_v29  ;;  %2639 = vperm.xlu1 %13410, %v15635_v6  }
 0xae3   :  { %v2556_v43 = vmul.f32 %v2536_v20, %v14828_v57 }
 0xae4   :  { %v15645_v48 = vadd.f32 %v2579_v46, %v2557_v42 }
 0xae5   :  { %v15643_v47 = vadd.f32 %v2577_v35, %v2556_v43 }
 0xae6   :  { %13412 = vset.pattern.permute.xlu1 %v14619_v1 }
 0xae7   :  { %2610 = vperm.xlu0 %13287, %v15643_v47   ;;  %2615 = vperm.xlu1 %13412, %v15645_v48  }
 0xae8   :  { %v12035_v4 = vpop.f32.mrb[88].mxu0 }
 0xae9   :  { %v2545_v44 = vpop.f32.mrb[89].mxu0  ;;  %v2551_v22 = vadd.f32 %v12035_v4, %v10340_v26 }
 0xaea   :  { %v2546_v52 = vadd.f32 %v10340_v26, %v2545_v44 }
 0xaeb   :  { %13411 = vset.pattern.permute.xlu0 %v14618_v0  ;;  %13413 = vset.pattern.permute.xlu1 %v14618_v0  ;;  %v2559_v62 = vmul.f32 %v2551_v22, %v14899_v2 }
 0xaec   :  { %v2558_v63 = vmul.f32 %v2546_v52, %v14879_v34  ;;  %2643 = vperm.xlu0 %13411, %v15633_v24   ;;  %2647 = vperm.xlu1 %13413, %v15643_v47  }
 0xaed   :  { %v15661_v61 = vadd.f32 %v2583_v21, %v2559_v62 }
 0xaee   :  { %v15656_v50 = vadd.f32 %v2581_v40, %v2558_v63 }
 0xaf0   :  { %13414 = vset.pattern.permute.xlu0 %v14619_v1  ;;  %2651 = vperm.xlu1 %13413, %v15645_v48  }
 0xaf1   :  { %2620 = vperm.xlu0 %13414, %v15656_v50  }
 0xaf4   :  { %2655 = vperm.xlu1 %13413, %v15656_v50  }
 0xaf5   :  { %2625 = vperm.xlu0 %13414, %v15661_v61  }
 0xaf8   :  { %2659 = vperm.xlu1 %13413, %v15661_v61  }
 0xafc   :  { %13535 = vset.pattern.permute.xlu1 %v14619_v1 }
 0xb5c   :  { %v2606_v12 = vpop.permute.xlu1 %2605 }
 0xb5d   :  { %v2601_v60 = vpop.permute.xlu0 %2600  ;;  %v2633_v36 = vmul.f32 %v2631_v17, %v2606_v12 }
 0xb5e   :  { %v2632_v26 = vmul.f32 %v2631_v17, %v2601_v60 }
 0xb61   :  { %v2640_v53 = vpop.permute.xlu1 %2639 }
 0xb62   :  { %v2666_v9 = vmul.f32 %v2665_v18, %v2640_v53 }
 0xb64   :  { %v2672_v38 = vadd.f32 %v2666_v9, %v2632_v26 }
 0xb66   :  { %v2686_v28 = vadd.f32 %v15715_v11, %v2672_v38  ;;  %v2611_v30 = vpop.permute.xlu0 %2610  ;;  %v2616_v55 = vpop.permute.xlu1 %2615 }
 0xb67   :  { %v2634_v10 = vmul.f32 %v2631_v17, %v2611_v30  ;;  %v2635_v44 = vmul.f32 %v2631_v17, %v2616_v55 }
 0xb68   :  { %v15719_v16 = vmul.f32 %v2686_v28, %v14818_v51 }
 0xb6a   :  { %v2704_v43 = vrot.slane %v15719_v16, 7 }
 0xb6b   :  { %v2644_v27 = vpop.permute.xlu0 %2643  ;;  %v2648_v56 = vpop.permute.xlu1 %2647 }
 0xb6c   :  { %v2667_v20 = vmul.f32 %v2665_v18, %v2644_v27  ;;  %v2668_v42 = vmul.f32 %v2665_v18, %v2648_v56  ;;  %v15731_v41 = vsel %vm196_vm0, 0.0, %v2704_v43 }
 0xb6d   :  { %v2757_v12 = vrot.slane %v15731_v41, 2  ;;  %v2726_v60 = vrot.slane %v15731_v41, 1 }
 0xb6e   :  { %v2673_v46 = vadd.f32 %v2667_v20, %v2633_v36  ;;  %v2674_v35 = vadd.f32 %v2668_v42, %v2634_v10 }
 0xb6f   :  { %v2652_v4 = vpop.permute.xlu1 %2651 }
 0xb70   :  { %v2687_v52 = vadd.f32 %v15715_v11, %v2673_v46  ;;  %v2688_v22 = vadd.f32 %v15715_v11, %v2674_v35  ;;  %v2669_v63 = vmul.f32 %v2665_v18, %v2652_v4  ;;  %v2621_v40 = vpop.permute.xlu0 %2620 }
 0xb71   :  { %v2636_v39 = vmul.f32 %v2631_v17, %v2621_v40 }
 0xb72   :  { %v15725_v62 = vmul.f32 %v2687_v52, %v14815_v49  ;;  %v15728_v21 = vmul.f32 %v2688_v22, %v14828_v57  ;;  %v2675_v8 = vadd.f32 %v2669_v63, %v2635_v44 }
 0xb73   :  { %v2656_v19 = vpop.permute.xlu1 %2655 }
 0xb74   :  { %v2705_v32 = vrot.slane %v15725_v62, 7  ;;  %v2707_v31 = vrot.slane %v15728_v21, 7  ;;  %v2689_v58 = vadd.f32 %v15715_v11, %v2675_v8  ;;  %v2670_v33 = vmul.f32 %v2665_v18, %v2656_v19  ;;  %v2626_v14 = vpop.permute.xlu0 %2625 }
 0xb75   :  { %v2637_v20 = vmul.f32 %v2631_v17, %v2626_v14 }
 0xb76   :  { %v15747_v53 = vmul.f32 %v2689_v58, %v14873_v29  ;;  %v2676_v26 = vadd.f32 %v2670_v33, %v2636_v39  ;;  %v2706_v9 = vsel %vm196_vm0, %v2704_v43, %v2705_v32  ;;  %v15751_v38 = vsel %vm196_vm0, %v2705_v32, %v2707_v31 }
 0xb77   :  { %v2660_v28 = vpop.permute.xlu1 %2659  ;;  %v2758_v30 = vrot.slane %v2706_v9, 2  ;;  %v2760_v55 = vrot.slane %v15751_v38, 2  ;;  %v2727_v27 = vrot.slane %v2706_v9, 1  ;;  %v2729_v56 = vrot.slane %v15751_v38, 1 }
 0xb78   :  { %v2709_v36 = vrot.slane %v15747_v53, 7  ;;  %v2690_v10 = vadd.f32 %v15715_v11, %v2676_v26  ;;  %v2671_v42 = vmul.f32 %v2665_v18, %v2660_v28 }
 0xb79   :  { %v2759_v46 = vsel %vm251_vm1, %v2757_v12, %v2758_v30  ;;  %v2761_v43 = vsel %vm251_vm1, %v2758_v30, %v2760_v55  ;;  %v2728_v35 = vsel %vm219_vm2, %v2726_v60, %v2727_v27  ;;  %v2730_v4 = vsel %vm219_vm2, %v2727_v27, %v2729_v56 }
 0xb7a   :  { %v15762_v44 = vmul.f32 %v2690_v10, %v14879_v34  ;;  %v2677_v52 = vadd.f32 %v2671_v42, %v2637_v20  ;;  %v13420_v22 = vpack.i.bf16 %v2761_v43, %v2759_v46  ;;  %v13415_v63 = vpack.i.bf16 %v2730_v4, %v2728_v35 }
 0xb7b   :  { %v2710_v40 = vsel %vm196_vm0, %v2707_v31, %v2709_v36 }
 0xb7c   :  { %v2711_v8 = vrot.slane %v15762_v44, 7  ;;  %v2691_v17 = vadd.f32 %v15715_v11, %v2677_v52  ;;  %13421 = vrot.lane.b32.xlu1 %v13420_v22, %s14622_s15  ;;  %13416 = vrot.lane.b32.xlu0 %v13415_v63, %s14623_s16  ;;  %v2762_v18 = vrot.slane %v2710_v40, 2  ;;  %v2731_v59 = vrot.slane %v2710_v40, 1 }
 0xb7e   :  { %v15770_v37 = vmul.f32 %v2691_v17, %v14899_v2  ;;  %v2712_v39 = vsel %vm196_vm0, %v2709_v36, %v2711_v8  ;;  %v2763_v31 = vsel %vm251_vm1, %v2760_v55, %v2762_v18  ;;  %v2732_v11 = vsel %vm219_vm2, %v2729_v56, %v2731_v59 }
 0xb7f   :  { %v2764_v19 = vrot.slane %v2712_v39, 2  ;;  %v2733_v32 = vrot.slane %v2712_v39, 1 }
 0xb80   :  { %v2713_v58 = vrot.slane %v15770_v37, 7 }
 0xb81   :  { %v2765_v33 = vsel %vm251_vm1, %v2762_v18, %v2764_v19  ;;  %v2734_v14 = vsel %vm219_vm2, %v2731_v59, %v2733_v32 }
 0xb82   :  { %v13430_v12 = vpack.i.bf16 %v2765_v33, %v2763_v31  ;;  %v13425_v60 = vpack.i.bf16 %v2734_v14, %v2732_v11  ;;  %v2714_v26 = vsel %vm196_vm0, %v2711_v8, %v2713_v58  ;;  %v2723_v28 = vsel %vm196_vm0, %v2713_v58, 0.0 }
 0xb83   :  { %v2766_v30 = vrot.slane %v2714_v26, 2  ;;  %v2768_v27 = vrot.slane %v2723_v28, 2  ;;  %v2735_v36 = vrot.slane %v2714_v26, 1  ;;  %v2737_v10 = vrot.slane %v2723_v28, 1 }
 0xb84   :  { %13431 = vrot.lane.b32.xlu1 %v13430_v12, %s14622_s15  ;;  %13426 = vrot.lane.b32.xlu0 %v13425_v60, %s14623_s16 }
 0xb85   :  { %v2767_v55 = vsel %vm251_vm1, %v2764_v19, %v2766_v30  ;;  %v2769_v56 = vsel %vm251_vm1, %v2766_v30, %v2768_v27  ;;  %v2736_v20 = vsel %vm219_vm2, %v2733_v32, %v2735_v36  ;;  %v2738_v42 = vsel %vm219_vm2, %v2735_v36, %v2737_v10 }
 0xb86   :  { %v13440_v46 = vpack.i.bf16 %v2769_v56, %v2767_v55  ;;  %v13435_v43 = vpack.i.bf16 %v2738_v42, %v2736_v20 }
 0xb88   :  { %13441 = vrot.lane.b32.xlu1 %v13440_v46, %s14622_s15  ;;  %13436 = vrot.lane.b32.xlu0 %v13435_v43, %s14623_s16 }
 0xbee   :  { %v13422_v35 = vpop.permute.xlu1 %13421  ;;  %v13417_v4 = vpop.permute.xlu0 %13416 }
 0xbef   :  { %v13424_v52 = vunpack.i.h.bf16 %v13422_v35  ;;  %v13423_v22 = vunpack.i.l.bf16 %v13422_v35  ;;  %v13419_v63 = vunpack.i.h.bf16 %v13417_v4  ;;  %v13418_v8 = vunpack.i.l.bf16 %v13417_v4  ;;  %v13863_v35 = vld [vmem:[%s18141_s8 + $0x38] sm:$0xff]   ;;  %v13865_v4 = vld [vmem:[%s18142_s10 + $0x48] sm:$0xff]  }
 0xbf1   :  { %v2789_v17 = vsel %vm283_vm4, %v2706_v9, %v13419_v63  ;;  %v2788_v18 = vsel %vm283_vm4, %v15731_v41, %v13418_v8 }
 0xbf2   :  { %v2795_v59 = vsel %vm290_vm5, %v2789_v17, %v13424_v52  ;;  %v2794_v19 = vsel %vm290_vm5, %v2788_v18, %v13423_v22  ;;  %v10386_v52 = vld [vmem:[%s18143_s7 + $0x4] ss:$0 sm:$0xff] }
 0xbf3   :  { %v2800_v32 = vpack.c.bf16 %v2795_v59, %v2794_v19 }
 0xbf5   :  { %12049 = vmatmul.mubr.msk.bf16.vlgmr.msra.gmra.mrb[92].mxu0 %vm355_vm6, %v2800_v32  ;;  %12073 = vmatmul.mubr.msk.bf16.vlgmr.msra.gmra.mrb[60].mxu1 %vm355_vm6, %v2800_v32 }
 0xbf6   :  { %v13432_v58 = vpop.permute.xlu1 %13431  ;;  %v13427_v31 = vpop.permute.xlu0 %13426  ;;  %12052 = vmatprep.mubr.msk.bf16.mxu0 %vm14621_vm3, %v14620_v15  ;;  %12076 = vmatprep.mubr.msk.bf16.mxu1 %vm14621_vm3, %v14620_v15 }
 0xbf7   :  { %v13434_v9 = vunpack.i.h.bf16 %v13432_v58  ;;  %v13433_v33 = vunpack.i.l.bf16 %v13432_v58  ;;  %v13429_v41 = vunpack.i.h.bf16 %v13427_v31  ;;  %v13428_v11 = vunpack.i.l.bf16 %v13427_v31 }
 0xbf9   :  { %v2791_v14 = vsel %vm283_vm4, %v2710_v40, %v13429_v41  ;;  %v2790_v12 = vsel %vm283_vm4, %v15751_v38, %v13428_v11 }
 0xbfa   :  { %v13442_v60 = vpop.permute.xlu1 %13441  ;;  %v13437_v28 = vpop.permute.xlu0 %13436  ;;  %v2796_v30 = vsel %vm290_vm5, %v2790_v12, %v13433_v33  ;;  %v2797_v27 = vsel %vm290_vm5, %v2791_v14, %v13434_v9  ;;  %v10363_v14 = vld [vmem:[%s18144_s5 + $0x4] ss:$0 sm:$0xff] }
 0xbfb   :  { %v13439_v36 = vunpack.i.h.bf16 %v13437_v28  ;;  %v13438_v10 = vunpack.i.l.bf16 %v13437_v28  ;;  %v2801_v55 = vpack.c.bf16 %v2797_v27, %v2796_v30  ;;  %v13444_v56 = vunpack.i.h.bf16 %v13442_v60 }
 0xbfc   :  { %v13443_v20 = vunpack.i.l.bf16 %v13442_v60 }
 0xbfd   :  { %v2793_v42 = vsel %vm283_vm4, %v2714_v26, %v13439_v36  ;;  %v2792_v46 = vsel %vm283_vm4, %v2712_v39, %v13438_v10  ;;  %12053 = vmatmul.mubr.msk.bf16.gmra.mrb[96].mxu0 %vm355_vm6, %v2801_v55  ;;  %12077 = vmatmul.mubr.msk.bf16.gmra.mrb[64].mxu1 %vm355_vm6, %v2801_v55  ;;  %v13862_v39 = vld [vmem:[%s18141_s8 + $0x30] sm:$0xff]   ;;  %v13864_v26 = vld [vmem:[%s18142_s10 + $0x40] sm:$0xff]  }
 0xbfe   :  { %12056 = vmatprep.mubr.msk.bf16.mxu0 %vm14621_vm3, %v14620_v15  ;;  %12080 = vmatprep.mubr.msk.bf16.mxu1 %vm14621_vm3, %v14620_v15  ;;  %v2798_v38 = vsel %vm290_vm5, %v2792_v46, %v13443_v20  ;;  %v2799_v40 = vsel %vm290_vm5, %v2793_v42, %v13444_v56 }
 0xbff   :  { %v2802_v43 = vpack.c.bf16 %v2799_v40, %v2798_v38  ;;  %12085 = vmatpush3.bf16.msra.mxu0 %v13862_v39  ;;  %12101 = vmatpush3.bf16.msra.mxu1 %v13864_v26 }
 0xc00   :  { %12086 = vmatprep.subr.bf16.mxu0 %v14620_v15  ;;  %12102 = vmatprep.subr.bf16.mxu1 %v14620_v15 }
 0xc03   :  { %12087 = vmatpush3.bf16.msra.mxu0 %v13863_v35  ;;  %12103 = vmatpush3.bf16.msra.mxu1 %v13865_v4 }
 0xc04   :  { %12140 = vmatprep.subr.bf16.mxu1 %v14620_v15  ;;  %12116 = vmatprep.subr.bf16.mxu0 %v14620_v15 }
 0xc05   :  { %12057 = vmatmul.mubr.msk.bf16.gmra.mrb[100].mxu0 %vm355_vm6, %v2802_v43  ;;  %12081 = vmatmul.mubr.msk.bf16.gmra.mrb[68].mxu1 %vm355_vm6, %v2802_v43 }
 0xc06   :  { %12088 = vmatprep.mubr.msk.bf16.mxu0 %vm14621_vm3, %v14620_v15  ;;  %12104 = vmatprep.mubr.msk.bf16.mxu1 %vm14621_vm3, %v14620_v15 }
 0xcc8   :  { %v2903_v22 = vpop.f32.mrb[92].mxu0  ;;  %v3017_v63 = vpop.f32.mrb[60].mxu1 }
 0xcc9   :  { %v3018_v8 = vadd.f32 %v10386_v52, %v3017_v63  ;;  %v12050_v17 = vpop.f32.mrb[93].mxu0  ;;  %v12074_v18 = vpop.f32.mrb[61].mxu1  ;;  %v2904_v20 = vadd.f32 %v10363_v14, %v2903_v22 }
 0xcca   :  { %v2906_v59 = vpop.f32.mrb[94].mxu0  ;;  %v3020_v19 = vpop.f32.mrb[62].mxu1 }
 0xccb   :  { %v10396_v32 = vmul.f32 -1.442695, %v3018_v8  ;;  %v3021_v58 = vadd.f32 %v10386_v52, %v3020_v19  ;;  %v12051_v31 = vpop.f32.mrb[95].mxu0  ;;  %v12075_v9 = vpop.f32.mrb[63].mxu1  ;;  %v2907_v38 = vadd.f32 %v10363_v14, %v2906_v59 }
 0xccd   :  { %14180 = vpow2.f32 %v10396_v32  ;;  %v10397_v33 = vmul.f32 -1.442695, %v3021_v58 }
 0xccf   :  { %14182 = vpow2.f32 %v10397_v33 }
 0xcd0   :  { %v2911_v41 = vpop.f32.mrb[96].mxu0  ;;  %v3025_v11 = vpop.f32.mrb[64].mxu1 }
 0xcd1   :  { %v3026_v12 = vadd.f32 %v10386_v52, %v3025_v11  ;;  %v12054_v60 = vpop.f32.mrb[97].mxu0  ;;  %v12078_v28 = vpop.f32.mrb[65].mxu1  ;;  %v2912_v59 = vadd.f32 %v10363_v14, %v2911_v41 }
 0xcd2   :  { %v2914_v30 = vpop.f32.mrb[98].mxu0  ;;  %v3028_v27 = vpop.f32.mrb[66].mxu1 }
 0xcd3   :  { %v10398_v36 = vmul.f32 -1.442695, %v3026_v12  ;;  %v3029_v10 = vadd.f32 %v10386_v52, %v3028_v27  ;;  %v12055_v55 = vpop.f32.mrb[99].mxu0  ;;  %v12079_v56 = vpop.f32.mrb[67].mxu1  ;;  %v2915_v33 = vadd.f32 %v10363_v14, %v2914_v30 }
 0xcd5   :  { %14184 = vpow2.f32 %v10398_v36  ;;  %v10399_v42 = vmul.f32 -1.442695, %v3029_v10 }
 0xcd7   :  { %v14181_v46 = vpop.eup %14180  ;;  %14186 = vpow2.f32 %v10399_v42 }
 0xcd8   :  { %v3064_v40 = vadd.f32 1.0, %v14181_v46  ;;  %14188 = vtanh.f32 %v2904_v20  ;;  %v2919_v39 = vpop.f32.mrb[100].mxu0  ;;  %v3033_v26 = vpop.f32.mrb[68].mxu1 }
 0xcd9   :  { %v14183_v43 = vpop.eup %14182  ;;  %v3034_v4 = vadd.f32 %v10386_v52, %v3033_v26  ;;  %v12058_v63 = vpop.f32.mrb[101].mxu0  ;;  %v2920_v55 = vadd.f32 %v10363_v14, %v2919_v39 }
 0xcda   :  { %14190 = vrcp.f32 %v3064_v40  ;;  %v3065_v35 = vadd.f32 1.0, %v14183_v43  ;;  %v12082_v8 = vpop.f32.mrb[69].mxu1  ;;  %v2922_v17 = vpop.f32.mrb[102].mxu0 }
 0xcdb   :  { %14192 = vtanh.f32 %v2907_v38  ;;  %v3036_v18 = vpop.f32.mrb[70].mxu1  ;;  %v10400_v22 = vmul.f32 -1.442695, %v3034_v4  ;;  %v12059_v32 = vpop.f32.mrb[103].mxu0  ;;  %v2923_v20 = vadd.f32 %v10363_v14, %v2922_v17 }
 0xcdc   :  { %14194 = vrcp.f32 %v3065_v35  ;;  %v3037_v19 = vadd.f32 %v10386_v52, %v3036_v18  ;;  %v12083_v58 = vpop.f32.mrb[71].mxu1 }
 0xcdd   :  { %14196 = vpow2.f32 %v10400_v22  ;;  %v13866_v58 = vld [vmem:[%s18138_s6 + $0xf0] sm:$0xff]  }
 0xcde   :  { %v10401_v31 = vmul.f32 -1.442695, %v3037_v19 }
 0xcdf   :  { %v14185_v9 = vpop.eup %14184 }
 0xce0   :  { %14198 = vpow2.f32 %v10401_v31  ;;  %v3066_v11 = vadd.f32 1.0, %v14185_v9  ;;  %v13868_v31 = vld [vmem:[%s18138_s6 + $0xf8] sm:$0xff]  }
 0xce1   :  { %v14187_v12 = vpop.eup %14186  ;;  %14200 = vtanh.f32 %v2912_v59  ;;  %v13867_v59 = vld [vmem:[%s18137_s4 + $0xf0] sm:$0xff]   ;;  %v13869_v9 = vld [vmem:[%s18137_s4 + $0xf8] sm:$0xff]  }
 0xce2   :  { %v14189_v60 = vpop.eup %14188  ;;  %14202 = vrcp.f32 %v3066_v11  ;;  %v3067_v28 = vadd.f32 1.0, %v14187_v12  ;;  %v13871_v11 = vld [vmem:[%s18137_s4 + $0x100] sm:$0xff]   ;;  %v13872_v12 = vld [vmem:[%s18138_s6 + $0x108] sm:$0xff]  }
 0xce3   :  { %14204 = vtanh.f32 %v2915_v33  ;;  %v13870_v33 = vld [vmem:[%s18138_s6 + $0x100] sm:$0xff]  }
 0xce4   :  { %v14191_v27 = vpop.eup %14190  ;;  %14206 = vrcp.f32 %v3067_v28  ;;  %v13874_v28 = vld [vmem:[%s18138_s6 + $0x110] sm:$0xff]  }
 0xce5   :  { %v14193_v36 = vpop.eup %14192  ;;  %v3082_v10 = vmul.f32 %v14191_v27, %v14189_v60  ;;  %14208 = vtanh.f32 %v2920_v55  ;;  %v13873_v60 = vld [vmem:[%s18137_s4 + $0x108] sm:$0xff]   ;;  %v13875_v27 = vld [vmem:[%s18137_s4 + $0x110] sm:$0xff]  }
 0xce6   :  { %v14195_v52 = vpop.eup %14194 }
 0xce7   :  { %v3083_v56 = vmul.f32 %v14195_v52, %v14193_v36  ;;  %v14197_v41 = vpop.eup %14196  ;;  %v10407_v36 = vld [vmem:[%s18145_s9 + $0x3] ss:$0 sm:$0xff] }
 0xce8   :  { %v3068_v42 = vadd.f32 1.0, %v14197_v41 }
 0xce9   :  { %v3088_v46 = vpack.c.bf16 %v3083_v56, %v3082_v10 }
 0xcea   :  { %v14199_v30 = vpop.eup %14198  ;;  %14210 = vrcp.f32 %v3068_v42 }
 0xceb   :  { %v3069_v38 = vadd.f32 1.0, %v14199_v30  ;;  %12089 = vmatmul.mubr.msk.bf16.vlgmr.msra.gmra.mrb[104].mxu0 %vm283_vm4, %v3088_v46  ;;  %12105 = vmatmul.mubr.msk.bf16.vlgmr.msra.gmra.mrb[72].mxu1 %vm283_vm4, %v3088_v46  ;;  %v14201_v40 = vpop.eup %14200  ;;  %14212 = vtanh.f32 %v2923_v20 }
 0xcec   :  { %12092 = vmatprep.mubr.msk.bf16.mxu0 %vm14621_vm3, %v14620_v15  ;;  %12108 = vmatprep.mubr.msk.bf16.mxu1 %vm14621_vm3, %v14620_v15  ;;  %v14203_v43 = vpop.eup %14202 }
 0xced   :  { %14214 = vrcp.f32 %v3069_v38  ;;  %v14205_v14 = vpop.eup %14204  ;;  %v3084_v39 = vmul.f32 %v14203_v43, %v14201_v40  ;;  %12141 = vmatpush3.bf16.msra.mxu1 %v13866_v58  ;;  %12117 = vmatpush3.bf16.msra.mxu0 %v13867_v59 }
 0xcee   :  { %v14207_v26 = vpop.eup %14206  ;;  %12142 = vmatprep.subr.bf16.mxu1 %v14620_v15  ;;  %12118 = vmatprep.subr.bf16.mxu0 %v14620_v15 }
 0xcef   :  { %v3085_v35 = vmul.f32 %v14207_v26, %v14205_v14  ;;  %v14209_v63 = vpop.eup %14208 }
 0xcf1   :  { %v3089_v4 = vpack.c.bf16 %v3085_v35, %v3084_v39  ;;  %12143 = vmatpush3.bf16.msra.mxu1 %v13868_v31  ;;  %12119 = vmatpush3.bf16.msra.mxu0 %v13869_v9 }
 0xcf2   :  { %12144 = vmatprep.subr.bf16.mxu1 %v14620_v15  ;;  %12120 = vmatprep.subr.bf16.mxu0 %v14620_v15 }
 0xcf3   :  { %12093 = vmatmul.mubr.msk.bf16.gmra.mrb[108].mxu0 %vm283_vm4, %v3089_v4  ;;  %12109 = vmatmul.mubr.msk.bf16.gmra.mrb[76].mxu1 %vm283_vm4, %v3089_v4 }
 0xcf4   :  { %v14211_v8 = vpop.eup %14210  ;;  %12096 = vmatprep.mubr.msk.bf16.mxu0 %vm14621_vm3, %v14620_v15  ;;  %12112 = vmatprep.mubr.msk.bf16.mxu1 %vm14621_vm3, %v14620_v15 }
 0xcf5   :  { %v14213_v17 = vpop.eup %14212  ;;  %v3086_v18 = vmul.f32 %v14211_v8, %v14209_v63  ;;  %12145 = vmatpush3.bf16.msra.mxu1 %v13870_v33  ;;  %12121 = vmatpush3.bf16.msra.mxu0 %v13871_v11  ;;  %v13876_v8 = vld [vmem:[%s18138_s6 + $0x118] sm:$0xff]  }
 0xcf6   :  { %12146 = vmatprep.subr.bf16.mxu1 %v14620_v15  ;;  %12122 = vmatprep.subr.bf16.mxu0 %v14620_v15 }
 0xcf7   :  { %v14215_v22 = vpop.eup %14214 }
 0xcf8   :  { %v3087_v19 = vmul.f32 %v14215_v22, %v14213_v17  ;;  %v13877_v17 = vld [vmem:[%s18137_s4 + $0x118] sm:$0xff]  }
 0xcf9   :  { %12147 = vmatpush3.bf16.msra.mxu1 %v13872_v12  ;;  %12123 = vmatpush3.bf16.msra.mxu0 %v13873_v60 }
 0xcfa   :  { %v3090_v32 = vpack.c.bf16 %v3087_v19, %v3086_v18  ;;  %12148 = vmatprep.subr.bf16.mxu1 %v14620_v15  ;;  %12124 = vmatprep.subr.bf16.mxu0 %v14620_v15 }
 0xcfc   :  { %12097 = vmatmul.mubr.msk.bf16.gmra.mrb[112].mxu0 %vm283_vm4, %v3090_v32  ;;  %12113 = vmatmul.mubr.msk.bf16.gmra.mrb[80].mxu1 %vm283_vm4, %v3090_v32 }
 0xcfd   :  { %12128 = vmatprep.mubr.msk.bf16.mxu0 %vm14621_vm3, %v14620_v15  ;;  %12152 = vmatprep.mubr.msk.bf16.mxu1 %vm14621_vm3, %v14620_v15 }
 0xcfe   :  { %12149 = vmatpush3.bf16.msra.mxu1 %v13874_v28  ;;  %12125 = vmatpush3.bf16.msra.mxu0 %v13875_v27 }
 0xcff   :  { %12150 = vmatprep.subr.bf16.mxu1 %v14620_v15  ;;  %12126 = vmatprep.subr.bf16.mxu0 %v14620_v15 }
 0xd02   :  { %12151 = vmatpush3.bf16.msra.mxu1 %v13876_v8  ;;  %12127 = vmatpush3.bf16.msra.mxu0 %v13877_v17 }
 0xd03   :  { %12164 = vmatprep.subr.bf16.mxu0 %v14620_v15  ;;  %12180 = vmatprep.subr.bf16.mxu1 %v14620_v15 }
 0xdbe   :  { %v3159_v10 = vpop.f32.mrb[104].mxu0 }
 0xdbf   :  { %v3160_v52 = vadd.f32 %v10407_v36, %v3159_v10  ;;  %v12090_v55 = vpop.f32.mrb[105].mxu0 }
 0xdc0   :  { %v3162_v56 = vpop.f32.mrb[106].mxu0 }
 0xdc1   :  { %v3182_v41 = vadd.f32 %v3160_v52, %v15719_v16  ;;  %v3163_v20 = vadd.f32 %v10407_v36, %v3162_v56  ;;  %v12091_v42 = vpop.f32.mrb[107].mxu0 }
 0xdc3   :  { %v3183_v46 = vadd.f32 %v3163_v20, %v15725_v62  ;;  %v15906_v30 = vmul.f32 %v3182_v41, %v14818_v51 }
 0xdc5   :  { %v15909_v38 = vmul.f32 %v3183_v46, %v14815_v49  ;;  %v3282_v26 = vrot.slane %v15906_v30, 7 }
 0xdc6   :  { %v3167_v43 = vpop.f32.mrb[108].mxu0 }
 0xdc7   :  { %v3283_v40 = vrot.slane %v15909_v38, 7  ;;  %v3168_v14 = vadd.f32 %v10407_v36, %v3167_v43  ;;  %v12094_v39 = vpop.f32.mrb[109].mxu0 }
 0xdc8   :  { %v3170_v35 = vpop.f32.mrb[110].mxu0 }
 0xdc9   :  { %v3184_v16 = vadd.f32 %v3168_v14, %v15728_v21  ;;  %v3171_v4 = vadd.f32 %v10407_v36, %v3170_v35  ;;  %v12095_v63 = vpop.f32.mrb[111].mxu0  ;;  %v15915_v62 = vsel %vm196_vm0, %v3282_v26, %v3283_v40  ;;  %v15928_v21 = vsel %vm196_vm0, 0.0, %v3282_v26 }
 0xdca   :  { %v3336_v58 = vrot.slane %v15915_v62, 2  ;;  %v3305_v31 = vrot.slane %v15915_v62, 1  ;;  %v3335_v12 = vrot.slane %v15928_v21, 2  ;;  %v3304_v27 = vrot.slane %v15928_v21, 1 }
 0xdcb   :  { %v15924_v18 = vmul.f32 %v3184_v16, %v14828_v57  ;;  %v3185_v22 = vadd.f32 %v3171_v4, %v15747_v53 }
 0xdcc   :  { %v3337_v41 = vsel %vm251_vm1, %v3335_v12, %v3336_v58  ;;  %v3306_v46 = vsel %vm219_vm2, %v3304_v27, %v3305_v31 }
 0xdcd   :  { %v3285_v19 = vrot.slane %v15924_v18, 7  ;;  %v15932_v32 = vmul.f32 %v3185_v22, %v14873_v29 }
 0xdcf   :  { %v3175_v59 = vpop.f32.mrb[112].mxu0  ;;  %v15939_v53 = vsel %vm196_vm0, %v3283_v40, %v3285_v19  ;;  %v3287_v9 = vrot.slane %v15932_v32, 7 }
 0xdd0   :  { %v3176_v33 = vadd.f32 %v10407_v36, %v3175_v59  ;;  %v12098_v11 = vpop.f32.mrb[113].mxu0  ;;  %v3338_v28 = vrot.slane %v15939_v53, 2  ;;  %v3307_v10 = vrot.slane %v15939_v53, 1 }
 0xdd1   :  { %v3178_v60 = vpop.f32.mrb[114].mxu0  ;;  %v3288_v20 = vsel %vm196_vm0, %v3285_v19, %v3287_v9 }
 0xdd2   :  { %v3186_v52 = vadd.f32 %v3176_v33, %v15762_v44  ;;  %v3179_v55 = vadd.f32 %v10407_v36, %v3178_v60  ;;  %v12099_v56 = vpop.f32.mrb[115].mxu0  ;;  %v3339_v42 = vsel %vm251_vm1, %v3336_v58, %v3338_v28  ;;  %v3308_v40 = vsel %vm219_vm2, %v3305_v31, %v3307_v10 }
 0xdd3   :  { %v13450_v39 = vpack.i.bf16 %v3339_v42, %v3337_v41  ;;  %v13445_v26 = vpack.i.bf16 %v3308_v40, %v3306_v46  ;;  %v3340_v35 = vrot.slane %v3288_v20, 2  ;;  %v3309_v16 = vrot.slane %v3288_v20, 1 }
 0xdd4   :  { %v15953_v43 = vmul.f32 %v3186_v52, %v14879_v34  ;;  %v3187_v14 = vadd.f32 %v3179_v55, %v15770_v37 }
 0xdd5   :  { %13451 = vrot.lane.b32.xlu1 %v13450_v39, %s14622_s15  ;;  %13446 = vrot.lane.b32.xlu0 %v13445_v26, %s14623_s16  ;;  %v3341_v19 = vsel %vm251_vm1, %v3338_v28, %v3340_v35  ;;  %v3310_v58 = vsel %vm219_vm2, %v3307_v10, %v3309_v16 }
 0xdd6   :  { %v3289_v44 = vrot.slane %v15953_v43, 7  ;;  %v15958_v36 = vmul.f32 %v3187_v14, %v14899_v2 }
 0xdd8   :  { %v3290_v4 = vsel %vm196_vm0, %v3287_v9, %v3289_v44  ;;  %v3291_v63 = vrot.slane %v15958_v36, 7 }
 0xdd9   :  { %v3342_v8 = vrot.slane %v3290_v4, 2  ;;  %v3311_v17 = vrot.slane %v3290_v4, 1 }
 0xdda   :  { %v3292_v37 = vsel %vm196_vm0, %v3289_v44, %v3291_v63  ;;  %v3301_v22 = vsel %vm196_vm0, %v3291_v63, 0.0 }
 0xddb   :  { %v3343_v59 = vsel %vm251_vm1, %v3340_v35, %v3342_v8  ;;  %v3312_v31 = vsel %vm219_vm2, %v3309_v16, %v3311_v17  ;;  %v3344_v33 = vrot.slane %v3292_v37, 2  ;;  %v3346_v11 = vrot.slane %v3301_v22, 2 }
 0xddc   :  { %v13460_v12 = vpack.i.bf16 %v3343_v59, %v3341_v19  ;;  %v13455_v9 = vpack.i.bf16 %v3312_v31, %v3310_v58  ;;  %v3313_v60 = vrot.slane %v3292_v37, 1  ;;  %v3315_v27 = vrot.slane %v3301_v22, 1 }
 0xddd   :  { %v3345_v52 = vsel %vm251_vm1, %v3342_v8, %v3344_v33  ;;  %v3347_v55 = vsel %vm251_vm1, %v3344_v33, %v3346_v11 }
 0xdde   :  { %13461 = vrot.lane.b32.xlu1 %v13460_v12, %s14622_s15  ;;  %13456 = vrot.lane.b32.xlu0 %v13455_v9, %s14623_s16  ;;  %v3314_v28 = vsel %vm219_vm2, %v3311_v17, %v3313_v60  ;;  %v3316_v10 = vsel %vm219_vm2, %v3313_v60, %v3315_v27  ;;  %v13470_v56 = vpack.i.bf16 %v3347_v55, %v3345_v52 }
 0xddf   :  { %v13465_v41 = vpack.i.bf16 %v3316_v10, %v3314_v28 }
 0xde2   :  { %13471 = vrot.lane.b32.xlu1 %v13470_v56, %s14622_s15  ;;  %13466 = vrot.lane.b32.xlu0 %v13465_v41, %s14623_s16 }
 0xe47   :  { %v13452_v42 = vpop.permute.xlu1 %13451  ;;  %v13447_v46 = vpop.permute.xlu0 %13446 }
 0xe48   :  { %v13454_v40 = vunpack.i.h.bf16 %v13452_v42  ;;  %v13453_v14 = vunpack.i.l.bf16 %v13452_v42  ;;  %v13449_v39 = vunpack.i.h.bf16 %v13447_v46  ;;  %v13448_v26 = vunpack.i.l.bf16 %v13447_v46  ;;  %v13879_v42 = vld [vmem:[%s18141_s8 + $0x48] sm:$0xff]   ;;  %v13881_v46 = vld [vmem:[%s18142_s10 + $0x58] sm:$0xff]  }
 0xe4a   :  { %v3367_v44 = vsel %vm283_vm4, %v15915_v62, %v13449_v39  ;;  %v3366_v35 = vsel %vm283_vm4, %v15928_v21, %v13448_v26 }
 0xe4b   :  { %v3373_v16 = vsel %vm290_vm5, %v3367_v44, %v13454_v40  ;;  %v3372_v63 = vsel %vm290_vm5, %v3366_v35, %v13453_v14  ;;  %v10460_v40 = vld [vmem:[%s18143_s7 + $0x5] ss:$0 sm:$0xff] }
 0xe4c   :  { %v3378_v8 = vpack.c.bf16 %v3373_v16, %v3372_v63 }
 0xe4e   :  { %12129 = vmatmul.mubr.msk.bf16.vlgmr.msra.gmra.mrb[116].mxu0 %vm355_vm6, %v3378_v8  ;;  %12153 = vmatmul.mubr.msk.bf16.vlgmr.msra.gmra.mrb[84].mxu1 %vm355_vm6, %v3378_v8 }
 0xe4f   :  { %12132 = vmatprep.mubr.msk.bf16.mxu0 %vm14621_vm3, %v14620_v15  ;;  %12156 = vmatprep.mubr.msk.bf16.mxu1 %vm14621_vm3, %v14620_v15 }
 0xe50   :  { %v13462_v17 = vpop.permute.xlu1 %13461  ;;  %v13457_v22 = vpop.permute.xlu0 %13456 }
 0xe51   :  { %v13464_v62 = vunpack.i.h.bf16 %v13462_v17  ;;  %v13463_v19 = vunpack.i.l.bf16 %v13462_v17  ;;  %v13459_v21 = vunpack.i.h.bf16 %v13457_v22  ;;  %v13458_v58 = vunpack.i.l.bf16 %v13457_v22 }
 0xe53   :  { %v3369_v59 = vsel %vm283_vm4, %v3288_v20, %v13459_v21  ;;  %v3368_v31 = vsel %vm283_vm4, %v15939_v53, %v13458_v58 }
 0xe54   :  { %v13472_v33 = vpop.permute.xlu1 %13471  ;;  %v13467_v11 = vpop.permute.xlu0 %13466  ;;  %v3374_v12 = vsel %vm290_vm5, %v3368_v31, %v13463_v19  ;;  %v3375_v9 = vsel %vm290_vm5, %v3369_v59, %v13464_v62  ;;  %v10437_v59 = vld [vmem:[%s18144_s5 + $0x5] ss:$0 sm:$0xff] }
 0xe55   :  { %v13469_v60 = vunpack.i.h.bf16 %v13467_v11  ;;  %v13468_v27 = vunpack.i.l.bf16 %v13467_v11  ;;  %v3379_v52 = vpack.c.bf16 %v3375_v9, %v3374_v12  ;;  %v13474_v55 = vunpack.i.h.bf16 %v13472_v33 }
 0xe56   :  { %v13473_v28 = vunpack.i.l.bf16 %v13472_v33 }
 0xe57   :  { %v3371_v10 = vsel %vm283_vm4, %v3292_v37, %v13469_v60  ;;  %v3370_v56 = vsel %vm283_vm4, %v3290_v4, %v13468_v27  ;;  %12133 = vmatmul.mubr.msk.bf16.gmra.mrb[120].mxu0 %vm355_vm6, %v3379_v52  ;;  %12157 = vmatmul.mubr.msk.bf16.gmra.mrb[88].mxu1 %vm355_vm6, %v3379_v52  ;;  %v13878_v4 = vld [vmem:[%s18141_s8 + $0x40] sm:$0xff]   ;;  %v13880_v37 = vld [vmem:[%s18142_s10 + $0x50] sm:$0xff]  }
 0xe58   :  { %12136 = vmatprep.mubr.msk.bf16.mxu0 %vm14621_vm3, %v14620_v15  ;;  %12160 = vmatprep.mubr.msk.bf16.mxu1 %vm14621_vm3, %v14620_v15  ;;  %v3376_v53 = vsel %vm290_vm5, %v3370_v56, %v13473_v28  ;;  %v3377_v20 = vsel %vm290_vm5, %v3371_v10, %v13474_v55 }
 0xe59   :  { %v3380_v41 = vpack.c.bf16 %v3377_v20, %v3376_v53  ;;  %12165 = vmatpush3.bf16.msra.mxu0 %v13878_v4  ;;  %12181 = vmatpush3.bf16.msra.mxu1 %v13880_v37 }
 0xe5a   :  { %12166 = vmatprep.subr.bf16.mxu0 %v14620_v15  ;;  %12182 = vmatprep.subr.bf16.mxu1 %v14620_v15 }
 0xe5d   :  { %12167 = vmatpush3.bf16.msra.mxu0 %v13879_v42  ;;  %12183 = vmatpush3.bf16.msra.mxu1 %v13881_v46 }
 0xe5e   :  { %12220 = vmatprep.subr.bf16.mxu1 %v14620_v15  ;;  %12196 = vmatprep.subr.bf16.mxu0 %v14620_v15 }
 0xe5f   :  { %12137 = vmatmul.mubr.msk.bf16.gmra.mrb[124].mxu0 %vm355_vm6, %v3380_v41  ;;  %12161 = vmatmul.mubr.msk.bf16.gmra.mrb[92].mxu1 %vm355_vm6, %v3380_v41 }
 0xe60   :  { %12168 = vmatprep.mubr.msk.bf16.mxu0 %vm14621_vm3, %v14620_v15  ;;  %12184 = vmatprep.mubr.msk.bf16.mxu1 %vm14621_vm3, %v14620_v15 }
 0xf21   :  { %v3481_v14 = vpop.f32.mrb[116].mxu0  ;;  %v3595_v39 = vpop.f32.mrb[84].mxu1 }
 0xf22   :  { %v3596_v26 = vadd.f32 %v10460_v40, %v3595_v39  ;;  %v12130_v44 = vpop.f32.mrb[117].mxu0  ;;  %v12154_v35 = vpop.f32.mrb[85].mxu1  ;;  %v3482_v28 = vadd.f32 %v10437_v59, %v3481_v14 }
 0xf23   :  { %v3484_v16 = vpop.f32.mrb[118].mxu0  ;;  %v3598_v63 = vpop.f32.mrb[86].mxu1 }
 0xf24   :  { %v10470_v8 = vmul.f32 -1.442695, %v3596_v26  ;;  %v3599_v17 = vadd.f32 %v10460_v40, %v3598_v63  ;;  %v12131_v22 = vpop.f32.mrb[119].mxu0  ;;  %v12155_v62 = vpop.f32.mrb[87].mxu1  ;;  %v3485_v53 = vadd.f32 %v10437_v59, %v3484_v16 }
 0xf26   :  { %14216 = vpow2.f32 %v10470_v8  ;;  %v10471_v19 = vmul.f32 -1.442695, %v3599_v17 }
 0xf28   :  { %14218 = vpow2.f32 %v10471_v19 }
 0xf2a   :  { %v3489_v21 = vpop.f32.mrb[120].mxu0  ;;  %v3603_v58 = vpop.f32.mrb[88].mxu1 }
 0xf2b   :  { %v3604_v31 = vadd.f32 %v10460_v40, %v3603_v58  ;;  %v12134_v33 = vpop.f32.mrb[121].mxu0  ;;  %v12158_v11 = vpop.f32.mrb[89].mxu1  ;;  %v3490_v16 = vadd.f32 %v10437_v59, %v3489_v21 }
 0xf2c   :  { %v3492_v12 = vpop.f32.mrb[122].mxu0  ;;  %v3606_v9 = vpop.f32.mrb[90].mxu1 }
 0xf2d   :  { %v10472_v60 = vmul.f32 -1.442695, %v3604_v31  ;;  %v3607_v27 = vadd.f32 %v10460_v40, %v3606_v9  ;;  %v12135_v52 = vpop.f32.mrb[123].mxu0  ;;  %v12159_v55 = vpop.f32.mrb[91].mxu1  ;;  %v3493_v19 = vadd.f32 %v10437_v59, %v3492_v12 }
 0xf2f   :  { %14220 = vpow2.f32 %v10472_v60  ;;  %v10473_v10 = vmul.f32 -1.442695, %v3607_v27 }
 0xf30   :  { %v14217_v56 = vpop.eup %14216 }
 0xf31   :  { %v3642_v20 = vadd.f32 1.0, %v14217_v56  ;;  %14222 = vpow2.f32 %v10473_v10 }
 0xf32   :  { %v14219_v41 = vpop.eup %14218  ;;  %14224 = vtanh.f32 %v3482_v28  ;;  %v3497_v4 = vpop.f32.mrb[124].mxu0 }
 0xf33   :  { %v3611_v37 = vpop.f32.mrb[92].mxu1  ;;  %14226 = vrcp.f32 %v3642_v20  ;;  %v3643_v42 = vadd.f32 1.0, %v14219_v41  ;;  %v12138_v39 = vpop.f32.mrb[125].mxu0  ;;  %v3498_v52 = vadd.f32 %v10437_v59, %v3497_v4 }
 0xf34   :  { %v3612_v46 = vadd.f32 %v10460_v40, %v3611_v37  ;;  %v12162_v26 = vpop.f32.mrb[93].mxu1  ;;  %14228 = vtanh.f32 %v3485_v53  ;;  %v3500_v44 = vpop.f32.mrb[126].mxu0 }
 0xf35   :  { %v3614_v35 = vpop.f32.mrb[94].mxu1  ;;  %14230 = vrcp.f32 %v3643_v42  ;;  %v12139_v8 = vpop.f32.mrb[127].mxu0  ;;  %v3501_v28 = vadd.f32 %v10437_v59, %v3500_v44 }
 0xf36   :  { %v10474_v14 = vmul.f32 -1.442695, %v3612_v46  ;;  %v3615_v63 = vadd.f32 %v10460_v40, %v3614_v35  ;;  %v12163_v17 = vpop.f32.mrb[95].mxu1 }
 0xf37   :  { %v13882_v17 = vld [vmem:[%s18138_s6 + $0x120] sm:$0xff]  }
 0xf38   :  { %14232 = vpow2.f32 %v10474_v14  ;;  %v10475_v22 = vmul.f32 -1.442695, %v3615_v63 }
 0xf39   :  { %v14221_v62 = vpop.eup %14220 }
 0xf3a   :  { %14234 = vpow2.f32 %v10475_v22  ;;  %v3644_v58 = vadd.f32 1.0, %v14221_v62  ;;  %v13884_v22 = vld [vmem:[%s18138_s6 + $0x128] sm:$0xff]  }
 0xf3b   :  { %v14223_v31 = vpop.eup %14222  ;;  %14236 = vtanh.f32 %v3490_v16  ;;  %v13883_v16 = vld [vmem:[%s18137_s4 + $0x120] sm:$0xff]   ;;  %v13885_v62 = vld [vmem:[%s18137_s4 + $0x128] sm:$0xff]  }
 0xf3c   :  { %v14225_v33 = vpop.eup %14224  ;;  %14238 = vrcp.f32 %v3644_v58  ;;  %v3645_v11 = vadd.f32 1.0, %v14223_v31  ;;  %v13887_v58 = vld [vmem:[%s18137_s4 + $0x130] sm:$0xff]   ;;  %v13888_v31 = vld [vmem:[%s18138_s6 + $0x138] sm:$0xff]  }
 0xf3d   :  { %v14227_v9 = vpop.eup %14226  ;;  %14240 = vtanh.f32 %v3493_v19  ;;  %v13886_v19 = vld [vmem:[%s18138_s6 + $0x130] sm:$0xff]  }
 0xf3e   :  { %v14229_v60 = vpop.eup %14228  ;;  %v3660_v27 = vmul.f32 %v14227_v9, %v14225_v33  ;;  %14242 = vrcp.f32 %v3645_v11  ;;  %v13889_v33 = vld [vmem:[%s18137_s4 + $0x138] sm:$0xff]   ;;  %v13890_v11 = vld [vmem:[%s18138_s6 + $0x140] sm:$0xff]  }
 0xf3f   :  { %v14231_v40 = vpop.eup %14230  ;;  %14244 = vtanh.f32 %v3498_v52  ;;  %v13891_v9 = vld [vmem:[%s18137_s4 + $0x140] sm:$0xff]  }
 0xf40   :  { %v3661_v55 = vmul.f32 %v14231_v40, %v14229_v60  ;;  %v10481_v60 = vld [vmem:[%s18145_s9 + $0x4] ss:$0 sm:$0xff] }
 0xf42   :  { %v14233_v21 = vpop.eup %14232  ;;  %v3666_v56 = vpack.c.bf16 %v3661_v55, %v3660_v27 }
 0xf43   :  { %v3646_v10 = vadd.f32 1.0, %v14233_v21 }
 0xf44   :  { %v14235_v12 = vpop.eup %14234  ;;  %12169 = vmatmul.mubr.msk.bf16.vlgmr.msra.gmra.mrb[128].mxu0 %vm283_vm4, %v3666_v56  ;;  %12185 = vmatmul.mubr.msk.bf16.vlgmr.msra.gmra.mrb[72].mxu1 %vm283_vm4, %v3666_v56 }
 0xf45   :  { %14246 = vrcp.f32 %v3646_v10  ;;  %v3647_v53 = vadd.f32 1.0, %v14235_v12  ;;  %v14237_v20 = vpop.eup %14236  ;;  %12172 = vmatprep.mubr.msk.bf16.mxu0 %vm14621_vm3, %v14620_v15  ;;  %12188 = vmatprep.mubr.msk.bf16.mxu1 %vm14621_vm3, %v14620_v15 }
 0xf46   :  { %14248 = vtanh.f32 %v3501_v28  ;;  %v14239_v41 = vpop.eup %14238  ;;  %12221 = vmatpush3.bf16.msra.mxu1 %v13882_v17  ;;  %12197 = vmatpush3.bf16.msra.mxu0 %v13883_v16 }
 0xf47   :  { %14250 = vrcp.f32 %v3647_v53  ;;  %v14241_v59 = vpop.eup %14240  ;;  %v3662_v4 = vmul.f32 %v14239_v41, %v14237_v20  ;;  %12222 = vmatprep.subr.bf16.mxu1 %v14620_v15  ;;  %12198 = vmatprep.subr.bf16.mxu0 %v14620_v15 }
 0xf48   :  { %v14243_v37 = vpop.eup %14242 }
 0xf49   :  { %v3663_v42 = vmul.f32 %v14243_v37, %v14241_v59  ;;  %v14245_v39 = vpop.eup %14244 }
 0xf4a   :  { %12223 = vmatpush3.bf16.msra.mxu1 %v13884_v22  ;;  %12199 = vmatpush3.bf16.msra.mxu0 %v13885_v62 }
 0xf4b   :  { %v3667_v46 = vpack.c.bf16 %v3663_v42, %v3662_v4  ;;  %12224 = vmatprep.subr.bf16.mxu1 %v14620_v15  ;;  %12200 = vmatprep.subr.bf16.mxu0 %v14620_v15 }
 0xf4d   :  { %12173 = vmatmul.mubr.msk.bf16.gmra.mrb[132].mxu0 %vm283_vm4, %v3667_v46  ;;  %12189 = vmatmul.mubr.msk.bf16.gmra.mrb[76].mxu1 %vm283_vm4, %v3667_v46 }
 0xf4e   :  { %12176 = vmatprep.mubr.msk.bf16.mxu0 %vm14621_vm3, %v14620_v15  ;;  %12192 = vmatprep.mubr.msk.bf16.mxu1 %vm14621_vm3, %v14620_v15 }
 0xf4f   :  { %v14247_v26 = vpop.eup %14246  ;;  %12225 = vmatpush3.bf16.msra.mxu1 %v13886_v19  ;;  %12201 = vmatpush3.bf16.msra.mxu0 %v13887_v58 }
 0xf50   :  { %v14249_v44 = vpop.eup %14248  ;;  %v3664_v35 = vmul.f32 %v14247_v26, %v14245_v39  ;;  %12226 = vmatprep.subr.bf16.mxu1 %v14620_v15  ;;  %12202 = vmatprep.subr.bf16.mxu0 %v14620_v15  ;;  %v13892_v26 = vld [vmem:[%s18138_s6 + $0x148] sm:$0xff]  }
 0xf51   :  { %v14251_v14 = vpop.eup %14250 }
 0xf52   :  { %v3665_v63 = vmul.f32 %v14251_v14, %v14249_v44  ;;  %v13893_v44 = vld [vmem:[%s18137_s4 + $0x148] sm:$0xff]  }
 0xf53   :  { %12227 = vmatpush3.bf16.msra.mxu1 %v13888_v31  ;;  %12203 = vmatpush3.bf16.msra.mxu0 %v13889_v33 }
 0xf54   :  { %v3668_v8 = vpack.c.bf16 %v3665_v63, %v3664_v35  ;;  %12228 = vmatprep.subr.bf16.mxu1 %v14620_v15  ;;  %12204 = vmatprep.subr.bf16.mxu0 %v14620_v15 }
 0xf56   :  { %12177 = vmatmul.mubr.msk.bf16.gmra.mrb[136].mxu0 %vm283_vm4, %v3668_v8  ;;  %12193 = vmatmul.mubr.msk.bf16.gmra.mrb[80].mxu1 %vm283_vm4, %v3668_v8 }
 0xf57   :  { %12208 = vmatprep.mubr.msk.bf16.mxu0 %vm14621_vm3, %v14620_v15  ;;  %12232 = vmatprep.mubr.msk.bf16.mxu1 %vm14621_vm3, %v14620_v15 }
 0xf58   :  { %12229 = vmatpush3.bf16.msra.mxu1 %v13890_v11  ;;  %12205 = vmatpush3.bf16.msra.mxu0 %v13891_v9 }
 0xf59   :  { %12230 = vmatprep.subr.bf16.mxu1 %v14620_v15  ;;  %12206 = vmatprep.subr.bf16.mxu0 %v14620_v15 }
 0xf5c   :  { %12231 = vmatpush3.bf16.msra.mxu1 %v13892_v26  ;;  %12207 = vmatpush3.bf16.msra.mxu0 %v13893_v44 }
 0xf5d   :  { %12244 = vmatprep.subr.bf16.mxu0 %v14620_v15  ;;  %12260 = vmatprep.subr.bf16.mxu1 %v14620_v15 }
0x1017   :  { %v3737_v27 = vpop.f32.mrb[128].mxu0 }
0x1018   :  { %v3738_v40 = vadd.f32 %v10481_v60, %v3737_v27  ;;  %v12170_v52 = vpop.f32.mrb[129].mxu0 }
0x1019   :  { %v3740_v55 = vpop.f32.mrb[130].mxu0 }
0x101a   :  { %v3760_v21 = vadd.f32 %v3738_v40, %v15906_v30  ;;  %v3741_v28 = vadd.f32 %v10481_v60, %v3740_v55  ;;  %v12171_v10 = vpop.f32.mrb[131].mxu0 }
0x101c   :  { %v3761_v56 = vadd.f32 %v3741_v28, %v15909_v38  ;;  %v16097_v12 = vmul.f32 %v3760_v21, %v14818_v51 }
0x101e   :  { %v16100_v53 = vmul.f32 %v3761_v56, %v14815_v49  ;;  %v3866_v37 = vrot.slane %v16097_v12, 7 }
0x1020   :  { %v3867_v20 = vrot.slane %v16100_v53, 7  ;;  %v3745_v41 = vpop.f32.mrb[132].mxu0 }
0x1021   :  { %v3746_v59 = vadd.f32 %v10481_v60, %v3745_v41  ;;  %v12174_v4 = vpop.f32.mrb[133].mxu0 }
0x1022   :  { %v3748_v42 = vpop.f32.mrb[134].mxu0  ;;  %v16106_v38 = vsel %vm196_vm0, %v3866_v37, %v3867_v20 }
0x1023   :  { %v3762_v30 = vadd.f32 %v3746_v59, %v15924_v18  ;;  %v3749_v46 = vadd.f32 %v10481_v60, %v3748_v42  ;;  %v12175_v39 = vpop.f32.mrb[135].mxu0  ;;  %v16119_v18 = vsel %vm196_vm0, 0.0, %v3866_v37  ;;  %v3920_v17 = vrot.slane %v16106_v38, 2 }
0x1024   :  { %v3889_v22 = vrot.slane %v16106_v38, 1  ;;  %v3919_v31 = vrot.slane %v16119_v18, 2  ;;  %v3888_v9 = vrot.slane %v16119_v18, 1 }
0x1025   :  { %v16115_v35 = vmul.f32 %v3762_v30, %v14828_v57  ;;  %v3763_v14 = vadd.f32 %v3749_v46, %v15932_v32 }
0x1026   :  { %v3921_v21 = vsel %vm251_vm1, %v3919_v31, %v3920_v17  ;;  %v3890_v56 = vsel %vm219_vm2, %v3888_v9, %v3889_v22 }
0x1027   :  { %v3869_v63 = vrot.slane %v16115_v35, 7  ;;  %v16123_v8 = vmul.f32 %v3763_v14, %v14873_v29 }
0x1029   :  { %v3753_v16 = vpop.f32.mrb[136].mxu0  ;;  %v16130_v32 = vsel %vm196_vm0, %v3867_v20, %v3869_v63  ;;  %v3871_v62 = vrot.slane %v16123_v8, 7 }
0x102a   :  { %v3754_v19 = vadd.f32 %v10481_v60, %v3753_v16  ;;  %v12178_v58 = vpop.f32.mrb[137].mxu0  ;;  %v3922_v11 = vrot.slane %v16130_v32, 2  ;;  %v3891_v27 = vrot.slane %v16130_v32, 1 }
0x102b   :  { %v3756_v33 = vpop.f32.mrb[138].mxu0  ;;  %v3872_v28 = vsel %vm196_vm0, %v3869_v63, %v3871_v62 }
0x102c   :  { %v3764_v40 = vadd.f32 %v3754_v19, %v15953_v43  ;;  %v3757_v52 = vadd.f32 %v10481_v60, %v3756_v33  ;;  %v12179_v55 = vpop.f32.mrb[139].mxu0  ;;  %v3923_v10 = vsel %vm251_vm1, %v3920_v17, %v3922_v11  ;;  %v3892_v20 = vsel %vm219_vm2, %v3889_v22, %v3891_v27 }
0x102d   :  { %v13480_v4 = vpack.i.bf16 %v3923_v10, %v3921_v21  ;;  %v13475_v37 = vpack.i.bf16 %v3892_v20, %v3890_v56  ;;  %v3924_v42 = vrot.slane %v3872_v28, 2  ;;  %v3893_v30 = vrot.slane %v3872_v28, 1 }
0x102e   :  { %v16144_v41 = vmul.f32 %v3764_v40, %v14879_v34  ;;  %v3765_v59 = vadd.f32 %v3757_v52, %v15958_v36 }
0x102f   :  { %13481 = vrot.lane.b32.xlu1 %v13480_v4, %s14622_s15  ;;  %13476 = vrot.lane.b32.xlu0 %v13475_v37, %s14623_s16  ;;  %v3925_v63 = vsel %vm251_vm1, %v3922_v11, %v3924_v42  ;;  %v3894_v17 = vsel %vm219_vm2, %v3891_v27, %v3893_v30 }
0x1030   :  { %v3873_v43 = vrot.slane %v16144_v41, 7  ;;  %v16149_v60 = vmul.f32 %v3765_v59, %v14899_v2 }
0x1032   :  { %v3874_v46 = vsel %vm196_vm0, %v3871_v62, %v3873_v43  ;;  %v3875_v39 = vrot.slane %v16149_v60, 7 }
0x1033   :  { %v3926_v26 = vrot.slane %v3874_v46, 2  ;;  %v3895_v44 = vrot.slane %v3874_v46, 1 }
0x1034   :  { %v3876_v36 = vsel %vm196_vm0, %v3873_v43, %v3875_v39  ;;  %v3885_v14 = vsel %vm196_vm0, %v3875_v39, 0.0 }
0x1035   :  { %v3927_v16 = vsel %vm251_vm1, %v3924_v42, %v3926_v26  ;;  %v3896_v22 = vsel %vm219_vm2, %v3893_v30, %v3895_v44  ;;  %v3928_v19 = vrot.slane %v3876_v36, 2  ;;  %v3930_v58 = vrot.slane %v3885_v14, 2 }
0x1036   :  { %v13490_v31 = vpack.i.bf16 %v3927_v16, %v3925_v63  ;;  %v13485_v62 = vpack.i.bf16 %v3896_v22, %v3894_v17  ;;  %v3897_v33 = vrot.slane %v3876_v36, 1  ;;  %v3899_v9 = vrot.slane %v3885_v14, 1 }
0x1037   :  { %v3929_v40 = vsel %vm251_vm1, %v3926_v26, %v3928_v19  ;;  %v3931_v52 = vsel %vm251_vm1, %v3928_v19, %v3930_v58 }
0x1038   :  { %13491 = vrot.lane.b32.xlu1 %v13490_v31, %s14622_s15  ;;  %13486 = vrot.lane.b32.xlu0 %v13485_v62, %s14623_s16  ;;  %v3898_v11 = vsel %vm219_vm2, %v3895_v44, %v3897_v33  ;;  %v3900_v27 = vsel %vm219_vm2, %v3897_v33, %v3899_v9  ;;  %v13500_v55 = vpack.i.bf16 %v3931_v52, %v3929_v40 }
0x1039   :  { %v13495_v21 = vpack.i.bf16 %v3900_v27, %v3898_v11 }
0x103c   :  { %13501 = vrot.lane.b32.xlu1 %v13500_v55, %s14622_s15  ;;  %13496 = vrot.lane.b32.xlu0 %v13495_v21, %s14623_s16 }
0x10a1   :  { %v13482_v10 = vpop.permute.xlu1 %13481  ;;  %v13477_v56 = vpop.permute.xlu0 %13476 }
0x10a2   :  { %v13484_v20 = vunpack.i.h.bf16 %v13482_v10  ;;  %v13483_v59 = vunpack.i.l.bf16 %v13482_v10  ;;  %v13479_v4 = vunpack.i.h.bf16 %v13477_v56  ;;  %v13478_v37 = vunpack.i.l.bf16 %v13477_v56  ;;  %v13895_v10 = vld [vmem:[%s18141_s8 + $0x58] sm:$0xff]   ;;  %v13897_v56 = vld [vmem:[%s18142_s10 + $0x68] sm:$0xff]  }
0x10a4   :  { %v3951_v43 = vsel %vm283_vm4, %v16106_v38, %v13479_v4  ;;  %v3950_v42 = vsel %vm283_vm4, %v16119_v18, %v13478_v37 }
0x10a5   :  { %v3957_v30 = vsel %vm290_vm5, %v3951_v43, %v13484_v20  ;;  %v3956_v39 = vsel %vm290_vm5, %v3950_v42, %v13483_v59  ;;  %v10534_v20 = vld [vmem:[%s18143_s7 + $0x6] ss:$0 sm:$0xff] }
0x10a6   :  { %v3962_v26 = vpack.c.bf16 %v3957_v30, %v3956_v39 }
0x10a8   :  { %12209 = vmatmul.mubr.msk.bf16.vlgmr.msra.gmra.mrb[140].mxu0 %vm355_vm6, %v3962_v26  ;;  %12233 = vmatmul.mubr.msk.bf16.vlgmr.msra.gmra.mrb[96].mxu1 %vm355_vm6, %v3962_v26 }
0x10a9   :  { %12212 = vmatprep.mubr.msk.bf16.mxu0 %vm14621_vm3, %v14620_v15  ;;  %12236 = vmatprep.mubr.msk.bf16.mxu1 %vm14621_vm3, %v14620_v15 }
0x10aa   :  { %v13492_v44 = vpop.permute.xlu1 %13491  ;;  %v13487_v14 = vpop.permute.xlu0 %13486 }
0x10ab   :  { %v13494_v38 = vunpack.i.h.bf16 %v13492_v44  ;;  %v13493_v63 = vunpack.i.l.bf16 %v13492_v44  ;;  %v13489_v18 = vunpack.i.h.bf16 %v13487_v14  ;;  %v13488_v17 = vunpack.i.l.bf16 %v13487_v14 }
0x10ad   :  { %v3953_v16 = vsel %vm283_vm4, %v3872_v28, %v13489_v18  ;;  %v3952_v22 = vsel %vm283_vm4, %v16130_v32, %v13488_v17 }
0x10ae   :  { %v13502_v19 = vpop.permute.xlu1 %13501  ;;  %v13497_v58 = vpop.permute.xlu0 %13496  ;;  %v3958_v31 = vsel %vm290_vm5, %v3952_v22, %v13493_v63  ;;  %v3959_v62 = vsel %vm290_vm5, %v3953_v16, %v13494_v38  ;;  %v10511_v16 = vld [vmem:[%s18144_s5 + $0x6] ss:$0 sm:$0xff] }
0x10af   :  { %v13499_v33 = vunpack.i.h.bf16 %v13497_v58  ;;  %v13498_v9 = vunpack.i.l.bf16 %v13497_v58  ;;  %v3963_v40 = vpack.c.bf16 %v3959_v62, %v3958_v31  ;;  %v13504_v52 = vunpack.i.h.bf16 %v13502_v19 }
0x10b0   :  { %v13503_v11 = vunpack.i.l.bf16 %v13502_v19 }
0x10b1   :  { %v3955_v27 = vsel %vm283_vm4, %v3876_v36, %v13499_v33  ;;  %v3954_v55 = vsel %vm283_vm4, %v3874_v46, %v13498_v9  ;;  %12213 = vmatmul.mubr.msk.bf16.gmra.mrb[144].mxu0 %vm355_vm6, %v3963_v40  ;;  %12237 = vmatmul.mubr.msk.bf16.gmra.mrb[100].mxu1 %vm355_vm6, %v3963_v40  ;;  %v13894_v46 = vld [vmem:[%s18141_s8 + $0x50] sm:$0xff]   ;;  %v13896_v36 = vld [vmem:[%s18142_s10 + $0x60] sm:$0xff]  }
0x10b2   :  { %12216 = vmatprep.mubr.msk.bf16.mxu0 %vm14621_vm3, %v14620_v15  ;;  %12240 = vmatprep.mubr.msk.bf16.mxu1 %vm14621_vm3, %v14620_v15  ;;  %v3960_v32 = vsel %vm290_vm5, %v3954_v55, %v13503_v11  ;;  %v3961_v28 = vsel %vm290_vm5, %v3955_v27, %v13504_v52 }
0x10b3   :  { %v3964_v21 = vpack.c.bf16 %v3961_v28, %v3960_v32  ;;  %12245 = vmatpush3.bf16.msra.mxu0 %v13894_v46  ;;  %12261 = vmatpush3.bf16.msra.mxu1 %v13896_v36 }
0x10b4   :  { %12246 = vmatprep.subr.bf16.mxu0 %v14620_v15  ;;  %12262 = vmatprep.subr.bf16.mxu1 %v14620_v15 }
0x10b7   :  { %12247 = vmatpush3.bf16.msra.mxu0 %v13895_v10  ;;  %12263 = vmatpush3.bf16.msra.mxu1 %v13897_v56 }
0x10b8   :  { %12300 = vmatprep.subr.bf16.mxu1 %v14620_v15  ;;  %12276 = vmatprep.subr.bf16.mxu0 %v14620_v15 }
0x10b9   :  { %12217 = vmatmul.mubr.msk.bf16.gmra.mrb[148].mxu0 %vm355_vm6, %v3964_v21  ;;  %12241 = vmatmul.mubr.msk.bf16.gmra.mrb[104].mxu1 %vm355_vm6, %v3964_v21 }
0x10ba   :  { %12248 = vmatprep.mubr.msk.bf16.mxu0 %vm14621_vm3, %v14620_v15  ;;  %12264 = vmatprep.mubr.msk.bf16.mxu1 %vm14621_vm3, %v14620_v15 }
0x117b   :  { %v4065_v59 = vpop.f32.mrb[140].mxu0  ;;  %v4179_v4 = vpop.f32.mrb[96].mxu1 }
0x117c   :  { %v4180_v37 = vadd.f32 %v10534_v20, %v4179_v4  ;;  %v12210_v43 = vpop.f32.mrb[141].mxu0  ;;  %v12234_v42 = vpop.f32.mrb[97].mxu1  ;;  %v4066_v11 = vadd.f32 %v10511_v16, %v4065_v59 }
0x117d   :  { %v4068_v30 = vpop.f32.mrb[142].mxu0  ;;  %v4182_v39 = vpop.f32.mrb[98].mxu1 }
0x117e   :  { %v10544_v26 = vmul.f32 -1.442695, %v4180_v37  ;;  %v4183_v44 = vadd.f32 %v10534_v20, %v4182_v39  ;;  %v12211_v14 = vpop.f32.mrb[143].mxu0  ;;  %v12235_v38 = vpop.f32.mrb[99].mxu1  ;;  %v4069_v32 = vadd.f32 %v10511_v16, %v4068_v30 }
0x1180   :  { %14252 = vpow2.f32 %v10544_v26  ;;  %v10545_v63 = vmul.f32 -1.442695, %v4183_v44 }
0x1182   :  { %14254 = vpow2.f32 %v10545_v63 }
0x1184   :  { %v4073_v18 = vpop.f32.mrb[144].mxu0  ;;  %v4187_v17 = vpop.f32.mrb[100].mxu1 }
0x1185   :  { %v4188_v22 = vadd.f32 %v10534_v20, %v4187_v17  ;;  %v12214_v19 = vpop.f32.mrb[145].mxu0  ;;  %v12238_v58 = vpop.f32.mrb[101].mxu1  ;;  %v4074_v30 = vadd.f32 %v10511_v16, %v4073_v18 }
0x1186   :  { %v4076_v31 = vpop.f32.mrb[146].mxu0  ;;  %v4190_v62 = vpop.f32.mrb[102].mxu1 }
0x1187   :  { %v10546_v33 = vmul.f32 -1.442695, %v4188_v22  ;;  %v4191_v9 = vadd.f32 %v10534_v20, %v4190_v62  ;;  %v12215_v40 = vpop.f32.mrb[147].mxu0  ;;  %v12239_v52 = vpop.f32.mrb[103].mxu1  ;;  %v4077_v63 = vadd.f32 %v10511_v16, %v4076_v31 }
0x1189   :  { %14256 = vpow2.f32 %v10546_v33  ;;  %v10547_v27 = vmul.f32 -1.442695, %v4191_v9 }
0x118a   :  { %v14253_v55 = vpop.eup %14252 }
0x118b   :  { %v4226_v28 = vadd.f32 1.0, %v14253_v55  ;;  %14258 = vpow2.f32 %v10547_v27 }
0x118c   :  { %v14255_v21 = vpop.eup %14254  ;;  %14260 = vtanh.f32 %v4066_v11  ;;  %v4081_v46 = vpop.f32.mrb[148].mxu0 }
0x118d   :  { %v4195_v36 = vpop.f32.mrb[104].mxu1  ;;  %14262 = vrcp.f32 %v4226_v28  ;;  %v4227_v10 = vadd.f32 1.0, %v14255_v21  ;;  %v12218_v4 = vpop.f32.mrb[149].mxu0  ;;  %v4082_v40 = vadd.f32 %v10511_v16, %v4081_v46 }
0x118e   :  { %v4196_v56 = vadd.f32 %v10534_v20, %v4195_v36  ;;  %v12242_v37 = vpop.f32.mrb[105].mxu1  ;;  %14264 = vtanh.f32 %v4069_v32  ;;  %v4084_v43 = vpop.f32.mrb[150].mxu0 }
0x118f   :  { %v4198_v42 = vpop.f32.mrb[106].mxu1  ;;  %14266 = vrcp.f32 %v4227_v10  ;;  %v12219_v26 = vpop.f32.mrb[151].mxu0  ;;  %v4085_v11 = vadd.f32 %v10511_v16, %v4084_v43 }
0x1190   :  { %v10548_v59 = vmul.f32 -1.442695, %v4196_v56  ;;  %v4199_v39 = vadd.f32 %v10534_v20, %v4198_v42  ;;  %v12243_v44 = vpop.f32.mrb[107].mxu1 }
0x1191   :  { %v13898_v44 = vld [vmem:[%s18138_s6 + $0x150] sm:$0xff]  }
0x1192   :  { %14268 = vpow2.f32 %v10548_v59  ;;  %v10549_v14 = vmul.f32 -1.442695, %v4199_v39 }
0x1193   :  { %v14257_v38 = vpop.eup %14256 }
0x1194   :  { %14270 = vpow2.f32 %v10549_v14  ;;  %v4228_v17 = vadd.f32 1.0, %v14257_v38  ;;  %v13900_v14 = vld [vmem:[%s18138_s6 + $0x158] sm:$0xff]  }
0x1195   :  { %v14259_v22 = vpop.eup %14258  ;;  %14272 = vtanh.f32 %v4074_v30  ;;  %v13899_v30 = vld [vmem:[%s18137_s4 + $0x150] sm:$0xff]   ;;  %v13901_v38 = vld [vmem:[%s18137_s4 + $0x158] sm:$0xff]  }
0x1196   :  { %v14261_v19 = vpop.eup %14260  ;;  %14274 = vrcp.f32 %v4228_v17  ;;  %v4229_v58 = vadd.f32 1.0, %v14259_v22  ;;  %v13903_v17 = vld [vmem:[%s18137_s4 + $0x160] sm:$0xff]   ;;  %v13904_v22 = vld [vmem:[%s18138_s6 + $0x168] sm:$0xff]  }
0x1197   :  { %v14263_v62 = vpop.eup %14262  ;;  %14276 = vtanh.f32 %v4077_v63  ;;  %v13902_v63 = vld [vmem:[%s18138_s6 + $0x160] sm:$0xff]  }
0x1198   :  { %v14265_v33 = vpop.eup %14264  ;;  %v4244_v9 = vmul.f32 %v14263_v62, %v14261_v19  ;;  %14278 = vrcp.f32 %v4229_v58  ;;  %v13905_v19 = vld [vmem:[%s18137_s4 + $0x168] sm:$0xff]   ;;  %v13906_v58 = vld [vmem:[%s18138_s6 + $0x170] sm:$0xff]  }
0x1199   :  { %v14267_v20 = vpop.eup %14266  ;;  %14280 = vtanh.f32 %v4082_v40  ;;  %v13907_v62 = vld [vmem:[%s18137_s4 + $0x170] sm:$0xff]  }
0x119a   :  { %v4245_v52 = vmul.f32 %v14267_v20, %v14265_v33  ;;  %v10555_v33 = vld [vmem:[%s18145_s9 + $0x5] ss:$0 sm:$0xff] }
0x119c   :  { %v14269_v18 = vpop.eup %14268  ;;  %v4250_v55 = vpack.c.bf16 %v4245_v52, %v4244_v9 }
0x119d   :  { %v4230_v27 = vadd.f32 1.0, %v14269_v18 }
0x119e   :  { %v14271_v31 = vpop.eup %14270  ;;  %12249 = vmatmul.mubr.msk.bf16.vlgmr.msra.gmra.mrb[152].mxu0 %vm283_vm4, %v4250_v55  ;;  %12265 = vmatmul.mubr.msk.bf16.vlgmr.msra.gmra.mrb[72].mxu1 %vm283_vm4, %v4250_v55 }
0x119f   :  { %14282 = vrcp.f32 %v4230_v27  ;;  %v4231_v32 = vadd.f32 1.0, %v14271_v31  ;;  %v14273_v28 = vpop.eup %14272  ;;  %12252 = vmatprep.mubr.msk.bf16.mxu0 %vm14621_vm3, %v14620_v15  ;;  %12268 = vmatprep.mubr.msk.bf16.mxu1 %vm14621_vm3, %v14620_v15 }
0x11a0   :  { %14284 = vtanh.f32 %v4085_v11  ;;  %v14275_v21 = vpop.eup %14274  ;;  %12301 = vmatpush3.bf16.msra.mxu1 %v13898_v44  ;;  %12277 = vmatpush3.bf16.msra.mxu0 %v13899_v30 }
0x11a1   :  { %14286 = vrcp.f32 %v4231_v32  ;;  %v14277_v16 = vpop.eup %14276  ;;  %v4246_v46 = vmul.f32 %v14275_v21, %v14273_v28  ;;  %12302 = vmatprep.subr.bf16.mxu1 %v14620_v15  ;;  %12278 = vmatprep.subr.bf16.mxu0 %v14620_v15 }
0x11a2   :  { %v14279_v36 = vpop.eup %14278 }
0x11a3   :  { %v4247_v10 = vmul.f32 %v14279_v36, %v14277_v16  ;;  %v14281_v4 = vpop.eup %14280 }
0x11a4   :  { %12303 = vmatpush3.bf16.msra.mxu1 %v13900_v14  ;;  %12279 = vmatpush3.bf16.msra.mxu0 %v13901_v38 }
0x11a5   :  { %v4251_v56 = vpack.c.bf16 %v4247_v10, %v4246_v46  ;;  %12304 = vmatprep.subr.bf16.mxu1 %v14620_v15  ;;  %12280 = vmatprep.subr.bf16.mxu0 %v14620_v15 }
0x11a7   :  { %12253 = vmatmul.mubr.msk.bf16.gmra.mrb[156].mxu0 %vm283_vm4, %v4251_v56  ;;  %12269 = vmatmul.mubr.msk.bf16.gmra.mrb[76].mxu1 %vm283_vm4, %v4251_v56 }
0x11a8   :  { %12256 = vmatprep.mubr.msk.bf16.mxu0 %vm14621_vm3, %v14620_v15  ;;  %12272 = vmatprep.mubr.msk.bf16.mxu1 %vm14621_vm3, %v14620_v15 }
0x11a9   :  { %v14283_v37 = vpop.eup %14282  ;;  %12305 = vmatpush3.bf16.msra.mxu1 %v13902_v63  ;;  %12281 = vmatpush3.bf16.msra.mxu0 %v13903_v17 }
0x11aa   :  { %v14285_v43 = vpop.eup %14284  ;;  %v4248_v42 = vmul.f32 %v14283_v37, %v14281_v4  ;;  %12306 = vmatprep.subr.bf16.mxu1 %v14620_v15  ;;  %12282 = vmatprep.subr.bf16.mxu0 %v14620_v15 }
0x11ab   :  { %v14287_v59 = vpop.eup %14286 }
0x11ac   :  { %v4249_v39 = vmul.f32 %v14287_v59, %v14285_v43  ;;  %v13909_v59 = vld [vmem:[%s18137_s4 + $0x178] sm:$0xff]  }
0x11ad   :  { %12307 = vmatpush3.bf16.msra.mxu1 %v13904_v22  ;;  %12283 = vmatpush3.bf16.msra.mxu0 %v13905_v19 }
0x11ae   :  { %v4252_v26 = vpack.c.bf16 %v4249_v39, %v4248_v42  ;;  %12308 = vmatprep.subr.bf16.mxu1 %v14620_v15  ;;  %12284 = vmatprep.subr.bf16.mxu0 %v14620_v15 }
0x11b0   :  { %12257 = vmatmul.mubr.msk.bf16.gmra.mrb[160].mxu0 %vm283_vm4, %v4252_v26  ;;  %12273 = vmatmul.mubr.msk.bf16.gmra.mrb[80].mxu1 %vm283_vm4, %v4252_v26 }
0x11b1   :  { %12288 = vmatprep.mubr.msk.bf16.mxu0 %vm14621_vm3, %v14620_v15  ;;  %12312 = vmatprep.mubr.msk.bf16.mxu1 %vm14621_vm3, %v14620_v15 }
0x11b2   :  { %12309 = vmatpush3.bf16.msra.mxu1 %v13906_v58  ;;  %12285 = vmatpush3.bf16.msra.mxu0 %v13907_v62 }
0x11b3   :  { %12310 = vmatprep.subr.bf16.mxu1 %v14620_v15  ;;  %12286 = vmatprep.subr.bf16.mxu0 %v14620_v15 }
0x11b6   :  { %12287 = vmatpush3.bf16.msra.mxu0 %v13909_v59 }
0x1271   :  { %v4321_v9 = vpop.f32.mrb[152].mxu0 }
0x1272   :  { %v4322_v20 = vadd.f32 %v10555_v33, %v4321_v9  ;;  %v12250_v40 = vpop.f32.mrb[153].mxu0 }
0x1273   :  { %v4324_v52 = vpop.f32.mrb[154].mxu0 }
0x1274   :  { %v4344_v18 = vadd.f32 %v4322_v20, %v16097_v12  ;;  %v4325_v11 = vadd.f32 %v10555_v33, %v4324_v52  ;;  %v12251_v27 = vpop.f32.mrb[155].mxu0 }
0x1276   :  { %v4350_v55 = vmul.f32 %v4344_v18, %v14818_v51  ;;  %v4345_v31 = vadd.f32 %v4325_v11, %v16100_v53  ;;  %v13908_v53 = vld [vmem:[%s18138_s6 + $0x178] sm:$0xff]  }
0x1277   :  { %12311 = vmatpush3.bf16.msra.mxu1 %v13908_v53 }
0x1278   :  { %v4351_v32 = vmul.f32 %v4345_v31, %v14815_v49  ;;  %v4450_v28 = vrot.slane %v4350_v55, 7  ;;  %12324 = vmatprep.subr.bf16.mxu1 %v14620_v15 }
0x127a   :  { %v4451_v21 = vrot.slane %v4351_v32, 7  ;;  %v4329_v16 = vpop.f32.mrb[156].mxu0  ;;  %v16302_v39 = vsel %vm196_vm0, 0.0, %v4450_v28 }
0x127b   :  { %v4330_v46 = vadd.f32 %v10555_v33, %v4329_v16  ;;  %v12254_v36 = vpop.f32.mrb[157].mxu0  ;;  %v4472_v22 = vrot.slane %v16302_v39, 1  ;;  %v4503_v19 = vrot.slane %v16302_v39, 2 }
0x127c   :  { %v16290_v10 = vsel %vm196_vm0, %v4450_v28, %v4451_v21  ;;  %v4332_v56 = vpop.f32.mrb[158].mxu0 }
0x127d   :  { %v4346_v4 = vadd.f32 %v4330_v46, %v16115_v35  ;;  %v4333_v12 = vadd.f32 %v10555_v33, %v4332_v56  ;;  %v12255_v37 = vpop.f32.mrb[159].mxu0  ;;  %v4504_v30 = vrot.slane %v16290_v10, 2 }
0x127f   :  { %v4352_v43 = vmul.f32 %v4346_v4, %v14828_v57  ;;  %v4347_v42 = vadd.f32 %v4333_v12, %v16123_v8  ;;  %v4473_v8 = vrot.slane %v16290_v10, 1  ;;  %v4505_v11 = vsel %vm251_vm1, %v4503_v19, %v4504_v30 }
0x1281   :  { %v4453_v26 = vrot.slane %v4352_v43, 7  ;;  %v4353_v35 = vmul.f32 %v4347_v42, %v14873_v29  ;;  %v4474_v55 = vsel %vm219_vm2, %v4472_v22, %v4473_v8 }
0x1283   :  { %v4337_v44 = vpop.f32.mrb[160].mxu0  ;;  %v16309_v14 = vsel %vm196_vm0, %v4451_v21, %v4453_v26  ;;  %v4455_v38 = vrot.slane %v4353_v35, 7 }
0x1284   :  { %v4338_v63 = vadd.f32 %v10555_v33, %v4337_v44  ;;  %v12258_v17 = vpop.f32.mrb[161].mxu0  ;;  %v4506_v62 = vrot.slane %v16309_v14, 2  ;;  %v4475_v9 = vrot.slane %v16309_v14, 1 }
0x1285   :  { %v4340_v58 = vpop.f32.mrb[162].mxu0  ;;  %v16316_v20 = vsel %vm196_vm0, %v4453_v26, %v4455_v38 }
0x1286   :  { %v4348_v40 = vadd.f32 %v4338_v63, %v16144_v41  ;;  %v4341_v52 = vadd.f32 %v10555_v33, %v4340_v58  ;;  %v12259_v18 = vpop.f32.mrb[163].mxu0  ;;  %v4507_v27 = vsel %vm251_vm1, %v4504_v30, %v4506_v62  ;;  %v4476_v31 = vsel %vm219_vm2, %v4473_v8, %v4475_v9 }
0x1287   :  { %v13510_v21 = vpack.i.bf16 %v4507_v27, %v4505_v11  ;;  %v13505_v16 = vpack.i.bf16 %v4476_v31, %v4474_v55  ;;  %v4508_v41 = vrot.slane %v16316_v20, 2  ;;  %v4477_v33 = vrot.slane %v16316_v20, 1 }
0x1288   :  { %v4354_v32 = vmul.f32 %v4348_v40, %v14879_v34  ;;  %v4349_v28 = vadd.f32 %v4341_v52, %v16149_v60 }
0x1289   :  { %13511 = vrot.lane.b32.xlu1 %v13510_v21, %s14622_s15  ;;  %13506 = vrot.lane.b32.xlu0 %v13505_v16, %s14623_s16  ;;  %v4509_v42 = vsel %vm251_vm1, %v4506_v62, %v4508_v41  ;;  %v4478_v53 = vsel %vm219_vm2, %v4475_v9, %v4477_v33 }
0x128a   :  { %v4457_v46 = vrot.slane %v4354_v32, 7  ;;  %v4355_v36 = vmul.f32 %v4349_v28, %v14899_v2 }
0x128c   :  { %v4458_v56 = vsel %vm196_vm0, %v4455_v38, %v4457_v46  ;;  %v4459_v4 = vrot.slane %v4355_v36, 7 }
0x128d   :  { %v4510_v12 = vrot.slane %v4458_v56, 2  ;;  %v4479_v37 = vrot.slane %v4458_v56, 1 }
0x128e   :  { %v4460_v60 = vsel %vm196_vm0, %v4457_v46, %v4459_v4  ;;  %v4469_v43 = vsel %vm196_vm0, %v4459_v4, 0.0 }
0x128f   :  { %v4483_v59 = vrot.slane %v4469_v43, 1  ;;  %v4514_v26 = vrot.slane %v4469_v43, 2  ;;  %v4511_v35 = vsel %vm251_vm1, %v4508_v41, %v4510_v12  ;;  %v4480_v44 = vsel %vm219_vm2, %v4477_v33, %v4479_v37 }
0x1290   :  { %v13520_v30 = vpack.i.bf16 %v4511_v35, %v4509_v42  ;;  %v13515_v8 = vpack.i.bf16 %v4480_v44, %v4478_v53  ;;  %v4512_v38 = vrot.slane %v4460_v60, 2  ;;  %v4481_v63 = vrot.slane %v4460_v60, 1 }
0x1292   :  { %13521 = vrot.lane.b32.xlu1 %v13520_v30, %s14622_s15  ;;  %13516 = vrot.lane.b32.xlu0 %v13515_v8, %s14623_s16  ;;  %v4513_v17 = vsel %vm251_vm1, %v4510_v12, %v4512_v38  ;;  %v4515_v22 = vsel %vm251_vm1, %v4512_v38, %v4514_v26  ;;  %v4482_v19 = vsel %vm219_vm2, %v4479_v37, %v4481_v63 }
0x1293   :  { %v4484_v58 = vsel %vm219_vm2, %v4481_v63, %v4483_v59  ;;  %v13530_v62 = vpack.i.bf16 %v4515_v22, %v4513_v17  ;;  %v10635_v17 = vld [vmem:[%s18146_s12 + $0x20] sm:$0xff]  ;;  %v10636_v22 = vld [vmem:[%s18146_s12 + $0x28] sm:$0xff] }
0x1294   :  { %v13525_v9 = vpack.i.bf16 %v4484_v58, %v4482_v19  ;;  %v10637_v19 = vld [vmem:[%s18146_s12 + $0x30] sm:$0xff]  ;;  %v13007_v58 = vpack.c.bf16 %v10636_v22, %v10635_v17 }
0x1296   :  { %13531 = vrot.lane.b32.xlu1 %v13530_v62, %s14622_s15  ;;  %13526 = vrot.lane.b32.xlu0 %v13525_v9, %s14623_s16  ;;  %v10638_v62 = vld [vmem:[%s18146_s12 + $0x38] sm:$0xff] }
0x1297   :  { %v13011_v9 = vpack.c.bf16 %v10638_v62, %v10637_v19  ;;  %13008 = vmatprep.subr.bf16.mxu0 %v13007_v58 }
0x12fb   :  { %v13512_v40 = vpop.permute.xlu1 %13511  ;;  %v13507_v52 = vpop.permute.xlu0 %13506 }
0x12fc   :  { %v13514_v18 = vunpack.i.h.bf16 %v13512_v40  ;;  %v13513_v11 = vunpack.i.l.bf16 %v13512_v40  ;;  %v13509_v27 = vunpack.i.h.bf16 %v13507_v52  ;;  %v13508_v55 = vunpack.i.l.bf16 %v13507_v52  ;;  %v10608_v40 = vld [vmem:[%s18143_s7 + $0x7] ss:$0 sm:$0xff] }
0x12fe   :  { %v4535_v31 = vsel %vm283_vm4, %v16290_v10, %v13509_v27  ;;  %v4534_v32 = vsel %vm283_vm4, %v16302_v39, %v13508_v55 }
0x12ff   :  { %v4541_v28 = vsel %vm290_vm5, %v4535_v31, %v13514_v18  ;;  %v4540_v21 = vsel %vm290_vm5, %v4534_v32, %v13513_v11 }
0x1300   :  { %v4546_v16 = vpack.c.bf16 %v4541_v28, %v4540_v21 }
0x1302   :  { %12289 = vmatmul.mubr.msk.bf16.vlgmr.msra.gmra.mrb[164].mxu0 %vm355_vm6, %v4546_v16  ;;  %12313 = vmatmul.mubr.msk.bf16.vlgmr.msra.gmra.mrb[108].mxu1 %vm355_vm6, %v4546_v16 }
0x1303   :  { %12292 = vmatprep.mubr.msk.bf16.mxu0 %vm14621_vm3, %v14620_v15  ;;  %12316 = vmatprep.mubr.msk.bf16.mxu1 %vm14621_vm3, %v14620_v15 }
0x1304   :  { %v13522_v46 = vpop.permute.xlu1 %13521  ;;  %v13517_v36 = vpop.permute.xlu0 %13516  ;;  %13010 = vmatpush3.bf16.msra.mxu0 %v13007_v58 }
0x1305   :  { %v13524_v10 = vunpack.i.h.bf16 %v13522_v46  ;;  %v13523_v41 = vunpack.i.l.bf16 %v13522_v46  ;;  %v13519_v39 = vunpack.i.h.bf16 %v13517_v36  ;;  %v13518_v33 = vunpack.i.l.bf16 %v13517_v36  ;;  %13012 = vmatprep.subr.bf16.mxu0 %v13011_v9 }
0x1307   :  { %v4537_v4 = vsel %vm283_vm4, %v16316_v20, %v13519_v39  ;;  %v4536_v12 = vsel %vm283_vm4, %v16309_v14, %v13518_v33  ;;  %v10585_v39 = vld [vmem:[%s18144_s5 + $0x7] ss:$0 sm:$0xff] }
0x1308   :  { %v13532_v37 = vpop.permute.xlu1 %13531  ;;  %v13527_v43 = vpop.permute.xlu0 %13526  ;;  %v4542_v42 = vsel %vm290_vm5, %v4536_v12, %v13523_v41  ;;  %v4543_v53 = vsel %vm290_vm5, %v4537_v4, %v13524_v10  ;;  %13014 = vmatpush3.bf16.msra.mxu0 %v13011_v9 }
0x1309   :  { %v13529_v59 = vunpack.i.h.bf16 %v13527_v43  ;;  %v13528_v26 = vunpack.i.l.bf16 %v13527_v43  ;;  %v4547_v35 = vpack.c.bf16 %v4543_v53, %v4542_v42  ;;  %v13534_v44 = vunpack.i.h.bf16 %v13532_v37  ;;  %12357 = vmatprep.subr.bf16.mxu0 %v14620_v15 }
0x130a   :  { %v13533_v30 = vunpack.i.l.bf16 %v13532_v37 }
0x130b   :  { %v4539_v8 = vsel %vm283_vm4, %v4460_v60, %v13529_v59  ;;  %v4538_v38 = vsel %vm283_vm4, %v4458_v56, %v13528_v26  ;;  %12293 = vmatmul.mubr.msk.bf16.gmra.mrb[168].mxu0 %vm355_vm6, %v4547_v35  ;;  %12317 = vmatmul.mubr.msk.bf16.gmra.mrb[112].mxu1 %vm355_vm6, %v4547_v35  ;;  %v13910_v56 = vld [vmem:[%s18142_s10 + $0x70] sm:$0xff]   ;;  %v13911_v60 = vld [vmem:[%s18142_s10 + $0x78] sm:$0xff]  }
0x130c   :  { %12296 = vmatprep.mubr.msk.bf16.mxu0 %vm14621_vm3, %v14620_v15  ;;  %12320 = vmatprep.mubr.msk.bf16.mxu1 %vm14621_vm3, %v14620_v15  ;;  %v4544_v14 = vsel %vm290_vm5, %v4538_v38, %v13533_v30  ;;  %v4545_v20 = vsel %vm290_vm5, %v4539_v8, %v13534_v44 }
0x130d   :  { %v4548_v63 = vpack.c.bf16 %v4545_v20, %v4544_v14  ;;  %12325 = vmatpush3.bf16.msra.mxu1 %v13910_v56 }
0x130e   :  { %12326 = vmatprep.subr.bf16.mxu1 %v14620_v15 }
0x1311   :  { %12327 = vmatpush3.bf16.msra.mxu1 %v13911_v60 }
0x1312   :  { %12381 = vmatprep.subr.bf16.mxu1 %v14620_v15 }
0x1313   :  { %12297 = vmatmul.mubr.msk.bf16.gmra.mrb[172].mxu0 %vm355_vm6, %v4548_v63  ;;  %12321 = vmatmul.mubr.msk.bf16.gmra.mrb[116].mxu1 %vm355_vm6, %v4548_v63 }
0x1314   :  { %12328 = vmatprep.mubr.msk.bf16.mxu1 %vm14621_vm3, %v14620_v15 }
0x13d5   :  { %v4649_v52 = vpop.f32.mrb[164].mxu0  ;;  %v4763_v18 = vpop.f32.mrb[108].mxu1 }
0x13d6   :  { %v4764_v11 = vadd.f32 %v10608_v40, %v4763_v18  ;;  %v12290_v27 = vpop.f32.mrb[165].mxu0  ;;  %v12314_v55 = vpop.f32.mrb[109].mxu1  ;;  %v4650_v35 = vadd.f32 %v10585_v39, %v4649_v52 }
0x13d7   :  { %v4652_v31 = vpop.f32.mrb[166].mxu0  ;;  %v4766_v32 = vpop.f32.mrb[110].mxu1 }
0x13d8   :  { %v10618_v28 = vmul.f32 -1.442695, %v4764_v11  ;;  %v4767_v21 = vadd.f32 %v10608_v40, %v4766_v32  ;;  %v12291_v16 = vpop.f32.mrb[167].mxu0  ;;  %v12315_v46 = vpop.f32.mrb[111].mxu1  ;;  %v4653_v8 = vadd.f32 %v10585_v39, %v4652_v31 }
0x13da   :  { %14288 = vpow2.f32 %v10618_v28  ;;  %v10619_v36 = vmul.f32 -1.442695, %v4767_v21 }
0x13dc   :  { %14290 = vpow2.f32 %v10619_v36 }
0x13de   :  { %v4657_v10 = vpop.f32.mrb[168].mxu0  ;;  %v4771_v41 = vpop.f32.mrb[112].mxu1 }
0x13df   :  { %v4772_v33 = vadd.f32 %v10608_v40, %v4771_v41  ;;  %v12294_v4 = vpop.f32.mrb[169].mxu0  ;;  %v12318_v12 = vpop.f32.mrb[113].mxu1  ;;  %v4658_v11 = vadd.f32 %v10585_v39, %v4657_v10 }
0x13e0   :  { %v4660_v37 = vpop.f32.mrb[170].mxu0  ;;  %v4774_v43 = vpop.f32.mrb[114].mxu1 }
0x13e1   :  { %v10620_v42 = vmul.f32 -1.442695, %v4772_v33  ;;  %v4775_v53 = vadd.f32 %v10608_v40, %v4774_v43  ;;  %v12295_v59 = vpop.f32.mrb[171].mxu0  ;;  %v12319_v26 = vpop.f32.mrb[115].mxu1  ;;  %v4661_v31 = vadd.f32 %v10585_v39, %v4660_v37 }
0x13e3   :  { %14292 = vpow2.f32 %v10620_v42  ;;  %v10621_v44 = vmul.f32 -1.442695, %v4775_v53 }
0x13e4   :  { %v14289_v30 = vpop.eup %14288 }
0x13e5   :  { %v4810_v38 = vadd.f32 1.0, %v14289_v30  ;;  %14294 = vpow2.f32 %v10621_v44 }
0x13e6   :  { %v14291_v14 = vpop.eup %14290  ;;  %14296 = vtanh.f32 %v4650_v35  ;;  %v4665_v20 = vpop.f32.mrb[172].mxu0 }
0x13e7   :  { %v4779_v63 = vpop.f32.mrb[116].mxu1  ;;  %14298 = vrcp.f32 %v4810_v38  ;;  %v4811_v56 = vadd.f32 1.0, %v14291_v14  ;;  %v12298_v17 = vpop.f32.mrb[173].mxu0  ;;  %v4666_v33 = vadd.f32 %v10585_v39, %v4665_v20 }
0x13e8   :  { %v4780_v60 = vadd.f32 %v10608_v40, %v4779_v63  ;;  %v12322_v22 = vpop.f32.mrb[117].mxu1  ;;  %14300 = vtanh.f32 %v4653_v8  ;;  %v4668_v19 = vpop.f32.mrb[174].mxu0 }
0x13e9   :  { %v4782_v58 = vpop.f32.mrb[118].mxu1  ;;  %14302 = vrcp.f32 %v4811_v56  ;;  %v12299_v52 = vpop.f32.mrb[175].mxu0  ;;  %v4669_v12 = vadd.f32 %v10585_v39, %v4668_v19  ;;  %v10418_v22 = vld [vmem:[%s18147_s11 + $0x4] ss:$0 sm:$0xff]  ;;  %v10492_v19 = vld [vmem:[%s18147_s11 + $0x5] ss:$0 sm:$0xff] }
0x13ea   :  { %v10622_v62 = vmul.f32 -1.442695, %v4780_v60  ;;  %v4783_v9 = vadd.f32 %v10608_v40, %v4782_v58  ;;  %v12323_v18 = vpop.f32.mrb[119].mxu1  ;;  %v13055_v58 = vadd.f32 %v10492_v19, %v10418_v22  ;;  %v10629_v52 = vld [vmem:[%s18147_s11 + $0x7] ss:$0 sm:$0xff] }
0x13ec   :  { %14304 = vpow2.f32 %v10622_v62  ;;  %v10623_v27 = vmul.f32 -1.442695, %v4783_v9  ;;  %v10566_v62 = vld [vmem:[%s18147_s11 + $0x6] ss:$0 sm:$0xff] }
0x13ed   :  { %v14293_v55 = vpop.eup %14292  ;;  %v13056_v9 = vadd.f32 %v13055_v58, %v10566_v62 }
0x13ee   :  { %14306 = vpow2.f32 %v10623_v27  ;;  %v4812_v32 = vadd.f32 1.0, %v14293_v55 }
0x13ef   :  { %v14295_v28 = vpop.eup %14294  ;;  %14308 = vtanh.f32 %v4658_v11  ;;  %v13057_v18 = vadd.f32 %v13056_v9, %v10629_v52 }
0x13f0   :  { %v14297_v21 = vpop.eup %14296  ;;  %14310 = vrcp.f32 %v4812_v32  ;;  %v4813_v16 = vadd.f32 1.0, %v14295_v28 }
0x13f1   :  { %v14299_v46 = vpop.eup %14298  ;;  %14312 = vtanh.f32 %v4661_v31 }
0x13f2   :  { %v14301_v36 = vpop.eup %14300  ;;  %v4828_v41 = vmul.f32 %v14299_v46, %v14297_v21  ;;  %14314 = vrcp.f32 %v4813_v16 }
0x13f3   :  { %v14303_v40 = vpop.eup %14302  ;;  %14316 = vtanh.f32 %v4666_v33 }
0x13f4   :  { %v4829_v4 = vmul.f32 %v14303_v40, %v14301_v36 }
0x13f6   :  { %v14305_v10 = vpop.eup %14304  ;;  %v4834_v42 = vpack.c.bf16 %v4829_v4, %v4828_v41 }
0x13f7   :  { %v4814_v43 = vadd.f32 1.0, %v14305_v10 }
0x13f8   :  { %v14307_v37 = vpop.eup %14306  ;;  %12329 = vmatmul.mubr.msk.bf16.vlgmr.msra.gmra.mrb[72].mxu1 %vm283_vm4, %v4834_v42 }
0x13f9   :  { %14318 = vrcp.f32 %v4814_v43  ;;  %v4815_v53 = vadd.f32 1.0, %v14307_v37  ;;  %v14309_v59 = vpop.eup %14308  ;;  %12332 = vmatprep.mubr.msk.bf16.mxu1 %vm14621_vm3, %v14620_v15 }
0x13fa   :  { %14320 = vtanh.f32 %v4669_v12  ;;  %v14311_v26 = vpop.eup %14310 }
0x13fb   :  { %14322 = vrcp.f32 %v4815_v53  ;;  %v14313_v35 = vpop.eup %14312  ;;  %v4830_v44 = vmul.f32 %v14311_v26, %v14309_v59 }
0x13fc   :  { %v14315_v30 = vpop.eup %14314 }
0x13fd   :  { %v4831_v8 = vmul.f32 %v14315_v30, %v14313_v35  ;;  %v14317_v38 = vpop.eup %14316  ;;  %v10640_v30 = vld [vmem:[%s18148_s13 + $0x1] ss:$0 sm:$0xff] }
0x13ff   :  { %v4835_v39 = vpack.c.bf16 %v4831_v8, %v4830_v44 }
0x1401   :  { %12333 = vmatmul.mubr.msk.bf16.gmra.mrb[76].mxu1 %vm283_vm4, %v4835_v39 }
0x1402   :  { %12336 = vmatprep.mubr.msk.bf16.mxu1 %vm14621_vm3, %v14620_v15 }
0x1403   :  { %v14319_v14 = vpop.eup %14318 }
0x1404   :  { %v14321_v20 = vpop.eup %14320  ;;  %v4832_v63 = vmul.f32 %v14319_v14, %v14317_v38 }
0x1405   :  { %v14323_v56 = vpop.eup %14322 }
0x1406   :  { %v4833_v60 = vmul.f32 %v14323_v56, %v14321_v20 }
0x1408   :  { %v4836_v17 = vpack.c.bf16 %v4833_v60, %v4832_v63 }
0x140a   :  { %12337 = vmatmul.mubr.msk.bf16.gmra.mrb[80].mxu1 %vm283_vm4, %v4836_v17 }
0x140b   :  { %12393 = vmatprep.mubr.msk.bf16.mxu1 %vm14621_vm3, %v14620_v15 }
0x14cb   :  { %v4905_v11 = vpop.f32.mrb[72].mxu1 }
0x14cc   :  { %v13058_v27 = vadd.f32 %v13057_v18, %v4905_v11  ;;  %v12330_v55 = vpop.f32.mrb[73].mxu1 }
0x14cd   :  { %v4908_v31 = vpop.f32.mrb[74].mxu1 }
0x14ce   :  { %v4934_v32 = vmul.f32 %v13058_v27, %v14818_v51  ;;  %v13062_v28 = vadd.f32 %v13057_v18, %v4908_v31  ;;  %v12331_v21 = vpop.f32.mrb[75].mxu1 }
0x14cf   :  { %v13916_v21 = vld [vmem:[%s18138_s6 + $0x190] sm:$0xff]  }
0x14d0   :  { %v4935_v16 = vmul.f32 %v13062_v28, %v14815_v49  ;;  %12348 = vmatprep.mubr.msk.f32.mxu0 %vm283_vm4, %v4934_v32  ;;  %v13913_v32 = vld [vmem:[%s18137_s4 + $0x180] sm:$0xff]   ;;  %v13915_v28 = vld [vmem:[%s18137_s4 + $0x188] sm:$0xff]  }
0x14d2   :  { %12349 = vmatmul.mubr.msk.f32.vlgmr.msra.gmra.mrb[90].mxu0 %vm283_vm4, %v4935_v16  ;;  %v13917_v16 = vld [vmem:[%s18137_s4 + $0x190] sm:$0xff]  }
0x14d3   :  { %12358 = vmatpush3.bf16.msra.mxu0 %v13913_v32 }
0x14d4   :  { %v4913_v46 = vpop.f32.mrb[76].mxu1  ;;  %12359 = vmatprep.subr.bf16.mxu0 %v14620_v15 }
0x14d5   :  { %v13066_v36 = vadd.f32 %v13057_v18, %v4913_v46  ;;  %v12334_v41 = vpop.f32.mrb[77].mxu1  ;;  %v13918_v46 = vld [vmem:[%s18138_s6 + $0x198] sm:$0xff]  }
0x14d6   :  { %v4916_v40 = vpop.f32.mrb[78].mxu1  ;;  %v13920_v41 = vld [vmem:[%s18138_s6 + $0x1a0] sm:$0xff]  }
0x14d7   :  { %v4936_v33 = vmul.f32 %v13066_v36, %v14828_v57  ;;  %v13070_v4 = vadd.f32 %v13057_v18, %v4916_v40  ;;  %v12335_v10 = vpop.f32.mrb[79].mxu1  ;;  %12360 = vmatpush3.bf16.msra.mxu0 %v13915_v28  ;;  %v13919_v36 = vld [vmem:[%s18137_s4 + $0x198] sm:$0xff]   ;;  %v13921_v40 = vld [vmem:[%s18137_s4 + $0x1a0] sm:$0xff]   ;;  %v13923_v28 = vld [vmem:[%s18137_s4 + $0x1a8] sm:$0xff]  }
0x14d8   :  { %12361 = vmatprep.subr.bf16.mxu0 %v14620_v15 }
0x14d9   :  { %v4937_v12 = vmul.f32 %v13070_v4, %v14873_v29  ;;  %12351 = vmatprep.mubr.msk.f32.mxu0 %vm283_vm4, %v4936_v33  ;;  %v10647_v33 = vld [vmem:[%s18139_s2 + $0x4] sm:$0x3] }
0x14da   :  { %v5113_v10 = vrot.slane %v10647_v33, %v14771_v23 }
0x14db   :  { %12352 = vmatmul.mubr.msk.f32.gmra.mrb[176].mxu0 %vm283_vm4, %v4937_v12  ;;  %v5147_v12 = vrot.slane %v10647_v33, %v14777_v25 }
0x14dc   :  { %12362 = vmatpush3.bf16.msra.mxu0 %v13917_v16 }
0x14dd   :  { %v4921_v43 = vpop.f32.mrb[80].mxu1  ;;  %12363 = vmatprep.subr.bf16.mxu0 %v14620_v15 }
0x14de   :  { %v13074_v42 = vadd.f32 %v13057_v18, %v4921_v43  ;;  %v12338_v37 = vpop.f32.mrb[81].mxu1 }
0x14df   :  { %v4924_v53 = vpop.f32.mrb[82].mxu1 }
0x14e0   :  { %v4938_v59 = vmul.f32 %v13074_v42, %v14879_v34  ;;  %v13078_v26 = vadd.f32 %v13057_v18, %v4924_v53  ;;  %v12339_v35 = vpop.f32.mrb[83].mxu1  ;;  %12364 = vmatpush3.bf16.msra.mxu0 %v13919_v36 }
0x14e1   :  { %12365 = vmatprep.subr.bf16.mxu0 %v14620_v15 }
0x14e2   :  { %v4939_v44 = vmul.f32 %v13078_v26, %v14899_v2  ;;  %12354 = vmatprep.mubr.msk.f32.mxu0 %vm283_vm4, %v4938_v59  ;;  %v16532_v59 = vld [vmem:[%s18140_s3 + $0x2] ss:$0 sm:$0xff] }
0x14e4   :  { %12355 = vmatmul.mubr.msk.f32.gmra.mrb[178].mxu0 %vm283_vm4, %v4939_v44 }
0x14e5   :  { %12369 = vmatprep.mubr.msk.bf16.mxu0 %vm14621_vm3, %v14620_v15  ;;  %12366 = vmatpush3.bf16.msra.mxu0 %v13921_v40 }
0x14e6   :  { %12367 = vmatprep.subr.bf16.mxu0 %v14620_v15 }
0x14e9   :  { %12368 = vmatpush3.bf16.msra.mxu0 %v13923_v28 }
0x14ea   :  { %12405 = vmatprep.subr.bf16.mxu0 %v14620_v15 }
0x15a5   :  { %v12350_v8 = vpop.f32.mrb[90].mxu0 }
0x15a6   :  { %v5043_v39 = vadd.f32 %v12350_v8, %v10640_v30  ;;  %v5037_v38 = vpop.f32.mrb[91].mxu0 }
0x15a7   :  { %v5038_v14 = vadd.f32 %v10640_v30, %v5037_v38 }
0x15a8   :  { %v5067_v20 = vmul.f32 %v5043_v39, %v14815_v49 }
0x15a9   :  { %v5066_v63 = vmul.f32 %v5038_v14, %v14818_v51 }
0x15aa   :  { %v16445_v56 = vadd.f32 %v5067_v20, %v15494_v54 }
0x15ab   :  { %v16448_v60 = vadd.f32 %v5066_v63, %v15500_v3 }
0x15ac   :  { %5087 = vperm.xlu1 %13535, %v16445_v56  }
0x15ad   :  { %5082 = vperm.xlu0 %13414, %v16448_v60  }
0x15ae   :  { %v12353_v17 = vpop.f32.mrb[176].mxu0 }
0x15af   :  { %v5053_v22 = vadd.f32 %v12353_v17, %v10640_v30  ;;  %v5047_v19 = vpop.f32.mrb[177].mxu0 }
0x15b0   :  { %v5048_v58 = vadd.f32 %v10640_v30, %v5047_v19  ;;  %13536 = vset.pattern.permute.xlu1 %v14618_v0 }
0x15b1   :  { %v5069_v62 = vmul.f32 %v5053_v22, %v14873_v29  ;;  %5121 = vperm.xlu1 %13536, %v16448_v60  }
0x15b2   :  { %v5068_v54 = vmul.f32 %v5048_v58, %v14828_v57 }
0x15b3   :  { %v16460_v3 = vadd.f32 %v5069_v62, %v15508_v45 }
0x15b4   :  { %v16457_v9 = vadd.f32 %v5068_v54, %v15514_v5 }
0x15b5   :  { %13538 = vset.pattern.permute.xlu1 %v14619_v1 }
0x15b6   :  { %5092 = vperm.xlu0 %13414, %v16457_v9   ;;  %5097 = vperm.xlu1 %13538, %v16460_v3  }
0x15b7   :  { %v12356_v52 = vpop.f32.mrb[178].mxu0 }
0x15b8   :  { %v5057_v18 = vpop.f32.mrb[179].mxu0  ;;  %v5063_v27 = vadd.f32 %v12356_v52, %v10640_v30 }
0x15b9   :  { %v5058_v11 = vadd.f32 %v10640_v30, %v5057_v18 }
0x15ba   :  { %13537 = vset.pattern.permute.xlu0 %v14618_v0  ;;  %13539 = vset.pattern.permute.xlu1 %v14618_v0  ;;  %v5071_v45 = vmul.f32 %v5063_v27, %v14899_v2 }
0x15bb   :  { %v5070_v55 = vmul.f32 %v5058_v11, %v14879_v34  ;;  %5125 = vperm.xlu0 %13537, %v16445_v56   ;;  %5129 = vperm.xlu1 %13539, %v16457_v9  }
0x15bc   :  { %v16478_v31 = vadd.f32 %v5071_v45, %v15522_v7  ;;  %v13914_v7 = vld [vmem:[%s18138_s6 + $0x188] sm:$0xff]  }
0x15bd   :  { %v16472_v5 = vadd.f32 %v5070_v55, %v15528_v13  ;;  %v13912_v13 = vld [vmem:[%s18138_s6 + $0x180] sm:$0xff]  }
0x15be   :  { %12382 = vmatpush3.bf16.msra.mxu1 %v13912_v13 }
0x15bf   :  { %13540 = vset.pattern.permute.xlu0 %v14619_v1  ;;  %5133 = vperm.xlu1 %13539, %v16460_v3  }
0x15c0   :  { %5102 = vperm.xlu0 %13540, %v16472_v5   ;;  %12383 = vmatprep.subr.bf16.mxu1 %v14620_v15 }
0x15c2   :  { %12384 = vmatpush3.bf16.msra.mxu1 %v13914_v7  ;;  %v13922_v7 = vld [vmem:[%s18138_s6 + $0x1a8] sm:$0xff]  }
0x15c3   :  { %5137 = vperm.xlu1 %13539, %v16472_v5   ;;  %12385 = vmatprep.subr.bf16.mxu1 %v14620_v15 }
0x15c4   :  { %5107 = vperm.xlu0 %13540, %v16478_v31  }
0x15c6   :  { %12386 = vmatpush3.bf16.msra.mxu1 %v13916_v21 }
0x15c7   :  { %5141 = vperm.xlu1 %13539, %v16478_v31   ;;  %12387 = vmatprep.subr.bf16.mxu1 %v14620_v15 }
0x15ca   :  { %12388 = vmatpush3.bf16.msra.mxu1 %v13918_v46 }
0x15cb   :  { %13661 = vset.pattern.permute.xlu1 %v14619_v1  ;;  %12389 = vmatprep.subr.bf16.mxu1 %v14620_v15 }
0x15ce   :  { %12390 = vmatpush3.bf16.msra.mxu1 %v13920_v41 }
0x15cf   :  { %12391 = vmatprep.subr.bf16.mxu1 %v14620_v15 }
0x15d2   :  { %12392 = vmatpush3.bf16.msra.mxu1 %v13922_v7 }
0x15d3   :  { %12421 = vmatprep.subr.bf16.mxu1 %v14620_v15 }
0x162b   :  { %v5088_v4 = vpop.permute.xlu1 %5087 }
0x162c   :  { %v5083_v43 = vpop.permute.xlu0 %5082  ;;  %v5115_v14 = vmul.f32 %v5113_v10, %v5088_v4 }
0x162d   :  { %v5114_v37 = vmul.f32 %v5113_v10, %v5083_v43 }
0x1630   :  { %v5122_v42 = vpop.permute.xlu1 %5121 }
0x1631   :  { %v5148_v53 = vmul.f32 %v5147_v12, %v5122_v42 }
0x1633   :  { %v5154_v26 = vadd.f32 %v5148_v53, %v5114_v37 }
0x1635   :  { %v5168_v35 = vadd.f32 %v16532_v59, %v5154_v26  ;;  %v5093_v44 = vpop.permute.xlu0 %5092  ;;  %v5098_v30 = vpop.permute.xlu1 %5097 }
0x1636   :  { %v5116_v20 = vmul.f32 %v5113_v10, %v5093_v44  ;;  %v5117_v54 = vmul.f32 %v5113_v10, %v5098_v30 }
0x1637   :  { %v16536_v8 = vmul.f32 %v5168_v35, %v14818_v51 }
0x1639   :  { %v5186_v22 = vrot.slane %v16536_v8, 7 }
0x163a   :  { %v5126_v39 = vpop.permute.xlu0 %5125  ;;  %v5130_v38 = vpop.permute.xlu1 %5129 }
0x163b   :  { %v5149_v63 = vmul.f32 %v5147_v12, %v5126_v39  ;;  %v5150_v17 = vmul.f32 %v5147_v12, %v5130_v38  ;;  %v16542_v55 = vsel %vm196_vm0, 0.0, %v5186_v22 }
0x163c   :  { %v5239_v33 = vrot.slane %v16542_v55, 2  ;;  %v5208_v43 = vrot.slane %v16542_v55, 1 }
0x163d   :  { %v5155_v19 = vadd.f32 %v5149_v63, %v5115_v14  ;;  %v5156_v58 = vadd.f32 %v5150_v17, %v5116_v20 }
0x163e   :  { %v5134_v62 = vpop.permute.xlu1 %5133 }
0x163f   :  { %v5169_v52 = vadd.f32 %v16532_v59, %v5155_v19  ;;  %v5170_v18 = vadd.f32 %v16532_v59, %v5156_v58  ;;  %v5151_v11 = vmul.f32 %v5147_v12, %v5134_v62  ;;  %v5103_v27 = vpop.permute.xlu0 %5102 }
0x1640   :  { %v5118_v21 = vmul.f32 %v5113_v10, %v5103_v27 }
0x1641   :  { %v16545_v45 = vmul.f32 %v5169_v52, %v14815_v49  ;;  %v16548_v13 = vmul.f32 %v5170_v18, %v14828_v57  ;;  %v5157_v32 = vadd.f32 %v5151_v11, %v5117_v54 }
0x1642   :  { %v5138_v16 = vpop.permute.xlu1 %5137 }
0x1643   :  { %v5187_v46 = vrot.slane %v16545_v45, 7  ;;  %v5189_v36 = vrot.slane %v16548_v13, 7  ;;  %v5171_v41 = vadd.f32 %v16532_v59, %v5157_v32  ;;  %v5152_v40 = vmul.f32 %v5147_v12, %v5138_v16  ;;  %v5108_v4 = vpop.permute.xlu0 %5107 }
0x1644   :  { %v5119_v63 = vmul.f32 %v5113_v10, %v5108_v4 }
0x1645   :  { %v5188_v42 = vsel %vm196_vm0, %v5186_v22, %v5187_v46  ;;  %v16565_v37 = vsel %vm196_vm0, %v5187_v46, %v5189_v36  ;;  %v16568_v53 = vmul.f32 %v5171_v41, %v14873_v29  ;;  %v5158_v26 = vadd.f32 %v5152_v40, %v5118_v21 }
0x1646   :  { %v5142_v35 = vpop.permute.xlu1 %5141  ;;  %v5240_v44 = vrot.slane %v5188_v42, 2  ;;  %v5242_v30 = vrot.slane %v16565_v37, 2  ;;  %v5209_v39 = vrot.slane %v5188_v42, 1  ;;  %v5211_v38 = vrot.slane %v16565_v37, 1 }
0x1647   :  { %v5191_v14 = vrot.slane %v16568_v53, 7  ;;  %v5172_v20 = vadd.f32 %v16532_v59, %v5158_v26  ;;  %v5153_v17 = vmul.f32 %v5147_v12, %v5142_v35 }
0x1648   :  { %v5241_v22 = vsel %vm251_vm1, %v5239_v33, %v5240_v44  ;;  %v5243_v19 = vsel %vm251_vm1, %v5240_v44, %v5242_v30  ;;  %v5210_v58 = vsel %vm219_vm2, %v5208_v43, %v5209_v39  ;;  %v5212_v62 = vsel %vm219_vm2, %v5209_v39, %v5211_v38 }
0x1649   :  { %v5192_v54 = vsel %vm196_vm0, %v5189_v36, %v5191_v14  ;;  %v16580_v52 = vmul.f32 %v5172_v20, %v14879_v34  ;;  %v5159_v18 = vadd.f32 %v5153_v17, %v5119_v63  ;;  %v13546_v11 = vpack.i.bf16 %v5243_v19, %v5241_v22 }
0x164a   :  { %v13541_v27 = vpack.i.bf16 %v5212_v62, %v5210_v58  ;;  %v5244_v12 = vrot.slane %v5192_v54, 2  ;;  %v5213_v7 = vrot.slane %v5192_v54, 1 }
0x164b   :  { %v5193_v32 = vrot.slane %v16580_v52, 7  ;;  %v5173_v10 = vadd.f32 %v16532_v59, %v5159_v18  ;;  %13547 = vrot.lane.b32.xlu1 %v13546_v11, %s14622_s15 }
0x164c   :  { %13542 = vrot.lane.b32.xlu0 %v13541_v27, %s14623_s16  ;;  %v5245_v41 = vsel %vm251_vm1, %v5242_v30, %v5244_v12  ;;  %v5214_v59 = vsel %vm219_vm2, %v5211_v38, %v5213_v7 }
0x164d   :  { %v5194_v28 = vsel %vm196_vm0, %v5191_v14, %v5193_v32  ;;  %v16588_v21 = vmul.f32 %v5173_v10, %v14899_v2 }
0x164e   :  { %v5246_v16 = vrot.slane %v5194_v28, 2  ;;  %v5215_v46 = vrot.slane %v5194_v28, 1 }
0x164f   :  { %v5195_v36 = vrot.slane %v16588_v21, 7 }
0x1650   :  { %v5247_v40 = vsel %vm251_vm1, %v5244_v12, %v5246_v16  ;;  %v5216_v33 = vsel %vm219_vm2, %v5213_v7, %v5215_v46 }
0x1651   :  { %v5196_v4 = vsel %vm196_vm0, %v5193_v32, %v5195_v36  ;;  %v5205_v43 = vsel %vm196_vm0, %v5195_v36, 0.0  ;;  %v13556_v26 = vpack.i.bf16 %v5247_v40, %v5245_v41  ;;  %v13551_v35 = vpack.i.bf16 %v5216_v33, %v5214_v59 }
0x1652   :  { %v5250_v44 = vrot.slane %v5205_v43, 2  ;;  %v5248_v39 = vrot.slane %v5196_v4, 2  ;;  %v5217_v14 = vrot.slane %v5196_v4, 1  ;;  %v5219_v20 = vrot.slane %v5205_v43, 1 }
0x1653   :  { %13557 = vrot.lane.b32.xlu1 %v13556_v26, %s14622_s15  ;;  %13552 = vrot.lane.b32.xlu0 %v13551_v35, %s14623_s16 }
0x1654   :  { %v5249_v30 = vsel %vm251_vm1, %v5246_v16, %v5248_v39  ;;  %v5251_v38 = vsel %vm251_vm1, %v5248_v39, %v5250_v44  ;;  %v5218_v63 = vsel %vm219_vm2, %v5215_v46, %v5217_v14  ;;  %v5220_v17 = vsel %vm219_vm2, %v5217_v14, %v5219_v20 }
0x1655   :  { %v13566_v22 = vpack.i.bf16 %v5251_v38, %v5249_v30  ;;  %v13561_v19 = vpack.i.bf16 %v5220_v17, %v5218_v63 }
0x1657   :  { %13567 = vrot.lane.b32.xlu1 %v13566_v22, %s14622_s15  ;;  %13562 = vrot.lane.b32.xlu0 %v13561_v19, %s14623_s16 }
0x16bd   :  { %v13548_v58 = vpop.permute.xlu1 %13547 }
0x16be   :  { %v13550_v62 = vunpack.i.h.bf16 %v13548_v58  ;;  %v13549_v18 = vunpack.i.l.bf16 %v13548_v58  ;;  %v13543_v11 = vpop.permute.xlu0 %13542  ;;  %v13925_v58 = vld [vmem:[%s18141_s8 + $0x68] sm:$0xff]  }
0x16bf   :  { %v13545_v27 = vunpack.i.h.bf16 %v13543_v11  ;;  %v13544_v32 = vunpack.i.l.bf16 %v13543_v11 }
0x16c1   :  { %v5271_v10 = vsel %vm283_vm4, %v5188_v42, %v13545_v27  ;;  %v5270_v12 = vsel %vm283_vm4, %v16542_v55, %v13544_v32 }
0x16c2   :  { %v5277_v7 = vsel %vm290_vm5, %v5271_v10, %v13550_v62  ;;  %v5276_v16 = vsel %vm290_vm5, %v5270_v12, %v13549_v18  ;;  %v13927_v62 = vld [vmem:[%s18142_s10 + $0x88] sm:$0xff]  }
0x16c3   :  { %v5282_v46 = vpack.c.bf16 %v5277_v7, %v5276_v16  ;;  %v10686_v18 = vld [vmem:[%s18143_s7 + $0x8] ss:$0 sm:$0xff] }
0x16c5   :  { %12370 = vmatmul.mubr.msk.bf16.vlgmr.msra.gmra.mrb[180].mxu0 %vm355_vm6, %v5282_v46  ;;  %12394 = vmatmul.mubr.msk.bf16.vlgmr.msra.gmra.mrb[120].mxu1 %vm355_vm6, %v5282_v46  ;;  %v13558_v36 = vpop.permute.xlu1 %13557  ;;  %v13553_v41 = vpop.permute.xlu0 %13552 }
0x16c6   :  { %v13560_v40 = vunpack.i.h.bf16 %v13558_v36  ;;  %v13559_v59 = vunpack.i.l.bf16 %v13558_v36  ;;  %v13555_v33 = vunpack.i.h.bf16 %v13553_v41  ;;  %v13554_v43 = vunpack.i.l.bf16 %v13553_v41  ;;  %12373 = vmatprep.mubr.msk.bf16.mxu0 %vm14621_vm3, %v14620_v15  ;;  %12397 = vmatprep.mubr.msk.bf16.mxu1 %vm14621_vm3, %v14620_v15 }
0x16c8   :  { %v5273_v55 = vsel %vm283_vm4, %v5192_v54, %v13555_v33  ;;  %v5272_v42 = vsel %vm283_vm4, %v16565_v37, %v13554_v43 }
0x16c9   :  { %v13568_v26 = vpop.permute.xlu1 %13567  ;;  %v13563_v35 = vpop.permute.xlu0 %13562  ;;  %v5278_v44 = vsel %vm290_vm5, %v5272_v42, %v13559_v59  ;;  %v5279_v39 = vsel %vm290_vm5, %v5273_v55, %v13560_v40 }
0x16ca   :  { %v13565_v14 = vunpack.i.h.bf16 %v13563_v35  ;;  %v13564_v20 = vunpack.i.l.bf16 %v13563_v35  ;;  %v5283_v30 = vpack.c.bf16 %v5279_v39, %v5278_v44  ;;  %v13570_v38 = vunpack.i.h.bf16 %v13568_v26  ;;  %v10663_v35 = vld [vmem:[%s18144_s5 + $0x8] ss:$0 sm:$0xff] }
0x16cb   :  { %v13569_v63 = vunpack.i.l.bf16 %v13568_v26 }
0x16cc   :  { %v5275_v17 = vsel %vm283_vm4, %v5196_v4, %v13565_v14  ;;  %v5274_v22 = vsel %vm283_vm4, %v5194_v28, %v13564_v20  ;;  %v13924_v28 = vld [vmem:[%s18141_s8 + $0x60] sm:$0xff]  }
0x16cd   :  { %12374 = vmatmul.mubr.msk.bf16.gmra.mrb[184].mxu0 %vm355_vm6, %v5283_v30  ;;  %12398 = vmatmul.mubr.msk.bf16.gmra.mrb[124].mxu1 %vm355_vm6, %v5283_v30  ;;  %v5280_v37 = vsel %vm290_vm5, %v5274_v22, %v13569_v63  ;;  %v5281_v54 = vsel %vm290_vm5, %v5275_v17, %v13570_v38  ;;  %v13926_v4 = vld [vmem:[%s18142_s10 + $0x80] sm:$0xff]  }
0x16ce   :  { %12377 = vmatprep.mubr.msk.bf16.mxu0 %vm14621_vm3, %v14620_v15  ;;  %12401 = vmatprep.mubr.msk.bf16.mxu1 %vm14621_vm3, %v14620_v15  ;;  %v5284_v19 = vpack.c.bf16 %v5281_v54, %v5280_v37 }
0x16cf   :  { %12406 = vmatpush3.bf16.msra.mxu0 %v13924_v28  ;;  %12422 = vmatpush3.bf16.msra.mxu1 %v13926_v4 }
0x16d0   :  { %12407 = vmatprep.subr.bf16.mxu0 %v14620_v15  ;;  %12423 = vmatprep.subr.bf16.mxu1 %v14620_v15 }
0x16d3   :  { %12408 = vmatpush3.bf16.msra.mxu0 %v13925_v58  ;;  %12424 = vmatpush3.bf16.msra.mxu1 %v13927_v62 }
0x16d4   :  { %12461 = vmatprep.subr.bf16.mxu1 %v14620_v15  ;;  %12437 = vmatprep.subr.bf16.mxu0 %v14620_v15 }
0x16d5   :  { %12378 = vmatmul.mubr.msk.bf16.gmra.mrb[188].mxu0 %vm355_vm6, %v5284_v19  ;;  %12402 = vmatmul.mubr.msk.bf16.gmra.mrb[128].mxu1 %vm355_vm6, %v5284_v19 }
0x16d6   :  { %12409 = vmatprep.mubr.msk.bf16.mxu0 %vm14621_vm3, %v14620_v15  ;;  %12425 = vmatprep.mubr.msk.bf16.mxu1 %vm14621_vm3, %v14620_v15 }
0x1798   :  { %v5385_v11 = vpop.f32.mrb[180].mxu0  ;;  %v5499_v27 = vpop.f32.mrb[120].mxu1 }
0x1799   :  { %v5500_v32 = vadd.f32 %v10686_v18, %v5499_v27  ;;  %v12371_v10 = vpop.f32.mrb[181].mxu0  ;;  %v12395_v12 = vpop.f32.mrb[121].mxu1  ;;  %v5386_v63 = vadd.f32 %v10663_v35, %v5385_v11 }
0x179a   :  { %v5388_v7 = vpop.f32.mrb[182].mxu0  ;;  %v5502_v16 = vpop.f32.mrb[122].mxu1 }
0x179b   :  { %v10696_v46 = vmul.f32 -1.442695, %v5500_v32  ;;  %v5503_v36 = vadd.f32 %v10686_v18, %v5502_v16  ;;  %v12372_v41 = vpop.f32.mrb[183].mxu0  ;;  %v12396_v40 = vpop.f32.mrb[123].mxu1  ;;  %v5389_v37 = vadd.f32 %v10663_v35, %v5388_v7 }
0x179d   :  { %14324 = vpow2.f32 %v10696_v46  ;;  %v10697_v59 = vmul.f32 -1.442695, %v5503_v36 }
0x179f   :  { %14326 = vpow2.f32 %v10697_v59 }
0x17a0   :  { %v5393_v33 = vpop.f32.mrb[184].mxu0  ;;  %v5507_v43 = vpop.f32.mrb[124].mxu1 }
0x17a1   :  { %v5508_v55 = vadd.f32 %v10686_v18, %v5507_v43  ;;  %v12375_v42 = vpop.f32.mrb[185].mxu0  ;;  %v12399_v26 = vpop.f32.mrb[125].mxu1  ;;  %v5394_v7 = vadd.f32 %v10663_v35, %v5393_v33 }
0x17a2   :  { %v5396_v44 = vpop.f32.mrb[186].mxu0  ;;  %v5510_v39 = vpop.f32.mrb[126].mxu1 }
0x17a3   :  { %v10698_v14 = vmul.f32 -1.442695, %v5508_v55  ;;  %v5511_v20 = vadd.f32 %v10686_v18, %v5510_v39  ;;  %v12376_v30 = vpop.f32.mrb[187].mxu0  ;;  %v12400_v38 = vpop.f32.mrb[127].mxu1  ;;  %v5397_v59 = vadd.f32 %v10663_v35, %v5396_v44 }
0x17a5   :  { %14328 = vpow2.f32 %v10698_v14  ;;  %v10699_v17 = vmul.f32 -1.442695, %v5511_v20 }
0x17a7   :  { %v14325_v22 = vpop.eup %14324  ;;  %14330 = vpow2.f32 %v10699_v17 }
0x17a8   :  { %v5546_v54 = vadd.f32 1.0, %v14325_v22  ;;  %v5401_v19 = vpop.f32.mrb[188].mxu0  ;;  %v5515_v28 = vpop.f32.mrb[128].mxu1  ;;  %14332 = vtanh.f32 %v5386_v63 }
0x17a9   :  { %v14327_v4 = vpop.eup %14326  ;;  %v5516_v58 = vadd.f32 %v10686_v18, %v5515_v28  ;;  %v12379_v62 = vpop.f32.mrb[189].mxu0  ;;  %v5402_v20 = vadd.f32 %v10663_v35, %v5401_v19 }
0x17aa   :  { %v12403_v27 = vpop.f32.mrb[129].mxu1  ;;  %14334 = vrcp.f32 %v5546_v54  ;;  %v5547_v32 = vadd.f32 1.0, %v14327_v4  ;;  %v5404_v10 = vpop.f32.mrb[190].mxu0 }
0x17ab   :  { %v5518_v12 = vpop.f32.mrb[130].mxu1  ;;  %14336 = vtanh.f32 %v5389_v37  ;;  %v10700_v16 = vmul.f32 -1.442695, %v5516_v58  ;;  %v12380_v46 = vpop.f32.mrb[191].mxu0  ;;  %v5405_v63 = vadd.f32 %v10663_v35, %v5404_v10 }
0x17ac   :  { %v5519_v11 = vadd.f32 %v10686_v18, %v5518_v12  ;;  %v12404_v36 = vpop.f32.mrb[131].mxu1  ;;  %14338 = vrcp.f32 %v5547_v32 }
0x17ad   :  { %14340 = vpow2.f32 %v10700_v16  ;;  %v13928_v36 = vld [vmem:[%s18138_s6 + $0x1b0] sm:$0xff]  }
0x17ae   :  { %v10701_v41 = vmul.f32 -1.442695, %v5519_v11 }
0x17af   :  { %v14329_v40 = vpop.eup %14328 }
0x17b0   :  { %14342 = vpow2.f32 %v10701_v41  ;;  %v5548_v43 = vadd.f32 1.0, %v14329_v40  ;;  %v13930_v41 = vld [vmem:[%s18138_s6 + $0x1b8] sm:$0xff]  }
0x17b1   :  { %v14331_v55 = vpop.eup %14330  ;;  %14344 = vtanh.f32 %v5394_v7  ;;  %v13929_v7 = vld [vmem:[%s18137_s4 + $0x1b0] sm:$0xff]   ;;  %v13931_v40 = vld [vmem:[%s18137_s4 + $0x1b8] sm:$0xff]  }
0x17b2   :  { %14346 = vrcp.f32 %v5548_v43  ;;  %v5549_v42 = vadd.f32 1.0, %v14331_v55  ;;  %v14333_v26 = vpop.eup %14332  ;;  %v13933_v43 = vld [vmem:[%s18137_s4 + $0x1c0] sm:$0xff]   ;;  %v13934_v55 = vld [vmem:[%s18138_s6 + $0x1c8] sm:$0xff]  }
0x17b3   :  { %14348 = vtanh.f32 %v5397_v59  ;;  %v13932_v59 = vld [vmem:[%s18138_s6 + $0x1c0] sm:$0xff]  }
0x17b4   :  { %v14335_v39 = vpop.eup %14334  ;;  %14350 = vrcp.f32 %v5549_v42  ;;  %v13935_v42 = vld [vmem:[%s18137_s4 + $0x1c8] sm:$0xff]  }
0x17b5   :  { %v14337_v14 = vpop.eup %14336  ;;  %v5564_v18 = vmul.f32 %v14335_v39, %v14333_v26  ;;  %14352 = vtanh.f32 %v5402_v20  ;;  %v13936_v26 = vld [vmem:[%s18138_s6 + $0x1d0] sm:$0xff]  }
0x17b6   :  { %v14339_v30 = vpop.eup %14338  ;;  %v13937_v39 = vld [vmem:[%s18137_s4 + $0x1d0] sm:$0xff]  }
0x17b7   :  { %v14341_v38 = vpop.eup %14340  ;;  %v5565_v33 = vmul.f32 %v14339_v30, %v14337_v14  ;;  %v10707_v14 = vld [vmem:[%s18145_s9 + $0x6] ss:$0 sm:$0xff] }
0x17b8   :  { %v5550_v17 = vadd.f32 1.0, %v14341_v38 }
0x17b9   :  { %v5570_v44 = vpack.c.bf16 %v5565_v33, %v5564_v18 }
0x17ba   :  { %v14343_v22 = vpop.eup %14342  ;;  %14354 = vrcp.f32 %v5550_v17 }
0x17bb   :  { %v5551_v37 = vadd.f32 1.0, %v14343_v22  ;;  %v14345_v54 = vpop.eup %14344  ;;  %14356 = vtanh.f32 %v5405_v63  ;;  %12410 = vmatmul.mubr.msk.bf16.vlgmr.msra.gmra.mrb[192].mxu0 %vm283_vm4, %v5570_v44  ;;  %12426 = vmatmul.mubr.msk.bf16.vlgmr.msra.gmra.mrb[132].mxu1 %vm283_vm4, %v5570_v44 }
0x17bc   :  { %v14347_v28 = vpop.eup %14346  ;;  %12413 = vmatprep.mubr.msk.bf16.mxu0 %vm14621_vm3, %v14620_v15  ;;  %12429 = vmatprep.mubr.msk.bf16.mxu1 %vm14621_vm3, %v14620_v15 }
0x17bd   :  { %14358 = vrcp.f32 %v5551_v37  ;;  %v14349_v35 = vpop.eup %14348  ;;  %v5566_v19 = vmul.f32 %v14347_v28, %v14345_v54  ;;  %12462 = vmatpush3.bf16.msra.mxu1 %v13928_v36  ;;  %12438 = vmatpush3.bf16.msra.mxu0 %v13929_v7 }
0x17be   :  { %v14351_v4 = vpop.eup %14350  ;;  %12463 = vmatprep.subr.bf16.mxu1 %v14620_v15  ;;  %12439 = vmatprep.subr.bf16.mxu0 %v14620_v15 }
0x17bf   :  { %v5567_v58 = vmul.f32 %v14351_v4, %v14349_v35  ;;  %v14353_v27 = vpop.eup %14352 }
0x17c1   :  { %v5571_v62 = vpack.c.bf16 %v5567_v58, %v5566_v19  ;;  %12464 = vmatpush3.bf16.msra.mxu1 %v13930_v41  ;;  %12440 = vmatpush3.bf16.msra.mxu0 %v13931_v40 }
0x17c2   :  { %12465 = vmatprep.subr.bf16.mxu1 %v14620_v15  ;;  %12441 = vmatprep.subr.bf16.mxu0 %v14620_v15 }
0x17c3   :  { %12414 = vmatmul.mubr.msk.bf16.gmra.mrb[196].mxu0 %vm283_vm4, %v5571_v62  ;;  %12430 = vmatmul.mubr.msk.bf16.gmra.mrb[136].mxu1 %vm283_vm4, %v5571_v62 }
0x17c4   :  { %v14355_v32 = vpop.eup %14354  ;;  %12417 = vmatprep.mubr.msk.bf16.mxu0 %vm14621_vm3, %v14620_v15  ;;  %12433 = vmatprep.mubr.msk.bf16.mxu1 %vm14621_vm3, %v14620_v15 }
0x17c5   :  { %v14357_v10 = vpop.eup %14356  ;;  %v5568_v12 = vmul.f32 %v14355_v32, %v14353_v27  ;;  %12466 = vmatpush3.bf16.msra.mxu1 %v13932_v59  ;;  %12442 = vmatpush3.bf16.msra.mxu0 %v13933_v43 }
0x17c6   :  { %12467 = vmatprep.subr.bf16.mxu1 %v14620_v15  ;;  %12443 = vmatprep.subr.bf16.mxu0 %v14620_v15 }
0x17c7   :  { %v14359_v16 = vpop.eup %14358 }
0x17c8   :  { %v5569_v11 = vmul.f32 %v14359_v16, %v14357_v10  ;;  %v13939_v16 = vld [vmem:[%s18137_s4 + $0x1d8] sm:$0xff]  }
0x17c9   :  { %12468 = vmatpush3.bf16.msra.mxu1 %v13934_v55  ;;  %12444 = vmatpush3.bf16.msra.mxu0 %v13935_v42 }
0x17ca   :  { %v5572_v46 = vpack.c.bf16 %v5569_v11, %v5568_v12  ;;  %12469 = vmatprep.subr.bf16.mxu1 %v14620_v15  ;;  %12445 = vmatprep.subr.bf16.mxu0 %v14620_v15  ;;  %v13938_v12 = vld [vmem:[%s18138_s6 + $0x1d8] sm:$0xff]  }
0x17cc   :  { %12418 = vmatmul.mubr.msk.bf16.gmra.mrb[200].mxu0 %vm283_vm4, %v5572_v46  ;;  %12434 = vmatmul.mubr.msk.bf16.gmra.mrb[140].mxu1 %vm283_vm4, %v5572_v46 }
0x17cd   :  { %12449 = vmatprep.mubr.msk.bf16.mxu0 %vm14621_vm3, %v14620_v15  ;;  %12473 = vmatprep.mubr.msk.bf16.mxu1 %vm14621_vm3, %v14620_v15 }
0x17ce   :  { %12470 = vmatpush3.bf16.msra.mxu1 %v13936_v26  ;;  %12446 = vmatpush3.bf16.msra.mxu0 %v13937_v39 }
0x17cf   :  { %12471 = vmatprep.subr.bf16.mxu1 %v14620_v15  ;;  %12447 = vmatprep.subr.bf16.mxu0 %v14620_v15 }
0x17d2   :  { %12472 = vmatpush3.bf16.msra.mxu1 %v13938_v12  ;;  %12448 = vmatpush3.bf16.msra.mxu0 %v13939_v16 }
0x17d3   :  { %12485 = vmatprep.subr.bf16.mxu0 %v14620_v15  ;;  %12501 = vmatprep.subr.bf16.mxu1 %v14620_v15 }
0x188e   :  { %v5641_v18 = vpop.f32.mrb[192].mxu0 }
0x188f   :  { %v5642_v20 = vadd.f32 %v10707_v14, %v5641_v18  ;;  %v12411_v30 = vpop.f32.mrb[193].mxu0 }
0x1890   :  { %v5644_v38 = vpop.f32.mrb[194].mxu0 }
0x1891   :  { %v5664_v33 = vadd.f32 %v5642_v20, %v16536_v8  ;;  %v5645_v63 = vadd.f32 %v10707_v14, %v5644_v38  ;;  %v12412_v17 = vpop.f32.mrb[195].mxu0 }
0x1893   :  { %v5665_v22 = vadd.f32 %v5645_v63, %v16545_v45  ;;  %v16723_v44 = vmul.f32 %v5664_v33, %v14818_v51 }
0x1895   :  { %v16726_v37 = vmul.f32 %v5665_v22, %v14815_v49  ;;  %v5764_v4 = vrot.slane %v16723_v44, 7 }
0x1896   :  { %v5649_v54 = vpop.f32.mrb[196].mxu0 }
0x1897   :  { %v5765_v28 = vrot.slane %v16726_v37, 7  ;;  %v5650_v35 = vadd.f32 %v10707_v14, %v5649_v54  ;;  %v12415_v19 = vpop.f32.mrb[197].mxu0 }
0x1898   :  { %v5652_v58 = vpop.f32.mrb[198].mxu0 }
0x1899   :  { %v5666_v8 = vadd.f32 %v5650_v35, %v16548_v13  ;;  %v5653_v62 = vadd.f32 %v10707_v14, %v5652_v58  ;;  %v12416_v27 = vpop.f32.mrb[199].mxu0  ;;  %v16732_v45 = vsel %vm196_vm0, %v5764_v4, %v5765_v28  ;;  %v16745_v13 = vsel %vm196_vm0, 0.0, %v5764_v4 }
0x189a   :  { %v5818_v36 = vrot.slane %v16732_v45, 2  ;;  %v5787_v7 = vrot.slane %v16732_v45, 1  ;;  %v5817_v41 = vrot.slane %v16745_v13, 2  ;;  %v5786_v39 = vrot.slane %v16745_v13, 1 }
0x189b   :  { %v16735_v32 = vmul.f32 %v5666_v8, %v14828_v57  ;;  %v5667_v10 = vadd.f32 %v5653_v62, %v16568_v53 }
0x189c   :  { %v5819_v33 = vsel %vm251_vm1, %v5817_v41, %v5818_v36  ;;  %v5788_v22 = vsel %vm219_vm2, %v5786_v39, %v5787_v7 }
0x189d   :  { %v5767_v11 = vrot.slane %v16735_v32, 7  ;;  %v16749_v46 = vmul.f32 %v5667_v10, %v14873_v29 }
0x189f   :  { %v5657_v53 = vpop.f32.mrb[200].mxu0  ;;  %v16757_v40 = vsel %vm196_vm0, %v5765_v28, %v5767_v11  ;;  %v5769_v59 = vrot.slane %v16749_v46, 7 }
0x18a0   :  { %v5658_v43 = vadd.f32 %v10707_v14, %v5657_v53  ;;  %v12419_v55 = vpop.f32.mrb[201].mxu0  ;;  %v5820_v26 = vrot.slane %v16757_v40, 2  ;;  %v5789_v18 = vrot.slane %v16757_v40, 1 }
0x18a1   :  { %v5660_v42 = vpop.f32.mrb[202].mxu0  ;;  %v5770_v63 = vsel %vm196_vm0, %v5767_v11, %v5769_v59 }
0x18a2   :  { %v5668_v20 = vadd.f32 %v5658_v43, %v16580_v52  ;;  %v5661_v30 = vadd.f32 %v10707_v14, %v5660_v42  ;;  %v12420_v38 = vpop.f32.mrb[203].mxu0  ;;  %v5821_v17 = vsel %vm251_vm1, %v5818_v36, %v5820_v26  ;;  %v5790_v54 = vsel %vm219_vm2, %v5787_v7, %v5789_v18 }
0x18a3   :  { %v13576_v19 = vpack.i.bf16 %v5821_v17, %v5819_v33  ;;  %v13571_v4 = vpack.i.bf16 %v5790_v54, %v5788_v22  ;;  %v5822_v58 = vrot.slane %v5770_v63, 2  ;;  %v5791_v8 = vrot.slane %v5770_v63, 1 }
0x18a4   :  { %v16770_v28 = vmul.f32 %v5668_v20, %v14879_v34  ;;  %v5669_v35 = vadd.f32 %v5661_v30, %v16588_v21 }
0x18a5   :  { %13577 = vrot.lane.b32.xlu1 %v13576_v19, %s14622_s15  ;;  %13572 = vrot.lane.b32.xlu0 %v13571_v4, %s14623_s16  ;;  %v5823_v11 = vsel %vm251_vm1, %v5820_v26, %v5822_v58  ;;  %v5792_v36 = vsel %vm219_vm2, %v5789_v18, %v5791_v8 }
0x18a6   :  { %v5771_v52 = vrot.slane %v16770_v28, 7  ;;  %v16775_v14 = vmul.f32 %v5669_v35, %v14899_v2 }
0x18a8   :  { %v5772_v62 = vsel %vm196_vm0, %v5769_v59, %v5771_v52  ;;  %v5773_v27 = vrot.slane %v16775_v14, 7 }
0x18a9   :  { %v5824_v10 = vrot.slane %v5772_v62, 2  ;;  %v5793_v12 = vrot.slane %v5772_v62, 1 }
0x18aa   :  { %v5774_v21 = vsel %vm196_vm0, %v5771_v52, %v5773_v27  ;;  %v5783_v16 = vsel %vm196_vm0, %v5773_v27, 0.0 }
0x18ab   :  { %v5797_v53 = vrot.slane %v5783_v16, 1  ;;  %v5828_v7 = vrot.slane %v5783_v16, 2  ;;  %v5825_v41 = vsel %vm251_vm1, %v5822_v58, %v5824_v10  ;;  %v5794_v43 = vsel %vm219_vm2, %v5791_v8, %v5793_v12 }
0x18ac   :  { %v13586_v55 = vpack.i.bf16 %v5825_v41, %v5823_v11  ;;  %v13581_v59 = vpack.i.bf16 %v5794_v43, %v5792_v36  ;;  %v5826_v42 = vrot.slane %v5774_v21, 2  ;;  %v5795_v39 = vrot.slane %v5774_v21, 1 }
0x18ae   :  { %13587 = vrot.lane.b32.xlu1 %v13586_v55, %s14622_s15  ;;  %13582 = vrot.lane.b32.xlu0 %v13581_v59, %s14623_s16  ;;  %v5827_v20 = vsel %vm251_vm1, %v5824_v10, %v5826_v42  ;;  %v5829_v26 = vsel %vm251_vm1, %v5826_v42, %v5828_v7  ;;  %v5796_v18 = vsel %vm219_vm2, %v5793_v12, %v5795_v39 }
0x18af   :  { %v5798_v30 = vsel %vm219_vm2, %v5795_v39, %v5797_v53  ;;  %v13596_v38 = vpack.i.bf16 %v5829_v26, %v5827_v20 }
0x18b0   :  { %v13591_v33 = vpack.i.bf16 %v5798_v30, %v5796_v18 }
0x18b2   :  { %13597 = vrot.lane.b32.xlu1 %v13596_v38, %s14622_s15  ;;  %13592 = vrot.lane.b32.xlu0 %v13591_v33, %s14623_s16 }
0x1917   :  { %v13578_v17 = vpop.permute.xlu1 %13577  ;;  %v13573_v22 = vpop.permute.xlu0 %13572 }
0x1918   :  { %v13580_v54 = vunpack.i.h.bf16 %v13578_v17  ;;  %v13579_v35 = vunpack.i.l.bf16 %v13578_v17  ;;  %v13575_v19 = vunpack.i.h.bf16 %v13573_v22  ;;  %v13574_v4 = vunpack.i.l.bf16 %v13573_v22  ;;  %v13941_v17 = vld [vmem:[%s18141_s8 + $0x78] sm:$0xff]  }
0x1919   :  { %v13943_v22 = vld [vmem:[%s18142_s10 + $0x98] sm:$0xff]  }
0x191a   :  { %v5849_v52 = vsel %vm283_vm4, %v16732_v45, %v13575_v19  ;;  %v5848_v58 = vsel %vm283_vm4, %v16745_v13, %v13574_v4 }
0x191b   :  { %v5855_v8 = vsel %vm290_vm5, %v5849_v52, %v13580_v54  ;;  %v5854_v27 = vsel %vm290_vm5, %v5848_v58, %v13579_v35  ;;  %v10760_v54 = vld [vmem:[%s18143_s7 + $0x9] ss:$0 sm:$0xff] }
0x191c   :  { %v5860_v10 = vpack.c.bf16 %v5855_v8, %v5854_v27 }
0x191e   :  { %12450 = vmatmul.mubr.msk.bf16.vlgmr.msra.gmra.mrb[204].mxu0 %vm355_vm6, %v5860_v10  ;;  %12474 = vmatmul.mubr.msk.bf16.vlgmr.msra.gmra.mrb[144].mxu1 %vm355_vm6, %v5860_v10 }
0x191f   :  { %12453 = vmatprep.mubr.msk.bf16.mxu0 %vm14621_vm3, %v14620_v15  ;;  %12477 = vmatprep.mubr.msk.bf16.mxu1 %vm14621_vm3, %v14620_v15 }
0x1920   :  { %v13588_v12 = vpop.permute.xlu1 %13587  ;;  %v13583_v16 = vpop.permute.xlu0 %13582 }
0x1921   :  { %v13590_v45 = vunpack.i.h.bf16 %v13588_v12  ;;  %v13589_v11 = vunpack.i.l.bf16 %v13588_v12  ;;  %v13585_v13 = vunpack.i.h.bf16 %v13583_v16  ;;  %v13584_v36 = vunpack.i.l.bf16 %v13583_v16 }
0x1923   :  { %v5851_v53 = vsel %vm283_vm4, %v5770_v63, %v13585_v13  ;;  %v5850_v7 = vsel %vm283_vm4, %v16757_v40, %v13584_v36 }
0x1924   :  { %v13598_v41 = vpop.permute.xlu1 %13597  ;;  %v13593_v43 = vpop.permute.xlu0 %13592  ;;  %v5856_v55 = vsel %vm290_vm5, %v5850_v7, %v13589_v11  ;;  %v5857_v59 = vsel %vm290_vm5, %v5851_v53, %v13590_v45  ;;  %v10737_v53 = vld [vmem:[%s18144_s5 + $0x9] ss:$0 sm:$0xff] }
0x1925   :  { %v13595_v42 = vunpack.i.h.bf16 %v13593_v43  ;;  %v13594_v39 = vunpack.i.l.bf16 %v13593_v43  ;;  %v5861_v20 = vpack.c.bf16 %v5857_v59, %v5856_v55  ;;  %v13600_v26 = vunpack.i.h.bf16 %v13598_v41 }
0x1926   :  { %v13599_v18 = vunpack.i.l.bf16 %v13598_v41 }
0x1927   :  { %v5853_v30 = vsel %vm283_vm4, %v5774_v21, %v13595_v42  ;;  %v5852_v38 = vsel %vm283_vm4, %v5772_v62, %v13594_v39  ;;  %12454 = vmatmul.mubr.msk.bf16.gmra.mrb[208].mxu0 %vm355_vm6, %v5861_v20  ;;  %12478 = vmatmul.mubr.msk.bf16.gmra.mrb[148].mxu1 %vm355_vm6, %v5861_v20  ;;  %v13940_v62 = vld [vmem:[%s18141_s8 + $0x70] sm:$0xff]  }
0x1928   :  { %12457 = vmatprep.mubr.msk.bf16.mxu0 %vm14621_vm3, %v14620_v15  ;;  %12481 = vmatprep.mubr.msk.bf16.mxu1 %vm14621_vm3, %v14620_v15  ;;  %v5858_v40 = vsel %vm290_vm5, %v5852_v38, %v13599_v18  ;;  %v5859_v63 = vsel %vm290_vm5, %v5853_v30, %v13600_v26  ;;  %v13942_v21 = vld [vmem:[%s18142_s10 + $0x90] sm:$0xff]  }
0x1929   :  { %v5862_v33 = vpack.c.bf16 %v5859_v63, %v5858_v40  ;;  %12486 = vmatpush3.bf16.msra.mxu0 %v13940_v62  ;;  %12502 = vmatpush3.bf16.msra.mxu1 %v13942_v21 }
0x192a   :  { %12487 = vmatprep.subr.bf16.mxu0 %v14620_v15  ;;  %12503 = vmatprep.subr.bf16.mxu1 %v14620_v15 }
0x192d   :  { %12488 = vmatpush3.bf16.msra.mxu0 %v13941_v17  ;;  %12504 = vmatpush3.bf16.msra.mxu1 %v13943_v22 }
0x192e   :  { %12541 = vmatprep.subr.bf16.mxu1 %v14620_v15  ;;  %12517 = vmatprep.subr.bf16.mxu0 %v14620_v15 }
0x192f   :  { %12458 = vmatmul.mubr.msk.bf16.gmra.mrb[212].mxu0 %vm355_vm6, %v5862_v33  ;;  %12482 = vmatmul.mubr.msk.bf16.gmra.mrb[152].mxu1 %vm355_vm6, %v5862_v33 }
0x1930   :  { %12489 = vmatprep.mubr.msk.bf16.mxu0 %vm14621_vm3, %v14620_v15  ;;  %12505 = vmatprep.mubr.msk.bf16.mxu1 %vm14621_vm3, %v14620_v15 }
0x19f1   :  { %v5963_v35 = vpop.f32.mrb[204].mxu0  ;;  %v6077_v19 = vpop.f32.mrb[144].mxu1 }
0x19f2   :  { %v6078_v4 = vadd.f32 %v10760_v54, %v6077_v19  ;;  %v12451_v52 = vpop.f32.mrb[205].mxu0  ;;  %v12475_v58 = vpop.f32.mrb[145].mxu1  ;;  %v5964_v18 = vadd.f32 %v10737_v53, %v5963_v35 }
0x19f3   :  { %v5966_v8 = vpop.f32.mrb[206].mxu0  ;;  %v6080_v27 = vpop.f32.mrb[146].mxu1 }
0x19f4   :  { %v10770_v10 = vmul.f32 -1.442695, %v6078_v4  ;;  %v6081_v12 = vadd.f32 %v10760_v54, %v6080_v27  ;;  %v12452_v16 = vpop.f32.mrb[207].mxu0  ;;  %v12476_v45 = vpop.f32.mrb[147].mxu1  ;;  %v5967_v40 = vadd.f32 %v10737_v53, %v5966_v8 }
0x19f6   :  { %14360 = vpow2.f32 %v10770_v10  ;;  %v10771_v11 = vmul.f32 -1.442695, %v6081_v12 }
0x19f8   :  { %14362 = vpow2.f32 %v10771_v11 }
0x19fa   :  { %v5971_v13 = vpop.f32.mrb[208].mxu0  ;;  %v6085_v36 = vpop.f32.mrb[148].mxu1 }
0x19fb   :  { %v6086_v7 = vadd.f32 %v10760_v54, %v6085_v36  ;;  %v12455_v41 = vpop.f32.mrb[209].mxu0  ;;  %v12479_v43 = vpop.f32.mrb[149].mxu1  ;;  %v5972_v8 = vadd.f32 %v10737_v53, %v5971_v13 }
0x19fc   :  { %v5974_v55 = vpop.f32.mrb[210].mxu0  ;;  %v6088_v59 = vpop.f32.mrb[150].mxu1 }
0x19fd   :  { %v10772_v42 = vmul.f32 -1.442695, %v6086_v7  ;;  %v6089_v39 = vadd.f32 %v10760_v54, %v6088_v59  ;;  %v12456_v20 = vpop.f32.mrb[211].mxu0  ;;  %v12480_v26 = vpop.f32.mrb[151].mxu1  ;;  %v5975_v11 = vadd.f32 %v10737_v53, %v5974_v55 }
0x19ff   :  { %14364 = vpow2.f32 %v10772_v42  ;;  %v10773_v30 = vmul.f32 -1.442695, %v6089_v39 }
0x1a00   :  { %v14361_v38 = vpop.eup %14360 }
0x1a01   :  { %v6124_v63 = vadd.f32 1.0, %v14361_v38  ;;  %14366 = vpow2.f32 %v10773_v30 }
0x1a02   :  { %v14363_v33 = vpop.eup %14362  ;;  %14368 = vtanh.f32 %v5964_v18  ;;  %v5979_v62 = vpop.f32.mrb[212].mxu0 }
0x1a03   :  { %v6093_v21 = vpop.f32.mrb[152].mxu1  ;;  %14370 = vrcp.f32 %v6124_v63  ;;  %v6125_v17 = vadd.f32 1.0, %v14363_v33  ;;  %v12459_v19 = vpop.f32.mrb[213].mxu0  ;;  %v5980_v20 = vadd.f32 %v10737_v53, %v5979_v62 }
0x1a04   :  { %v6094_v22 = vadd.f32 %v10760_v54, %v6093_v21  ;;  %v12483_v4 = vpop.f32.mrb[153].mxu1  ;;  %14372 = vtanh.f32 %v5967_v40  ;;  %v5982_v52 = vpop.f32.mrb[214].mxu0 }
0x1a05   :  { %v6096_v58 = vpop.f32.mrb[154].mxu1  ;;  %14374 = vrcp.f32 %v6125_v17  ;;  %v12460_v10 = vpop.f32.mrb[215].mxu0  ;;  %v5983_v18 = vadd.f32 %v10737_v53, %v5982_v52 }
0x1a06   :  { %v10774_v35 = vmul.f32 -1.442695, %v6094_v22  ;;  %v6097_v27 = vadd.f32 %v10760_v54, %v6096_v58  ;;  %v12484_v12 = vpop.f32.mrb[155].mxu1 }
0x1a07   :  { %v13944_v12 = vld [vmem:[%s18138_s6 + $0x1e0] sm:$0xff]  }
0x1a08   :  { %14376 = vpow2.f32 %v10774_v35  ;;  %v10775_v16 = vmul.f32 -1.442695, %v6097_v27 }
0x1a09   :  { %v14365_v45 = vpop.eup %14364 }
0x1a0a   :  { %14378 = vpow2.f32 %v10775_v16  ;;  %v6126_v36 = vadd.f32 1.0, %v14365_v45  ;;  %v13946_v16 = vld [vmem:[%s18138_s6 + $0x1e8] sm:$0xff]  }
0x1a0b   :  { %v14367_v7 = vpop.eup %14366  ;;  %14380 = vtanh.f32 %v5972_v8  ;;  %v13945_v8 = vld [vmem:[%s18137_s4 + $0x1e0] sm:$0xff]   ;;  %v13947_v45 = vld [vmem:[%s18137_s4 + $0x1e8] sm:$0xff]  }
0x1a0c   :  { %v14369_v41 = vpop.eup %14368  ;;  %14382 = vrcp.f32 %v6126_v36  ;;  %v6127_v43 = vadd.f32 1.0, %v14367_v7  ;;  %v13949_v36 = vld [vmem:[%s18137_s4 + $0x1f0] sm:$0xff]   ;;  %v13950_v7 = vld [vmem:[%s18138_s6 + $0x1f8] sm:$0xff]  }
0x1a0d   :  { %v14371_v59 = vpop.eup %14370  ;;  %14384 = vtanh.f32 %v5975_v11  ;;  %v13948_v11 = vld [vmem:[%s18138_s6 + $0x1f0] sm:$0xff]  }
0x1a0e   :  { %v14373_v42 = vpop.eup %14372  ;;  %v6142_v39 = vmul.f32 %v14371_v59, %v14369_v41  ;;  %14386 = vrcp.f32 %v6127_v43  ;;  %v13951_v41 = vld [vmem:[%s18137_s4 + $0x1f8] sm:$0xff]   ;;  %v13952_v43 = vld [vmem:[%s18138_s6 + $0x200] sm:$0xff]  }
0x1a0f   :  { %v14375_v54 = vpop.eup %14374  ;;  %14388 = vtanh.f32 %v5980_v20  ;;  %v13953_v59 = vld [vmem:[%s18137_s4 + $0x200] sm:$0xff]  }
0x1a10   :  { %v6143_v26 = vmul.f32 %v14375_v54, %v14373_v42  ;;  %v10781_v42 = vld [vmem:[%s18145_s9 + $0x7] ss:$0 sm:$0xff] }
0x1a12   :  { %v14377_v13 = vpop.eup %14376  ;;  %v6148_v38 = vpack.c.bf16 %v6143_v26, %v6142_v39 }
0x1a13   :  { %v6128_v30 = vadd.f32 1.0, %v14377_v13 }
0x1a14   :  { %v14379_v55 = vpop.eup %14378  ;;  %12490 = vmatmul.mubr.msk.bf16.vlgmr.msra.gmra.mrb[216].mxu0 %vm283_vm4, %v6148_v38  ;;  %12506 = vmatmul.mubr.msk.bf16.vlgmr.msra.gmra.mrb[132].mxu1 %vm283_vm4, %v6148_v38 }
0x1a15   :  { %14390 = vrcp.f32 %v6128_v30  ;;  %v6129_v40 = vadd.f32 1.0, %v14379_v55  ;;  %v14381_v63 = vpop.eup %14380  ;;  %12493 = vmatprep.mubr.msk.bf16.mxu0 %vm14621_vm3, %v14620_v15  ;;  %12509 = vmatprep.mubr.msk.bf16.mxu1 %vm14621_vm3, %v14620_v15 }
0x1a16   :  { %14392 = vtanh.f32 %v5983_v18  ;;  %v14383_v33 = vpop.eup %14382  ;;  %12542 = vmatpush3.bf16.msra.mxu1 %v13944_v12  ;;  %12518 = vmatpush3.bf16.msra.mxu0 %v13945_v8 }
0x1a17   :  { %14394 = vrcp.f32 %v6129_v40  ;;  %v14385_v53 = vpop.eup %14384  ;;  %v6144_v62 = vmul.f32 %v14383_v33, %v14381_v63  ;;  %12543 = vmatprep.subr.bf16.mxu1 %v14620_v15  ;;  %12519 = vmatprep.subr.bf16.mxu0 %v14620_v15 }
0x1a18   :  { %v14387_v21 = vpop.eup %14386 }
0x1a19   :  { %v6145_v17 = vmul.f32 %v14387_v21, %v14385_v53  ;;  %v14389_v19 = vpop.eup %14388 }
0x1a1a   :  { %12544 = vmatpush3.bf16.msra.mxu1 %v13946_v16  ;;  %12520 = vmatpush3.bf16.msra.mxu0 %v13947_v45 }
0x1a1b   :  { %v6149_v22 = vpack.c.bf16 %v6145_v17, %v6144_v62  ;;  %12545 = vmatprep.subr.bf16.mxu1 %v14620_v15  ;;  %12521 = vmatprep.subr.bf16.mxu0 %v14620_v15 }
0x1a1d   :  { %12494 = vmatmul.mubr.msk.bf16.gmra.mrb[220].mxu0 %vm283_vm4, %v6149_v22  ;;  %12510 = vmatmul.mubr.msk.bf16.gmra.mrb[136].mxu1 %vm283_vm4, %v6149_v22 }
0x1a1e   :  { %12497 = vmatprep.mubr.msk.bf16.mxu0 %vm14621_vm3, %v14620_v15  ;;  %12513 = vmatprep.mubr.msk.bf16.mxu1 %vm14621_vm3, %v14620_v15 }
0x1a1f   :  { %v14391_v4 = vpop.eup %14390  ;;  %12546 = vmatpush3.bf16.msra.mxu1 %v13948_v11  ;;  %12522 = vmatpush3.bf16.msra.mxu0 %v13949_v36 }
0x1a20   :  { %v14393_v52 = vpop.eup %14392  ;;  %v6146_v58 = vmul.f32 %v14391_v4, %v14389_v19  ;;  %12547 = vmatprep.subr.bf16.mxu1 %v14620_v15  ;;  %12523 = vmatprep.subr.bf16.mxu0 %v14620_v15 }
0x1a21   :  { %v14395_v35 = vpop.eup %14394 }
0x1a22   :  { %v6147_v27 = vmul.f32 %v14395_v35, %v14393_v52  ;;  %v13955_v35 = vld [vmem:[%s18137_s4 + $0x208] sm:$0xff]  }
0x1a23   :  { %12548 = vmatpush3.bf16.msra.mxu1 %v13950_v7  ;;  %12524 = vmatpush3.bf16.msra.mxu0 %v13951_v41 }
0x1a24   :  { %v6150_v10 = vpack.c.bf16 %v6147_v27, %v6146_v58  ;;  %12549 = vmatprep.subr.bf16.mxu1 %v14620_v15  ;;  %12525 = vmatprep.subr.bf16.mxu0 %v14620_v15  ;;  %v13954_v58 = vld [vmem:[%s18138_s6 + $0x208] sm:$0xff]  }
0x1a26   :  { %12498 = vmatmul.mubr.msk.bf16.gmra.mrb[224].mxu0 %vm283_vm4, %v6150_v10  ;;  %12514 = vmatmul.mubr.msk.bf16.gmra.mrb[140].mxu1 %vm283_vm4, %v6150_v10 }
0x1a27   :  { %12529 = vmatprep.mubr.msk.bf16.mxu0 %vm14621_vm3, %v14620_v15  ;;  %12553 = vmatprep.mubr.msk.bf16.mxu1 %vm14621_vm3, %v14620_v15 }
0x1a28   :  { %12550 = vmatpush3.bf16.msra.mxu1 %v13952_v43  ;;  %12526 = vmatpush3.bf16.msra.mxu0 %v13953_v59 }
0x1a29   :  { %12551 = vmatprep.subr.bf16.mxu1 %v14620_v15  ;;  %12527 = vmatprep.subr.bf16.mxu0 %v14620_v15 }
0x1a2c   :  { %12552 = vmatpush3.bf16.msra.mxu1 %v13954_v58  ;;  %12528 = vmatpush3.bf16.msra.mxu0 %v13955_v35 }
0x1a2d   :  { %12565 = vmatprep.subr.bf16.mxu0 %v14620_v15  ;;  %12581 = vmatprep.subr.bf16.mxu1 %v14620_v15 }
0x1ae7   :  { %v6219_v39 = vpop.f32.mrb[216].mxu0 }
0x1ae8   :  { %v6220_v54 = vadd.f32 %v10781_v42, %v6219_v39  ;;  %v12491_v20 = vpop.f32.mrb[217].mxu0 }
0x1ae9   :  { %v6222_v26 = vpop.f32.mrb[218].mxu0 }
0x1aea   :  { %v6242_v13 = vadd.f32 %v6220_v54, %v16723_v44  ;;  %v6223_v18 = vadd.f32 %v10781_v42, %v6222_v26  ;;  %v12492_v30 = vpop.f32.mrb[219].mxu0 }
0x1aec   :  { %v6243_v38 = vadd.f32 %v6223_v18, %v16726_v37  ;;  %v16914_v55 = vmul.f32 %v6242_v13, %v14818_v51 }
0x1aee   :  { %v16917_v40 = vmul.f32 %v6243_v38, %v14815_v49  ;;  %v6348_v21 = vrot.slane %v16914_v55, 7 }
0x1af0   :  { %v6349_v63 = vrot.slane %v16917_v40, 7  ;;  %v6227_v33 = vpop.f32.mrb[220].mxu0 }
0x1af1   :  { %v6228_v53 = vadd.f32 %v10781_v42, %v6227_v33  ;;  %v12495_v62 = vpop.f32.mrb[221].mxu0 }
0x1af2   :  { %v6230_v17 = vpop.f32.mrb[222].mxu0  ;;  %v16923_v37 = vsel %vm196_vm0, %v6348_v21, %v6349_v63 }
0x1af3   :  { %v6244_v44 = vadd.f32 %v6228_v53, %v16735_v32  ;;  %v6231_v22 = vadd.f32 %v10781_v42, %v6230_v17  ;;  %v12496_v19 = vpop.f32.mrb[223].mxu0  ;;  %v16936_v32 = vsel %vm196_vm0, 0.0, %v6348_v21  ;;  %v6402_v12 = vrot.slane %v16923_v37, 2 }
0x1af4   :  { %v6371_v8 = vrot.slane %v16923_v37, 1  ;;  %v6401_v16 = vrot.slane %v16936_v32, 2  ;;  %v6370_v41 = vrot.slane %v16936_v32, 1 }
0x1af5   :  { %v16926_v4 = vmul.f32 %v6244_v44, %v14828_v57  ;;  %v6245_v52 = vadd.f32 %v6231_v22, %v16749_v46 }
0x1af6   :  { %v6403_v13 = vsel %vm251_vm1, %v6401_v16, %v6402_v12  ;;  %v6372_v38 = vsel %vm219_vm2, %v6370_v41, %v6371_v8 }
0x1af7   :  { %v6351_v27 = vrot.slane %v16926_v4, 7  ;;  %v16940_v10 = vmul.f32 %v6245_v52, %v14873_v29 }
0x1af9   :  { %v6235_v46 = vpop.f32.mrb[224].mxu0  ;;  %v16948_v45 = vsel %vm196_vm0, %v6349_v63, %v6351_v27  ;;  %v6353_v11 = vrot.slane %v16940_v10, 7 }
0x1afa   :  { %v6236_v36 = vadd.f32 %v10781_v42, %v6235_v46  ;;  %v12499_v7 = vpop.f32.mrb[225].mxu0  ;;  %v6404_v59 = vrot.slane %v16948_v45, 2  ;;  %v6373_v39 = vrot.slane %v16948_v45, 1 }
0x1afb   :  { %v6238_v43 = vpop.f32.mrb[226].mxu0  ;;  %v6354_v18 = vsel %vm196_vm0, %v6351_v27, %v6353_v11 }
0x1afc   :  { %v6246_v54 = vadd.f32 %v6236_v36, %v16770_v28  ;;  %v6239_v20 = vadd.f32 %v10781_v42, %v6238_v43  ;;  %v12500_v26 = vpop.f32.mrb[227].mxu0  ;;  %v6405_v30 = vsel %vm251_vm1, %v6402_v12, %v6404_v59  ;;  %v6374_v63 = vsel %vm219_vm2, %v6371_v8, %v6373_v39 }
0x1afd   :  { %v13606_v62 = vpack.i.bf16 %v6405_v30, %v6403_v13  ;;  %v13601_v21 = vpack.i.bf16 %v6374_v63, %v6372_v38  ;;  %v6406_v17 = vrot.slane %v6354_v18, 2  ;;  %v6375_v44 = vrot.slane %v6354_v18, 1 }
0x1afe   :  { %v16961_v33 = vmul.f32 %v6246_v54, %v14879_v34  ;;  %v6247_v53 = vadd.f32 %v6239_v20, %v16775_v14 }
0x1aff   :  { %13607 = vrot.lane.b32.xlu1 %v13606_v62, %s14622_s15  ;;  %13602 = vrot.lane.b32.xlu0 %v13601_v21, %s14623_s16  ;;  %v6407_v27 = vsel %vm251_vm1, %v6404_v59, %v6406_v17  ;;  %v6376_v12 = vsel %vm219_vm2, %v6373_v39, %v6375_v44 }
0x1b00   :  { %v6355_v28 = vrot.slane %v16961_v33, 7  ;;  %v16966_v42 = vmul.f32 %v6247_v53, %v14899_v2 }
0x1b02   :  { %v6356_v22 = vsel %vm196_vm0, %v6353_v11, %v6355_v28  ;;  %v6357_v19 = vrot.slane %v16966_v42, 7 }
0x1b03   :  { %v6408_v52 = vrot.slane %v6356_v22, 2  ;;  %v6377_v58 = vrot.slane %v6356_v22, 1 }
0x1b04   :  { %v6358_v14 = vsel %vm196_vm0, %v6355_v28, %v6357_v19  ;;  %v6367_v35 = vsel %vm196_vm0, %v6357_v19, 0.0 }
0x1b05   :  { %v6381_v46 = vrot.slane %v6367_v35, 1  ;;  %v6412_v8 = vrot.slane %v6367_v35, 2  ;;  %v6409_v16 = vsel %vm251_vm1, %v6406_v17, %v6408_v52  ;;  %v6378_v36 = vsel %vm219_vm2, %v6375_v44, %v6377_v58 }
0x1b06   :  { %v13616_v7 = vpack.i.bf16 %v6409_v16, %v6407_v27  ;;  %v13611_v11 = vpack.i.bf16 %v6378_v36, %v6376_v12  ;;  %v6410_v41 = vrot.slane %v6358_v14, 2  ;;  %v6379_v43 = vrot.slane %v6358_v14, 1 }
0x1b08   :  { %13617 = vrot.lane.b32.xlu1 %v13616_v7, %s14622_s15  ;;  %13612 = vrot.lane.b32.xlu0 %v13611_v11, %s14623_s16  ;;  %v6411_v54 = vsel %vm251_vm1, %v6408_v52, %v6410_v41  ;;  %v6413_v59 = vsel %vm251_vm1, %v6410_v41, %v6412_v8  ;;  %v6380_v39 = vsel %vm219_vm2, %v6377_v58, %v6379_v43 }
0x1b09   :  { %v6382_v20 = vsel %vm219_vm2, %v6379_v43, %v6381_v46  ;;  %v13626_v26 = vpack.i.bf16 %v6413_v59, %v6411_v54 }
0x1b0a   :  { %v13621_v13 = vpack.i.bf16 %v6382_v20, %v6380_v39 }
0x1b0c   :  { %13627 = vrot.lane.b32.xlu1 %v13626_v26, %s14622_s15  ;;  %13622 = vrot.lane.b32.xlu0 %v13621_v13, %s14623_s16 }
0x1b71   :  { %v13608_v30 = vpop.permute.xlu1 %13607  ;;  %v13603_v38 = vpop.permute.xlu0 %13602 }
0x1b72   :  { %v13610_v63 = vunpack.i.h.bf16 %v13608_v30  ;;  %v13609_v53 = vunpack.i.l.bf16 %v13608_v30  ;;  %v13605_v62 = vunpack.i.h.bf16 %v13603_v38  ;;  %v13604_v21 = vunpack.i.l.bf16 %v13603_v38  ;;  %v13957_v30 = vld [vmem:[%s18141_s8 + $0x88] sm:$0xff]  }
0x1b73   :  { %v13959_v38 = vld [vmem:[%s18142_s10 + $0xa8] sm:$0xff]  }
0x1b74   :  { %v6433_v28 = vsel %vm283_vm4, %v16923_v37, %v13605_v62  ;;  %v6432_v17 = vsel %vm283_vm4, %v16936_v32, %v13604_v21 }
0x1b75   :  { %v6439_v44 = vsel %vm290_vm5, %v6433_v28, %v13610_v63  ;;  %v6438_v19 = vsel %vm290_vm5, %v6432_v17, %v13609_v53  ;;  %v10834_v63 = vld [vmem:[%s18143_s7 + $0xa] ss:$0 sm:$0xff] }
0x1b76   :  { %v6444_v52 = vpack.c.bf16 %v6439_v44, %v6438_v19 }
0x1b78   :  { %12530 = vmatmul.mubr.msk.bf16.vlgmr.msra.gmra.mrb[228].mxu0 %vm355_vm6, %v6444_v52  ;;  %12554 = vmatmul.mubr.msk.bf16.vlgmr.msra.gmra.mrb[156].mxu1 %vm355_vm6, %v6444_v52 }
0x1b79   :  { %12533 = vmatprep.mubr.msk.bf16.mxu0 %vm14621_vm3, %v14620_v15  ;;  %12557 = vmatprep.mubr.msk.bf16.mxu1 %vm14621_vm3, %v14620_v15 }
0x1b7a   :  { %v13618_v58 = vpop.permute.xlu1 %13617  ;;  %v13613_v35 = vpop.permute.xlu0 %13612 }
0x1b7b   :  { %v13620_v37 = vunpack.i.h.bf16 %v13618_v58  ;;  %v13619_v27 = vunpack.i.l.bf16 %v13618_v58  ;;  %v13615_v32 = vunpack.i.h.bf16 %v13613_v35  ;;  %v13614_v12 = vunpack.i.l.bf16 %v13613_v35 }
0x1b7d   :  { %v6435_v46 = vsel %vm283_vm4, %v6354_v18, %v13615_v32  ;;  %v6434_v8 = vsel %vm283_vm4, %v16948_v45, %v13614_v12 }
0x1b7e   :  { %v13628_v16 = vpop.permute.xlu1 %13627  ;;  %v13623_v36 = vpop.permute.xlu0 %13622  ;;  %v6440_v7 = vsel %vm290_vm5, %v6434_v8, %v13619_v27  ;;  %v6441_v11 = vsel %vm290_vm5, %v6435_v46, %v13620_v37  ;;  %v10811_v46 = vld [vmem:[%s18144_s5 + $0xa] ss:$0 sm:$0xff] }
0x1b7f   :  { %v13625_v41 = vunpack.i.h.bf16 %v13623_v36  ;;  %v13624_v43 = vunpack.i.l.bf16 %v13623_v36  ;;  %v6445_v54 = vpack.c.bf16 %v6441_v11, %v6440_v7  ;;  %v13630_v59 = vunpack.i.h.bf16 %v13628_v16 }
0x1b80   :  { %v13629_v39 = vunpack.i.l.bf16 %v13628_v16 }
0x1b81   :  { %v6437_v20 = vsel %vm283_vm4, %v6358_v14, %v13625_v41  ;;  %v6436_v26 = vsel %vm283_vm4, %v6356_v22, %v13624_v43  ;;  %12534 = vmatmul.mubr.msk.bf16.gmra.mrb[232].mxu0 %vm355_vm6, %v6445_v54  ;;  %12558 = vmatmul.mubr.msk.bf16.gmra.mrb[160].mxu1 %vm355_vm6, %v6445_v54  ;;  %v13956_v22 = vld [vmem:[%s18141_s8 + $0x80] sm:$0xff]  }
0x1b82   :  { %12537 = vmatprep.mubr.msk.bf16.mxu0 %vm14621_vm3, %v14620_v15  ;;  %12561 = vmatprep.mubr.msk.bf16.mxu1 %vm14621_vm3, %v14620_v15  ;;  %v6442_v45 = vsel %vm290_vm5, %v6436_v26, %v13629_v39  ;;  %v6443_v18 = vsel %vm290_vm5, %v6437_v20, %v13630_v59  ;;  %v13958_v14 = vld [vmem:[%s18142_s10 + $0xa0] sm:$0xff]  }
0x1b83   :  { %v6446_v13 = vpack.c.bf16 %v6443_v18, %v6442_v45  ;;  %12566 = vmatpush3.bf16.msra.mxu0 %v13956_v22  ;;  %12582 = vmatpush3.bf16.msra.mxu1 %v13958_v14 }
0x1b84   :  { %12567 = vmatprep.subr.bf16.mxu0 %v14620_v15  ;;  %12583 = vmatprep.subr.bf16.mxu1 %v14620_v15 }
0x1b87   :  { %12568 = vmatpush3.bf16.msra.mxu0 %v13957_v30  ;;  %12584 = vmatpush3.bf16.msra.mxu1 %v13959_v38 }
0x1b88   :  { %12621 = vmatprep.subr.bf16.mxu1 %v14620_v15  ;;  %12597 = vmatprep.subr.bf16.mxu0 %v14620_v15 }
0x1b89   :  { %12538 = vmatmul.mubr.msk.bf16.gmra.mrb[236].mxu0 %vm355_vm6, %v6446_v13  ;;  %12562 = vmatmul.mubr.msk.bf16.gmra.mrb[164].mxu1 %vm355_vm6, %v6446_v13 }
0x1b8a   :  { %12569 = vmatprep.mubr.msk.bf16.mxu0 %vm14621_vm3, %v14620_v15  ;;  %12585 = vmatprep.mubr.msk.bf16.mxu1 %vm14621_vm3, %v14620_v15 }
0x1c4b   :  { %v6547_v53 = vpop.f32.mrb[228].mxu0  ;;  %v6661_v62 = vpop.f32.mrb[156].mxu1 }
0x1c4c   :  { %v6662_v21 = vadd.f32 %v10834_v63, %v6661_v62  ;;  %v12531_v28 = vpop.f32.mrb[229].mxu0  ;;  %v12555_v17 = vpop.f32.mrb[157].mxu1  ;;  %v6548_v39 = vadd.f32 %v10811_v46, %v6547_v53 }
0x1c4d   :  { %v6550_v44 = vpop.f32.mrb[230].mxu0  ;;  %v6664_v19 = vpop.f32.mrb[158].mxu1 }
0x1c4e   :  { %v10844_v52 = vmul.f32 -1.442695, %v6662_v21  ;;  %v6665_v58 = vadd.f32 %v10834_v63, %v6664_v19  ;;  %v12532_v35 = vpop.f32.mrb[231].mxu0  ;;  %v12556_v37 = vpop.f32.mrb[159].mxu1  ;;  %v6551_v45 = vadd.f32 %v10811_v46, %v6550_v44 }
0x1c50   :  { %14396 = vpow2.f32 %v10844_v52  ;;  %v10845_v27 = vmul.f32 -1.442695, %v6665_v58 }
0x1c52   :  { %14398 = vpow2.f32 %v10845_v27 }
0x1c54   :  { %v6555_v32 = vpop.f32.mrb[232].mxu0  ;;  %v6669_v12 = vpop.f32.mrb[160].mxu1 }
0x1c55   :  { %v6670_v8 = vadd.f32 %v10834_v63, %v6669_v12  ;;  %v12535_v16 = vpop.f32.mrb[233].mxu0  ;;  %v12559_v36 = vpop.f32.mrb[161].mxu1  ;;  %v6556_v44 = vadd.f32 %v10811_v46, %v6555_v32 }
0x1c56   :  { %v6558_v7 = vpop.f32.mrb[234].mxu0  ;;  %v6672_v11 = vpop.f32.mrb[162].mxu1 }
0x1c57   :  { %v10846_v41 = vmul.f32 -1.442695, %v6670_v8  ;;  %v6673_v43 = vadd.f32 %v10834_v63, %v6672_v11  ;;  %v12536_v54 = vpop.f32.mrb[235].mxu0  ;;  %v12560_v59 = vpop.f32.mrb[163].mxu1  ;;  %v6559_v27 = vadd.f32 %v10811_v46, %v6558_v7 }
0x1c59   :  { %14400 = vpow2.f32 %v10846_v41  ;;  %v10847_v20 = vmul.f32 -1.442695, %v6673_v43 }
0x1c5a   :  { %v14397_v26 = vpop.eup %14396 }
0x1c5b   :  { %v6708_v18 = vadd.f32 1.0, %v14397_v26  ;;  %14402 = vpow2.f32 %v10847_v20 }
0x1c5c   :  { %v14399_v13 = vpop.eup %14398  ;;  %14404 = vtanh.f32 %v6548_v39  ;;  %v6563_v22 = vpop.f32.mrb[236].mxu0 }
0x1c5d   :  { %v6677_v14 = vpop.f32.mrb[164].mxu1  ;;  %14406 = vrcp.f32 %v6708_v18  ;;  %v6709_v30 = vadd.f32 1.0, %v14399_v13  ;;  %v12539_v62 = vpop.f32.mrb[237].mxu0  ;;  %v6564_v54 = vadd.f32 %v10811_v46, %v6563_v22 }
0x1c5e   :  { %v6678_v38 = vadd.f32 %v10834_v63, %v6677_v14  ;;  %v12563_v21 = vpop.f32.mrb[165].mxu1  ;;  %14408 = vtanh.f32 %v6551_v45  ;;  %v6566_v28 = vpop.f32.mrb[238].mxu0 }
0x1c5f   :  { %v6680_v17 = vpop.f32.mrb[166].mxu1  ;;  %14410 = vrcp.f32 %v6709_v30  ;;  %v12540_v52 = vpop.f32.mrb[239].mxu0  ;;  %v6567_v39 = vadd.f32 %v10811_v46, %v6566_v28 }
0x1c60   :  { %v10848_v53 = vmul.f32 -1.442695, %v6678_v38  ;;  %v6681_v19 = vadd.f32 %v10834_v63, %v6680_v17  ;;  %v12564_v58 = vpop.f32.mrb[167].mxu1 }
0x1c61   :  { %v13960_v58 = vld [vmem:[%s18138_s6 + $0x210] sm:$0xff]  }
0x1c62   :  { %14412 = vpow2.f32 %v10848_v53  ;;  %v10849_v35 = vmul.f32 -1.442695, %v6681_v19 }
0x1c63   :  { %v14401_v37 = vpop.eup %14400 }
0x1c64   :  { %14414 = vpow2.f32 %v10849_v35  ;;  %v6710_v12 = vadd.f32 1.0, %v14401_v37  ;;  %v13962_v35 = vld [vmem:[%s18138_s6 + $0x218] sm:$0xff]  }
0x1c65   :  { %v14403_v8 = vpop.eup %14402  ;;  %14416 = vtanh.f32 %v6556_v44  ;;  %v13961_v44 = vld [vmem:[%s18137_s4 + $0x210] sm:$0xff]   ;;  %v13963_v37 = vld [vmem:[%s18137_s4 + $0x218] sm:$0xff]  }
0x1c66   :  { %v14405_v16 = vpop.eup %14404  ;;  %14418 = vrcp.f32 %v6710_v12  ;;  %v6711_v36 = vadd.f32 1.0, %v14403_v8  ;;  %v13965_v12 = vld [vmem:[%s18137_s4 + $0x220] sm:$0xff]   ;;  %v13966_v8 = vld [vmem:[%s18138_s6 + $0x228] sm:$0xff]  }
0x1c67   :  { %v14407_v11 = vpop.eup %14406  ;;  %14420 = vtanh.f32 %v6559_v27  ;;  %v13964_v27 = vld [vmem:[%s18138_s6 + $0x220] sm:$0xff]  }
0x1c68   :  { %v14409_v41 = vpop.eup %14408  ;;  %v6726_v43 = vmul.f32 %v14407_v11, %v14405_v16  ;;  %14422 = vrcp.f32 %v6711_v36  ;;  %v13967_v16 = vld [vmem:[%s18137_s4 + $0x228] sm:$0xff]   ;;  %v13968_v36 = vld [vmem:[%s18138_s6 + $0x230] sm:$0xff]  }
0x1c69   :  { %v14411_v63 = vpop.eup %14410  ;;  %14424 = vtanh.f32 %v6564_v54  ;;  %v13969_v11 = vld [vmem:[%s18137_s4 + $0x230] sm:$0xff]  }
0x1c6a   :  { %v6727_v59 = vmul.f32 %v14411_v63, %v14409_v41  ;;  %v10855_v41 = vld [vmem:[%s18145_s9 + $0x8] ss:$0 sm:$0xff] }
0x1c6c   :  { %v14413_v32 = vpop.eup %14412  ;;  %v6732_v26 = vpack.c.bf16 %v6727_v59, %v6726_v43 }
0x1c6d   :  { %v6712_v20 = vadd.f32 1.0, %v14413_v32 }
0x1c6e   :  { %v14415_v7 = vpop.eup %14414  ;;  %12570 = vmatmul.mubr.msk.bf16.vlgmr.msra.gmra.mrb[240].mxu0 %vm283_vm4, %v6732_v26  ;;  %12586 = vmatmul.mubr.msk.bf16.vlgmr.msra.gmra.mrb[132].mxu1 %vm283_vm4, %v6732_v26 }
0x1c6f   :  { %14426 = vrcp.f32 %v6712_v20  ;;  %v6713_v45 = vadd.f32 1.0, %v14415_v7  ;;  %v14417_v18 = vpop.eup %14416  ;;  %12573 = vmatprep.mubr.msk.bf16.mxu0 %vm14621_vm3, %v14620_v15  ;;  %12589 = vmatprep.mubr.msk.bf16.mxu1 %vm14621_vm3, %v14620_v15 }
0x1c70   :  { %14428 = vtanh.f32 %v6567_v39  ;;  %v14419_v13 = vpop.eup %14418  ;;  %12622 = vmatpush3.bf16.msra.mxu1 %v13960_v58  ;;  %12598 = vmatpush3.bf16.msra.mxu0 %v13961_v44 }
0x1c71   :  { %14430 = vrcp.f32 %v6713_v45  ;;  %v14421_v46 = vpop.eup %14420  ;;  %v6728_v22 = vmul.f32 %v14419_v13, %v14417_v18  ;;  %12623 = vmatprep.subr.bf16.mxu1 %v14620_v15  ;;  %12599 = vmatprep.subr.bf16.mxu0 %v14620_v15 }
0x1c72   :  { %v14423_v14 = vpop.eup %14422 }
0x1c73   :  { %v6729_v30 = vmul.f32 %v14423_v14, %v14421_v46  ;;  %v14425_v62 = vpop.eup %14424 }
0x1c74   :  { %12624 = vmatpush3.bf16.msra.mxu1 %v13962_v35  ;;  %12600 = vmatpush3.bf16.msra.mxu0 %v13963_v37 }
0x1c75   :  { %v6733_v38 = vpack.c.bf16 %v6729_v30, %v6728_v22  ;;  %12625 = vmatprep.subr.bf16.mxu1 %v14620_v15  ;;  %12601 = vmatprep.subr.bf16.mxu0 %v14620_v15 }
0x1c77   :  { %12574 = vmatmul.mubr.msk.bf16.gmra.mrb[244].mxu0 %vm283_vm4, %v6733_v38  ;;  %12590 = vmatmul.mubr.msk.bf16.gmra.mrb[136].mxu1 %vm283_vm4, %v6733_v38 }
0x1c78   :  { %12577 = vmatprep.mubr.msk.bf16.mxu0 %vm14621_vm3, %v14620_v15  ;;  %12593 = vmatprep.mubr.msk.bf16.mxu1 %vm14621_vm3, %v14620_v15 }
0x1c79   :  { %v14427_v21 = vpop.eup %14426  ;;  %12626 = vmatpush3.bf16.msra.mxu1 %v13964_v27  ;;  %12602 = vmatpush3.bf16.msra.mxu0 %v13965_v12 }
0x1c7a   :  { %v14429_v28 = vpop.eup %14428  ;;  %v6730_v17 = vmul.f32 %v14427_v21, %v14425_v62  ;;  %12627 = vmatprep.subr.bf16.mxu1 %v14620_v15  ;;  %12603 = vmatprep.subr.bf16.mxu0 %v14620_v15 }
0x1c7b   :  { %v14431_v53 = vpop.eup %14430 }
0x1c7c   :  { %v6731_v19 = vmul.f32 %v14431_v53, %v14429_v28  ;;  %v13970_v28 = vld [vmem:[%s18138_s6 + $0x238] sm:$0xff]  }
0x1c7d   :  { %12628 = vmatpush3.bf16.msra.mxu1 %v13966_v8  ;;  %12604 = vmatpush3.bf16.msra.mxu0 %v13967_v16 }
0x1c7e   :  { %v6734_v52 = vpack.c.bf16 %v6731_v19, %v6730_v17  ;;  %12629 = vmatprep.subr.bf16.mxu1 %v14620_v15  ;;  %12605 = vmatprep.subr.bf16.mxu0 %v14620_v15 }
0x1c80   :  { %12578 = vmatmul.mubr.msk.bf16.gmra.mrb[248].mxu0 %vm283_vm4, %v6734_v52  ;;  %12594 = vmatmul.mubr.msk.bf16.gmra.mrb[140].mxu1 %vm283_vm4, %v6734_v52 }
0x1c81   :  { %12609 = vmatprep.mubr.msk.bf16.mxu0 %vm14621_vm3, %v14620_v15  ;;  %12633 = vmatprep.mubr.msk.bf16.mxu1 %vm14621_vm3, %v14620_v15 }
0x1c82   :  { %12630 = vmatpush3.bf16.msra.mxu1 %v13968_v36  ;;  %12606 = vmatpush3.bf16.msra.mxu0 %v13969_v11 }
0x1c83   :  { %12631 = vmatprep.subr.bf16.mxu1 %v14620_v15  ;;  %12607 = vmatprep.subr.bf16.mxu0 %v14620_v15 }
0x1c86   :  { %12632 = vmatpush3.bf16.msra.mxu1 %v13970_v28 }
0x1c87   :  { %12645 = vmatprep.subr.bf16.mxu1 %v14620_v15 }
0x1d41   :  { %v6803_v43 = vpop.f32.mrb[240].mxu0 }
0x1d42   :  { %v6804_v63 = vadd.f32 %v10855_v41, %v6803_v43  ;;  %v12571_v54 = vpop.f32.mrb[241].mxu0 }
0x1d43   :  { %v6806_v59 = vpop.f32.mrb[242].mxu0 }
0x1d44   :  { %v6826_v32 = vadd.f32 %v6804_v63, %v16914_v55  ;;  %v6807_v39 = vadd.f32 %v10855_v41, %v6806_v59  ;;  %v12572_v20 = vpop.f32.mrb[243].mxu0 }
0x1d46   :  { %v6832_v26 = vmul.f32 %v6826_v32, %v14818_v51  ;;  %v6827_v7 = vadd.f32 %v6807_v39, %v16917_v40  ;;  %v13971_v40 = vld [vmem:[%s18137_s4 + $0x238] sm:$0xff]  }
0x1d47   :  { %12608 = vmatpush3.bf16.msra.mxu0 %v13971_v40 }
0x1d48   :  { %v6833_v45 = vmul.f32 %v6827_v7, %v14815_v49  ;;  %v6932_v18 = vrot.slane %v6832_v26, 7 }
0x1d4a   :  { %v6933_v13 = vrot.slane %v6833_v45, 7  ;;  %v6811_v46 = vpop.f32.mrb[244].mxu0  ;;  %v17119_v19 = vsel %vm196_vm0, 0.0, %v6932_v18 }
0x1d4b   :  { %v6812_v22 = vadd.f32 %v10855_v41, %v6811_v46  ;;  %v12575_v14 = vpop.f32.mrb[245].mxu0  ;;  %v6954_v8 = vrot.slane %v17119_v19, 1  ;;  %v6985_v16 = vrot.slane %v17119_v19, 2 }
0x1d4c   :  { %v17107_v30 = vsel %vm196_vm0, %v6932_v18, %v6933_v13  ;;  %v6814_v38 = vpop.f32.mrb[246].mxu0 }
0x1d4d   :  { %v6828_v62 = vadd.f32 %v6812_v22, %v16926_v4  ;;  %v6815_v55 = vadd.f32 %v10855_v41, %v6814_v38  ;;  %v12576_v21 = vpop.f32.mrb[247].mxu0  ;;  %v6955_v58 = vrot.slane %v17107_v30, 1  ;;  %v6986_v44 = vrot.slane %v17107_v30, 2 }
0x1d4f   :  { %v6834_v17 = vmul.f32 %v6828_v62, %v14828_v57  ;;  %v6829_v53 = vadd.f32 %v6815_v55, %v16940_v10  ;;  %v6987_v39 = vsel %vm251_vm1, %v6985_v16, %v6986_v44  ;;  %v6956_v26 = vsel %vm219_vm2, %v6954_v8, %v6955_v58 }
0x1d51   :  { %v6935_v4 = vrot.slane %v6834_v17, 7  ;;  %v6835_v52 = vmul.f32 %v6829_v53, %v14873_v29 }
0x1d53   :  { %v6819_v35 = vpop.f32.mrb[248].mxu0  ;;  %v17126_v37 = vsel %vm196_vm0, %v6933_v13, %v6935_v4  ;;  %v6937_v27 = vrot.slane %v6835_v52, 7 }
0x1d54   :  { %v6820_v10 = vadd.f32 %v10855_v41, %v6819_v35  ;;  %v12579_v12 = vpop.f32.mrb[249].mxu0  ;;  %v6957_v36 = vrot.slane %v17126_v37, 1  ;;  %v6988_v11 = vrot.slane %v17126_v37, 2 }
0x1d55   :  { %v6822_v43 = vpop.f32.mrb[250].mxu0  ;;  %v17133_v63 = vsel %vm196_vm0, %v6935_v4, %v6937_v27 }
0x1d56   :  { %v6830_v54 = vadd.f32 %v6820_v10, %v16961_v33  ;;  %v6823_v59 = vadd.f32 %v10855_v41, %v6822_v43  ;;  %v12580_v32 = vpop.f32.mrb[251].mxu0  ;;  %v6989_v20 = vsel %vm251_vm1, %v6986_v44, %v6988_v11  ;;  %v6958_v7 = vsel %vm219_vm2, %v6955_v58, %v6957_v36 }
0x1d57   :  { %v13636_v13 = vpack.i.bf16 %v6989_v20, %v6987_v39  ;;  %v13631_v46 = vpack.i.bf16 %v6958_v7, %v6956_v26  ;;  %v6959_v33 = vrot.slane %v17133_v63, 1  ;;  %v6990_v41 = vrot.slane %v17133_v63, 2 }
0x1d58   :  { %v6836_v45 = vmul.f32 %v6830_v54, %v14879_v34  ;;  %v6831_v18 = vadd.f32 %v6823_v59, %v16966_v42 }
0x1d59   :  { %13637 = vrot.lane.b32.xlu1 %v13636_v13, %s14622_s15  ;;  %13632 = vrot.lane.b32.xlu0 %v13631_v46, %s14623_s16  ;;  %v6991_v52 = vsel %vm251_vm1, %v6988_v11, %v6990_v41  ;;  %v6960_v44 = vsel %vm219_vm2, %v6957_v36, %v6959_v33 }
0x1d5a   :  { %v6939_v22 = vrot.slane %v6836_v45, 7  ;;  %v6837_v14 = vmul.f32 %v6831_v18, %v14899_v2 }
0x1d5c   :  { %v6940_v38 = vsel %vm196_vm0, %v6937_v27, %v6939_v22  ;;  %v6941_v62 = vrot.slane %v6837_v14, 7 }
0x1d5d   :  { %v6961_v55 = vrot.slane %v6940_v38, 1  ;;  %v6992_v21 = vrot.slane %v6940_v38, 2 }
0x1d5e   :  { %v6942_v42 = vsel %vm196_vm0, %v6939_v22, %v6941_v62  ;;  %v6951_v28 = vsel %vm196_vm0, %v6941_v62, 0.0 }
0x1d5f   :  { %v6963_v40 = vrot.slane %v6942_v42, 1  ;;  %v6965_v17 = vrot.slane %v6951_v28, 1  ;;  %v6994_v53 = vrot.slane %v6942_v42, 2  ;;  %v6996_v4 = vrot.slane %v6951_v28, 2 }
0x1d60   :  { %v6993_v58 = vsel %vm251_vm1, %v6990_v41, %v6992_v21  ;;  %v6962_v35 = vsel %vm219_vm2, %v6959_v33, %v6961_v55 }
0x1d61   :  { %v13646_v27 = vpack.i.bf16 %v6993_v58, %v6991_v52  ;;  %v13641_v10 = vpack.i.bf16 %v6962_v35, %v6960_v44  ;;  %v6995_v12 = vsel %vm251_vm1, %v6992_v21, %v6994_v53  ;;  %v6997_v8 = vsel %vm251_vm1, %v6994_v53, %v6996_v4 }
0x1d62   :  { %v6964_v16 = vsel %vm219_vm2, %v6961_v55, %v6963_v40  ;;  %v6966_v43 = vsel %vm219_vm2, %v6963_v40, %v6965_v17  ;;  %v13656_v11 = vpack.i.bf16 %v6997_v8, %v6995_v12  ;;  %v10935_v12 = vld [vmem:[%s18146_s12 + $0x40] sm:$0xff]  ;;  %v10936_v8 = vld [vmem:[%s18146_s12 + $0x48] sm:$0xff] }
0x1d63   :  { %13647 = vrot.lane.b32.xlu1 %v13646_v27, %s14622_s15  ;;  %13642 = vrot.lane.b32.xlu0 %v13641_v10, %s14623_s16  ;;  %v13651_v54 = vpack.i.bf16 %v6966_v43, %v6964_v16  ;;  %v10937_v16 = vld [vmem:[%s18146_s12 + $0x50] sm:$0xff]  ;;  %v13015_v43 = vpack.c.bf16 %v10936_v8, %v10935_v12 }
0x1d65   :  { %13016 = vmatprep.subr.bf16.mxu0 %v13015_v43 }
0x1d67   :  { %13657 = vrot.lane.b32.xlu1 %v13656_v11, %s14622_s15  ;;  %13652 = vrot.lane.b32.xlu0 %v13651_v54, %s14623_s16  ;;  %v10938_v11 = vld [vmem:[%s18146_s12 + $0x58] sm:$0xff] }
0x1d68   :  { %v13019_v54 = vpack.c.bf16 %v10938_v11, %v10937_v16 }
0x1dcb   :  { %v13638_v36 = vpop.permute.xlu1 %13637  ;;  %v13633_v59 = vpop.permute.xlu0 %13632 }
0x1dcc   :  { %v13640_v32 = vunpack.i.h.bf16 %v13638_v36  ;;  %v13639_v39 = vunpack.i.l.bf16 %v13638_v36  ;;  %v13635_v20 = vunpack.i.h.bf16 %v13633_v59  ;;  %v13634_v26 = vunpack.i.l.bf16 %v13633_v59  ;;  %v10908_v36 = vld [vmem:[%s18143_s7 + $0xb] ss:$0 sm:$0xff] }
0x1dce   :  { %v7017_v7 = vsel %vm283_vm4, %v17107_v30, %v13635_v20  ;;  %v7016_v45 = vsel %vm283_vm4, %v17119_v19, %v13634_v26 }
0x1dcf   :  { %v7023_v18 = vsel %vm290_vm5, %v7017_v7, %v13640_v32  ;;  %v7022_v13 = vsel %vm290_vm5, %v7016_v45, %v13639_v39 }
0x1dd0   :  { %v7028_v46 = vpack.c.bf16 %v7023_v18, %v7022_v13 }
0x1dd2   :  { %12610 = vmatmul.mubr.msk.bf16.vlgmr.msra.gmra.mrb[252].mxu0 %vm355_vm6, %v7028_v46  ;;  %12634 = vmatmul.mubr.msk.bf16.vlgmr.msra.gmra.mrb[168].mxu1 %vm355_vm6, %v7028_v46 }
0x1dd3   :  { %12613 = vmatprep.mubr.msk.bf16.mxu0 %vm14621_vm3, %v14620_v15  ;;  %12637 = vmatprep.mubr.msk.bf16.mxu1 %vm14621_vm3, %v14620_v15 }
0x1dd4   :  { %13018 = vmatpush3.bf16.msra.mxu0 %v13015_v43 }
0x1dd5   :  { %v13648_v22 = vpop.permute.xlu1 %13647  ;;  %v13643_v30 = vpop.permute.xlu0 %13642  ;;  %13020 = vmatprep.subr.bf16.mxu0 %v13019_v54 }
0x1dd6   :  { %v13650_v14 = vunpack.i.h.bf16 %v13648_v22  ;;  %v13649_v33 = vunpack.i.l.bf16 %v13648_v22  ;;  %v13645_v19 = vunpack.i.h.bf16 %v13643_v30  ;;  %v13644_v41 = vunpack.i.l.bf16 %v13643_v30 }
0x1dd8   :  { %v7019_v62 = vsel %vm283_vm4, %v17133_v63, %v13645_v19  ;;  %v7018_v55 = vsel %vm283_vm4, %v17126_v37, %v13644_v41  ;;  %13022 = vmatpush3.bf16.msra.mxu0 %v13019_v54  ;;  %v10885_v19 = vld [vmem:[%s18144_s5 + $0xb] ss:$0 sm:$0xff] }
0x1dd9   :  { %v7025_v21 = vsel %vm290_vm5, %v7019_v62, %v13650_v14  ;;  %v7024_v28 = vsel %vm290_vm5, %v7018_v55, %v13649_v33  ;;  %v13658_v40 = vpop.permute.xlu1 %13657  ;;  %v13653_v17 = vpop.permute.xlu0 %13652  ;;  %12678 = vmatprep.subr.bf16.mxu0 %v14620_v15 }
0x1dda   :  { %v7029_v53 = vpack.c.bf16 %v7025_v21, %v7024_v28  ;;  %v13655_v4 = vunpack.i.h.bf16 %v13653_v17  ;;  %v13660_v52 = vunpack.i.h.bf16 %v13658_v40  ;;  %v13659_v58 = vunpack.i.l.bf16 %v13658_v40 }
0x1ddb   :  { %v13654_v44 = vunpack.i.l.bf16 %v13653_v17 }
0x1ddc   :  { %v7021_v35 = vsel %vm283_vm4, %v6942_v42, %v13655_v4  ;;  %12614 = vmatmul.mubr.msk.bf16.gmra.mrb[0].mxu0 %vm355_vm6, %v7029_v53  ;;  %12638 = vmatmul.mubr.msk.bf16.gmra.mrb[172].mxu1 %vm355_vm6, %v7029_v53  ;;  %v13973_v42 = vld [vmem:[%s18142_s10 + $0xb8] sm:$0xff]  }
0x1ddd   :  { %v7020_v63 = vsel %vm283_vm4, %v6940_v38, %v13654_v44  ;;  %12617 = vmatprep.mubr.msk.bf16.mxu0 %vm14621_vm3, %v14620_v15  ;;  %12641 = vmatprep.mubr.msk.bf16.mxu1 %vm14621_vm3, %v14620_v15  ;;  %v7027_v37 = vsel %vm290_vm5, %v7021_v35, %v13660_v52  ;;  %v13972_v38 = vld [vmem:[%s18142_s10 + $0xb0] sm:$0xff]  }
0x1dde   :  { %v7026_v27 = vsel %vm290_vm5, %v7020_v63, %v13659_v58  ;;  %12646 = vmatpush3.bf16.msra.mxu1 %v13972_v38 }
0x1ddf   :  { %v7030_v10 = vpack.c.bf16 %v7027_v37, %v7026_v27  ;;  %12647 = vmatprep.subr.bf16.mxu1 %v14620_v15 }
0x1de2   :  { %12648 = vmatpush3.bf16.msra.mxu1 %v13973_v42 }
0x1de3   :  { %12702 = vmatprep.subr.bf16.mxu1 %v14620_v15 }
0x1de4   :  { %12618 = vmatmul.mubr.msk.bf16.gmra.mrb[4].mxu0 %vm355_vm6, %v7030_v10  ;;  %12642 = vmatmul.mubr.msk.bf16.gmra.mrb[176].mxu1 %vm355_vm6, %v7030_v10 }
0x1de5   :  { %12649 = vmatprep.mubr.msk.bf16.mxu1 %vm14621_vm3, %v14620_v15 }
0x1ea5   :  { %v7131_v59 = vpop.f32.mrb[252].mxu0  ;;  %v7245_v32 = vpop.f32.mrb[168].mxu1 }
0x1ea6   :  { %v7246_v39 = vadd.f32 %v10908_v36, %v7245_v32  ;;  %v12611_v20 = vpop.f32.mrb[253].mxu0  ;;  %v12635_v26 = vpop.f32.mrb[169].mxu1  ;;  %v7132_v52 = vadd.f32 %v10885_v19, %v7131_v59 }
0x1ea7   :  { %v7134_v7 = vpop.f32.mrb[254].mxu0  ;;  %v7248_v45 = vpop.f32.mrb[170].mxu1 }
0x1ea8   :  { %v10918_v18 = vmul.f32 -1.442695, %v7246_v39  ;;  %v7249_v13 = vadd.f32 %v10908_v36, %v7248_v45  ;;  %v12612_v46 = vpop.f32.mrb[255].mxu0  ;;  %v12636_v22 = vpop.f32.mrb[171].mxu1  ;;  %v7135_v35 = vadd.f32 %v10885_v19, %v7134_v7 }
0x1eaa   :  { %14432 = vpow2.f32 %v10918_v18  ;;  %v10919_v30 = vmul.f32 -1.442695, %v7249_v13 }
0x1eac   :  { %14434 = vpow2.f32 %v10919_v30 }
0x1eaf   :  { %v7139_v14 = vpop.f32.mrb[0].mxu0  ;;  %v7253_v33 = vpop.f32.mrb[172].mxu1 }
0x1eb0   :  { %v7254_v41 = vadd.f32 %v10908_v36, %v7253_v33  ;;  %v12615_v62 = vpop.f32.mrb[1].mxu0  ;;  %v12639_v55 = vpop.f32.mrb[173].mxu1  ;;  %v7140_v39 = vadd.f32 %v10885_v19, %v7139_v14 }
0x1eb1   :  { %v7142_v21 = vpop.f32.mrb[2].mxu0  ;;  %v7256_v28 = vpop.f32.mrb[174].mxu1 }
0x1eb2   :  { %v10920_v40 = vmul.f32 -1.442695, %v7254_v41  ;;  %v7257_v17 = vadd.f32 %v10908_v36, %v7256_v28  ;;  %v12616_v53 = vpop.f32.mrb[3].mxu0  ;;  %v12640_v4 = vpop.f32.mrb[175].mxu1  ;;  %v7143_v7 = vadd.f32 %v10885_v19, %v7142_v21 }
0x1eb4   :  { %14436 = vpow2.f32 %v10920_v40  ;;  %v10921_v58 = vmul.f32 -1.442695, %v7257_v17  ;;  %v14433_v44 = vpop.eup %14432 }
0x1eb5   :  { %v7292_v63 = vadd.f32 1.0, %v14433_v44 }
0x1eb6   :  { %14438 = vpow2.f32 %v10921_v58  ;;  %v14435_v37 = vpop.eup %14434 }
0x1eb7   :  { %14440 = vtanh.f32 %v7132_v52  ;;  %v7147_v27 = vpop.f32.mrb[4].mxu0  ;;  %v7261_v10 = vpop.f32.mrb[176].mxu1  ;;  %v7293_v38 = vadd.f32 1.0, %v14435_v37 }
0x1eb8   :  { %14442 = vrcp.f32 %v7292_v63  ;;  %v7262_v42 = vadd.f32 %v10908_v36, %v7261_v10  ;;  %v12619_v12 = vpop.f32.mrb[5].mxu0  ;;  %v12643_v8 = vpop.f32.mrb[177].mxu1  ;;  %v7148_v41 = vadd.f32 %v10885_v19, %v7147_v27 }
0x1eb9   :  { %14444 = vtanh.f32 %v7135_v35  ;;  %v7150_v16 = vpop.f32.mrb[6].mxu0  ;;  %v7264_v43 = vpop.f32.mrb[178].mxu1  ;;  %v10718_v8 = vld [vmem:[%s18147_s11 + $0x8] ss:$0 sm:$0xff] }
0x1eba   :  { %14446 = vrcp.f32 %v7293_v38  ;;  %v10922_v11 = vmul.f32 -1.442695, %v7262_v42  ;;  %v7265_v54 = vadd.f32 %v10908_v36, %v7264_v43  ;;  %v12620_v59 = vpop.f32.mrb[7].mxu0  ;;  %v12644_v32 = vpop.f32.mrb[179].mxu1  ;;  %v7151_v55 = vadd.f32 %v10885_v19, %v7150_v16  ;;  %v10792_v16 = vld [vmem:[%s18147_s11 + $0x9] ss:$0 sm:$0xff] }
0x1ebb   :  { %v13079_v43 = vadd.f32 %v10792_v16, %v10718_v8  ;;  %v10929_v59 = vld [vmem:[%s18147_s11 + $0xb] ss:$0 sm:$0xff] }
0x1ebc   :  { %14448 = vpow2.f32 %v10922_v11  ;;  %v10923_v20 = vmul.f32 -1.442695, %v7265_v54  ;;  %v10866_v11 = vld [vmem:[%s18147_s11 + $0xa] ss:$0 sm:$0xff] }
0x1ebd   :  { %v13080_v54 = vadd.f32 %v13079_v43, %v10866_v11 }
0x1ebe   :  { %v14437_v26 = vpop.eup %14436  ;;  %14450 = vpow2.f32 %v10923_v20 }
0x1ebf   :  { %v7294_v45 = vadd.f32 1.0, %v14437_v26  ;;  %14452 = vtanh.f32 %v7140_v39  ;;  %v13081_v32 = vadd.f32 %v13080_v54, %v10929_v59  ;;  %v7557_v59 = vmul.f32 %v15645_v48, %v14873_v29 }
0x1ec0   :  { %v14439_v18 = vpop.eup %14438 }
0x1ec1   :  { %v14441_v13 = vpop.eup %14440  ;;  %14454 = vrcp.f32 %v7294_v45  ;;  %v7295_v46 = vadd.f32 1.0, %v14439_v18 }
0x1ec2   :  { %v14443_v22 = vpop.eup %14442  ;;  %14456 = vtanh.f32 %v7143_v7 }
0x1ec3   :  { %v14445_v30 = vpop.eup %14444  ;;  %v7310_v33 = vmul.f32 %v14443_v22, %v14441_v13  ;;  %14458 = vrcp.f32 %v7295_v46 }
0x1ec4   :  { %v14447_v36 = vpop.eup %14446  ;;  %14460 = vtanh.f32 %v7148_v41 }
0x1ec5   :  { %v7311_v62 = vmul.f32 %v14447_v36, %v14445_v30 }
0x1ec6   :  { %v14449_v14 = vpop.eup %14448 }
0x1ec7   :  { %v7296_v28 = vadd.f32 1.0, %v14449_v14  ;;  %v7316_v40 = vpack.c.bf16 %v7311_v62, %v7310_v33 }
0x1ec8   :  { %v14451_v21 = vpop.eup %14450 }
0x1ec9   :  { %14462 = vrcp.f32 %v7296_v28  ;;  %v7297_v17 = vadd.f32 1.0, %v14451_v21  ;;  %12650 = vmatmul.mubr.msk.bf16.vlgmr.msra.gmra.mrb[132].mxu1 %vm283_vm4, %v7316_v40  ;;  %v14453_v53 = vpop.eup %14452 }
0x1eca   :  { %14464 = vtanh.f32 %v7151_v55  ;;  %12653 = vmatprep.mubr.msk.bf16.mxu1 %vm14621_vm3, %v14620_v15 }
0x1ecb   :  { %v14455_v4 = vpop.eup %14454  ;;  %14466 = vrcp.f32 %v7297_v17 }
0x1ecc   :  { %v14457_v52 = vpop.eup %14456  ;;  %v7312_v58 = vmul.f32 %v14455_v4, %v14453_v53 }
0x1ecd   :  { %v14459_v44 = vpop.eup %14458 }
0x1ece   :  { %v7313_v35 = vmul.f32 %v14459_v44, %v14457_v52  ;;  %v14461_v63 = vpop.eup %14460  ;;  %v10940_v44 = vld [vmem:[%s18148_s13 + $0x2] ss:$0 sm:$0xff] }
0x1ed0   :  { %v7317_v19 = vpack.c.bf16 %v7313_v35, %v7312_v58 }
0x1ed2   :  { %12654 = vmatmul.mubr.msk.bf16.gmra.mrb[136].mxu1 %vm283_vm4, %v7317_v19 }
0x1ed3   :  { %v14463_v37 = vpop.eup %14462  ;;  %12657 = vmatprep.mubr.msk.bf16.mxu1 %vm14621_vm3, %v14620_v15 }
0x1ed4   :  { %v14465_v27 = vpop.eup %14464  ;;  %v7314_v10 = vmul.f32 %v14463_v37, %v14461_v63 }
0x1ed5   :  { %v14467_v38 = vpop.eup %14466 }
0x1ed6   :  { %v7315_v42 = vmul.f32 %v14467_v38, %v14465_v27 }
0x1ed8   :  { %v7318_v12 = vpack.c.bf16 %v7315_v42, %v7314_v10  ;;  %v7555_v10 = vmul.f32 %v15633_v24, %v14815_v49  ;;  %v7554_v42 = vmul.f32 %v15635_v6, %v14818_v51 }
0x1eda   :  { %12658 = vmatmul.mubr.msk.bf16.gmra.mrb[140].mxu1 %vm283_vm4, %v7318_v12 }
0x1edb   :  { %12714 = vmatprep.mubr.msk.bf16.mxu1 %vm14621_vm3, %v14620_v15 }
0x1f9c   :  { %v7387_v39 = vpop.f32.mrb[132].mxu1 }
0x1f9d   :  { %v13082_v20 = vadd.f32 %v13081_v32, %v7387_v39  ;;  %v12651_v26 = vpop.f32.mrb[133].mxu1 }
0x1f9e   :  { %v7390_v7 = vpop.f32.mrb[134].mxu1 }
0x1f9f   :  { %v7416_v45 = vmul.f32 %v13082_v20, %v14818_v51  ;;  %v13086_v18 = vadd.f32 %v13081_v32, %v7390_v7  ;;  %v12652_v13 = vpop.f32.mrb[135].mxu1 }
0x1fa0   :  { %v7559_v13 = vmul.f32 %v15661_v61, %v14899_v2  ;;  %v13976_v61 = vld [vmem:[%s18138_s6 + $0x248] sm:$0xff]  }
0x1fa1   :  { %v7417_v46 = vmul.f32 %v13086_v18, %v14815_v49  ;;  %12669 = vmatprep.mubr.msk.f32.mxu0 %vm283_vm4, %v7416_v45 }
0x1fa3   :  { %12670 = vmatmul.mubr.msk.f32.vlgmr.msra.gmra.mrb[8].mxu0 %vm283_vm4, %v7417_v46  ;;  %v7558_v46 = vmul.f32 %v15656_v50, %v14879_v34  ;;  %v13974_v50 = vld [vmem:[%s18138_s6 + $0x240] sm:$0xff]  }
0x1fa4   :  { %12703 = vmatpush3.bf16.msra.mxu1 %v13974_v50 }
0x1fa5   :  { %v7395_v22 = vpop.f32.mrb[136].mxu1  ;;  %12704 = vmatprep.subr.bf16.mxu1 %v14620_v15 }
0x1fa6   :  { %v13090_v30 = vadd.f32 %v13081_v32, %v7395_v22  ;;  %v12655_v33 = vpop.f32.mrb[137].mxu1 }
0x1fa7   :  { %v7398_v36 = vpop.f32.mrb[138].mxu1  ;;  %v13977_v33 = vld [vmem:[%s18137_s4 + $0x248] sm:$0xff]  }
0x1fa8   :  { %v7418_v41 = vmul.f32 %v13090_v30, %v14828_v57  ;;  %v13094_v62 = vadd.f32 %v13081_v32, %v7398_v36  ;;  %v12656_v14 = vpop.f32.mrb[139].mxu1  ;;  %12705 = vmatpush3.bf16.msra.mxu1 %v13976_v61  ;;  %v13979_v36 = vld [vmem:[%s18137_s4 + $0x250] sm:$0xff]  }
0x1fa9   :  { %12706 = vmatprep.subr.bf16.mxu1 %v14620_v15  ;;  %v13982_v14 = vld [vmem:[%s18138_s6 + $0x260] sm:$0xff]  }
0x1faa   :  { %v7419_v55 = vmul.f32 %v13094_v62, %v14873_v29  ;;  %12672 = vmatprep.mubr.msk.f32.mxu0 %vm283_vm4, %v7418_v41  ;;  %v13980_v41 = vld [vmem:[%s18138_s6 + $0x258] sm:$0xff]  }
0x1fab   :  { %v13981_v62 = vld [vmem:[%s18137_s4 + $0x258] sm:$0xff]  }
0x1fac   :  { %12673 = vmatmul.mubr.msk.f32.gmra.mrb[10].mxu0 %vm283_vm4, %v7419_v55  ;;  %v13983_v55 = vld [vmem:[%s18137_s4 + $0x260] sm:$0xff]  }
0x1fad   :  { %v7403_v28 = vpop.f32.mrb[140].mxu1 }
0x1fae   :  { %v13098_v40 = vadd.f32 %v13081_v32, %v7403_v28  ;;  %v12659_v21 = vpop.f32.mrb[141].mxu1  ;;  %v10947_v28 = vld [vmem:[%s18139_s2 + $0x6] sm:$0x3] }
0x1faf   :  { %v7406_v17 = vpop.f32.mrb[142].mxu1  ;;  %v7601_v21 = vrot.slane %v10947_v28, %v14771_v23 }
0x1fb0   :  { %v7420_v53 = vmul.f32 %v13098_v40, %v14879_v34  ;;  %v13102_v4 = vadd.f32 %v13081_v32, %v7406_v17  ;;  %v12660_v52 = vpop.f32.mrb[143].mxu1  ;;  %v7556_v32 = vmul.f32 %v15643_v47, %v14828_v57  ;;  %v7635_v17 = vrot.slane %v10947_v28, %v14777_v25 }
0x1fb2   :  { %v7421_v58 = vmul.f32 %v13102_v4, %v14899_v2  ;;  %12675 = vmatprep.mubr.msk.f32.mxu0 %vm283_vm4, %v7420_v53 }
0x1fb4   :  { %12676 = vmatmul.mubr.msk.f32.gmra.mrb[12].mxu0 %vm283_vm4, %v7421_v58 }
0x1fb5   :  { %12690 = vmatprep.mubr.msk.bf16.mxu0 %vm14621_vm3, %v14620_v15 }
0x2076   :  { %v12671_v35 = vpop.f32.mrb[8].mxu0 }
0x2077   :  { %v7525_v19 = vadd.f32 %v12671_v35, %v10940_v44  ;;  %v7519_v63 = vpop.f32.mrb[9].mxu0 }
0x2078   :  { %v7520_v37 = vadd.f32 %v10940_v44, %v7519_v63 }
0x2079   :  { %v7549_v27 = vmul.f32 %v7525_v19, %v14815_v49 }
0x207a   :  { %v7548_v38 = vmul.f32 %v7520_v37, %v14818_v51 }
0x207b   :  { %v17265_v12 = vadd.f32 %v7555_v10, %v7549_v27 }
0x207c   :  { %v17267_v8 = vadd.f32 %v7554_v42, %v7548_v38 }
0x207d   :  { %7575 = vperm.xlu1 %13661, %v17265_v12  }
0x207e   :  { %7570 = vperm.xlu0 %13540, %v17267_v8  }
0x207f   :  { %v12674_v16 = vpop.f32.mrb[10].mxu0 }
0x2080   :  { %v7535_v43 = vadd.f32 %v12674_v16, %v10940_v44  ;;  %v7529_v11 = vpop.f32.mrb[11].mxu0 }
0x2081   :  { %v7530_v54 = vadd.f32 %v10940_v44, %v7529_v11  ;;  %13662 = vset.pattern.permute.xlu1 %v14618_v0 }
0x2082   :  { %v7551_v24 = vmul.f32 %v7535_v43, %v14873_v29  ;;  %7609 = vperm.xlu1 %13662, %v17267_v8  }
0x2083   :  { %v7550_v6 = vmul.f32 %v7530_v54, %v14828_v57 }
0x2084   :  { %v17279_v39 = vadd.f32 %v7557_v59, %v7551_v24 }
0x2085   :  { %v17281_v20 = vadd.f32 %v7556_v32, %v7550_v6 }
0x2086   :  { %13664 = vset.pattern.permute.xlu1 %v14619_v1 }
0x2087   :  { %v12677_v26 = vpop.f32.mrb[12].mxu0  ;;  %7580 = vperm.xlu0 %13540, %v17281_v20   ;;  %7585 = vperm.xlu1 %13664, %v17279_v39  }
0x2088   :  { %v7545_v7 = vadd.f32 %v12677_v26, %v10940_v44  ;;  %v7539_v48 = vpop.f32.mrb[13].mxu0 }
0x2089   :  { %v7540_v45 = vadd.f32 %v10940_v44, %v7539_v48  ;;  %v17355_v44 = vld [vmem:[%s18140_s3 + $0x3] ss:$0 sm:$0xff] }
0x208a   :  { %v7553_v18 = vmul.f32 %v7545_v7, %v14899_v2 }
0x208b   :  { %v7552_v47 = vmul.f32 %v7540_v45, %v14879_v34  ;;  %13663 = vset.pattern.permute.xlu0 %v14618_v0  ;;  %13665 = vset.pattern.permute.xlu1 %v14618_v0 }
0x208c   :  { %v17294_v22 = vadd.f32 %v7559_v13, %v7553_v18  ;;  %7613 = vperm.xlu0 %13663, %v17265_v12   ;;  %7617 = vperm.xlu1 %13665, %v17281_v20  }
0x208d   :  { %v17298_v30 = vadd.f32 %v7558_v46, %v7552_v47  ;;  %v13984_v47 = vld [vmem:[%s18138_s6 + $0x268] sm:$0xff]  }
0x208e   :  { %v13985_v46 = vld [vmem:[%s18137_s4 + $0x268] sm:$0xff]  }
0x2090   :  { %13666 = vset.pattern.permute.xlu0 %v14619_v1  ;;  %7621 = vperm.xlu1 %13665, %v17279_v39   ;;  %v13975_v1 = vld [vmem:[%s18137_s4 + $0x240] sm:$0xff]  }
0x2091   :  { %7590 = vperm.xlu0 %13666, %v17298_v30   ;;  %12679 = vmatpush3.bf16.msra.mxu0 %v13975_v1 }
0x2092   :  { %12680 = vmatprep.subr.bf16.mxu0 %v14620_v15 }
0x2094   :  { %7625 = vperm.xlu1 %13665, %v17298_v30  }
0x2095   :  { %7595 = vperm.xlu0 %13666, %v17294_v22   ;;  %12681 = vmatpush3.bf16.msra.mxu0 %v13977_v33 }
0x2096   :  { %12682 = vmatprep.subr.bf16.mxu0 %v14620_v15 }
0x2098   :  { %7629 = vperm.xlu1 %13665, %v17294_v22  }
0x2099   :  { %13787 = vset.pattern.permute.xlu0 %v14618_v0  ;;  %v13978_v0 = vld [vmem:[%s18138_s6 + $0x250] sm:$0xff]   ;;  %12683 = vmatpush3.bf16.msra.mxu0 %v13979_v36 }
0x209a   :  { %12707 = vmatpush3.bf16.msra.mxu1 %v13978_v0  ;;  %12684 = vmatprep.subr.bf16.mxu0 %v14620_v15 }
0x209b   :  { %12708 = vmatprep.subr.bf16.mxu1 %v14620_v15 }
0x209d   :  { %12685 = vmatpush3.bf16.msra.mxu0 %v13981_v62 }
0x209e   :  { %12709 = vmatpush3.bf16.msra.mxu1 %v13980_v41  ;;  %12686 = vmatprep.subr.bf16.mxu0 %v14620_v15 }
0x209f   :  { %12710 = vmatprep.subr.bf16.mxu1 %v14620_v15 }
0x20a1   :  { %12687 = vmatpush3.bf16.msra.mxu0 %v13983_v55 }
0x20a2   :  { %12711 = vmatpush3.bf16.msra.mxu1 %v13982_v14  ;;  %12688 = vmatprep.subr.bf16.mxu0 %v14620_v15 }
0x20a3   :  { %12712 = vmatprep.subr.bf16.mxu1 %v14620_v15 }
0x20a5   :  { %12689 = vmatpush3.bf16.msra.mxu0 %v13985_v46 }
0x20a6   :  { %12713 = vmatpush3.bf16.msra.mxu1 %v13984_v47  ;;  %12726 = vmatprep.subr.bf16.mxu0 %v14620_v15 }
0x20a7   :  { %12742 = vmatprep.subr.bf16.mxu1 %v14620_v15 }
0x20fc   :  { %v7576_v40 = vpop.permute.xlu1 %7575 }
0x20fd   :  { %v7571_v53 = vpop.permute.xlu0 %7570  ;;  %v7603_v25 = vmul.f32 %v7601_v21, %v7576_v40 }
0x20fe   :  { %v7602_v52 = vmul.f32 %v7601_v21, %v7571_v53 }
0x2101   :  { %v7610_v4 = vpop.permute.xlu1 %7609 }
0x2102   :  { %v7636_v58 = vmul.f32 %v7635_v17, %v7610_v4 }
0x2104   :  { %v7642_v35 = vadd.f32 %v7636_v58, %v7602_v52 }
0x2106   :  { %v7656_v19 = vadd.f32 %v17355_v44, %v7642_v35  ;;  %v7581_v63 = vpop.permute.xlu0 %7580  ;;  %v7586_v37 = vpop.permute.xlu1 %7585 }
0x2107   :  { %v7604_v38 = vmul.f32 %v7601_v21, %v7581_v63  ;;  %v7605_v59 = vmul.f32 %v7601_v21, %v7586_v37 }
0x2108   :  { %v17359_v27 = vmul.f32 %v7656_v19, %v14818_v51 }
0x210a   :  { %v7674_v43 = vrot.slane %v17359_v27, 7 }
0x210b   :  { %v7614_v23 = vpop.permute.xlu0 %7613  ;;  %v7618_v10 = vpop.permute.xlu1 %7617 }
0x210c   :  { %v7637_v42 = vmul.f32 %v7635_v17, %v7614_v23  ;;  %v7638_v16 = vmul.f32 %v7635_v17, %v7618_v10  ;;  %v17365_v48 = vsel %vm196_vm0, 0.0, %v7674_v43 }
0x210d   :  { %v7696_v41 = vrot.slane %v17365_v48, 1  ;;  %v7727_v62 = vrot.slane %v17365_v48, 2 }
0x210e   :  { %v7643_v11 = vadd.f32 %v7637_v42, %v7603_v25  ;;  %v7644_v54 = vadd.f32 %v7638_v16, %v7604_v38 }
0x210f   :  { %v7622_v24 = vpop.permute.xlu1 %7621 }
0x2110   :  { %v7657_v6 = vadd.f32 %v17355_v44, %v7643_v11  ;;  %v7658_v32 = vadd.f32 %v17355_v44, %v7644_v54  ;;  %v7639_v26 = vmul.f32 %v7635_v17, %v7622_v24  ;;  %v7591_v7 = vpop.permute.xlu0 %7590 }
0x2111   :  { %v7606_v50 = vmul.f32 %v7601_v21, %v7591_v7 }
0x2112   :  { %v17368_v45 = vmul.f32 %v7657_v6, %v14815_v49  ;;  %v17371_v18 = vmul.f32 %v7658_v32, %v14828_v57  ;;  %v7645_v13 = vadd.f32 %v7639_v26, %v7605_v59 }
0x2113   :  { %v7626_v1 = vpop.permute.xlu1 %7625 }
0x2114   :  { %v7675_v61 = vrot.slane %v17368_v45, 7  ;;  %v7677_v33 = vrot.slane %v17371_v18, 7  ;;  %v7659_v0 = vadd.f32 %v17355_v44, %v7645_v13  ;;  %v7640_v36 = vmul.f32 %v7635_v17, %v7626_v1  ;;  %v7596_v14 = vpop.permute.xlu0 %7595 }
0x2115   :  { %v7607_v23 = vmul.f32 %v7601_v21, %v7596_v14 }
0x2116   :  { %v7676_v55 = vsel %vm196_vm0, %v7674_v43, %v7675_v61  ;;  %v17388_v28 = vsel %vm196_vm0, %v7675_v61, %v7677_v33  ;;  %v17391_v40 = vmul.f32 %v7659_v0, %v14873_v29  ;;  %v7646_v53 = vadd.f32 %v7640_v36, %v7606_v50 }
0x2117   :  { %v7630_v4 = vpop.permute.xlu1 %7629  ;;  %v7728_v52 = vrot.slane %v7676_v55, 2  ;;  %v7730_v58 = vrot.slane %v17388_v28, 2  ;;  %v7697_v35 = vrot.slane %v7676_v55, 1  ;;  %v7699_v19 = vrot.slane %v17388_v28, 1 }
0x2118   :  { %v7679_v63 = vrot.slane %v17391_v40, 7  ;;  %v7660_v37 = vadd.f32 %v17355_v44, %v7646_v53  ;;  %v7641_v10 = vmul.f32 %v7635_v17, %v7630_v4 }
0x2119   :  { %v7729_v25 = vsel %vm251_vm1, %v7727_v62, %v7728_v52  ;;  %v7731_v38 = vsel %vm251_vm1, %v7728_v52, %v7730_v58  ;;  %v7698_v42 = vsel %vm219_vm2, %v7696_v41, %v7697_v35  ;;  %v7700_v16 = vsel %vm219_vm2, %v7697_v35, %v7699_v19 }
0x211a   :  { %v7680_v43 = vsel %vm196_vm0, %v7677_v33, %v7679_v63  ;;  %v17403_v11 = vmul.f32 %v7660_v37, %v14879_v34  ;;  %v7647_v54 = vadd.f32 %v7641_v10, %v7607_v23  ;;  %v13672_v24 = vpack.i.bf16 %v7731_v38, %v7729_v25 }
0x211b   :  { %v13667_v59 = vpack.i.bf16 %v7700_v16, %v7698_v42  ;;  %v7732_v17 = vrot.slane %v7680_v43, 2  ;;  %v7701_v32 = vrot.slane %v7680_v43, 1 }
0x211c   :  { %v7681_v6 = vrot.slane %v17403_v11, 7  ;;  %v7661_v21 = vadd.f32 %v17355_v44, %v7647_v54  ;;  %13673 = vrot.lane.b32.xlu1 %v13672_v24, %s14622_s15 }
0x211d   :  { %13668 = vrot.lane.b32.xlu0 %v13667_v59, %s14623_s16  ;;  %v7733_v50 = vsel %vm251_vm1, %v7730_v58, %v7732_v17  ;;  %v7702_v44 = vsel %vm219_vm2, %v7699_v19, %v7701_v32 }
0x211e   :  { %v7682_v26 = vsel %vm196_vm0, %v7679_v63, %v7681_v6  ;;  %v17411_v7 = vmul.f32 %v7661_v21, %v14899_v2 }
0x211f   :  { %v7734_v13 = vrot.slane %v7682_v26, 2  ;;  %v7703_v47 = vrot.slane %v7682_v26, 1 }
0x2120   :  { %v7683_v46 = vrot.slane %v17411_v7, 7 }
0x2121   :  { %v7735_v1 = vsel %vm251_vm1, %v7732_v17, %v7734_v13  ;;  %v7704_v61 = vsel %vm219_vm2, %v7701_v32, %v7703_v47 }
0x2122   :  { %v7684_v33 = vsel %vm196_vm0, %v7681_v6, %v7683_v46  ;;  %v7693_v0 = vsel %vm196_vm0, %v7683_v46, 0.0  ;;  %v13682_v36 = vpack.i.bf16 %v7735_v1, %v7733_v50  ;;  %v13677_v41 = vpack.i.bf16 %v7704_v61, %v7702_v44 }
0x2123   :  { %v7707_v62 = vrot.slane %v7693_v0, 1  ;;  %v7738_v14 = vrot.slane %v7693_v0, 2  ;;  %v7736_v53 = vrot.slane %v7684_v33, 2  ;;  %v7705_v4 = vrot.slane %v7684_v33, 1 }
0x2124   :  { %13683 = vrot.lane.b32.xlu1 %v13682_v36, %s14622_s15  ;;  %13678 = vrot.lane.b32.xlu0 %v13677_v41, %s14623_s16 }
0x2125   :  { %v7737_v52 = vsel %vm251_vm1, %v7734_v13, %v7736_v53  ;;  %v7739_v58 = vsel %vm251_vm1, %v7736_v53, %v7738_v14  ;;  %v7706_v35 = vsel %vm219_vm2, %v7703_v47, %v7705_v4  ;;  %v7708_v19 = vsel %vm219_vm2, %v7705_v4, %v7707_v62 }
0x2126   :  { %v13692_v63 = vpack.i.bf16 %v7739_v58, %v7737_v52  ;;  %v13687_v37 = vpack.i.bf16 %v7708_v19, %v7706_v35  ;;  %v13987_v35 = vld [vmem:[%s18141_s8 + $0x98] sm:$0xff]   ;;  %v13989_v19 = vld [vmem:[%s18142_s10 + $0xc8] sm:$0xff]  }
0x2128   :  { %13693 = vrot.lane.b32.xlu1 %v13692_v63, %s14622_s15  ;;  %13688 = vrot.lane.b32.xlu0 %v13687_v37, %s14623_s16  ;;  %v10986_v63 = vld [vmem:[%s18143_s7 + $0xc] ss:$0 sm:$0xff] }
0x218e   :  { %v13674_v23 = vpop.permute.xlu1 %13673 }
0x218f   :  { %v13676_v10 = vunpack.i.h.bf16 %v13674_v23  ;;  %v13675_v25 = vunpack.i.l.bf16 %v13674_v23  ;;  %v13669_v38 = vpop.permute.xlu0 %13668 }
0x2190   :  { %v13671_v42 = vunpack.i.h.bf16 %v13669_v38  ;;  %v13670_v16 = vunpack.i.l.bf16 %v13669_v38 }
0x2192   :  { %v7759_v54 = vsel %vm283_vm4, %v7676_v55, %v13671_v42  ;;  %v7758_v24 = vsel %vm283_vm4, %v17365_v48, %v13670_v16 }
0x2193   :  { %v7765_v59 = vsel %vm290_vm5, %v7759_v54, %v13676_v10  ;;  %v7764_v6 = vsel %vm290_vm5, %v7758_v24, %v13675_v25 }
0x2194   :  { %v7770_v21 = vpack.c.bf16 %v7765_v59, %v7764_v6 }
0x2196   :  { %12691 = vmatmul.mubr.msk.bf16.vlgmr.msra.gmra.mrb[16].mxu0 %vm355_vm6, %v7770_v21  ;;  %12715 = vmatmul.mubr.msk.bf16.vlgmr.msra.gmra.mrb[180].mxu1 %vm355_vm6, %v7770_v21  ;;  %v13684_v17 = vpop.permute.xlu1 %13683  ;;  %v13679_v32 = vpop.permute.xlu0 %13678 }
0x2197   :  { %v13686_v13 = vunpack.i.h.bf16 %v13684_v17  ;;  %v13685_v47 = vunpack.i.l.bf16 %v13684_v17  ;;  %v13681_v46 = vunpack.i.h.bf16 %v13679_v32  ;;  %v13680_v50 = vunpack.i.l.bf16 %v13679_v32  ;;  %12694 = vmatprep.mubr.msk.bf16.mxu0 %vm14621_vm3, %v14620_v15  ;;  %12718 = vmatprep.mubr.msk.bf16.mxu1 %vm14621_vm3, %v14620_v15 }
0x2199   :  { %v7761_v48 = vsel %vm283_vm4, %v7680_v43, %v13681_v46  ;;  %v7760_v55 = vsel %vm283_vm4, %v17388_v28, %v13680_v50  ;;  %v10963_v50 = vld [vmem:[%s18144_s5 + $0xc] ss:$0 sm:$0xff] }
0x219a   :  { %v7767_v1 = vsel %vm290_vm5, %v7761_v48, %v13686_v13  ;;  %v7766_v44 = vsel %vm290_vm5, %v7760_v55, %v13685_v47  ;;  %v13694_v61 = vpop.permute.xlu1 %13693  ;;  %v13689_v0 = vpop.permute.xlu0 %13688 }
0x219b   :  { %v7771_v36 = vpack.c.bf16 %v7767_v1, %v7766_v44  ;;  %v13691_v41 = vunpack.i.h.bf16 %v13689_v0  ;;  %v13690_v62 = vunpack.i.l.bf16 %v13689_v0  ;;  %v13696_v14 = vunpack.i.h.bf16 %v13694_v61 }
0x219c   :  { %v13695_v53 = vunpack.i.l.bf16 %v13694_v61 }
0x219d   :  { %v7763_v4 = vsel %vm283_vm4, %v7684_v33, %v13691_v41  ;;  %v7762_v52 = vsel %vm283_vm4, %v7682_v26, %v13690_v62  ;;  %v13986_v26 = vld [vmem:[%s18141_s8 + $0x90] sm:$0xff]   ;;  %v13988_v33 = vld [vmem:[%s18142_s10 + $0xc0] sm:$0xff]  }
0x219e   :  { %12695 = vmatmul.mubr.msk.bf16.gmra.mrb[20].mxu0 %vm355_vm6, %v7771_v36  ;;  %12719 = vmatmul.mubr.msk.bf16.gmra.mrb[184].mxu1 %vm355_vm6, %v7771_v36  ;;  %v7769_v28 = vsel %vm290_vm5, %v7763_v4, %v13696_v14  ;;  %v7768_v43 = vsel %vm290_vm5, %v7762_v52, %v13695_v53 }
0x219f   :  { %12698 = vmatprep.mubr.msk.bf16.mxu0 %vm14621_vm3, %v14620_v15  ;;  %12722 = vmatprep.mubr.msk.bf16.mxu1 %vm14621_vm3, %v14620_v15  ;;  %v7772_v58 = vpack.c.bf16 %v7769_v28, %v7768_v43 }
0x21a0   :  { %12727 = vmatpush3.bf16.msra.mxu0 %v13986_v26  ;;  %12743 = vmatpush3.bf16.msra.mxu1 %v13988_v33 }
0x21a1   :  { %12728 = vmatprep.subr.bf16.mxu0 %v14620_v15  ;;  %12744 = vmatprep.subr.bf16.mxu1 %v14620_v15 }
0x21a4   :  { %12729 = vmatpush3.bf16.msra.mxu0 %v13987_v35  ;;  %12745 = vmatpush3.bf16.msra.mxu1 %v13989_v19 }
0x21a5   :  { %12782 = vmatprep.subr.bf16.mxu1 %v14620_v15  ;;  %12758 = vmatprep.subr.bf16.mxu0 %v14620_v15 }
0x21a6   :  { %12699 = vmatmul.mubr.msk.bf16.gmra.mrb[24].mxu0 %vm355_vm6, %v7772_v58  ;;  %12723 = vmatmul.mubr.msk.bf16.gmra.mrb[188].mxu1 %vm355_vm6, %v7772_v58 }
0x21a7   :  { %12730 = vmatprep.mubr.msk.bf16.mxu0 %vm14621_vm3, %v14620_v15  ;;  %12746 = vmatprep.mubr.msk.bf16.mxu1 %vm14621_vm3, %v14620_v15 }
0x2269   :  { %v7873_v37 = vpop.f32.mrb[16].mxu0  ;;  %v7987_v23 = vpop.f32.mrb[180].mxu1 }
0x226a   :  { %v7988_v10 = vadd.f32 %v10986_v63, %v7987_v23  ;;  %v12692_v25 = vpop.f32.mrb[17].mxu0  ;;  %v12716_v38 = vpop.f32.mrb[181].mxu1  ;;  %v7874_v36 = vadd.f32 %v10963_v50, %v7873_v37 }
0x226b   :  { %v7876_v42 = vpop.f32.mrb[18].mxu0  ;;  %v7990_v16 = vpop.f32.mrb[182].mxu1 }
0x226c   :  { %v10996_v54 = vmul.f32 -1.442695, %v7988_v10  ;;  %v7991_v24 = vadd.f32 %v10986_v63, %v7990_v16  ;;  %v12693_v59 = vpop.f32.mrb[19].mxu0  ;;  %v12717_v6 = vpop.f32.mrb[183].mxu1  ;;  %v7877_v14 = vadd.f32 %v10963_v50, %v7876_v42 }
0x226e   :  { %14468 = vpow2.f32 %v10996_v54  ;;  %v10997_v21 = vmul.f32 -1.442695, %v7991_v24 }
0x2270   :  { %14470 = vpow2.f32 %v10997_v21 }
0x2271   :  { %v7881_v17 = vpop.f32.mrb[20].mxu0  ;;  %v7995_v32 = vpop.f32.mrb[184].mxu1 }
0x2272   :  { %v7996_v13 = vadd.f32 %v10986_v63, %v7995_v32  ;;  %v12696_v47 = vpop.f32.mrb[21].mxu0  ;;  %v12720_v46 = vpop.f32.mrb[185].mxu1  ;;  %v7882_v38 = vadd.f32 %v10963_v50, %v7881_v17 }
0x2273   :  { %v7884_v48 = vpop.f32.mrb[22].mxu0  ;;  %v7998_v55 = vpop.f32.mrb[186].mxu1 }
0x2274   :  { %v10998_v1 = vmul.f32 -1.442695, %v7996_v13  ;;  %v7999_v44 = vadd.f32 %v10986_v63, %v7998_v55  ;;  %v12697_v61 = vpop.f32.mrb[23].mxu0  ;;  %v12721_v0 = vpop.f32.mrb[187].mxu1  ;;  %v7885_v54 = vadd.f32 %v10963_v50, %v7884_v48 }
0x2276   :  { %14472 = vpow2.f32 %v10998_v1  ;;  %v10999_v41 = vmul.f32 -1.442695, %v7999_v44 }
0x2278   :  { %v14469_v62 = vpop.eup %14468  ;;  %14474 = vpow2.f32 %v10999_v41 }
0x2279   :  { %v8034_v53 = vadd.f32 1.0, %v14469_v62  ;;  %v7889_v4 = vpop.f32.mrb[24].mxu0  ;;  %v8003_v52 = vpop.f32.mrb[188].mxu1  ;;  %14476 = vtanh.f32 %v7874_v36 }
0x227a   :  { %v14471_v28 = vpop.eup %14470  ;;  %v8004_v43 = vadd.f32 %v10986_v63, %v8003_v52  ;;  %v12700_v58 = vpop.f32.mrb[25].mxu0  ;;  %v7890_v47 = vadd.f32 %v10963_v50, %v7889_v4 }
0x227b   :  { %v12724_v26 = vpop.f32.mrb[189].mxu1  ;;  %14478 = vrcp.f32 %v8034_v53  ;;  %v8035_v33 = vadd.f32 1.0, %v14471_v28  ;;  %v7892_v35 = vpop.f32.mrb[26].mxu0 }
0x227c   :  { %v8006_v19 = vpop.f32.mrb[190].mxu1  ;;  %14480 = vtanh.f32 %v7877_v14  ;;  %v11000_v23 = vmul.f32 -1.442695, %v8004_v43  ;;  %v12701_v10 = vpop.f32.mrb[27].mxu0  ;;  %v7893_v1 = vadd.f32 %v10963_v50, %v7892_v35 }
0x227d   :  { %v8007_v37 = vadd.f32 %v10986_v63, %v8006_v19  ;;  %v12725_v25 = vpop.f32.mrb[191].mxu1  ;;  %14482 = vrcp.f32 %v8035_v33  ;;  %v13990_v19 = vld [vmem:[%s18138_s6 + $0x270] sm:$0xff]   ;;  %v13993_v10 = vld [vmem:[%s18137_s4 + $0x278] sm:$0xff]  }
0x227e   :  { %14484 = vpow2.f32 %v11000_v23  ;;  %v13991_v23 = vld [vmem:[%s18137_s4 + $0x270] sm:$0xff]   ;;  %v13994_v25 = vld [vmem:[%s18138_s6 + $0x280] sm:$0xff]  }
0x227f   :  { %v11001_v42 = vmul.f32 -1.442695, %v8007_v37  ;;  %v13992_v37 = vld [vmem:[%s18138_s6 + $0x278] sm:$0xff]  }
0x2280   :  { %v14473_v16 = vpop.eup %14472 }
0x2281   :  { %14486 = vpow2.f32 %v11001_v42  ;;  %v8036_v24 = vadd.f32 1.0, %v14473_v16  ;;  %v13996_v42 = vld [vmem:[%s18138_s6 + $0x288] sm:$0xff]  }
0x2282   :  { %v14475_v59 = vpop.eup %14474  ;;  %14488 = vtanh.f32 %v7882_v38  ;;  %v13995_v38 = vld [vmem:[%s18137_s4 + $0x280] sm:$0xff]   ;;  %v13997_v16 = vld [vmem:[%s18137_s4 + $0x288] sm:$0xff]  }
0x2283   :  { %14490 = vrcp.f32 %v8036_v24  ;;  %v8037_v6 = vadd.f32 1.0, %v14475_v59  ;;  %v14477_v21 = vpop.eup %14476  ;;  %v13999_v24 = vld [vmem:[%s18137_s4 + $0x290] sm:$0xff]   ;;  %v11007_v59 = vld [vmem:[%s18145_s9 + $0x9] ss:$0 sm:$0xff] }
0x2284   :  { %14492 = vtanh.f32 %v7885_v54  ;;  %v13998_v54 = vld [vmem:[%s18138_s6 + $0x290] sm:$0xff]  }
0x2285   :  { %v14479_v32 = vpop.eup %14478  ;;  %14494 = vrcp.f32 %v8037_v6 }
0x2286   :  { %v14481_v13 = vpop.eup %14480  ;;  %v8052_v63 = vmul.f32 %v14479_v32, %v14477_v21  ;;  %14496 = vtanh.f32 %v7890_v47 }
0x2287   :  { %v14483_v46 = vpop.eup %14482 }
0x2288   :  { %v14485_v55 = vpop.eup %14484  ;;  %v8053_v17 = vmul.f32 %v14483_v46, %v14481_v13 }
0x2289   :  { %v8038_v44 = vadd.f32 1.0, %v14485_v55 }
0x228a   :  { %v8058_v48 = vpack.c.bf16 %v8053_v17, %v8052_v63 }
0x228b   :  { %v14487_v61 = vpop.eup %14486  ;;  %14498 = vrcp.f32 %v8038_v44 }
0x228c   :  { %v8039_v0 = vadd.f32 1.0, %v14487_v61  ;;  %v14489_v36 = vpop.eup %14488  ;;  %14500 = vtanh.f32 %v7893_v1  ;;  %12731 = vmatmul.mubr.msk.bf16.vlgmr.msra.gmra.mrb[28].mxu0 %vm283_vm4, %v8058_v48  ;;  %12747 = vmatmul.mubr.msk.bf16.vlgmr.msra.gmra.mrb[192].mxu1 %vm283_vm4, %v8058_v48 }
0x228d   :  { %v14491_v41 = vpop.eup %14490  ;;  %12734 = vmatprep.mubr.msk.bf16.mxu0 %vm14621_vm3, %v14620_v15  ;;  %12750 = vmatprep.mubr.msk.bf16.mxu1 %vm14621_vm3, %v14620_v15 }
0x228e   :  { %14502 = vrcp.f32 %v8039_v0  ;;  %v14493_v50 = vpop.eup %14492  ;;  %v8054_v62 = vmul.f32 %v14491_v41, %v14489_v36  ;;  %12783 = vmatpush3.bf16.msra.mxu1 %v13990_v19  ;;  %12759 = vmatpush3.bf16.msra.mxu0 %v13991_v23 }
0x228f   :  { %v14495_v14 = vpop.eup %14494  ;;  %12784 = vmatprep.subr.bf16.mxu1 %v14620_v15  ;;  %12760 = vmatprep.subr.bf16.mxu0 %v14620_v15 }
0x2290   :  { %v8055_v53 = vmul.f32 %v14495_v14, %v14493_v50  ;;  %v14497_v52 = vpop.eup %14496 }
0x2292   :  { %v8059_v4 = vpack.c.bf16 %v8055_v53, %v8054_v62  ;;  %12785 = vmatpush3.bf16.msra.mxu1 %v13992_v37  ;;  %12761 = vmatpush3.bf16.msra.mxu0 %v13993_v10 }
0x2293   :  { %12786 = vmatprep.subr.bf16.mxu1 %v14620_v15  ;;  %12762 = vmatprep.subr.bf16.mxu0 %v14620_v15 }
0x2294   :  { %12735 = vmatmul.mubr.msk.bf16.gmra.mrb[32].mxu0 %vm283_vm4, %v8059_v4  ;;  %12751 = vmatmul.mubr.msk.bf16.gmra.mrb[196].mxu1 %vm283_vm4, %v8059_v4  ;;  %v14000_v4 = vld [vmem:[%s18138_s6 + $0x298] sm:$0xff]  }
0x2295   :  { %v14499_v28 = vpop.eup %14498  ;;  %12738 = vmatprep.mubr.msk.bf16.mxu0 %vm14621_vm3, %v14620_v15  ;;  %12754 = vmatprep.mubr.msk.bf16.mxu1 %vm14621_vm3, %v14620_v15 }
0x2296   :  { %v14501_v43 = vpop.eup %14500  ;;  %v8056_v58 = vmul.f32 %v14499_v28, %v14497_v52  ;;  %12787 = vmatpush3.bf16.msra.mxu1 %v13994_v25  ;;  %12763 = vmatpush3.bf16.msra.mxu0 %v13995_v38  ;;  %v14001_v52 = vld [vmem:[%s18137_s4 + $0x298] sm:$0xff]  }
0x2297   :  { %12788 = vmatprep.subr.bf16.mxu1 %v14620_v15  ;;  %12764 = vmatprep.subr.bf16.mxu0 %v14620_v15 }
0x2298   :  { %v14503_v26 = vpop.eup %14502 }
0x2299   :  { %v8057_v33 = vmul.f32 %v14503_v26, %v14501_v43 }
0x229a   :  { %12789 = vmatpush3.bf16.msra.mxu1 %v13996_v42  ;;  %12765 = vmatpush3.bf16.msra.mxu0 %v13997_v16 }
0x229b   :  { %v8060_v35 = vpack.c.bf16 %v8057_v33, %v8056_v58  ;;  %12790 = vmatprep.subr.bf16.mxu1 %v14620_v15  ;;  %12766 = vmatprep.subr.bf16.mxu0 %v14620_v15 }
0x229d   :  { %12739 = vmatmul.mubr.msk.bf16.gmra.mrb[36].mxu0 %vm283_vm4, %v8060_v35  ;;  %12755 = vmatmul.mubr.msk.bf16.gmra.mrb[200].mxu1 %vm283_vm4, %v8060_v35 }
0x229e   :  { %12770 = vmatprep.mubr.msk.bf16.mxu0 %vm14621_vm3, %v14620_v15  ;;  %12794 = vmatprep.mubr.msk.bf16.mxu1 %vm14621_vm3, %v14620_v15 }
0x229f   :  { %12791 = vmatpush3.bf16.msra.mxu1 %v13998_v54  ;;  %12767 = vmatpush3.bf16.msra.mxu0 %v13999_v24 }
0x22a0   :  { %12792 = vmatprep.subr.bf16.mxu1 %v14620_v15  ;;  %12768 = vmatprep.subr.bf16.mxu0 %v14620_v15 }
0x22a3   :  { %12793 = vmatpush3.bf16.msra.mxu1 %v14000_v4  ;;  %12769 = vmatpush3.bf16.msra.mxu0 %v14001_v52 }
0x22a4   :  { %12806 = vmatprep.subr.bf16.mxu0 %v14620_v15  ;;  %12822 = vmatprep.subr.bf16.mxu1 %v14620_v15 }
0x235f   :  { %v8129_v6 = vpop.f32.mrb[28].mxu0 }
0x2360   :  { %v8130_v21 = vadd.f32 %v11007_v59, %v8129_v6  ;;  %v12732_v32 = vpop.f32.mrb[29].mxu0 }
0x2361   :  { %v8132_v13 = vpop.f32.mrb[30].mxu0 }
0x2362   :  { %v8152_v63 = vadd.f32 %v8130_v21, %v17359_v27  ;;  %v8133_v47 = vadd.f32 %v11007_v59, %v8132_v13  ;;  %v12733_v46 = vpop.f32.mrb[31].mxu0 }
0x2364   :  { %v8153_v55 = vadd.f32 %v8133_v47, %v17368_v45  ;;  %v17546_v17 = vmul.f32 %v8152_v63, %v14818_v51 }
0x2366   :  { %v17549_v1 = vmul.f32 %v8153_v55, %v14815_v49  ;;  %v8252_v36 = vrot.slane %v17546_v17, 7 }
0x2367   :  { %v8137_v44 = vpop.f32.mrb[32].mxu0 }
0x2368   :  { %v8253_v61 = vrot.slane %v17549_v1, 7  ;;  %v8138_v48 = vadd.f32 %v11007_v59, %v8137_v44  ;;  %v12736_v0 = vpop.f32.mrb[33].mxu0 }
0x2369   :  { %v8140_v41 = vpop.f32.mrb[34].mxu0 }
0x236a   :  { %v8154_v27 = vadd.f32 %v8138_v48, %v17371_v18  ;;  %v8141_v50 = vadd.f32 %v11007_v59, %v8140_v41  ;;  %v12737_v62 = vpop.f32.mrb[35].mxu0  ;;  %v17555_v45 = vsel %vm196_vm0, %v8252_v36, %v8253_v61  ;;  %v17568_v18 = vsel %vm196_vm0, 0.0, %v8252_v36 }
0x236b   :  { %v8306_v58 = vrot.slane %v17555_v45, 2  ;;  %v8275_v26 = vrot.slane %v17555_v45, 1  ;;  %v8305_v33 = vrot.slane %v17568_v18, 2  ;;  %v8274_v10 = vrot.slane %v17568_v18, 1 }
0x236c   :  { %v17558_v14 = vmul.f32 %v8154_v27, %v14828_v57  ;;  %v8155_v53 = vadd.f32 %v8141_v50, %v17391_v40 }
0x236d   :  { %v8307_v6 = vsel %vm251_vm1, %v8305_v33, %v8306_v58  ;;  %v8276_v13 = vsel %vm219_vm2, %v8274_v10, %v8275_v26 }
0x236e   :  { %v8255_v28 = vrot.slane %v17558_v14, 7  ;;  %v17572_v43 = vmul.f32 %v8155_v53, %v14873_v29 }
0x2370   :  { %v8145_v40 = vpop.f32.mrb[36].mxu0  ;;  %v17580_v35 = vsel %vm196_vm0, %v8253_v61, %v8255_v28  ;;  %v8257_v19 = vrot.slane %v17572_v43, 7 }
0x2371   :  { %v8146_v23 = vadd.f32 %v11007_v59, %v8145_v40  ;;  %v12740_v37 = vpop.f32.mrb[37].mxu0  ;;  %v8308_v38 = vrot.slane %v17580_v35, 2  ;;  %v8277_v42 = vrot.slane %v17580_v35, 1 }
0x2372   :  { %v8148_v25 = vpop.f32.mrb[38].mxu0  ;;  %v8258_v21 = vsel %vm196_vm0, %v8255_v28, %v8257_v19 }
0x2373   :  { %v8156_v16 = vadd.f32 %v8146_v23, %v17403_v11  ;;  %v8149_v54 = vadd.f32 %v11007_v59, %v8148_v25  ;;  %v12741_v24 = vpop.f32.mrb[39].mxu0  ;;  %v8309_v32 = vsel %vm251_vm1, %v8306_v58, %v8308_v38  ;;  %v8278_v63 = vsel %vm219_vm2, %v8275_v26, %v8277_v42 }
0x2374   :  { %v13702_v55 = vpack.i.bf16 %v8309_v32, %v8307_v6  ;;  %v13697_v44 = vpack.i.bf16 %v8278_v63, %v8276_v13  ;;  %v8310_v61 = vrot.slane %v8258_v21, 2  ;;  %v8279_v48 = vrot.slane %v8258_v21, 1 }
0x2375   :  { %v17593_v47 = vmul.f32 %v8156_v16, %v14879_v34  ;;  %v8157_v46 = vadd.f32 %v8149_v54, %v17411_v7 }
0x2376   :  { %13703 = vrot.lane.b32.xlu1 %v13702_v55, %s14622_s15  ;;  %13698 = vrot.lane.b32.xlu0 %v13697_v44, %s14623_s16  ;;  %v8311_v62 = vsel %vm251_vm1, %v8308_v38, %v8310_v61  ;;  %v8280_v53 = vsel %vm219_vm2, %v8277_v42, %v8279_v48 }
0x2377   :  { %v8259_v11 = vrot.slane %v17593_v47, 7  ;;  %v17598_v59 = vmul.f32 %v8157_v46, %v14899_v2 }
0x2379   :  { %v8260_v0 = vsel %vm196_vm0, %v8257_v19, %v8259_v11  ;;  %v8261_v36 = vrot.slane %v17598_v59, 7 }
0x237a   :  { %v8312_v41 = vrot.slane %v8260_v0, 2  ;;  %v8281_v27 = vrot.slane %v8260_v0, 1 }
0x237b   :  { %v8262_v7 = vsel %vm196_vm0, %v8259_v11, %v8261_v36  ;;  %v8271_v50 = vsel %vm196_vm0, %v8261_v36, 0.0 }
0x237c   :  { %v8285_v4 = vrot.slane %v8271_v50, 1  ;;  %v8316_v52 = vrot.slane %v8271_v50, 2  ;;  %v8313_v28 = vsel %vm251_vm1, %v8310_v61, %v8312_v41  ;;  %v8282_v58 = vsel %vm219_vm2, %v8279_v48, %v8281_v27 }
0x237d   :  { %v13712_v40 = vpack.i.bf16 %v8313_v28, %v8311_v62  ;;  %v13707_v26 = vpack.i.bf16 %v8282_v58, %v8280_v53  ;;  %v8314_v33 = vrot.slane %v8262_v7, 2  ;;  %v8283_v19 = vrot.slane %v8262_v7, 1 }
0x237f   :  { %13713 = vrot.lane.b32.xlu1 %v13712_v40, %s14622_s15  ;;  %13708 = vrot.lane.b32.xlu0 %v13707_v26, %s14623_s16  ;;  %v8315_v23 = vsel %vm251_vm1, %v8312_v41, %v8314_v33  ;;  %v8317_v37 = vsel %vm251_vm1, %v8314_v33, %v8316_v52  ;;  %v8284_v10 = vsel %vm219_vm2, %v8281_v27, %v8283_v19 }
0x2380   :  { %v8286_v25 = vsel %vm219_vm2, %v8283_v19, %v8285_v4  ;;  %v13722_v38 = vpack.i.bf16 %v8317_v37, %v8315_v23 }
0x2381   :  { %v13717_v42 = vpack.i.bf16 %v8286_v25, %v8284_v10  ;;  %v14003_v10 = vld [vmem:[%s18141_s8 + $0xa8] sm:$0xff]   ;;  %v14005_v25 = vld [vmem:[%s18142_s10 + $0xd8] sm:$0xff]  }
0x2383   :  { %13723 = vrot.lane.b32.xlu1 %v13722_v38, %s14622_s15  ;;  %13718 = vrot.lane.b32.xlu0 %v13717_v42, %s14623_s16  ;;  %v11060_v38 = vld [vmem:[%s18143_s7 + $0xd] ss:$0 sm:$0xff] }
0x23e8   :  { %v13704_v16 = vpop.permute.xlu1 %13703  ;;  %v13699_v54 = vpop.permute.xlu0 %13698 }
0x23e9   :  { %v13706_v24 = vunpack.i.h.bf16 %v13704_v16  ;;  %v13705_v6 = vunpack.i.l.bf16 %v13704_v16  ;;  %v13701_v32 = vunpack.i.h.bf16 %v13699_v54  ;;  %v13700_v13 = vunpack.i.l.bf16 %v13699_v54 }
0x23eb   :  { %v8337_v63 = vsel %vm283_vm4, %v17555_v45, %v13701_v32  ;;  %v8336_v46 = vsel %vm283_vm4, %v17568_v18, %v13700_v13 }
0x23ec   :  { %v8343_v55 = vsel %vm290_vm5, %v8337_v63, %v13706_v24  ;;  %v8342_v44 = vsel %vm290_vm5, %v8336_v46, %v13705_v6 }
0x23ed   :  { %v8348_v11 = vpack.c.bf16 %v8343_v55, %v8342_v44 }
0x23ef   :  { %12771 = vmatmul.mubr.msk.bf16.vlgmr.msra.gmra.mrb[40].mxu0 %vm355_vm6, %v8348_v11  ;;  %12795 = vmatmul.mubr.msk.bf16.vlgmr.msra.gmra.mrb[204].mxu1 %vm355_vm6, %v8348_v11 }
0x23f0   :  { %12774 = vmatprep.mubr.msk.bf16.mxu0 %vm14621_vm3, %v14620_v15  ;;  %12798 = vmatprep.mubr.msk.bf16.mxu1 %vm14621_vm3, %v14620_v15 }
0x23f1   :  { %v13714_v61 = vpop.permute.xlu1 %13713  ;;  %v13709_v48 = vpop.permute.xlu0 %13708 }
0x23f2   :  { %v13716_v45 = vunpack.i.h.bf16 %v13714_v61  ;;  %v13715_v36 = vunpack.i.l.bf16 %v13714_v61  ;;  %v13711_v18 = vunpack.i.h.bf16 %v13709_v48  ;;  %v13710_v41 = vunpack.i.l.bf16 %v13709_v48 }
0x23f4   :  { %v8339_v27 = vsel %vm283_vm4, %v8258_v21, %v13711_v18  ;;  %v8338_v50 = vsel %vm283_vm4, %v17580_v35, %v13710_v41  ;;  %v11037_v41 = vld [vmem:[%s18144_s5 + $0xd] ss:$0 sm:$0xff] }
0x23f5   :  { %v8345_v62 = vsel %vm290_vm5, %v8339_v27, %v13716_v45  ;;  %v8344_v53 = vsel %vm290_vm5, %v8338_v50, %v13715_v36  ;;  %v13724_v4 = vpop.permute.xlu1 %13723  ;;  %v13719_v52 = vpop.permute.xlu0 %13718 }
0x23f6   :  { %v8349_v28 = vpack.c.bf16 %v8345_v62, %v8344_v53  ;;  %v13721_v58 = vunpack.i.h.bf16 %v13719_v52  ;;  %v13726_v40 = vunpack.i.h.bf16 %v13724_v4  ;;  %v13725_v26 = vunpack.i.l.bf16 %v13724_v4 }
0x23f7   :  { %v13720_v33 = vunpack.i.l.bf16 %v13719_v52 }
0x23f8   :  { %v8341_v19 = vsel %vm283_vm4, %v8262_v7, %v13721_v58  ;;  %12775 = vmatmul.mubr.msk.bf16.gmra.mrb[44].mxu0 %vm355_vm6, %v8349_v28  ;;  %12799 = vmatmul.mubr.msk.bf16.gmra.mrb[208].mxu1 %vm355_vm6, %v8349_v28  ;;  %v14004_v7 = vld [vmem:[%s18142_s10 + $0xd0] sm:$0xff]  }
0x23f9   :  { %v8340_v21 = vsel %vm283_vm4, %v8260_v0, %v13720_v33  ;;  %12778 = vmatprep.mubr.msk.bf16.mxu0 %vm14621_vm3, %v14620_v15  ;;  %12802 = vmatprep.mubr.msk.bf16.mxu1 %vm14621_vm3, %v14620_v15  ;;  %v8347_v35 = vsel %vm290_vm5, %v8341_v19, %v13726_v40  ;;  %v14002_v0 = vld [vmem:[%s18141_s8 + $0xa0] sm:$0xff]  }
0x23fa   :  { %v8346_v23 = vsel %vm290_vm5, %v8340_v21, %v13725_v26  ;;  %12807 = vmatpush3.bf16.msra.mxu0 %v14002_v0  ;;  %12823 = vmatpush3.bf16.msra.mxu1 %v14004_v7 }
0x23fb   :  { %v8350_v37 = vpack.c.bf16 %v8347_v35, %v8346_v23  ;;  %12808 = vmatprep.subr.bf16.mxu0 %v14620_v15  ;;  %12824 = vmatprep.subr.bf16.mxu1 %v14620_v15 }
0x23fe   :  { %12809 = vmatpush3.bf16.msra.mxu0 %v14003_v10  ;;  %12825 = vmatpush3.bf16.msra.mxu1 %v14005_v25 }
0x23ff   :  { %12862 = vmatprep.subr.bf16.mxu1 %v14620_v15  ;;  %12838 = vmatprep.subr.bf16.mxu0 %v14620_v15 }
0x2400   :  { %12779 = vmatmul.mubr.msk.bf16.gmra.mrb[48].mxu0 %vm355_vm6, %v8350_v37  ;;  %12803 = vmatmul.mubr.msk.bf16.gmra.mrb[212].mxu1 %vm355_vm6, %v8350_v37 }
0x2401   :  { %12810 = vmatprep.mubr.msk.bf16.mxu0 %vm14621_vm3, %v14620_v15  ;;  %12826 = vmatprep.mubr.msk.bf16.mxu1 %vm14621_vm3, %v14620_v15 }
0x24c2   :  { %v8451_v42 = vpop.f32.mrb[40].mxu0  ;;  %v8565_v16 = vpop.f32.mrb[204].mxu1 }
0x24c3   :  { %v8566_v54 = vadd.f32 %v11060_v38, %v8565_v16  ;;  %v12772_v24 = vpop.f32.mrb[41].mxu0  ;;  %v12796_v6 = vpop.f32.mrb[205].mxu1  ;;  %v8452_v28 = vadd.f32 %v11037_v41, %v8451_v42 }
0x24c4   :  { %v8454_v32 = vpop.f32.mrb[42].mxu0  ;;  %v8568_v13 = vpop.f32.mrb[206].mxu1 }
0x24c5   :  { %v11070_v63 = vmul.f32 -1.442695, %v8566_v54  ;;  %v8569_v46 = vadd.f32 %v11060_v38, %v8568_v13  ;;  %v12773_v55 = vpop.f32.mrb[43].mxu0  ;;  %v12797_v44 = vpop.f32.mrb[207].mxu1  ;;  %v8455_v26 = vadd.f32 %v11037_v41, %v8454_v32 }
0x24c7   :  { %14504 = vpow2.f32 %v11070_v63  ;;  %v11071_v11 = vmul.f32 -1.442695, %v8569_v46 }
0x24c9   :  { %14506 = vpow2.f32 %v11071_v11 }
0x24cb   :  { %v8459_v61 = vpop.f32.mrb[44].mxu0  ;;  %v8573_v48 = vpop.f32.mrb[208].mxu1 }
0x24cc   :  { %v8574_v45 = vadd.f32 %v11060_v38, %v8573_v48  ;;  %v12776_v36 = vpop.f32.mrb[45].mxu0  ;;  %v12800_v18 = vpop.f32.mrb[209].mxu1  ;;  %v8460_v6 = vadd.f32 %v11037_v41, %v8459_v61 }
0x24cd   :  { %v8462_v27 = vpop.f32.mrb[46].mxu0  ;;  %v8576_v50 = vpop.f32.mrb[210].mxu1 }
0x24ce   :  { %v11072_v62 = vmul.f32 -1.442695, %v8574_v45  ;;  %v8577_v53 = vadd.f32 %v11060_v38, %v8576_v50  ;;  %v12777_v4 = vpop.f32.mrb[47].mxu0  ;;  %v12801_v52 = vpop.f32.mrb[211].mxu1  ;;  %v8463_v63 = vadd.f32 %v11037_v41, %v8462_v27 }
0x24d0   :  { %14508 = vpow2.f32 %v11072_v62  ;;  %v11073_v58 = vmul.f32 -1.442695, %v8577_v53 }
0x24d1   :  { %v14505_v40 = vpop.eup %14504 }
0x24d2   :  { %14510 = vpow2.f32 %v11073_v58  ;;  %v8612_v33 = vadd.f32 1.0, %v14505_v40 }
0x24d3   :  { %v8467_v19 = vpop.f32.mrb[48].mxu0  ;;  %v8581_v21 = vpop.f32.mrb[212].mxu1  ;;  %14512 = vtanh.f32 %v8452_v28 }
0x24d4   :  { %v14507_v35 = vpop.eup %14506  ;;  %v8582_v23 = vadd.f32 %v11060_v38, %v8581_v21  ;;  %v12780_v37 = vpop.f32.mrb[49].mxu0  ;;  %14514 = vrcp.f32 %v8612_v33  ;;  %v8468_v36 = vadd.f32 %v11037_v41, %v8467_v19 }
0x24d5   :  { %v12804_v0 = vpop.f32.mrb[213].mxu1  ;;  %v8613_v7 = vadd.f32 1.0, %v14507_v35  ;;  %v8470_v10 = vpop.f32.mrb[50].mxu0  ;;  %14516 = vtanh.f32 %v8455_v26 }
0x24d6   :  { %v8584_v25 = vpop.f32.mrb[214].mxu1  ;;  %v11074_v16 = vmul.f32 -1.442695, %v8582_v23  ;;  %v12781_v54 = vpop.f32.mrb[51].mxu0  ;;  %v8471_v62 = vadd.f32 %v11037_v41, %v8470_v10 }
0x24d7   :  { %v8585_v42 = vadd.f32 %v11060_v38, %v8584_v25  ;;  %v12805_v24 = vpop.f32.mrb[215].mxu1  ;;  %14518 = vrcp.f32 %v8613_v7  ;;  %v14006_v25 = vld [vmem:[%s18138_s6 + $0x2a0] sm:$0xff]   ;;  %v14009_v54 = vld [vmem:[%s18137_s4 + $0x2a8] sm:$0xff]  }
0x24d8   :  { %14520 = vpow2.f32 %v11074_v16  ;;  %v14007_v16 = vld [vmem:[%s18137_s4 + $0x2a0] sm:$0xff]   ;;  %v14010_v24 = vld [vmem:[%s18138_s6 + $0x2b0] sm:$0xff]  }
0x24d9   :  { %v11075_v32 = vmul.f32 -1.442695, %v8585_v42  ;;  %v14008_v42 = vld [vmem:[%s18138_s6 + $0x2a8] sm:$0xff]  }
0x24da   :  { %v14509_v13 = vpop.eup %14508 }
0x24db   :  { %14522 = vpow2.f32 %v11075_v32  ;;  %v8614_v46 = vadd.f32 1.0, %v14509_v13  ;;  %v14012_v32 = vld [vmem:[%s18138_s6 + $0x2b8] sm:$0xff]  }
0x24dc   :  { %v14511_v55 = vpop.eup %14510  ;;  %14524 = vtanh.f32 %v8460_v6  ;;  %v14011_v6 = vld [vmem:[%s18137_s4 + $0x2b0] sm:$0xff]   ;;  %v14013_v13 = vld [vmem:[%s18137_s4 + $0x2b8] sm:$0xff]  }
0x24dd   :  { %14526 = vrcp.f32 %v8614_v46  ;;  %v8615_v44 = vadd.f32 1.0, %v14511_v55  ;;  %v14513_v11 = vpop.eup %14512  ;;  %v14015_v46 = vld [vmem:[%s18137_s4 + $0x2c0] sm:$0xff]   ;;  %v11081_v55 = vld [vmem:[%s18145_s9 + $0xa] ss:$0 sm:$0xff] }
0x24de   :  { %14528 = vtanh.f32 %v8463_v63  ;;  %v14515_v48 = vpop.eup %14514  ;;  %v14014_v63 = vld [vmem:[%s18138_s6 + $0x2c0] sm:$0xff]  }
0x24df   :  { %14530 = vrcp.f32 %v8615_v44  ;;  %v14517_v45 = vpop.eup %14516  ;;  %v8630_v38 = vmul.f32 %v14515_v48, %v14513_v11 }
0x24e0   :  { %14532 = vtanh.f32 %v8468_v36 }
0x24e1   :  { %v14519_v18 = vpop.eup %14518 }
0x24e2   :  { %v14521_v50 = vpop.eup %14520  ;;  %v8631_v61 = vmul.f32 %v14519_v18, %v14517_v45 }
0x24e3   :  { %v8616_v53 = vadd.f32 1.0, %v14521_v50 }
0x24e4   :  { %v8636_v27 = vpack.c.bf16 %v8631_v61, %v8630_v38 }
0x24e5   :  { %v14523_v4 = vpop.eup %14522  ;;  %14534 = vrcp.f32 %v8616_v53 }
0x24e6   :  { %v8617_v52 = vadd.f32 1.0, %v14523_v4  ;;  %v14525_v28 = vpop.eup %14524  ;;  %14536 = vtanh.f32 %v8471_v62  ;;  %12811 = vmatmul.mubr.msk.bf16.vlgmr.msra.gmra.mrb[52].mxu0 %vm283_vm4, %v8636_v27  ;;  %12827 = vmatmul.mubr.msk.bf16.vlgmr.msra.gmra.mrb[192].mxu1 %vm283_vm4, %v8636_v27 }
0x24e7   :  { %v14527_v58 = vpop.eup %14526  ;;  %12814 = vmatprep.mubr.msk.bf16.mxu0 %vm14621_vm3, %v14620_v15  ;;  %12830 = vmatprep.mubr.msk.bf16.mxu1 %vm14621_vm3, %v14620_v15 }
0x24e8   :  { %14538 = vrcp.f32 %v8617_v52  ;;  %v14529_v41 = vpop.eup %14528  ;;  %v8632_v40 = vmul.f32 %v14527_v58, %v14525_v28  ;;  %12863 = vmatpush3.bf16.msra.mxu1 %v14006_v25  ;;  %12839 = vmatpush3.bf16.msra.mxu0 %v14007_v16 }
0x24e9   :  { %v14531_v26 = vpop.eup %14530  ;;  %12864 = vmatprep.subr.bf16.mxu1 %v14620_v15  ;;  %12840 = vmatprep.subr.bf16.mxu0 %v14620_v15 }
0x24ea   :  { %v8633_v33 = vmul.f32 %v14531_v26, %v14529_v41  ;;  %v14533_v21 = vpop.eup %14532 }
0x24ec   :  { %v8637_v19 = vpack.c.bf16 %v8633_v33, %v8632_v40  ;;  %12865 = vmatpush3.bf16.msra.mxu1 %v14008_v42  ;;  %12841 = vmatpush3.bf16.msra.mxu0 %v14009_v54 }
0x24ed   :  { %12866 = vmatprep.subr.bf16.mxu1 %v14620_v15  ;;  %12842 = vmatprep.subr.bf16.mxu0 %v14620_v15 }
0x24ee   :  { %12815 = vmatmul.mubr.msk.bf16.gmra.mrb[56].mxu0 %vm283_vm4, %v8637_v19  ;;  %12831 = vmatmul.mubr.msk.bf16.gmra.mrb[196].mxu1 %vm283_vm4, %v8637_v19  ;;  %v14016_v19 = vld [vmem:[%s18138_s6 + $0x2c8] sm:$0xff]  }
0x24ef   :  { %v14535_v35 = vpop.eup %14534  ;;  %12818 = vmatprep.mubr.msk.bf16.mxu0 %vm14621_vm3, %v14620_v15  ;;  %12834 = vmatprep.mubr.msk.bf16.mxu1 %vm14621_vm3, %v14620_v15 }
0x24f0   :  { %v14537_v23 = vpop.eup %14536  ;;  %v8634_v37 = vmul.f32 %v14535_v35, %v14533_v21  ;;  %12867 = vmatpush3.bf16.msra.mxu1 %v14010_v24  ;;  %12843 = vmatpush3.bf16.msra.mxu0 %v14011_v6  ;;  %v14017_v21 = vld [vmem:[%s18137_s4 + $0x2c8] sm:$0xff]  }
0x24f1   :  { %12868 = vmatprep.subr.bf16.mxu1 %v14620_v15  ;;  %12844 = vmatprep.subr.bf16.mxu0 %v14620_v15 }
0x24f2   :  { %v14539_v0 = vpop.eup %14538 }
0x24f3   :  { %v8635_v7 = vmul.f32 %v14539_v0, %v14537_v23 }
0x24f4   :  { %12869 = vmatpush3.bf16.msra.mxu1 %v14012_v32  ;;  %12845 = vmatpush3.bf16.msra.mxu0 %v14013_v13 }
0x24f5   :  { %v8638_v10 = vpack.c.bf16 %v8635_v7, %v8634_v37  ;;  %12870 = vmatprep.subr.bf16.mxu1 %v14620_v15  ;;  %12846 = vmatprep.subr.bf16.mxu0 %v14620_v15 }
0x24f7   :  { %12819 = vmatmul.mubr.msk.bf16.gmra.mrb[60].mxu0 %vm283_vm4, %v8638_v10  ;;  %12835 = vmatmul.mubr.msk.bf16.gmra.mrb[200].mxu1 %vm283_vm4, %v8638_v10 }
0x24f8   :  { %12850 = vmatprep.mubr.msk.bf16.mxu0 %vm14621_vm3, %v14620_v15  ;;  %12874 = vmatprep.mubr.msk.bf16.mxu1 %vm14621_vm3, %v14620_v15 }
0x24f9   :  { %12871 = vmatpush3.bf16.msra.mxu1 %v14014_v63  ;;  %12847 = vmatpush3.bf16.msra.mxu0 %v14015_v46 }
0x24fa   :  { %12872 = vmatprep.subr.bf16.mxu1 %v14620_v15  ;;  %12848 = vmatprep.subr.bf16.mxu0 %v14620_v15 }
0x24fd   :  { %12873 = vmatpush3.bf16.msra.mxu1 %v14016_v19  ;;  %12849 = vmatpush3.bf16.msra.mxu0 %v14017_v21 }
0x24fe   :  { %12886 = vmatprep.subr.bf16.mxu0 %v14620_v15  ;;  %12902 = vmatprep.subr.bf16.mxu1 %v14620_v15 }
0x25b9   :  { %v8707_v44 = vpop.f32.mrb[52].mxu0 }
0x25ba   :  { %v8708_v11 = vadd.f32 %v11081_v55, %v8707_v44  ;;  %v12812_v48 = vpop.f32.mrb[53].mxu0 }
0x25bb   :  { %v8710_v45 = vpop.f32.mrb[54].mxu0 }
0x25bc   :  { %v8730_v38 = vadd.f32 %v8708_v11, %v17546_v17  ;;  %v8711_v36 = vadd.f32 %v11081_v55, %v8710_v45  ;;  %v12813_v18 = vpop.f32.mrb[55].mxu0 }
0x25be   :  { %v8731_v50 = vadd.f32 %v8711_v36, %v17549_v1  ;;  %v17737_v61 = vmul.f32 %v8730_v38, %v14818_v51 }
0x25c0   :  { %v17740_v62 = vmul.f32 %v8731_v50, %v14815_v49  ;;  %v8836_v28 = vrot.slane %v17737_v61, 7 }
0x25c1   :  { %v8715_v53 = vpop.f32.mrb[56].mxu0 }
0x25c2   :  { %v8837_v4 = vrot.slane %v17740_v62, 7  ;;  %v8716_v27 = vadd.f32 %v11081_v55, %v8715_v53  ;;  %v12816_v52 = vpop.f32.mrb[57].mxu0 }
0x25c3   :  { %v8718_v58 = vpop.f32.mrb[58].mxu0 }
0x25c4   :  { %v8732_v17 = vadd.f32 %v8716_v27, %v17558_v14  ;;  %v8719_v41 = vadd.f32 %v11081_v55, %v8718_v58  ;;  %v12817_v40 = vpop.f32.mrb[59].mxu0  ;;  %v17746_v1 = vsel %vm196_vm0, %v8836_v28, %v8837_v4  ;;  %v17759_v14 = vsel %vm196_vm0, 0.0, %v8836_v28 }
0x25c5   :  { %v8890_v37 = vrot.slane %v17746_v1, 2  ;;  %v8859_v0 = vrot.slane %v17746_v1, 1  ;;  %v8889_v7 = vrot.slane %v17759_v14, 2  ;;  %v8858_v54 = vrot.slane %v17759_v14, 1 }
0x25c6   :  { %v17749_v26 = vmul.f32 %v8732_v17, %v14828_v57  ;;  %v8733_v33 = vadd.f32 %v8719_v41, %v17572_v43 }
0x25c7   :  { %v8891_v44 = vsel %vm251_vm1, %v8889_v7, %v8890_v37  ;;  %v8860_v45 = vsel %vm219_vm2, %v8858_v54, %v8859_v0 }
0x25c8   :  { %v8839_v35 = vrot.slane %v17749_v26, 7  ;;  %v17763_v23 = vmul.f32 %v8733_v33, %v14873_v29 }
0x25ca   :  { %v8723_v43 = vpop.f32.mrb[60].mxu0  ;;  %v17771_v10 = vsel %vm196_vm0, %v8837_v4, %v8839_v35  ;;  %v8841_v25 = vrot.slane %v17763_v23, 7 }
0x25cb   :  { %v8724_v16 = vadd.f32 %v11081_v55, %v8723_v43  ;;  %v12820_v42 = vpop.f32.mrb[61].mxu0  ;;  %v8892_v6 = vrot.slane %v17771_v10, 2  ;;  %v8861_v32 = vrot.slane %v17771_v10, 1 }
0x25cc   :  { %v8726_v24 = vpop.f32.mrb[62].mxu0  ;;  %v8842_v11 = vsel %vm196_vm0, %v8839_v35, %v8841_v25 }
0x25cd   :  { %v8734_v13 = vadd.f32 %v8724_v16, %v17593_v47  ;;  %v8727_v63 = vadd.f32 %v11081_v55, %v8726_v24  ;;  %v12821_v46 = vpop.f32.mrb[63].mxu0  ;;  %v8893_v48 = vsel %vm251_vm1, %v8890_v37, %v8892_v6  ;;  %v8862_v38 = vsel %vm219_vm2, %v8859_v0, %v8861_v32 }
0x25ce   :  { %v13732_v50 = vpack.i.bf16 %v8893_v48, %v8891_v44  ;;  %v13727_v53 = vpack.i.bf16 %v8862_v38, %v8860_v45  ;;  %v8894_v4 = vrot.slane %v8842_v11, 2  ;;  %v8863_v27 = vrot.slane %v8842_v11, 1 }
0x25cf   :  { %v17784_v36 = vmul.f32 %v8734_v13, %v14879_v34  ;;  %v8735_v18 = vadd.f32 %v8727_v63, %v17598_v59 }
0x25d0   :  { %13733 = vrot.lane.b32.xlu1 %v13732_v50, %s14622_s15  ;;  %13728 = vrot.lane.b32.xlu0 %v13727_v53, %s14623_s16  ;;  %v8895_v40 = vsel %vm251_vm1, %v8892_v6, %v8894_v4  ;;  %v8864_v33 = vsel %vm219_vm2, %v8861_v32, %v8863_v27 }
0x25d1   :  { %v8843_v47 = vrot.slane %v17784_v36, 7  ;;  %v17789_v55 = vmul.f32 %v8735_v18, %v14899_v2 }
0x25d3   :  { %v8844_v52 = vsel %vm196_vm0, %v8841_v25, %v8843_v47  ;;  %v8845_v28 = vrot.slane %v17789_v55, 7 }
0x25d4   :  { %v8896_v58 = vrot.slane %v8844_v52, 2  ;;  %v8865_v17 = vrot.slane %v8844_v52, 1 }
0x25d5   :  { %v8846_v59 = vsel %vm196_vm0, %v8843_v47, %v8845_v28  ;;  %v8855_v41 = vsel %vm196_vm0, %v8845_v28, 0.0 }
0x25d6   :  { %v8869_v19 = vrot.slane %v8855_v41, 1  ;;  %v8900_v21 = vrot.slane %v8855_v41, 2  ;;  %v8897_v35 = vsel %vm251_vm1, %v8894_v4, %v8896_v58  ;;  %v8866_v37 = vsel %vm219_vm2, %v8863_v27, %v8865_v17 }
0x25d7   :  { %v13742_v43 = vpack.i.bf16 %v8897_v35, %v8895_v40  ;;  %v13737_v0 = vpack.i.bf16 %v8866_v37, %v8864_v33  ;;  %v8898_v7 = vrot.slane %v8846_v59, 2  ;;  %v8867_v25 = vrot.slane %v8846_v59, 1 }
0x25d9   :  { %13743 = vrot.lane.b32.xlu1 %v13742_v43, %s14622_s15  ;;  %13738 = vrot.lane.b32.xlu0 %v13737_v0, %s14623_s16  ;;  %v8899_v16 = vsel %vm251_vm1, %v8896_v58, %v8898_v7  ;;  %v8901_v42 = vsel %vm251_vm1, %v8898_v7, %v8900_v21  ;;  %v8868_v54 = vsel %vm219_vm2, %v8865_v17, %v8867_v25 }
0x25da   :  { %v8870_v24 = vsel %vm219_vm2, %v8867_v25, %v8869_v19  ;;  %v13752_v6 = vpack.i.bf16 %v8901_v42, %v8899_v16 }
0x25db   :  { %v13747_v32 = vpack.i.bf16 %v8870_v24, %v8868_v54  ;;  %v14019_v54 = vld [vmem:[%s18141_s8 + $0xb8] sm:$0xff]   ;;  %v14021_v24 = vld [vmem:[%s18142_s10 + $0xe8] sm:$0xff]  }
0x25dd   :  { %13753 = vrot.lane.b32.xlu1 %v13752_v6, %s14622_s15  ;;  %13748 = vrot.lane.b32.xlu0 %v13747_v32, %s14623_s16  ;;  %v11134_v6 = vld [vmem:[%s18143_s7 + $0xe] ss:$0 sm:$0xff] }
0x2642   :  { %v13734_v13 = vpop.permute.xlu1 %13733  ;;  %v13729_v63 = vpop.permute.xlu0 %13728 }
0x2643   :  { %v13736_v46 = vunpack.i.h.bf16 %v13734_v13  ;;  %v13735_v44 = vunpack.i.l.bf16 %v13734_v13  ;;  %v13731_v48 = vunpack.i.h.bf16 %v13729_v63  ;;  %v13730_v45 = vunpack.i.l.bf16 %v13729_v63 }
0x2645   :  { %v8921_v38 = vsel %vm283_vm4, %v17746_v1, %v13731_v48  ;;  %v8920_v18 = vsel %vm283_vm4, %v17759_v14, %v13730_v45 }
0x2646   :  { %v8927_v50 = vsel %vm290_vm5, %v8921_v38, %v13736_v46  ;;  %v8926_v53 = vsel %vm290_vm5, %v8920_v18, %v13735_v44 }
0x2647   :  { %v8932_v47 = vpack.c.bf16 %v8927_v50, %v8926_v53 }
0x2649   :  { %12851 = vmatmul.mubr.msk.bf16.vlgmr.msra.gmra.mrb[64].mxu0 %vm355_vm6, %v8932_v47  ;;  %12875 = vmatmul.mubr.msk.bf16.vlgmr.msra.gmra.mrb[216].mxu1 %vm355_vm6, %v8932_v47 }
0x264a   :  { %12854 = vmatprep.mubr.msk.bf16.mxu0 %vm14621_vm3, %v14620_v15  ;;  %12878 = vmatprep.mubr.msk.bf16.mxu1 %vm14621_vm3, %v14620_v15 }
0x264b   :  { %v13744_v4 = vpop.permute.xlu1 %13743  ;;  %v13739_v27 = vpop.permute.xlu0 %13738 }
0x264c   :  { %v13746_v1 = vunpack.i.h.bf16 %v13744_v4  ;;  %v13745_v28 = vunpack.i.l.bf16 %v13744_v4  ;;  %v13741_v14 = vunpack.i.h.bf16 %v13739_v27  ;;  %v13740_v58 = vunpack.i.l.bf16 %v13739_v27 }
0x264e   :  { %v8923_v17 = vsel %vm283_vm4, %v8842_v11, %v13741_v14  ;;  %v8922_v41 = vsel %vm283_vm4, %v17771_v10, %v13740_v58  ;;  %v11111_v58 = vld [vmem:[%s18144_s5 + $0xe] ss:$0 sm:$0xff] }
0x264f   :  { %v8929_v40 = vsel %vm290_vm5, %v8923_v17, %v13746_v1  ;;  %v8928_v33 = vsel %vm290_vm5, %v8922_v41, %v13745_v28  ;;  %v13754_v19 = vpop.permute.xlu1 %13753  ;;  %v13749_v21 = vpop.permute.xlu0 %13748 }
0x2650   :  { %v8933_v35 = vpack.c.bf16 %v8929_v40, %v8928_v33  ;;  %v13751_v37 = vunpack.i.h.bf16 %v13749_v21  ;;  %v13756_v43 = vunpack.i.h.bf16 %v13754_v19  ;;  %v13755_v0 = vunpack.i.l.bf16 %v13754_v19 }
0x2651   :  { %v13750_v7 = vunpack.i.l.bf16 %v13749_v21 }
0x2652   :  { %v8925_v25 = vsel %vm283_vm4, %v8846_v59, %v13751_v37  ;;  %12855 = vmatmul.mubr.msk.bf16.gmra.mrb[68].mxu0 %vm355_vm6, %v8933_v35  ;;  %12879 = vmatmul.mubr.msk.bf16.gmra.mrb[220].mxu1 %vm355_vm6, %v8933_v35  ;;  %v14020_v59 = vld [vmem:[%s18142_s10 + $0xe0] sm:$0xff]  }
0x2653   :  { %v8924_v11 = vsel %vm283_vm4, %v8844_v52, %v13750_v7  ;;  %12858 = vmatprep.mubr.msk.bf16.mxu0 %vm14621_vm3, %v14620_v15  ;;  %12882 = vmatprep.mubr.msk.bf16.mxu1 %vm14621_vm3, %v14620_v15  ;;  %v8931_v10 = vsel %vm290_vm5, %v8925_v25, %v13756_v43  ;;  %v14018_v52 = vld [vmem:[%s18141_s8 + $0xb0] sm:$0xff]  }
0x2654   :  { %v8930_v16 = vsel %vm290_vm5, %v8924_v11, %v13755_v0  ;;  %12887 = vmatpush3.bf16.msra.mxu0 %v14018_v52  ;;  %12903 = vmatpush3.bf16.msra.mxu1 %v14020_v59 }
0x2655   :  { %v8934_v42 = vpack.c.bf16 %v8931_v10, %v8930_v16  ;;  %12888 = vmatprep.subr.bf16.mxu0 %v14620_v15  ;;  %12904 = vmatprep.subr.bf16.mxu1 %v14620_v15 }
0x2658   :  { %12889 = vmatpush3.bf16.msra.mxu0 %v14019_v54  ;;  %12905 = vmatpush3.bf16.msra.mxu1 %v14021_v24 }
0x2659   :  { %12942 = vmatprep.subr.bf16.mxu1 %v14620_v15  ;;  %12918 = vmatprep.subr.bf16.mxu0 %v14620_v15 }
0x265a   :  { %12859 = vmatmul.mubr.msk.bf16.gmra.mrb[72].mxu0 %vm355_vm6, %v8934_v42  ;;  %12883 = vmatmul.mubr.msk.bf16.gmra.mrb[224].mxu1 %vm355_vm6, %v8934_v42 }
0x265b   :  { %12890 = vmatprep.mubr.msk.bf16.mxu0 %vm14621_vm3, %v14620_v15  ;;  %12906 = vmatprep.mubr.msk.bf16.mxu1 %vm14621_vm3, %v14620_v15 }
0x271c   :  { %v9035_v32 = vpop.f32.mrb[64].mxu0  ;;  %v9149_v13 = vpop.f32.mrb[216].mxu1 }
0x271d   :  { %v9150_v63 = vadd.f32 %v11134_v6, %v9149_v13  ;;  %v12852_v46 = vpop.f32.mrb[65].mxu0  ;;  %v12876_v44 = vpop.f32.mrb[217].mxu1  ;;  %v9036_v35 = vadd.f32 %v11111_v58, %v9035_v32 }
0x271e   :  { %v9038_v48 = vpop.f32.mrb[66].mxu0  ;;  %v9152_v45 = vpop.f32.mrb[218].mxu1 }
0x271f   :  { %v11144_v38 = vmul.f32 -1.442695, %v9150_v63  ;;  %v9153_v18 = vadd.f32 %v11134_v6, %v9152_v45  ;;  %v12853_v50 = vpop.f32.mrb[67].mxu0  ;;  %v12877_v53 = vpop.f32.mrb[219].mxu1  ;;  %v9039_v0 = vadd.f32 %v11111_v58, %v9038_v48 }
0x2721   :  { %14540 = vpow2.f32 %v11144_v38  ;;  %v11145_v47 = vmul.f32 -1.442695, %v9153_v18 }
0x2723   :  { %14542 = vpow2.f32 %v11145_v47 }
0x2725   :  { %v9043_v4 = vpop.f32.mrb[68].mxu0  ;;  %v9157_v27 = vpop.f32.mrb[220].mxu1 }
0x2726   :  { %v9158_v1 = vadd.f32 %v11134_v6, %v9157_v27  ;;  %v12856_v28 = vpop.f32.mrb[69].mxu0  ;;  %v12880_v14 = vpop.f32.mrb[221].mxu1  ;;  %v9044_v44 = vadd.f32 %v11111_v58, %v9043_v4 }
0x2727   :  { %v9046_v17 = vpop.f32.mrb[70].mxu0  ;;  %v9160_v41 = vpop.f32.mrb[222].mxu1 }
0x2728   :  { %v11146_v40 = vmul.f32 -1.442695, %v9158_v1  ;;  %v9161_v33 = vadd.f32 %v11134_v6, %v9160_v41  ;;  %v12857_v19 = vpop.f32.mrb[71].mxu0  ;;  %v12881_v21 = vpop.f32.mrb[223].mxu1  ;;  %v9047_v38 = vadd.f32 %v11111_v58, %v9046_v17 }
0x272a   :  { %14544 = vpow2.f32 %v11146_v40  ;;  %v11147_v37 = vmul.f32 -1.442695, %v9161_v33 }
0x272b   :  { %v14541_v43 = vpop.eup %14540 }
0x272c   :  { %14546 = vpow2.f32 %v11147_v37  ;;  %v9196_v7 = vadd.f32 1.0, %v14541_v43 }
0x272d   :  { %v9051_v25 = vpop.f32.mrb[72].mxu0  ;;  %v9165_v11 = vpop.f32.mrb[224].mxu1  ;;  %14548 = vtanh.f32 %v9036_v35 }
0x272e   :  { %v14543_v10 = vpop.eup %14542  ;;  %v9166_v16 = vadd.f32 %v11134_v6, %v9165_v11  ;;  %v12860_v42 = vpop.f32.mrb[73].mxu0  ;;  %14550 = vrcp.f32 %v9196_v7  ;;  %v9052_v28 = vadd.f32 %v11111_v58, %v9051_v25 }
0x272f   :  { %v12884_v52 = vpop.f32.mrb[225].mxu1  ;;  %v9197_v59 = vadd.f32 1.0, %v14543_v10  ;;  %v9054_v54 = vpop.f32.mrb[74].mxu0  ;;  %14552 = vtanh.f32 %v9039_v0 }
0x2730   :  { %v9168_v24 = vpop.f32.mrb[226].mxu1  ;;  %v11148_v13 = vmul.f32 -1.442695, %v9166_v16  ;;  %v12861_v63 = vpop.f32.mrb[75].mxu0  ;;  %v9055_v40 = vadd.f32 %v11111_v58, %v9054_v54 }
0x2731   :  { %v9169_v32 = vadd.f32 %v11134_v6, %v9168_v24  ;;  %v12885_v46 = vpop.f32.mrb[227].mxu1  ;;  %14554 = vrcp.f32 %v9197_v59  ;;  %v14022_v24 = vld [vmem:[%s18138_s6 + $0x2d0] sm:$0xff]   ;;  %v14025_v63 = vld [vmem:[%s18137_s4 + $0x2d8] sm:$0xff]  }
0x2732   :  { %14556 = vpow2.f32 %v11148_v13  ;;  %v14023_v13 = vld [vmem:[%s18137_s4 + $0x2d0] sm:$0xff]   ;;  %v14026_v46 = vld [vmem:[%s18138_s6 + $0x2e0] sm:$0xff]  }
0x2733   :  { %v11149_v48 = vmul.f32 -1.442695, %v9169_v32  ;;  %v14024_v32 = vld [vmem:[%s18138_s6 + $0x2d8] sm:$0xff]  }
0x2734   :  { %v14545_v45 = vpop.eup %14544 }
0x2735   :  { %14558 = vpow2.f32 %v11149_v48  ;;  %v9198_v18 = vadd.f32 1.0, %v14545_v45  ;;  %v14028_v48 = vld [vmem:[%s18138_s6 + $0x2e8] sm:$0xff]  }
0x2736   :  { %v14547_v50 = vpop.eup %14546  ;;  %14560 = vtanh.f32 %v9044_v44  ;;  %v14027_v44 = vld [vmem:[%s18137_s4 + $0x2e0] sm:$0xff]   ;;  %v14029_v45 = vld [vmem:[%s18137_s4 + $0x2e8] sm:$0xff]  }
0x2737   :  { %14562 = vrcp.f32 %v9198_v18  ;;  %v9199_v53 = vadd.f32 1.0, %v14547_v50  ;;  %v14549_v47 = vpop.eup %14548  ;;  %v14031_v18 = vld [vmem:[%s18137_s4 + $0x2f0] sm:$0xff]   ;;  %v11155_v50 = vld [vmem:[%s18145_s9 + $0xb] ss:$0 sm:$0xff] }
0x2738   :  { %14564 = vtanh.f32 %v9047_v38  ;;  %v14551_v27 = vpop.eup %14550  ;;  %v14030_v38 = vld [vmem:[%s18138_s6 + $0x2f0] sm:$0xff]  }
0x2739   :  { %14566 = vrcp.f32 %v9199_v53  ;;  %v14553_v1 = vpop.eup %14552  ;;  %v9214_v6 = vmul.f32 %v14551_v27, %v14549_v47 }
0x273a   :  { %14568 = vtanh.f32 %v9052_v28 }
0x273b   :  { %v14555_v14 = vpop.eup %14554 }
0x273c   :  { %v14557_v41 = vpop.eup %14556  ;;  %v9215_v4 = vmul.f32 %v14555_v14, %v14553_v1 }
0x273d   :  { %v9200_v33 = vadd.f32 1.0, %v14557_v41 }
0x273e   :  { %v9220_v17 = vpack.c.bf16 %v9215_v4, %v9214_v6 }
0x273f   :  { %v14559_v19 = vpop.eup %14558  ;;  %14570 = vrcp.f32 %v9200_v33 }
0x2740   :  { %v9201_v21 = vadd.f32 1.0, %v14559_v19  ;;  %v14561_v35 = vpop.eup %14560  ;;  %14572 = vtanh.f32 %v9055_v40  ;;  %12891 = vmatmul.mubr.msk.bf16.vlgmr.msra.gmra.mrb[76].mxu0 %vm283_vm4, %v9220_v17  ;;  %12907 = vmatmul.mubr.msk.bf16.vlgmr.msra.gmra.mrb[192].mxu1 %vm283_vm4, %v9220_v17 }
0x2741   :  { %v14563_v37 = vpop.eup %14562  ;;  %12894 = vmatprep.mubr.msk.bf16.mxu0 %vm14621_vm3, %v14620_v15  ;;  %12910 = vmatprep.mubr.msk.bf16.mxu1 %vm14621_vm3, %v14620_v15 }
0x2742   :  { %14574 = vrcp.f32 %v9201_v21  ;;  %v14565_v58 = vpop.eup %14564  ;;  %v9216_v43 = vmul.f32 %v14563_v37, %v14561_v35  ;;  %12943 = vmatpush3.bf16.msra.mxu1 %v14022_v24  ;;  %12919 = vmatpush3.bf16.msra.mxu0 %v14023_v13 }
0x2743   :  { %v14567_v0 = vpop.eup %14566  ;;  %12944 = vmatprep.subr.bf16.mxu1 %v14620_v15  ;;  %12920 = vmatprep.subr.bf16.mxu0 %v14620_v15 }
0x2744   :  { %v9217_v7 = vmul.f32 %v14567_v0, %v14565_v58  ;;  %v14569_v11 = vpop.eup %14568 }
0x2746   :  { %v9221_v25 = vpack.c.bf16 %v9217_v7, %v9216_v43  ;;  %12945 = vmatpush3.bf16.msra.mxu1 %v14024_v32  ;;  %12921 = vmatpush3.bf16.msra.mxu0 %v14025_v63 }
0x2747   :  { %12946 = vmatprep.subr.bf16.mxu1 %v14620_v15  ;;  %12922 = vmatprep.subr.bf16.mxu0 %v14620_v15 }
0x2748   :  { %12895 = vmatmul.mubr.msk.bf16.gmra.mrb[80].mxu0 %vm283_vm4, %v9221_v25  ;;  %12911 = vmatmul.mubr.msk.bf16.gmra.mrb[196].mxu1 %vm283_vm4, %v9221_v25 }
0x2749   :  { %v14571_v10 = vpop.eup %14570  ;;  %12898 = vmatprep.mubr.msk.bf16.mxu0 %vm14621_vm3, %v14620_v15  ;;  %12914 = vmatprep.mubr.msk.bf16.mxu1 %vm14621_vm3, %v14620_v15 }
0x274a   :  { %v14573_v16 = vpop.eup %14572  ;;  %v9218_v42 = vmul.f32 %v14571_v10, %v14569_v11  ;;  %12947 = vmatpush3.bf16.msra.mxu1 %v14026_v46  ;;  %12923 = vmatpush3.bf16.msra.mxu0 %v14027_v44  ;;  %v14033_v11 = vld [vmem:[%s18137_s4 + $0x2f8] sm:$0xff]   ;;  %s14625_s4 = smov 2  }
0x274b   :  { %12948 = vmatprep.subr.bf16.mxu1 %v14620_v15  ;;  %12924 = vmatprep.subr.bf16.mxu0 %v14620_v15 }
0x274c   :  { %v14575_v52 = vpop.eup %14574 }
0x274d   :  { %v9219_v59 = vmul.f32 %v14575_v52, %v14573_v16 }
0x274e   :  { %12949 = vmatpush3.bf16.msra.mxu1 %v14028_v48  ;;  %12925 = vmatpush3.bf16.msra.mxu0 %v14029_v45 }
0x274f   :  { %v9222_v54 = vpack.c.bf16 %v9219_v59, %v9218_v42  ;;  %12950 = vmatprep.subr.bf16.mxu1 %v14620_v15  ;;  %12926 = vmatprep.subr.bf16.mxu0 %v14620_v15 }
0x2751   :  { %12899 = vmatmul.mubr.msk.bf16.gmra.mrb[84].mxu0 %vm283_vm4, %v9222_v54  ;;  %12915 = vmatmul.mubr.msk.bf16.gmra.mrb[200].mxu1 %vm283_vm4, %v9222_v54 }
0x2752   :  { %12930 = vmatprep.mubr.msk.bf16.mxu0 %vm14621_vm3, %v14620_v15  ;;  %12954 = vmatprep.mubr.msk.bf16.mxu1 %vm14621_vm3, %v14620_v15 }
0x2753   :  { %12951 = vmatpush3.bf16.msra.mxu1 %v14030_v38  ;;  %12927 = vmatpush3.bf16.msra.mxu0 %v14031_v18 }
0x2754   :  { %12952 = vmatprep.subr.bf16.mxu1 %v14620_v15  ;;  %12928 = vmatprep.subr.bf16.mxu0 %v14620_v15 }
0x2757   :  { %12929 = vmatpush3.bf16.msra.mxu0 %v14033_v11 }
0x2813   :  { %v9291_v53 = vpop.f32.mrb[76].mxu0 }
0x2814   :  { %v9292_v47 = vadd.f32 %v11155_v50, %v9291_v53  ;;  %v12892_v27 = vpop.f32.mrb[77].mxu0 }
0x2815   :  { %v9294_v1 = vpop.f32.mrb[78].mxu0 }
0x2816   :  { %v9314_v6 = vadd.f32 %v9292_v47, %v17737_v61  ;;  %v9295_v28 = vadd.f32 %v11155_v50, %v9294_v1  ;;  %v12893_v14 = vpop.f32.mrb[79].mxu0 }
0x2818   :  { %v9320_v41 = vmul.f32 %v9314_v6, %v14818_v51  ;;  %v9315_v4 = vadd.f32 %v9295_v28, %v17740_v62  ;;  %v14032_v62 = vld [vmem:[%s18138_s6 + $0x2f8] sm:$0xff]  }
0x2819   :  { %12953 = vmatpush3.bf16.msra.mxu1 %v14032_v62 }
0x281a   :  { %v9321_v40 = vmul.f32 %v9315_v4, %v14815_v49  ;;  %v9420_v19 = vrot.slane %v9320_v41, 7  ;;  %12966 = vmatprep.subr.bf16.mxu1 %v14620_v15 }
0x281b   :  { %v9299_v33 = vpop.f32.mrb[80].mxu0 }
0x281c   :  { %v9421_v17 = vrot.slane %v9321_v40, 7  ;;  %v9300_v21 = vadd.f32 %v11155_v50, %v9299_v33  ;;  %v12896_v35 = vpop.f32.mrb[81].mxu0  ;;  %v17942_v10 = vsel %vm196_vm0, 0.0, %v9420_v19 }
0x281d   :  { %v9302_v37 = vpop.f32.mrb[82].mxu0  ;;  %v9442_v32 = vrot.slane %v17942_v10, 1  ;;  %v9473_v63 = vrot.slane %v17942_v10, 2 }
0x281e   :  { %v17930_v58 = vsel %vm196_vm0, %v9420_v19, %v9421_v17  ;;  %v9316_v43 = vadd.f32 %v9300_v21, %v17749_v26  ;;  %v9303_v61 = vadd.f32 %v11155_v50, %v9302_v37  ;;  %v12897_v0 = vpop.f32.mrb[83].mxu0 }
0x281f   :  { %v9443_v42 = vrot.slane %v17930_v58, 1 }
0x2820   :  { %v9322_v7 = vmul.f32 %v9316_v43, %v14828_v57  ;;  %v9317_v25 = vadd.f32 %v9303_v61, %v17763_v23  ;;  %v9474_v23 = vrot.slane %v17930_v58, 2 }
0x2821   :  { %v9444_v1 = vsel %vm219_vm2, %v9442_v32, %v9443_v42 }
0x2822   :  { %v9423_v16 = vrot.slane %v9322_v7, 7  ;;  %v9323_v26 = vmul.f32 %v9317_v25, %v14873_v29  ;;  %v9475_v47 = vsel %vm251_vm1, %v9473_v63, %v9474_v23 }
0x2824   :  { %v9307_v52 = vpop.f32.mrb[84].mxu0  ;;  %v17949_v59 = vsel %vm196_vm0, %v9421_v17, %v9423_v16  ;;  %v9425_v54 = vrot.slane %v9323_v26, 7 }
0x2825   :  { %v9308_v24 = vadd.f32 %v11155_v50, %v9307_v52  ;;  %v12900_v13 = vpop.f32.mrb[85].mxu0  ;;  %v9445_v46 = vrot.slane %v17949_v59, 1  ;;  %v9476_v44 = vrot.slane %v17949_v59, 2 }
0x2826   :  { %v9310_v48 = vpop.f32.mrb[86].mxu0  ;;  %v17956_v45 = vsel %vm196_vm0, %v9423_v16, %v9425_v54 }
0x2827   :  { %v9318_v38 = vadd.f32 %v9308_v24, %v17784_v36  ;;  %v9311_v18 = vadd.f32 %v11155_v50, %v9310_v48  ;;  %v12901_v53 = vpop.f32.mrb[87].mxu0  ;;  %v9477_v27 = vsel %vm251_vm1, %v9474_v23, %v9476_v44  ;;  %v9446_v6 = vsel %vm219_vm2, %v9443_v42, %v9445_v46 }
0x2828   :  { %v13762_v41 = vpack.i.bf16 %v9477_v27, %v9475_v47  ;;  %v13757_v4 = vpack.i.bf16 %v9446_v6, %v9444_v1  ;;  %v9447_v36 = vrot.slane %v17956_v45, 1  ;;  %v9478_v50 = vrot.slane %v17956_v45, 2 }
0x2829   :  { %v9324_v28 = vmul.f32 %v9318_v38, %v14879_v34  ;;  %v9319_v14 = vadd.f32 %v9311_v18, %v17789_v55 }
0x282a   :  { %13763 = vrot.lane.b32.xlu1 %v13762_v41, %s14622_s15  ;;  %13758 = vrot.lane.b32.xlu0 %v13757_v4, %s14623_s16  ;;  %v9479_v25 = vsel %vm251_vm1, %v9476_v44, %v9478_v50  ;;  %v9448_v11 = vsel %vm219_vm2, %v9445_v46, %v9447_v36 }
0x282b   :  { %v9427_v40 = vrot.slane %v9324_v28, 7  ;;  %v9325_v33 = vmul.f32 %v9319_v14, %v14899_v2 }
0x282d   :  { %v17971_v19 = vsel %vm196_vm0, %v9425_v54, %v9427_v40  ;;  %v9429_v17 = vrot.slane %v9325_v33, 7 }
0x282e   :  { %v9449_v21 = vrot.slane %v17971_v19, 1  ;;  %v9480_v55 = vrot.slane %v17971_v19, 2 }
0x282f   :  { %v9430_v35 = vsel %vm196_vm0, %v9427_v40, %v9429_v17  ;;  %v9439_v37 = vsel %vm196_vm0, %v9429_v17, 0.0 }
0x2830   :  { %v9451_v43 = vrot.slane %v9430_v35, 1  ;;  %v9453_v61 = vrot.slane %v9439_v37, 1  ;;  %v9482_v0 = vrot.slane %v9430_v35, 2  ;;  %v9484_v7 = vrot.slane %v9439_v37, 2 }
0x2831   :  { %v9481_v62 = vsel %vm251_vm1, %v9478_v50, %v9480_v55  ;;  %v9450_v16 = vsel %vm219_vm2, %v9447_v36, %v9449_v21 }
0x2832   :  { %v13772_v26 = vpack.i.bf16 %v9481_v62, %v9479_v25  ;;  %v13767_v42 = vpack.i.bf16 %v9450_v16, %v9448_v11  ;;  %v9483_v23 = vsel %vm251_vm1, %v9480_v55, %v9482_v0  ;;  %v9485_v52 = vsel %vm251_vm1, %v9482_v0, %v9484_v7  ;;  %v11208_v7 = vld [vmem:[%s18143_s7 + $0xf] ss:$0 sm:$0xff] }
0x2833   :  { %v9452_v54 = vsel %vm219_vm2, %v9449_v21, %v9451_v43  ;;  %v9454_v24 = vsel %vm219_vm2, %v9451_v43, %v9453_v61  ;;  %v13782_v13 = vpack.i.bf16 %v9485_v52, %v9483_v23  ;;  %v11235_v43 = vld [vmem:[%s18146_s12 + $0x60] sm:$0xff]  ;;  %v11236_v61 = vld [vmem:[%s18146_s12 + $0x68] sm:$0xff] }
0x2834   :  { %13773 = vrot.lane.b32.xlu1 %v13772_v26, %s14622_s15  ;;  %13768 = vrot.lane.b32.xlu0 %v13767_v42, %s14623_s16  ;;  %v13777_v32 = vpack.i.bf16 %v9454_v24, %v9452_v54  ;;  %v13023_v0 = vpack.c.bf16 %v11236_v61, %v11235_v43 }
0x2836   :  { %13024 = vmatprep.subr.bf16.mxu0 %v13023_v0 }
0x2838   :  { %13783 = vrot.lane.b32.xlu1 %v13782_v13, %s14622_s15  ;;  %13778 = vrot.lane.b32.xlu0 %v13777_v32, %s14623_s16 }
0x283c   :  { %10056 = vrot.lane.b32.xlu1 %v17265_v12, %s14625_s4  ;;  %10054 = vrot.lane.b32.xlu0 %v17267_v8, %s14625_s4 }
0x2840   :  { %10060 = vrot.lane.b32.xlu1 %v17279_v39, %s14625_s4  ;;  %10058 = vrot.lane.b32.xlu0 %v17281_v20, %s14625_s4 }
0x2844   :  { %10064 = vrot.lane.b32.xlu1 %v17294_v22, %s14625_s4  ;;  %10062 = vrot.lane.b32.xlu0 %v17298_v30, %s14625_s4 }
0x289c   :  { %v13764_v63 = vpop.permute.xlu1 %13763  ;;  %v13759_v46 = vpop.permute.xlu0 %13758 }
0x289d   :  { %v13766_v44 = vunpack.i.h.bf16 %v13764_v63  ;;  %v13765_v48 = vunpack.i.l.bf16 %v13764_v63  ;;  %v13761_v38 = vunpack.i.h.bf16 %v13759_v46  ;;  %v13760_v18 = vunpack.i.l.bf16 %v13759_v46 }
0x289f   :  { %v9505_v53 = vsel %vm283_vm4, %v17930_v58, %v13761_v38  ;;  %v9504_v12 = vsel %vm283_vm4, %v17942_v10, %v13760_v18 }
0x28a0   :  { %v9511_v8 = vsel %vm290_vm5, %v9505_v53, %v13766_v44  ;;  %v9510_v39 = vsel %vm290_vm5, %v9504_v12, %v13765_v48  ;;  %v11185_v44 = vld [vmem:[%s18144_s5 + $0xf] ss:$0 sm:$0xff] }
0x28a1   :  { %v9516_v20 = vpack.c.bf16 %v9511_v8, %v9510_v39 }
0x28a3   :  { %12931 = vmatmul.mubr.msk.bf16.vlgmr.msra.gmra.mrb[92].mxu0 %vm355_vm6, %v9516_v20  ;;  %12955 = vmatmul.mubr.msk.bf16.vlgmr.msra.gmra.mrb[228].mxu1 %vm355_vm6, %v9516_v20 }
0x28a4   :  { %12934 = vmatprep.mubr.msk.bf16.mxu0 %vm14621_vm3, %v14620_v15  ;;  %12958 = vmatprep.mubr.msk.bf16.mxu1 %vm14621_vm3, %v14620_v15 }
0x28a5   :  { %13026 = vmatpush3.bf16.msra.mxu0 %v13023_v0 }
0x28a6   :  { %v13774_v22 = vpop.permute.xlu1 %13773  ;;  %v13769_v30 = vpop.permute.xlu0 %13768 }
0x28a7   :  { %v13776_v58 = vunpack.i.h.bf16 %v13774_v22  ;;  %v13775_v47 = vunpack.i.l.bf16 %v13774_v22  ;;  %v13771_v10 = vunpack.i.h.bf16 %v13769_v30  ;;  %v13770_v27 = vunpack.i.l.bf16 %v13769_v30 }
0x28a9   :  { %v9507_v1 = vsel %vm283_vm4, %v17956_v45, %v13771_v10  ;;  %v9506_v6 = vsel %vm283_vm4, %v17949_v59, %v13770_v27 }
0x28aa   :  { %v9513_v28 = vsel %vm290_vm5, %v9507_v1, %v13776_v58  ;;  %v9512_v14 = vsel %vm290_vm5, %v9506_v6, %v13775_v47  ;;  %v13784_v41 = vpop.permute.xlu1 %13783  ;;  %v13779_v4 = vpop.permute.xlu0 %13778 }
0x28ab   :  { %v9517_v40 = vpack.c.bf16 %v9513_v28, %v9512_v14  ;;  %v13781_v33 = vunpack.i.h.bf16 %v13779_v4  ;;  %v13786_v36 = vunpack.i.h.bf16 %v13784_v41  ;;  %v13785_v50 = vunpack.i.l.bf16 %v13784_v41 }
0x28ac   :  { %v13780_v17 = vunpack.i.l.bf16 %v13779_v4 }
0x28ad   :  { %v9509_v21 = vsel %vm283_vm4, %v9430_v35, %v13781_v33  ;;  %12935 = vmatmul.mubr.msk.bf16.gmra.mrb[96].mxu0 %vm355_vm6, %v9517_v40  ;;  %12959 = vmatmul.mubr.msk.bf16.gmra.mrb[232].mxu1 %vm355_vm6, %v9517_v40  ;;  %v14035_v35 = vld [vmem:[%s18142_s10 + $0xf8] sm:$0xff]  }
0x28ae   :  { %v9508_v59 = vsel %vm283_vm4, %v17971_v19, %v13780_v17  ;;  %12938 = vmatprep.mubr.msk.bf16.mxu0 %vm14621_vm3, %v14620_v15  ;;  %12962 = vmatprep.mubr.msk.bf16.mxu1 %vm14621_vm3, %v14620_v15  ;;  %v9515_v45 = vsel %vm290_vm5, %v9509_v21, %v13786_v36  ;;  %v14034_v19 = vld [vmem:[%s18142_s10 + $0xf0] sm:$0xff]  }
0x28af   :  { %v9514_v55 = vsel %vm290_vm5, %v9508_v59, %v13785_v50  ;;  %12967 = vmatpush3.bf16.msra.mxu1 %v14034_v19 }
0x28b0   :  { %v9518_v37 = vpack.c.bf16 %v9515_v45, %v9514_v55  ;;  %12968 = vmatprep.subr.bf16.mxu1 %v14620_v15 }
0x28b3   :  { %12969 = vmatpush3.bf16.msra.mxu1 %v14035_v35 }
0x28b5   :  { %12939 = vmatmul.mubr.msk.bf16.gmra.mrb[100].mxu0 %vm355_vm6, %v9518_v37  ;;  %12963 = vmatmul.mubr.msk.bf16.gmra.mrb[236].mxu1 %vm355_vm6, %v9518_v37 }
0x28b6   :  { %12970 = vmatprep.mubr.msk.bf16.mxu1 %vm14621_vm3, %v14620_v15 }
0x2976   :  { %v9619_v25 = vpop.f32.mrb[92].mxu0  ;;  %v9733_v62 = vpop.f32.mrb[228].mxu1 }
0x2977   :  { %v9734_v11 = vadd.f32 %v11208_v7, %v9733_v62  ;;  %v12932_v16 = vpop.f32.mrb[93].mxu0  ;;  %v12956_v26 = vpop.f32.mrb[229].mxu1  ;;  %v9620_v30 = vadd.f32 %v11185_v44, %v9619_v25 }
0x2978   :  { %v9622_v42 = vpop.f32.mrb[94].mxu0  ;;  %v9736_v23 = vpop.f32.mrb[230].mxu1 }
0x2979   :  { %v11218_v52 = vmul.f32 -1.442695, %v9734_v11  ;;  %v9737_v54 = vadd.f32 %v11208_v7, %v9736_v23  ;;  %v12933_v24 = vpop.f32.mrb[95].mxu0  ;;  %v12957_v13 = vpop.f32.mrb[231].mxu1  ;;  %v9623_v10 = vadd.f32 %v11185_v44, %v9622_v42 }
0x297b   :  { %14576 = vpow2.f32 %v11218_v52  ;;  %v11219_v32 = vmul.f32 -1.442695, %v9737_v54 }
0x297d   :  { %14578 = vpow2.f32 %v11219_v32 }
0x2980   :  { %v9627_v63 = vpop.f32.mrb[96].mxu0  ;;  %v9741_v46 = vpop.f32.mrb[232].mxu1 }
0x2981   :  { %v9742_v48 = vadd.f32 %v11208_v7, %v9741_v46  ;;  %v12936_v38 = vpop.f32.mrb[97].mxu0  ;;  %v12960_v18 = vpop.f32.mrb[233].mxu1  ;;  %v9628_v45 = vadd.f32 %v11185_v44, %v9627_v63 }
0x2982   :  { %v9630_v53 = vpop.f32.mrb[98].mxu0  ;;  %v9744_v12 = vpop.f32.mrb[234].mxu1 }
0x2983   :  { %v11220_v8 = vmul.f32 -1.442695, %v9742_v48  ;;  %v9745_v39 = vadd.f32 %v11208_v7, %v9744_v12  ;;  %v12937_v20 = vpop.f32.mrb[99].mxu0  ;;  %v12961_v22 = vpop.f32.mrb[235].mxu1  ;;  %v9631_v19 = vadd.f32 %v11185_v44, %v9630_v53 }
0x2985   :  { %14580 = vpow2.f32 %v11220_v8  ;;  %v11221_v58 = vmul.f32 -1.442695, %v9745_v39  ;;  %v14577_v47 = vpop.eup %14576 }
0x2986   :  { %v9780_v27 = vadd.f32 1.0, %v14577_v47  ;;  %v11238_v47 = vld [vmem:[%s18146_s12 + $0x78] sm:$0xff] }
0x2987   :  { %14582 = vpow2.f32 %v11221_v58  ;;  %v14579_v1 = vpop.eup %14578  ;;  %v11237_v58 = vld [vmem:[%s18146_s12 + $0x70] sm:$0xff] }
0x2988   :  { %14584 = vtanh.f32 %v9620_v30  ;;  %v9635_v6 = vpop.f32.mrb[100].mxu0  ;;  %v9749_v28 = vpop.f32.mrb[236].mxu1  ;;  %v9781_v14 = vadd.f32 1.0, %v14579_v1 }
0x2989   :  { %14586 = vrcp.f32 %v9780_v27  ;;  %v9750_v41 = vadd.f32 %v11208_v7, %v9749_v28  ;;  %v12940_v4 = vpop.f32.mrb[101].mxu0  ;;  %v12964_v40 = vpop.f32.mrb[237].mxu1  ;;  %v9636_v16 = vadd.f32 %v11185_v44, %v9635_v6  ;;  %v11092_v27 = vld [vmem:[%s18147_s11 + $0xd] ss:$0 sm:$0xff]  ;;  %v11166_v6 = vld [vmem:[%s18147_s11 + $0xe] ss:$0 sm:$0xff] }
0x298a   :  { %14588 = vtanh.f32 %v9623_v10  ;;  %v9638_v33 = vpop.f32.mrb[102].mxu0  ;;  %v9752_v36 = vpop.f32.mrb[238].mxu1  ;;  %v13027_v10 = vpack.c.bf16 %v11238_v47, %v11237_v58  ;;  %v10044_v58 = vmul.f32 %v16457_v9, %v14828_v57 }
0x298b   :  { %14590 = vrcp.f32 %v9781_v14  ;;  %v11222_v50 = vmul.f32 -1.442695, %v9750_v41  ;;  %v9753_v17 = vadd.f32 %v11208_v7, %v9752_v36  ;;  %v12941_v21 = vpop.f32.mrb[103].mxu0  ;;  %v12965_v59 = vpop.f32.mrb[239].mxu1  ;;  %v9639_v23 = vadd.f32 %v11185_v44, %v9638_v33  ;;  %v11229_v14 = vld [vmem:[%s18147_s11 + $0xf] ss:$0 sm:$0xff] }
0x298c   :  { %13028 = vmatprep.subr.bf16.mxu0 %v13027_v10 }
0x298d   :  { %14592 = vpow2.f32 %v11222_v50  ;;  %v11223_v55 = vmul.f32 -1.442695, %v9753_v17  ;;  %13030 = vmatpush3.bf16.msra.mxu0 %v13027_v10 }
0x298f   :  { %v14581_v37 = vpop.eup %14580  ;;  %14594 = vpow2.f32 %v11223_v55 }
0x2990   :  { %v9782_v35 = vadd.f32 1.0, %v14581_v37  ;;  %14596 = vtanh.f32 %v9628_v45 }
0x2991   :  { %v14583_v43 = vpop.eup %14582 }
0x2992   :  { %v14585_v61 = vpop.eup %14584  ;;  %14598 = vrcp.f32 %v9782_v35  ;;  %v9783_v0 = vadd.f32 1.0, %v14583_v43 }
0x2993   :  { %v14587_v25 = vpop.eup %14586  ;;  %14600 = vtanh.f32 %v9631_v19 }
0x2994   :  { %v14589_v62 = vpop.eup %14588  ;;  %v9798_v11 = vmul.f32 %v14587_v25, %v14585_v61  ;;  %14602 = vrcp.f32 %v9783_v0 }
0x2995   :  { %v14591_v7 = vpop.eup %14590  ;;  %14604 = vtanh.f32 %v9636_v16 }
0x2996   :  { %v9799_v26 = vmul.f32 %v14591_v7, %v14589_v62 }
0x2997   :  { %v14593_v42 = vpop.eup %14592 }
0x2998   :  { %v9784_v52 = vadd.f32 1.0, %v14593_v42  ;;  %v9804_v54 = vpack.c.bf16 %v9799_v26, %v9798_v11 }
0x2999   :  { %v14595_v24 = vpop.eup %14594 }
0x299a   :  { %14606 = vrcp.f32 %v9784_v52  ;;  %v9785_v13 = vadd.f32 1.0, %v14595_v24  ;;  %12971 = vmatmul.mubr.msk.bf16.vlgmr.msra.gmra.mrb[192].mxu1 %vm283_vm4, %v9804_v54  ;;  %v14597_v32 = vpop.eup %14596  ;;  %v11240_v52 = vld [vmem:[%s18148_s13 + $0x3] ss:$0 sm:$0xff] }
0x299b   :  { %14608 = vtanh.f32 %v9639_v23  ;;  %12974 = vmatprep.mubr.msk.bf16.mxu1 %vm14621_vm3, %v14620_v15 }
0x299c   :  { %v14599_v63 = vpop.eup %14598  ;;  %14610 = vrcp.f32 %v9785_v13 }
0x299d   :  { %v14601_v46 = vpop.eup %14600  ;;  %v9800_v48 = vmul.f32 %v14599_v63, %v14597_v32 }
0x299e   :  { %v14603_v38 = vpop.eup %14602 }
0x299f   :  { %v9801_v18 = vmul.f32 %v14603_v38, %v14601_v46  ;;  %v14605_v53 = vpop.eup %14604  ;;  %v10043_v46 = vmul.f32 %v16445_v56, %v14815_v49  ;;  %v10042_v38 = vmul.f32 %v16448_v60, %v14818_v51 }
0x29a1   :  { %v9805_v44 = vpack.c.bf16 %v9801_v18, %v9800_v48 }
0x29a3   :  { %12975 = vmatmul.mubr.msk.bf16.gmra.mrb[196].mxu1 %vm283_vm4, %v9805_v44  ;;  %v10057_v44 = vpop.permute.xlu1 %10056 }
0x29a4   :  { %v14607_v12 = vpop.eup %14606  ;;  %12978 = vmatprep.mubr.msk.bf16.mxu1 %vm14621_vm3, %v14620_v15  ;;  %v11018_v15 = vld [vmem:[%s18147_s11 + $0xc] ss:$0 sm:$0xff] }
0x29a5   :  { %v14609_v8 = vpop.eup %14608  ;;  %v9802_v39 = vmul.f32 %v14607_v12, %v14605_v53  ;;  %v13103_v1 = vadd.f32 %v11092_v27, %v11018_v15  ;;  %v10055_v12 = vpop.permute.xlu0 %10054 }
0x29a6   :  { %v14611_v20 = vpop.eup %14610 }
0x29a7   :  { %v9803_v22 = vmul.f32 %v14611_v20, %v14609_v8  ;;  %v13104_v28 = vadd.f32 %v13103_v1, %v11166_v6  ;;  %v10061_v10 = vpop.permute.xlu1 %10060 }
0x29a9   :  { %v9806_v30 = vpack.c.bf16 %v9803_v22, %v9802_v39  ;;  %v13105_v41 = vadd.f32 %v13104_v28, %v11229_v14  ;;  %v10045_v22 = vmul.f32 %v16460_v3, %v14873_v29  ;;  %v10059_v27 = vpop.permute.xlu0 %10058  ;;  %v10047_v14 = vmul.f32 %v16478_v31, %v14899_v2 }
0x29ab   :  { %12979 = vmatmul.mubr.msk.bf16.gmra.mrb[200].mxu1 %vm283_vm4, %v9806_v30 }
0x2a6d   :  { %v9875_v4 = vpop.f32.mrb[192].mxu1 }
0x2a6e   :  { %v13106_v40 = vadd.f32 %v13105_v41, %v9875_v4  ;;  %v12972_v33 = vpop.f32.mrb[193].mxu1  ;;  %v10046_v4 = vmul.f32 %v16472_v5, %v14879_v34 }
0x2a6f   :  { %v9878_v36 = vpop.f32.mrb[194].mxu1  ;;  %v10065_v33 = vpop.permute.xlu1 %10064 }
0x2a70   :  { %v9904_v50 = vmul.f32 %v13106_v40, %v14818_v51  ;;  %v13110_v17 = vadd.f32 %v13105_v41, %v9878_v36  ;;  %v12973_v21 = vpop.f32.mrb[195].mxu1 }
0x2a72   :  { %v9905_v59 = vmul.f32 %v13110_v17, %v14815_v49  ;;  %12990 = vmatprep.mubr.msk.f32.mxu0 %vm283_vm4, %v9904_v50  ;;  %v10063_v50 = vpop.permute.xlu0 %10062 }
0x2a74   :  { %12991 = vmatmul.mubr.msk.f32.vlgmr.msra.gmra.mrb[14].mxu0 %vm283_vm4, %v9905_v59 }
0x2a76   :  { %v9883_v45 = vpop.f32.mrb[196].mxu1 }
0x2a77   :  { %v13114_v55 = vadd.f32 %v13105_v41, %v9883_v45  ;;  %v12976_v37 = vpop.f32.mrb[197].mxu1 }
0x2a78   :  { %v9886_v19 = vpop.f32.mrb[198].mxu1 }
0x2a79   :  { %v9906_v35 = vmul.f32 %v13114_v55, %v14828_v57  ;;  %v13118_v43 = vadd.f32 %v13105_v41, %v9886_v19  ;;  %v12977_v61 = vpop.f32.mrb[199].mxu1 }
0x2a7b   :  { %v9907_v0 = vmul.f32 %v13118_v43, %v14873_v29  ;;  %12993 = vmatprep.mubr.msk.f32.mxu0 %vm283_vm4, %v9906_v35 }
0x2a7d   :  { %12994 = vmatmul.mubr.msk.f32.gmra.mrb[88].mxu0 %vm283_vm4, %v9907_v0 }
0x2a7e   :  { %v9891_v25 = vpop.f32.mrb[200].mxu1 }
0x2a7f   :  { %v13122_v62 = vadd.f32 %v13105_v41, %v9891_v25  ;;  %v12980_v11 = vpop.f32.mrb[201].mxu1 }
0x2a80   :  { %v9894_v7 = vpop.f32.mrb[202].mxu1 }
0x2a81   :  { %v9908_v16 = vmul.f32 %v13122_v62, %v14879_v34  ;;  %v13126_v26 = vadd.f32 %v13105_v41, %v9894_v7  ;;  %v12981_v42 = vpop.f32.mrb[203].mxu1 }
0x2a83   :  { %v9909_v23 = vmul.f32 %v13126_v26, %v14899_v2  ;;  %12996 = vmatprep.mubr.msk.f32.mxu0 %vm283_vm4, %v9908_v16 }
0x2a85   :  { %12997 = vmatmul.mubr.msk.f32.gmra.mrb[104].mxu0 %vm283_vm4, %v9909_v23 }
0x2b47   :  { %v12992_v54 = vpop.f32.mrb[14].mxu0 }
0x2b48   :  { %v10013_v24 = vadd.f32 %v12992_v54, %v11240_v52  ;;  %v10007_v13 = vpop.f32.mrb[15].mxu0 }
0x2b49   :  { %v10008_v32 = vadd.f32 %v11240_v52, %v10007_v13 }
0x2b4a   :  { %v10037_v63 = vmul.f32 %v10013_v24, %v14815_v49 }
0x2b4b   :  { %v10036_v48 = vmul.f32 %v10008_v32, %v14818_v51 }
0x2b4c   :  { %v10049_v18 = vadd.f32 %v10043_v46, %v10037_v63 }
0x2b4d   :  { %v10048_v53 = vadd.f32 %v10042_v38, %v10036_v48 }
0x2b4e   :  { %v10074_v8 = vsel %vm10072_vm7, %v10049_v18, %v10057_v44 }
0x2b4f   :  { %10081 = vst.msk [vmem:[%s18149_s14 + $0x8] sm:$0xff] %vm10079_vm8, %v10074_v8  ;;  %v10073_v49 = vsel %vm10072_vm7, %v10048_v53, %v10055_v12 }
0x2b50   :  { %10080 = vst.msk [vmem:[%s18149_s14] sm:$0xff] %vm10079_vm8, %v10073_v49  ;;  %v12995_v51 = vpop.f32.mrb[88].mxu0 }
0x2b51   :  { %v10023_v56 = vadd.f32 %v12995_v51, %v11240_v52  ;;  %v10017_v60 = vpop.f32.mrb[89].mxu0 }
0x2b52   :  { %v10018_v39 = vadd.f32 %v11240_v52, %v10017_v60 }
0x2b53   :  { %v10039_v20 = vmul.f32 %v10023_v56, %v14873_v29 }
0x2b54   :  { %v10038_v30 = vmul.f32 %v10018_v39, %v14828_v57 }
0x2b55   :  { %v10051_v47 = vadd.f32 %v10045_v22, %v10039_v20 }
0x2b56   :  { %v10050_v15 = vadd.f32 %v10044_v58, %v10038_v30 }
0x2b57   :  { %v10076_v1 = vsel %vm10072_vm7, %v10051_v47, %v10061_v10 }
0x2b58   :  { %10083 = vst.msk [vmem:[%s18149_s14 + $0x18] sm:$0xff] %vm10079_vm8, %v10076_v1  ;;  %v10075_v6 = vsel %vm10072_vm7, %v10050_v15, %v10059_v27  ;;  %v12998_v28 = vpop.f32.mrb[104].mxu0 }
0x2b59   :  { %10082 = vst.msk [vmem:[%s18149_s14 + $0x10] sm:$0xff] %vm10079_vm8, %v10075_v6  ;;  %v10033_v57 = vadd.f32 %v12998_v28, %v11240_v52  ;;  %v10027_v29 = vpop.f32.mrb[105].mxu0 }
0x2b5a   :  { %v10028_v9 = vadd.f32 %v11240_v52, %v10027_v29 }
0x2b5b   :  { %v10041_v3 = vmul.f32 %v10033_v57, %v14899_v2 }
0x2b5c   :  { %v10040_v41 = vmul.f32 %v10028_v9, %v14879_v34 }
0x2b5d   :  { %v10053_v40 = vadd.f32 %v10047_v14, %v10041_v3 }
0x2b5e   :  { %v10052_v36 = vadd.f32 %v10046_v4, %v10040_v41 }
0x2b5f   :  { %v10078_v17 = vsel %vm10072_vm7, %v10053_v40, %v10065_v33 }
0x2b60   :  { %10085 = vst.msk [vmem:[%s18149_s14 + $0x28] sm:$0xff] %vm10079_vm8, %v10078_v17  ;;  %v10077_v21 = vsel %vm10072_vm7, %v10052_v36, %v10063_v50 }
0x2b61   :  { %10084 = vst.msk [vmem:[%s18149_s14 + $0x20] sm:$0xff] %vm10079_vm8, %v10077_v21 }

</bundles_post_ra>
